<compile_context>
chip_gen: v7x
topology: tpu7x:2x2x1
jax: 0.10.0
libtpu: 0.0.40
codegen_flags: <defaults>
</compile_context>

<pallas_src>
import functools

import jax
import jax.numpy as jnp
from jax.experimental import pallas as pl
from jax.experimental.pallas import tpu as pltpu


# ----------------------------------------------------------------------------
# Fused kernel: conv1 + relu + conv2 + relu + flatten + fc1 + relu + fc2 + relu + fc3
# ----------------------------------------------------------------------------
def cnn3_fused_kernel(x_ref, w1_ref, b1_ref, w2t_ref, b2s_ref,
                      fw1_ref, fb1_ref, fw2_ref, fb2_ref, fw3_ref, fb3_ref,
                      out_ref, feat_ref, *, K, C1, C2):
    N = x_ref.shape[0]
    H, W = x_ref.shape[2], x_ref.shape[3]
    H1, W1 = H - K + 1, W - K + 1
    H2, W2 = H1 - K + 1, W1 - K + 1
    F = C2 * W2                       # lane-dense feature width per spatial row

    x = x_ref[...]                    # (N, 1, H, W) float32

    # ---- conv1 (Cin = 1) + ReLU: 3 channels kept as register values (VPU). --------
    h1 = []
    for co in range(C1):
        acc = jnp.zeros((N, H1, W1), jnp.float32) + b1_ref[co]
        for kh in range(K):
            for kw in range(K):
                wv = w1_ref[(co * K + kh) * K + kw]           # scalar from SMEM
                acc = acc + x[:, 0, kh:kh + H1, kw:kw + W1] * wv
        h1.append(jnp.maximum(acc, 0.0))

    # ---- conv2 (Cin = C1) + ReLU, lane-vectorized across all C2 output channels. ---
    # 27 multiply-adds on (N, H2, C2*W2) at ~56% lane utilization instead of 324 taps
    # on (N, H2, W2) at ~9%.  Weight rows come from the pre-packed (27, C2*W2) table.
    acc2 = jnp.zeros((N, H2, F), jnp.float32) + b2s_ref[...]
    for ci in range(C1):
        for kh in range(K):
            for kw in range(K):
                sv = h1[ci][:, kh:kh + H2, kw:kw + W2]        # (N, H2, W2)
                svt = jnp.concatenate([sv] * C2, axis=-1)     # (N, H2, C2*W2)
                t = (ci * K + kh) * K + kw
                acc2 = acc2 + svt * w2t_ref[t:t + 1, :]       # (1, C2*W2) broadcast
    # ONE full-width store of the feature slab (feat[n, h, c*W2 + w]).
    feat_ref[...] = jnp.maximum(acc2, 0.0)

    # ---- flatten to lane-dense (N, H2*C2*W2) and fc1 + ReLU as ONE MXU matmul. -----
    # fw1_ref is pre-permuted to (H2*C2*W2, 120) in matching (h, c, w) row order, so
    # this is exactly flatten + Linear (up to f32 addition order).
    feat_flat = jnp.concatenate([feat_ref[:, hh, :] for hh in range(H2)], axis=-1)
    h = jnp.dot(feat_flat, fw1_ref[...], preferred_element_type=jnp.float32) + fb1_ref[...]
    h = jnp.maximum(h, 0.0)

    # ---- fc2 + ReLU, fc3 (MXU; weights already (in, out)). -------------------------
    h = jnp.dot(h, fw2_ref[...], preferred_element_type=jnp.float32) + fb2_ref[...]
    h = jnp.maximum(h, 0.0)
    out_ref[...] = jnp.dot(h, fw3_ref[...], preferred_element_type=jnp.float32) + fb3_ref[...]


# ----------------------------------------------------------------------------
# One-time parameter repack (outside the per-call path): no runtime transposes.
# ----------------------------------------------------------------------------
def prepare_params(params, *, img_h, img_w, k_size):
    (w1, b1, w2, b2, fw1, fb1, fw2, fb2, fw3, fb3) = params
    K = k_size
    C1, C2 = w2.shape[1], w2.shape[0]
    H2 = img_h - 2 * (K - 1)
    W2 = img_w - 2 * (K - 1)
    F1 = fw1.shape[0]
    assert w1.shape == (C1, 1, K, K), w1.shape
    assert fw1.shape[1] == C2 * H2 * W2, (fw1.shape, C2, H2, W2)

    # conv2 weight table: row (ci*K+kh)*K+kw, lane c*W2+w  ->  w2[c, ci, kh, kw]
    w2_rows = jnp.transpose(w2, (1, 2, 3, 0)).reshape(C1 * K * K, C2)   # [tap, c]
    w2_tab = jnp.repeat(w2_rows, W2, axis=1)                            # (27, C2*W2)
    b2_slab = jnp.repeat(b2, W2).reshape(1, C2 * W2)                    # (1,  C2*W2)

    # fc1.weight permuted from PyTorch flatten order (c, h, w) to the kernel's
    # lane-dense feature order (h, c, w), stored (in, out) = (1728, 120).
    fw1p = jnp.transpose(fw1.reshape(F1, C2, H2, W2),
                         (2, 1, 3, 0)).reshape(H2 * C2 * W2, F1)

    return (
        w1.reshape(-1), b1,                 # conv1 (SMEM scalars)
        w2_tab, b2_slab,                    # conv2 (lane-vectorized VMEM table + bias slab)
        fw1p, fb1.reshape(1, -1),           # fc1 (in, out), (h,c,w) row order
        fw2.T, fb2.reshape(1, -1),          # fc2 (in, out)
        fw3.T, fb3.reshape(1, -1),          # fc3 (in, out)
    )


# ----------------------------------------------------------------------------
# Wrapper: single pallas_call, everything VMEM-resident, no grid.
# ----------------------------------------------------------------------------
def cnn3_forward(x, prepped, *, k_size):
    (w1f, b1, w2_tab, b2_slab, fw1p, fb1, fw2t, fb2, fw3t, fb3) = prepped
    N, _, H, W = x.shape
    K = k_size
    H2 = H - 2 * (K - 1)
    W2 = W - 2 * (K - 1)
    C1 = b1.shape[0]
    C2 = b2_slab.shape[1] // W2
    n_out = fw3t.shape[1]

    vmem = pl.BlockSpec(memory_space=pltpu.MemorySpace.VMEM)
    smem = pl.BlockSpec(memory_space=pltpu.MemorySpace.SMEM)

    return pl.pallas_call(
        functools.partial(cnn3_fused_kernel, K=K, C1=C1, C2=C2),
        out_shape=jax.ShapeDtypeStruct((N, n_out), jnp.float32),
        in_specs=[vmem, smem, smem, vmem, vmem,
                  vmem, vmem, vmem, vmem, vmem, vmem],
        out_specs=vmem,
        scratch_shapes=[pltpu.VMEM((N, H2, C2 * W2), jnp.float32)],
    )(x, w1f, b1, w2_tab, b2_slab, fw1p, fb1, fw2t, fb2, fw3t, fb3)


# ----------------------------------------------------------------------------
# Pure-JAX reference (PyTorch semantics) for verification
# ----------------------------------------------------------------------------
def reference_forward(x, params):
    (w1, b1, w2, b2, fw1, fb1, fw2, fb2, fw3, fb3) = params
    dn = ("NCHW", "OIHW", "NCHW")
    y = jax.lax.conv_general_dilated(x, w1, (1, 1), "VALID", dimension_numbers=dn)
    y = jnp.maximum(y + b1[None, :, None, None], 0.0)
    y = jax.lax.conv_general_dilated(y, w2, (1, 1), "VALID", dimension_numbers=dn)
    y = jnp.maximum(y + b2[None, :, None, None], 0.0)
    y = y.reshape(y.shape[0], -1)
    y = jnp.maximum(y @ fw1.T + fb1, 0.0)
    y = jnp.maximum(y @ fw2.T + fb2, 0.0)
    return y @ fw3.T + fb3


if __name__ == "__main__":
    # Module config: CNN_3(input_h=16, input_w=12, k_size=3); actual images 16x16.
    input_h, input_w, k_size = 16, 12, 3
    N, H, W = 2, 16, 16
    fc1_in = 12 * (input_h - 2 * (k_size - 1)) * input_w  # 1728

    key = jax.random.PRNGKey(0)
    ks = jax.random.split(key, 11)
    s = 0.1
    params = (
        jax.random.normal(ks[0], (3, 1, k_size, k_size), jnp.float32) * s,    # conv1.weight
        jax.random.normal(ks[1], (3,), jnp.float32) * s,                      # conv1.bias
        jax.random.normal(ks[2], (12, 3, k_size, k_size), jnp.float32) * s,   # conv2.weight
        jax.random.normal(ks[3], (12,), jnp.float32) * s,                     # conv2.bias
        jax.random.normal(ks[4], (120, fc1_in), jnp.float32) * s,             # fc1.weight (out, in)
        jax.random.normal(ks[5], (120,), jnp.float32) * s,                    # fc1.bias
        jax.random.normal(ks[6], (84, 120), jnp.float32) * s,                 # fc2.weight
        jax.random.normal(ks[7], (84,), jnp.float32) * s,                     # fc2.bias
        jax.random.normal(ks[8], (10, 84), jnp.float32) * s,                  # fc3.weight
        jax.random.normal(ks[9], (10,), jnp.float32) * s,                     # fc3.bias
    )
    x = jax.random.normal(ks[10], (N, 1, H, W), jnp.float32)

    prepped = prepare_params(params, img_h=H, img_w=W, k_size=k_size)
    prepped = jax.block_until_ready(prepped)   # one-time repack, outside the hot path

    out = cnn3_forward(x, prepped, k_size=k_size)
    out = jax.block_until_ready(out)

    ref = reference_forward(x, params)
    assert out.shape == (N, 10), out.shape
    max_err = float(jnp.max(jnp.abs(out - ref)))
    assert max_err < 1e-3, f"mismatch vs reference: {max_err}"
    print("KERNEL_OK")
</pallas_src>

<mosaic_0001>
module attributes {stable_mosaic.version = 11 : i64} {
  func.func @cnn3_fused_kernel(%arg0: memref<2x1x16x16xf32, #tpu.memory_space<vmem>>, %arg1: memref<27xf32, #tpu.memory_space<smem>>, %arg2: memref<3xf32, #tpu.memory_space<smem>>, %arg3: memref<27x144xf32, #tpu.memory_space<vmem>>, %arg4: memref<1x144xf32, #tpu.memory_space<vmem>>, %arg5: memref<1728x120xf32, #tpu.memory_space<vmem>>, %arg6: memref<1x120xf32, #tpu.memory_space<vmem>>, %arg7: memref<120x84xf32, #tpu.memory_space<vmem>>, %arg8: memref<1x84xf32, #tpu.memory_space<vmem>>, %arg9: memref<84x10xf32, #tpu.memory_space<vmem>>, %arg10: memref<1x10xf32, #tpu.memory_space<vmem>>, %arg11: memref<2x10xf32, #tpu.memory_space<vmem>>, %arg12: memref<2x12x144xf32, #tpu.memory_space<vmem>>) attributes {dimension_semantics = [], scalar_prefetch = 0 : i64, scratch_operands = 1 : i64, tpu.core_type = #tpu.core_type<tc>} {
    %c0 = arith.constant 0 : index
    %c0_0 = arith.constant 0 : index
    %c0_1 = arith.constant 0 : index
    %c0_2 = arith.constant 0 : index
    %0 = vector.load %arg0[%c0, %c0_0, %c0_1, %c0_2] : memref<2x1x16x16xf32, #tpu.memory_space<vmem>>, vector<2x1x16x16xf32>
    %cst = arith.constant 0.000000e+00 : f32
    %1 = vector.broadcast %cst : f32 to vector<2x14x14xf32>
    %c0_3 = arith.constant 0 : index
    %2 = memref.load %arg2[%c0_3] : memref<3xf32, #tpu.memory_space<smem>>
    %3 = vector.broadcast %2 : f32 to vector<2x14x14xf32>
    %4 = arith.addf %1, %3 : vector<2x14x14xf32>
    %c0_4 = arith.constant 0 : index
    %5 = memref.load %arg1[%c0_4] : memref<27xf32, #tpu.memory_space<smem>>
    %6 = vector.extract_strided_slice %0 {offsets = [0, 0, 0, 0], sizes = [2, 1, 14, 14], strides = [1, 1, 1, 1]} : vector<2x1x16x16xf32> to vector<2x1x14x14xf32>
    %7 = vector.shape_cast %6 : vector<2x1x14x14xf32> to vector<2x14x14xf32>
    %8 = vector.broadcast %5 : f32 to vector<2x14x14xf32>
    %9 = arith.mulf %7, %8 : vector<2x14x14xf32>
    %10 = arith.addf %4, %9 : vector<2x14x14xf32>
    %c1 = arith.constant 1 : index
    %11 = memref.load %arg1[%c1] : memref<27xf32, #tpu.memory_space<smem>>
    %12 = vector.extract_strided_slice %0 {offsets = [0, 0, 0, 1], sizes = [2, 1, 14, 14], strides = [1, 1, 1, 1]} : vector<2x1x16x16xf32> to vector<2x1x14x14xf32>
    %13 = vector.shape_cast %12 : vector<2x1x14x14xf32> to vector<2x14x14xf32>
    %14 = vector.broadcast %11 : f32 to vector<2x14x14xf32>
    %15 = arith.mulf %13, %14 : vector<2x14x14xf32>
    %16 = arith.addf %10, %15 : vector<2x14x14xf32>
    %c2 = arith.constant 2 : index
    %17 = memref.load %arg1[%c2] : memref<27xf32, #tpu.memory_space<smem>>
    %18 = vector.extract_strided_slice %0 {offsets = [0, 0, 0, 2], sizes = [2, 1, 14, 14], strides = [1, 1, 1, 1]} : vector<2x1x16x16xf32> to vector<2x1x14x14xf32>
    %19 = vector.shape_cast %18 : vector<2x1x14x14xf32> to vector<2x14x14xf32>
    %20 = vector.broadcast %17 : f32 to vector<2x14x14xf32>
    %21 = arith.mulf %19, %20 : vector<2x14x14xf32>
    %22 = arith.addf %16, %21 : vector<2x14x14xf32>
    %c3 = arith.constant 3 : index
    %23 = memref.load %arg1[%c3] : memref<27xf32, #tpu.memory_space<smem>>
    %24 = vector.extract_strided_slice %0 {offsets = [0, 0, 1, 0], sizes = [2, 1, 14, 14], strides = [1, 1, 1, 1]} : vector<2x1x16x16xf32> to vector<2x1x14x14xf32>
    %25 = vector.shape_cast %24 : vector<2x1x14x14xf32> to vector<2x14x14xf32>
    %26 = vector.broadcast %23 : f32 to vector<2x14x14xf32>
    %27 = arith.mulf %25, %26 : vector<2x14x14xf32>
    %28 = arith.addf %22, %27 : vector<2x14x14xf32>
    %c4 = arith.constant 4 : index
    %29 = memref.load %arg1[%c4] : memref<27xf32, #tpu.memory_space<smem>>
    %30 = vector.extract_strided_slice %0 {offsets = [0, 0, 1, 1], sizes = [2, 1, 14, 14], strides = [1, 1, 1, 1]} : vector<2x1x16x16xf32> to vector<2x1x14x14xf32>
    %31 = vector.shape_cast %30 : vector<2x1x14x14xf32> to vector<2x14x14xf32>
    %32 = vector.broadcast %29 : f32 to vector<2x14x14xf32>
    %33 = arith.mulf %31, %32 : vector<2x14x14xf32>
    %34 = arith.addf %28, %33 : vector<2x14x14xf32>
    %c5 = arith.constant 5 : index
    %35 = memref.load %arg1[%c5] : memref<27xf32, #tpu.memory_space<smem>>
    %36 = vector.extract_strided_slice %0 {offsets = [0, 0, 1, 2], sizes = [2, 1, 14, 14], strides = [1, 1, 1, 1]} : vector<2x1x16x16xf32> to vector<2x1x14x14xf32>
    %37 = vector.shape_cast %36 : vector<2x1x14x14xf32> to vector<2x14x14xf32>
    %38 = vector.broadcast %35 : f32 to vector<2x14x14xf32>
    %39 = arith.mulf %37, %38 : vector<2x14x14xf32>
    %40 = arith.addf %34, %39 : vector<2x14x14xf32>
    %c6 = arith.constant 6 : index
    %41 = memref.load %arg1[%c6] : memref<27xf32, #tpu.memory_space<smem>>
    %42 = vector.extract_strided_slice %0 {offsets = [0, 0, 2, 0], sizes = [2, 1, 14, 14], strides = [1, 1, 1, 1]} : vector<2x1x16x16xf32> to vector<2x1x14x14xf32>
    %43 = vector.shape_cast %42 : vector<2x1x14x14xf32> to vector<2x14x14xf32>
    %44 = vector.broadcast %41 : f32 to vector<2x14x14xf32>
    %45 = arith.mulf %43, %44 : vector<2x14x14xf32>
    %46 = arith.addf %40, %45 : vector<2x14x14xf32>
    %c7 = arith.constant 7 : index
    %47 = memref.load %arg1[%c7] : memref<27xf32, #tpu.memory_space<smem>>
    %48 = vector.extract_strided_slice %0 {offsets = [0, 0, 2, 1], sizes = [2, 1, 14, 14], strides = [1, 1, 1, 1]} : vector<2x1x16x16xf32> to vector<2x1x14x14xf32>
    %49 = vector.shape_cast %48 : vector<2x1x14x14xf32> to vector<2x14x14xf32>
    %50 = vector.broadcast %47 : f32 to vector<2x14x14xf32>
    %51 = arith.mulf %49, %50 : vector<2x14x14xf32>
    %52 = arith.addf %46, %51 : vector<2x14x14xf32>
    %c8 = arith.constant 8 : index
    %53 = memref.load %arg1[%c8] : memref<27xf32, #tpu.memory_space<smem>>
    %54 = vector.extract_strided_slice %0 {offsets = [0, 0, 2, 2], sizes = [2, 1, 14, 14], strides = [1, 1, 1, 1]} : vector<2x1x16x16xf32> to vector<2x1x14x14xf32>
    %55 = vector.shape_cast %54 : vector<2x1x14x14xf32> to vector<2x14x14xf32>
    %56 = vector.broadcast %53 : f32 to vector<2x14x14xf32>
    %57 = arith.mulf %55, %56 : vector<2x14x14xf32>
    %58 = arith.addf %52, %57 : vector<2x14x14xf32>
    %cst_5 = arith.constant 0.000000e+00 : f32
    %59 = vector.broadcast %cst_5 : f32 to vector<2x14x14xf32>
    %60 = arith.maximumf %58, %59 : vector<2x14x14xf32>
    %cst_6 = arith.constant 0.000000e+00 : f32
    %61 = vector.broadcast %cst_6 : f32 to vector<2x14x14xf32>
    %c1_7 = arith.constant 1 : index
    %62 = memref.load %arg2[%c1_7] : memref<3xf32, #tpu.memory_space<smem>>
    %63 = vector.broadcast %62 : f32 to vector<2x14x14xf32>
    %64 = arith.addf %61, %63 : vector<2x14x14xf32>
    %c9 = arith.constant 9 : index
    %65 = memref.load %arg1[%c9] : memref<27xf32, #tpu.memory_space<smem>>
    %66 = vector.extract_strided_slice %0 {offsets = [0, 0, 0, 0], sizes = [2, 1, 14, 14], strides = [1, 1, 1, 1]} : vector<2x1x16x16xf32> to vector<2x1x14x14xf32>
    %67 = vector.shape_cast %66 : vector<2x1x14x14xf32> to vector<2x14x14xf32>
    %68 = vector.broadcast %65 : f32 to vector<2x14x14xf32>
    %69 = arith.mulf %67, %68 : vector<2x14x14xf32>
    %70 = arith.addf %64, %69 : vector<2x14x14xf32>
    %c10 = arith.constant 10 : index
    %71 = memref.load %arg1[%c10] : memref<27xf32, #tpu.memory_space<smem>>
    %72 = vector.extract_strided_slice %0 {offsets = [0, 0, 0, 1], sizes = [2, 1, 14, 14], strides = [1, 1, 1, 1]} : vector<2x1x16x16xf32> to vector<2x1x14x14xf32>
    %73 = vector.shape_cast %72 : vector<2x1x14x14xf32> to vector<2x14x14xf32>
    %74 = vector.broadcast %71 : f32 to vector<2x14x14xf32>
    %75 = arith.mulf %73, %74 : vector<2x14x14xf32>
    %76 = arith.addf %70, %75 : vector<2x14x14xf32>
    %c11 = arith.constant 11 : index
    %77 = memref.load %arg1[%c11] : memref<27xf32, #tpu.memory_space<smem>>
    %78 = vector.extract_strided_slice %0 {offsets = [0, 0, 0, 2], sizes = [2, 1, 14, 14], strides = [1, 1, 1, 1]} : vector<2x1x16x16xf32> to vector<2x1x14x14xf32>
    %79 = vector.shape_cast %78 : vector<2x1x14x14xf32> to vector<2x14x14xf32>
    %80 = vector.broadcast %77 : f32 to vector<2x14x14xf32>
    %81 = arith.mulf %79, %80 : vector<2x14x14xf32>
    %82 = arith.addf %76, %81 : vector<2x14x14xf32>
    %c12 = arith.constant 12 : index
    %83 = memref.load %arg1[%c12] : memref<27xf32, #tpu.memory_space<smem>>
    %84 = vector.extract_strided_slice %0 {offsets = [0, 0, 1, 0], sizes = [2, 1, 14, 14], strides = [1, 1, 1, 1]} : vector<2x1x16x16xf32> to vector<2x1x14x14xf32>
    %85 = vector.shape_cast %84 : vector<2x1x14x14xf32> to vector<2x14x14xf32>
    %86 = vector.broadcast %83 : f32 to vector<2x14x14xf32>
    %87 = arith.mulf %85, %86 : vector<2x14x14xf32>
    %88 = arith.addf %82, %87 : vector<2x14x14xf32>
    %c13 = arith.constant 13 : index
    %89 = memref.load %arg1[%c13] : memref<27xf32, #tpu.memory_space<smem>>
    %90 = vector.extract_strided_slice %0 {offsets = [0, 0, 1, 1], sizes = [2, 1, 14, 14], strides = [1, 1, 1, 1]} : vector<2x1x16x16xf32> to vector<2x1x14x14xf32>
    %91 = vector.shape_cast %90 : vector<2x1x14x14xf32> to vector<2x14x14xf32>
    %92 = vector.broadcast %89 : f32 to vector<2x14x14xf32>
    %93 = arith.mulf %91, %92 : vector<2x14x14xf32>
    %94 = arith.addf %88, %93 : vector<2x14x14xf32>
    %c14 = arith.constant 14 : index
    %95 = memref.load %arg1[%c14] : memref<27xf32, #tpu.memory_space<smem>>
    %96 = vector.extract_strided_slice %0 {offsets = [0, 0, 1, 2], sizes = [2, 1, 14, 14], strides = [1, 1, 1, 1]} : vector<2x1x16x16xf32> to vector<2x1x14x14xf32>
    %97 = vector.shape_cast %96 : vector<2x1x14x14xf32> to vector<2x14x14xf32>
    %98 = vector.broadcast %95 : f32 to vector<2x14x14xf32>
    %99 = arith.mulf %97, %98 : vector<2x14x14xf32>
    %100 = arith.addf %94, %99 : vector<2x14x14xf32>
    %c15 = arith.constant 15 : index
    %101 = memref.load %arg1[%c15] : memref<27xf32, #tpu.memory_space<smem>>
    %102 = vector.extract_strided_slice %0 {offsets = [0, 0, 2, 0], sizes = [2, 1, 14, 14], strides = [1, 1, 1, 1]} : vector<2x1x16x16xf32> to vector<2x1x14x14xf32>
    %103 = vector.shape_cast %102 : vector<2x1x14x14xf32> to vector<2x14x14xf32>
    %104 = vector.broadcast %101 : f32 to vector<2x14x14xf32>
    %105 = arith.mulf %103, %104 : vector<2x14x14xf32>
    %106 = arith.addf %100, %105 : vector<2x14x14xf32>
    %c16 = arith.constant 16 : index
    %107 = memref.load %arg1[%c16] : memref<27xf32, #tpu.memory_space<smem>>
    %108 = vector.extract_strided_slice %0 {offsets = [0, 0, 2, 1], sizes = [2, 1, 14, 14], strides = [1, 1, 1, 1]} : vector<2x1x16x16xf32> to vector<2x1x14x14xf32>
    %109 = vector.shape_cast %108 : vector<2x1x14x14xf32> to vector<2x14x14xf32>
    %110 = vector.broadcast %107 : f32 to vector<2x14x14xf32>
    %111 = arith.mulf %109, %110 : vector<2x14x14xf32>
    %112 = arith.addf %106, %111 : vector<2x14x14xf32>
    %c17 = arith.constant 17 : index
    %113 = memref.load %arg1[%c17] : memref<27xf32, #tpu.memory_space<smem>>
    %114 = vector.extract_strided_slice %0 {offsets = [0, 0, 2, 2], sizes = [2, 1, 14, 14], strides = [1, 1, 1, 1]} : vector<2x1x16x16xf32> to vector<2x1x14x14xf32>
    %115 = vector.shape_cast %114 : vector<2x1x14x14xf32> to vector<2x14x14xf32>
    %116 = vector.broadcast %113 : f32 to vector<2x14x14xf32>
    %117 = arith.mulf %115, %116 : vector<2x14x14xf32>
    %118 = arith.addf %112, %117 : vector<2x14x14xf32>
    %cst_8 = arith.constant 0.000000e+00 : f32
    %119 = vector.broadcast %cst_8 : f32 to vector<2x14x14xf32>
    %120 = arith.maximumf %118, %119 : vector<2x14x14xf32>
    %cst_9 = arith.constant 0.000000e+00 : f32
    %121 = vector.broadcast %cst_9 : f32 to vector<2x14x14xf32>
    %c2_10 = arith.constant 2 : index
    %122 = memref.load %arg2[%c2_10] : memref<3xf32, #tpu.memory_space<smem>>
    %123 = vector.broadcast %122 : f32 to vector<2x14x14xf32>
    %124 = arith.addf %121, %123 : vector<2x14x14xf32>
    %c18 = arith.constant 18 : index
    %125 = memref.load %arg1[%c18] : memref<27xf32, #tpu.memory_space<smem>>
    %126 = vector.extract_strided_slice %0 {offsets = [0, 0, 0, 0], sizes = [2, 1, 14, 14], strides = [1, 1, 1, 1]} : vector<2x1x16x16xf32> to vector<2x1x14x14xf32>
    %127 = vector.shape_cast %126 : vector<2x1x14x14xf32> to vector<2x14x14xf32>
    %128 = vector.broadcast %125 : f32 to vector<2x14x14xf32>
    %129 = arith.mulf %127, %128 : vector<2x14x14xf32>
    %130 = arith.addf %124, %129 : vector<2x14x14xf32>
    %c19 = arith.constant 19 : index
    %131 = memref.load %arg1[%c19] : memref<27xf32, #tpu.memory_space<smem>>
    %132 = vector.extract_strided_slice %0 {offsets = [0, 0, 0, 1], sizes = [2, 1, 14, 14], strides = [1, 1, 1, 1]} : vector<2x1x16x16xf32> to vector<2x1x14x14xf32>
    %133 = vector.shape_cast %132 : vector<2x1x14x14xf32> to vector<2x14x14xf32>
    %134 = vector.broadcast %131 : f32 to vector<2x14x14xf32>
    %135 = arith.mulf %133, %134 : vector<2x14x14xf32>
    %136 = arith.addf %130, %135 : vector<2x14x14xf32>
    %c20 = arith.constant 20 : index
    %137 = memref.load %arg1[%c20] : memref<27xf32, #tpu.memory_space<smem>>
    %138 = vector.extract_strided_slice %0 {offsets = [0, 0, 0, 2], sizes = [2, 1, 14, 14], strides = [1, 1, 1, 1]} : vector<2x1x16x16xf32> to vector<2x1x14x14xf32>
    %139 = vector.shape_cast %138 : vector<2x1x14x14xf32> to vector<2x14x14xf32>
    %140 = vector.broadcast %137 : f32 to vector<2x14x14xf32>
    %141 = arith.mulf %139, %140 : vector<2x14x14xf32>
    %142 = arith.addf %136, %141 : vector<2x14x14xf32>
    %c21 = arith.constant 21 : index
    %143 = memref.load %arg1[%c21] : memref<27xf32, #tpu.memory_space<smem>>
    %144 = vector.extract_strided_slice %0 {offsets = [0, 0, 1, 0], sizes = [2, 1, 14, 14], strides = [1, 1, 1, 1]} : vector<2x1x16x16xf32> to vector<2x1x14x14xf32>
    %145 = vector.shape_cast %144 : vector<2x1x14x14xf32> to vector<2x14x14xf32>
    %146 = vector.broadcast %143 : f32 to vector<2x14x14xf32>
    %147 = arith.mulf %145, %146 : vector<2x14x14xf32>
    %148 = arith.addf %142, %147 : vector<2x14x14xf32>
    %c22 = arith.constant 22 : index
    %149 = memref.load %arg1[%c22] : memref<27xf32, #tpu.memory_space<smem>>
    %150 = vector.extract_strided_slice %0 {offsets = [0, 0, 1, 1], sizes = [2, 1, 14, 14], strides = [1, 1, 1, 1]} : vector<2x1x16x16xf32> to vector<2x1x14x14xf32>
    %151 = vector.shape_cast %150 : vector<2x1x14x14xf32> to vector<2x14x14xf32>
    %152 = vector.broadcast %149 : f32 to vector<2x14x14xf32>
    %153 = arith.mulf %151, %152 : vector<2x14x14xf32>
    %154 = arith.addf %148, %153 : vector<2x14x14xf32>
    %c23 = arith.constant 23 : index
    %155 = memref.load %arg1[%c23] : memref<27xf32, #tpu.memory_space<smem>>
    %156 = vector.extract_strided_slice %0 {offsets = [0, 0, 1, 2], sizes = [2, 1, 14, 14], strides = [1, 1, 1, 1]} : vector<2x1x16x16xf32> to vector<2x1x14x14xf32>
    %157 = vector.shape_cast %156 : vector<2x1x14x14xf32> to vector<2x14x14xf32>
    %158 = vector.broadcast %155 : f32 to vector<2x14x14xf32>
    %159 = arith.mulf %157, %158 : vector<2x14x14xf32>
    %160 = arith.addf %154, %159 : vector<2x14x14xf32>
    %c24 = arith.constant 24 : index
    %161 = memref.load %arg1[%c24] : memref<27xf32, #tpu.memory_space<smem>>
    %162 = vector.extract_strided_slice %0 {offsets = [0, 0, 2, 0], sizes = [2, 1, 14, 14], strides = [1, 1, 1, 1]} : vector<2x1x16x16xf32> to vector<2x1x14x14xf32>
    %163 = vector.shape_cast %162 : vector<2x1x14x14xf32> to vector<2x14x14xf32>
    %164 = vector.broadcast %161 : f32 to vector<2x14x14xf32>
    %165 = arith.mulf %163, %164 : vector<2x14x14xf32>
    %166 = arith.addf %160, %165 : vector<2x14x14xf32>
    %c25 = arith.constant 25 : index
    %167 = memref.load %arg1[%c25] : memref<27xf32, #tpu.memory_space<smem>>
    %168 = vector.extract_strided_slice %0 {offsets = [0, 0, 2, 1], sizes = [2, 1, 14, 14], strides = [1, 1, 1, 1]} : vector<2x1x16x16xf32> to vector<2x1x14x14xf32>
    %169 = vector.shape_cast %168 : vector<2x1x14x14xf32> to vector<2x14x14xf32>
    %170 = vector.broadcast %167 : f32 to vector<2x14x14xf32>
    %171 = arith.mulf %169, %170 : vector<2x14x14xf32>
    %172 = arith.addf %166, %171 : vector<2x14x14xf32>
    %c26 = arith.constant 26 : index
    %173 = memref.load %arg1[%c26] : memref<27xf32, #tpu.memory_space<smem>>
    %174 = vector.extract_strided_slice %0 {offsets = [0, 0, 2, 2], sizes = [2, 1, 14, 14], strides = [1, 1, 1, 1]} : vector<2x1x16x16xf32> to vector<2x1x14x14xf32>
    %175 = vector.shape_cast %174 : vector<2x1x14x14xf32> to vector<2x14x14xf32>
    %176 = vector.broadcast %173 : f32 to vector<2x14x14xf32>
    %177 = arith.mulf %175, %176 : vector<2x14x14xf32>
    %178 = arith.addf %172, %177 : vector<2x14x14xf32>
    %cst_11 = arith.constant 0.000000e+00 : f32
    %179 = vector.broadcast %cst_11 : f32 to vector<2x14x14xf32>
    %180 = arith.maximumf %178, %179 : vector<2x14x14xf32>
    %cst_12 = arith.constant 0.000000e+00 : f32
    %181 = vector.broadcast %cst_12 : f32 to vector<2x12x144xf32>
    %c0_13 = arith.constant 0 : index
    %c0_14 = arith.constant 0 : index
    %182 = vector.load %arg4[%c0_13, %c0_14] : memref<1x144xf32, #tpu.memory_space<vmem>>, vector<1x144xf32>
    %183 = vector.shape_cast %182 : vector<1x144xf32> to vector<1x1x144xf32>
    %184 = vector.broadcast %183 : vector<1x1x144xf32> to vector<2x12x144xf32>
    %185 = arith.addf %181, %184 : vector<2x12x144xf32>
    %186 = vector.extract_strided_slice %60 {offsets = [0, 0, 0], sizes = [2, 12, 12], strides = [1, 1, 1]} : vector<2x14x14xf32> to vector<2x12x12xf32>
    %187 = tpu.concatenate %186, %186, %186, %186, %186, %186, %186, %186, %186, %186, %186, %186 in 2 : vector<2x12x12xf32>, vector<2x12x12xf32>, vector<2x12x12xf32>, vector<2x12x12xf32>, vector<2x12x12xf32>, vector<2x12x12xf32>, vector<2x12x12xf32>, vector<2x12x12xf32>, vector<2x12x12xf32>, vector<2x12x12xf32>, vector<2x12x12xf32>, vector<2x12x12xf32> -> vector<2x12x144xf32>
    %c0_15 = arith.constant 0 : index
    %c0_16 = arith.constant 0 : index
    %188 = vector.load %arg3[%c0_15, %c0_16] : memref<27x144xf32, #tpu.memory_space<vmem>>, vector<1x144xf32>
    %189 = vector.shape_cast %188 : vector<1x144xf32> to vector<1x1x144xf32>
    %190 = vector.broadcast %189 : vector<1x1x144xf32> to vector<2x12x144xf32>
    %191 = arith.mulf %187, %190 : vector<2x12x144xf32>
    %192 = arith.addf %185, %191 : vector<2x12x144xf32>
    %193 = vector.extract_strided_slice %60 {offsets = [0, 0, 1], sizes = [2, 12, 12], strides = [1, 1, 1]} : vector<2x14x14xf32> to vector<2x12x12xf32>
    %194 = tpu.concatenate %193, %193, %193, %193, %193, %193, %193, %193, %193, %193, %193, %193 in 2 : vector<2x12x12xf32>, vector<2x12x12xf32>, vector<2x12x12xf32>, vector<2x12x12xf32>, vector<2x12x12xf32>, vector<2x12x12xf32>, vector<2x12x12xf32>, vector<2x12x12xf32>, vector<2x12x12xf32>, vector<2x12x12xf32>, vector<2x12x12xf32>, vector<2x12x12xf32> -> vector<2x12x144xf32>
    %c1_17 = arith.constant 1 : index
    %c0_18 = arith.constant 0 : index
    %195 = vector.load %arg3[%c1_17, %c0_18] : memref<27x144xf32, #tpu.memory_space<vmem>>, vector<1x144xf32>
    %196 = vector.shape_cast %195 : vector<1x144xf32> to vector<1x1x144xf32>
    %197 = vector.broadcast %196 : vector<1x1x144xf32> to vector<2x12x144xf32>
    %198 = arith.mulf %194, %197 : vector<2x12x144xf32>
    %199 = arith.addf %192, %198 : vector<2x12x144xf32>
    %200 = vector.extract_strided_slice %60 {offsets = [0, 0, 2], sizes = [2, 12, 12], strides = [1, 1, 1]} : vector<2x14x14xf32> to vector<2x12x12xf32>
    %201 = tpu.concatenate %200, %200, %200, %200, %200, %200, %200, %200, %200, %200, %200, %200 in 2 : vector<2x12x12xf32>, vector<2x12x12xf32>, vector<2x12x12xf32>, vector<2x12x12xf32>, vector<2x12x12xf32>, vector<2x12x12xf32>, vector<2x12x12xf32>, vector<2x12x12xf32>, vector<2x12x12xf32>, vector<2x12x12xf32>, vector<2x12x12xf32>, vector<2x12x12xf32> -> vector<2x12x144xf32>
    %c2_19 = arith.constant 2 : index
    %c0_20 = arith.constant 0 : index
    %202 = vector.load %arg3[%c2_19, %c0_20] : memref<27x144xf32, #tpu.memory_space<vmem>>, vector<1x144xf32>
    %203 = vector.shape_cast %202 : vector<1x144xf32> to vector<1x1x144xf32>
    %204 = vector.broadcast %203 : vector<1x1x144xf32> to vector<2x12x144xf32>
    %205 = arith.mulf %201, %204 : vector<2x12x144xf32>
    %206 = arith.addf %199, %205 : vector<2x12x144xf32>
    %207 = vector.extract_strided_slice %60 {offsets = [0, 1, 0], sizes = [2, 12, 12], strides = [1, 1, 1]} : vector<2x14x14xf32> to vector<2x12x12xf32>
    %208 = tpu.concatenate %207, %207, %207, %207, %207, %207, %207, %207, %207, %207, %207, %207 in 2 : vector<2x12x12xf32>, vector<2x12x12xf32>, vector<2x12x12xf32>, vector<2x12x12xf32>, vector<2x12x12xf32>, vector<2x12x12xf32>, vector<2x12x12xf32>, vector<2x12x12xf32>, vector<2x12x12xf32>, vector<2x12x12xf32>, vector<2x12x12xf32>, vector<2x12x12xf32> -> vector<2x12x144xf32>
    %c3_21 = arith.constant 3 : index
    %c0_22 = arith.constant 0 : index
    %209 = vector.load %arg3[%c3_21, %c0_22] : memref<27x144xf32, #tpu.memory_space<vmem>>, vector<1x144xf32>
    %210 = vector.shape_cast %209 : vector<1x144xf32> to vector<1x1x144xf32>
    %211 = vector.broadcast %210 : vector<1x1x144xf32> to vector<2x12x144xf32>
    %212 = arith.mulf %208, %211 : vector<2x12x144xf32>
    %213 = arith.addf %206, %212 : vector<2x12x144xf32>
    %214 = vector.extract_strided_slice %60 {offsets = [0, 1, 1], sizes = [2, 12, 12], strides = [1, 1, 1]} : vector<2x14x14xf32> to vector<2x12x12xf32>
    %215 = tpu.concatenate %214, %214, %214, %214, %214, %214, %214, %214, %214, %214, %214, %214 in 2 : vector<2x12x12xf32>, vector<2x12x12xf32>, vector<2x12x12xf32>, vector<2x12x12xf32>, vector<2x12x12xf32>, vector<2x12x12xf32>, vector<2x12x12xf32>, vector<2x12x12xf32>, vector<2x12x12xf32>, vector<2x12x12xf32>, vector<2x12x12xf32>, vector<2x12x12xf32> -> vector<2x12x144xf32>
    %c4_23 = arith.constant 4 : index
    %c0_24 = arith.constant 0 : index
    %216 = vector.load %arg3[%c4_23, %c0_24] : memref<27x144xf32, #tpu.memory_space<vmem>>, vector<1x144xf32>
    %217 = vector.shape_cast %216 : vector<1x144xf32> to vector<1x1x144xf32>
    %218 = vector.broadcast %217 : vector<1x1x144xf32> to vector<2x12x144xf32>
    %219 = arith.mulf %215, %218 : vector<2x12x144xf32>
    %220 = arith.addf %213, %219 : vector<2x12x144xf32>
    %221 = vector.extract_strided_slice %60 {offsets = [0, 1, 2], sizes = [2, 12, 12], strides = [1, 1, 1]} : vector<2x14x14xf32> to vector<2x12x12xf32>
    %222 = tpu.concatenate %221, %221, %221, %221, %221, %221, %221, %221, %221, %221, %221, %221 in 2 : vector<2x12x12xf32>, vector<2x12x12xf32>, vector<2x12x12xf32>, vector<2x12x12xf32>, vector<2x12x12xf32>, vector<2x12x12xf32>, vector<2x12x12xf32>, vector<2x12x12xf32>, vector<2x12x12xf32>, vector<2x12x12xf32>, vector<2x12x12xf32>, vector<2x12x12xf32> -> vector<2x12x144xf32>
    %c5_25 = arith.constant 5 : index
    %c0_26 = arith.constant 0 : index
    %223 = vector.load %arg3[%c5_25, %c0_26] : memref<27x144xf32, #tpu.memory_space<vmem>>, vector<1x144xf32>
    %224 = vector.shape_cast %223 : vector<1x144xf32> to vector<1x1x144xf32>
    %225 = vector.broadcast %224 : vector<1x1x144xf32> to vector<2x12x144xf32>
    %226 = arith.mulf %222, %225 : vector<2x12x144xf32>
    %227 = arith.addf %220, %226 : vector<2x12x144xf32>
    %228 = vector.extract_strided_slice %60 {offsets = [0, 2, 0], sizes = [2, 12, 12], strides = [1, 1, 1]} : vector<2x14x14xf32> to vector<2x12x12xf32>
    %229 = tpu.concatenate %228, %228, %228, %228, %228, %228, %228, %228, %228, %228, %228, %228 in 2 : vector<2x12x12xf32>, vector<2x12x12xf32>, vector<2x12x12xf32>, vector<2x12x12xf32>, vector<2x12x12xf32>, vector<2x12x12xf32>, vector<2x12x12xf32>, vector<2x12x12xf32>, vector<2x12x12xf32>, vector<2x12x12xf32>, vector<2x12x12xf32>, vector<2x12x12xf32> -> vector<2x12x144xf32>
    %c6_27 = arith.constant 6 : index
    %c0_28 = arith.constant 0 : index
    %230 = vector.load %arg3[%c6_27, %c0_28] : memref<27x144xf32, #tpu.memory_space<vmem>>, vector<1x144xf32>
    %231 = vector.shape_cast %230 : vector<1x144xf32> to vector<1x1x144xf32>
    %232 = vector.broadcast %231 : vector<1x1x144xf32> to vector<2x12x144xf32>
    %233 = arith.mulf %229, %232 : vector<2x12x144xf32>
    %234 = arith.addf %227, %233 : vector<2x12x144xf32>
    %235 = vector.extract_strided_slice %60 {offsets = [0, 2, 1], sizes = [2, 12, 12], strides = [1, 1, 1]} : vector<2x14x14xf32> to vector<2x12x12xf32>
    %236 = tpu.concatenate %235, %235, %235, %235, %235, %235, %235, %235, %235, %235, %235, %235 in 2 : vector<2x12x12xf32>, vector<2x12x12xf32>, vector<2x12x12xf32>, vector<2x12x12xf32>, vector<2x12x12xf32>, vector<2x12x12xf32>, vector<2x12x12xf32>, vector<2x12x12xf32>, vector<2x12x12xf32>, vector<2x12x12xf32>, vector<2x12x12xf32>, vector<2x12x12xf32> -> vector<2x12x144xf32>
    %c7_29 = arith.constant 7 : index
    %c0_30 = arith.constant 0 : index
    %237 = vector.load %arg3[%c7_29, %c0_30] : memref<27x144xf32, #tpu.memory_space<vmem>>, vector<1x144xf32>
    %238 = vector.shape_cast %237 : vector<1x144xf32> to vector<1x1x144xf32>
    %239 = vector.broadcast %238 : vector<1x1x144xf32> to vector<2x12x144xf32>
    %240 = arith.mulf %236, %239 : vector<2x12x144xf32>
    %241 = arith.addf %234, %240 : vector<2x12x144xf32>
    %242 = vector.extract_strided_slice %60 {offsets = [0, 2, 2], sizes = [2, 12, 12], strides = [1, 1, 1]} : vector<2x14x14xf32> to vector<2x12x12xf32>
    %243 = tpu.concatenate %242, %242, %242, %242, %242, %242, %242, %242, %242, %242, %242, %242 in 2 : vector<2x12x12xf32>, vector<2x12x12xf32>, vector<2x12x12xf32>, vector<2x12x12xf32>, vector<2x12x12xf32>, vector<2x12x12xf32>, vector<2x12x12xf32>, vector<2x12x12xf32>, vector<2x12x12xf32>, vector<2x12x12xf32>, vector<2x12x12xf32>, vector<2x12x12xf32> -> vector<2x12x144xf32>
    %c8_31 = arith.constant 8 : index
    %c0_32 = arith.constant 0 : index
    %244 = vector.load %arg3[%c8_31, %c0_32] : memref<27x144xf32, #tpu.memory_space<vmem>>, vector<1x144xf32>
    %245 = vector.shape_cast %244 : vector<1x144xf32> to vector<1x1x144xf32>
    %246 = vector.broadcast %245 : vector<1x1x144xf32> to vector<2x12x144xf32>
    %247 = arith.mulf %243, %246 : vector<2x12x144xf32>
    %248 = arith.addf %241, %247 : vector<2x12x144xf32>
    %249 = vector.extract_strided_slice %120 {offsets = [0, 0, 0], sizes = [2, 12, 12], strides = [1, 1, 1]} : vector<2x14x14xf32> to vector<2x12x12xf32>
    %250 = tpu.concatenate %249, %249, %249, %249, %249, %249, %249, %249, %249, %249, %249, %249 in 2 : vector<2x12x12xf32>, vector<2x12x12xf32>, vector<2x12x12xf32>, vector<2x12x12xf32>, vector<2x12x12xf32>, vector<2x12x12xf32>, vector<2x12x12xf32>, vector<2x12x12xf32>, vector<2x12x12xf32>, vector<2x12x12xf32>, vector<2x12x12xf32>, vector<2x12x12xf32> -> vector<2x12x144xf32>
    %c9_33 = arith.constant 9 : index
    %c0_34 = arith.constant 0 : index
    %251 = vector.load %arg3[%c9_33, %c0_34] : memref<27x144xf32, #tpu.memory_space<vmem>>, vector<1x144xf32>
    %252 = vector.shape_cast %251 : vector<1x144xf32> to vector<1x1x144xf32>
    %253 = vector.broadcast %252 : vector<1x1x144xf32> to vector<2x12x144xf32>
    %254 = arith.mulf %250, %253 : vector<2x12x144xf32>
    %255 = arith.addf %248, %254 : vector<2x12x144xf32>
    %256 = vector.extract_strided_slice %120 {offsets = [0, 0, 1], sizes = [2, 12, 12], strides = [1, 1, 1]} : vector<2x14x14xf32> to vector<2x12x12xf32>
    %257 = tpu.concatenate %256, %256, %256, %256, %256, %256, %256, %256, %256, %256, %256, %256 in 2 : vector<2x12x12xf32>, vector<2x12x12xf32>, vector<2x12x12xf32>, vector<2x12x12xf32>, vector<2x12x12xf32>, vector<2x12x12xf32>, vector<2x12x12xf32>, vector<2x12x12xf32>, vector<2x12x12xf32>, vector<2x12x12xf32>, vector<2x12x12xf32>, vector<2x12x12xf32> -> vector<2x12x144xf32>
    %c10_35 = arith.constant 10 : index
    %c0_36 = arith.constant 0 : index
    %258 = vector.load %arg3[%c10_35, %c0_36] : memref<27x144xf32, #tpu.memory_space<vmem>>, vector<1x144xf32>
    %259 = vector.shape_cast %258 : vector<1x144xf32> to vector<1x1x144xf32>
    %260 = vector.broadcast %259 : vector<1x1x144xf32> to vector<2x12x144xf32>
    %261 = arith.mulf %257, %260 : vector<2x12x144xf32>
    %262 = arith.addf %255, %261 : vector<2x12x144xf32>
    %263 = vector.extract_strided_slice %120 {offsets = [0, 0, 2], sizes = [2, 12, 12], strides = [1, 1, 1]} : vector<2x14x14xf32> to vector<2x12x12xf32>
    %264 = tpu.concatenate %263, %263, %263, %263, %263, %263, %263, %263, %263, %263, %263, %263 in 2 : vector<2x12x12xf32>, vector<2x12x12xf32>, vector<2x12x12xf32>, vector<2x12x12xf32>, vector<2x12x12xf32>, vector<2x12x12xf32>, vector<2x12x12xf32>, vector<2x12x12xf32>, vector<2x12x12xf32>, vector<2x12x12xf32>, vector<2x12x12xf32>, vector<2x12x12xf32> -> vector<2x12x144xf32>
    %c11_37 = arith.constant 11 : index
    %c0_38 = arith.constant 0 : index
    %265 = vector.load %arg3[%c11_37, %c0_38] : memref<27x144xf32, #tpu.memory_space<vmem>>, vector<1x144xf32>
    %266 = vector.shape_cast %265 : vector<1x144xf32> to vector<1x1x144xf32>
    %267 = vector.broadcast %266 : vector<1x1x144xf32> to vector<2x12x144xf32>
    %268 = arith.mulf %264, %267 : vector<2x12x144xf32>
    %269 = arith.addf %262, %268 : vector<2x12x144xf32>
    %270 = vector.extract_strided_slice %120 {offsets = [0, 1, 0], sizes = [2, 12, 12], strides = [1, 1, 1]} : vector<2x14x14xf32> to vector<2x12x12xf32>
    %271 = tpu.concatenate %270, %270, %270, %270, %270, %270, %270, %270, %270, %270, %270, %270 in 2 : vector<2x12x12xf32>, vector<2x12x12xf32>, vector<2x12x12xf32>, vector<2x12x12xf32>, vector<2x12x12xf32>, vector<2x12x12xf32>, vector<2x12x12xf32>, vector<2x12x12xf32>, vector<2x12x12xf32>, vector<2x12x12xf32>, vector<2x12x12xf32>, vector<2x12x12xf32> -> vector<2x12x144xf32>
    %c12_39 = arith.constant 12 : index
    %c0_40 = arith.constant 0 : index
    %272 = vector.load %arg3[%c12_39, %c0_40] : memref<27x144xf32, #tpu.memory_space<vmem>>, vector<1x144xf32>
    %273 = vector.shape_cast %272 : vector<1x144xf32> to vector<1x1x144xf32>
    %274 = vector.broadcast %273 : vector<1x1x144xf32> to vector<2x12x144xf32>
    %275 = arith.mulf %271, %274 : vector<2x12x144xf32>
    %276 = arith.addf %269, %275 : vector<2x12x144xf32>
    %277 = vector.extract_strided_slice %120 {offsets = [0, 1, 1], sizes = [2, 12, 12], strides = [1, 1, 1]} : vector<2x14x14xf32> to vector<2x12x12xf32>
    %278 = tpu.concatenate %277, %277, %277, %277, %277, %277, %277, %277, %277, %277, %277, %277 in 2 : vector<2x12x12xf32>, vector<2x12x12xf32>, vector<2x12x12xf32>, vector<2x12x12xf32>, vector<2x12x12xf32>, vector<2x12x12xf32>, vector<2x12x12xf32>, vector<2x12x12xf32>, vector<2x12x12xf32>, vector<2x12x12xf32>, vector<2x12x12xf32>, vector<2x12x12xf32> -> vector<2x12x144xf32>
    %c13_41 = arith.constant 13 : index
    %c0_42 = arith.constant 0 : index
    %279 = vector.load %arg3[%c13_41, %c0_42] : memref<27x144xf32, #tpu.memory_space<vmem>>, vector<1x144xf32>
    %280 = vector.shape_cast %279 : vector<1x144xf32> to vector<1x1x144xf32>
    %281 = vector.broadcast %280 : vector<1x1x144xf32> to vector<2x12x144xf32>
    %282 = arith.mulf %278, %281 : vector<2x12x144xf32>
    %283 = arith.addf %276, %282 : vector<2x12x144xf32>
    %284 = vector.extract_strided_slice %120 {offsets = [0, 1, 2], sizes = [2, 12, 12], strides = [1, 1, 1]} : vector<2x14x14xf32> to vector<2x12x12xf32>
    %285 = tpu.concatenate %284, %284, %284, %284, %284, %284, %284, %284, %284, %284, %284, %284 in 2 : vector<2x12x12xf32>, vector<2x12x12xf32>, vector<2x12x12xf32>, vector<2x12x12xf32>, vector<2x12x12xf32>, vector<2x12x12xf32>, vector<2x12x12xf32>, vector<2x12x12xf32>, vector<2x12x12xf32>, vector<2x12x12xf32>, vector<2x12x12xf32>, vector<2x12x12xf32> -> vector<2x12x144xf32>
    %c14_43 = arith.constant 14 : index
    %c0_44 = arith.constant 0 : index
    %286 = vector.load %arg3[%c14_43, %c0_44] : memref<27x144xf32, #tpu.memory_space<vmem>>, vector<1x144xf32>
    %287 = vector.shape_cast %286 : vector<1x144xf32> to vector<1x1x144xf32>
    %288 = vector.broadcast %287 : vector<1x1x144xf32> to vector<2x12x144xf32>
    %289 = arith.mulf %285, %288 : vector<2x12x144xf32>
    %290 = arith.addf %283, %289 : vector<2x12x144xf32>
    %291 = vector.extract_strided_slice %120 {offsets = [0, 2, 0], sizes = [2, 12, 12], strides = [1, 1, 1]} : vector<2x14x14xf32> to vector<2x12x12xf32>
    %292 = tpu.concatenate %291, %291, %291, %291, %291, %291, %291, %291, %291, %291, %291, %291 in 2 : vector<2x12x12xf32>, vector<2x12x12xf32>, vector<2x12x12xf32>, vector<2x12x12xf32>, vector<2x12x12xf32>, vector<2x12x12xf32>, vector<2x12x12xf32>, vector<2x12x12xf32>, vector<2x12x12xf32>, vector<2x12x12xf32>, vector<2x12x12xf32>, vector<2x12x12xf32> -> vector<2x12x144xf32>
    %c15_45 = arith.constant 15 : index
    %c0_46 = arith.constant 0 : index
    %293 = vector.load %arg3[%c15_45, %c0_46] : memref<27x144xf32, #tpu.memory_space<vmem>>, vector<1x144xf32>
    %294 = vector.shape_cast %293 : vector<1x144xf32> to vector<1x1x144xf32>
    %295 = vector.broadcast %294 : vector<1x1x144xf32> to vector<2x12x144xf32>
    %296 = arith.mulf %292, %295 : vector<2x12x144xf32>
    %297 = arith.addf %290, %296 : vector<2x12x144xf32>
    %298 = vector.extract_strided_slice %120 {offsets = [0, 2, 1], sizes = [2, 12, 12], strides = [1, 1, 1]} : vector<2x14x14xf32> to vector<2x12x12xf32>
    %299 = tpu.concatenate %298, %298, %298, %298, %298, %298, %298, %298, %298, %298, %298, %298 in 2 : vector<2x12x12xf32>, vector<2x12x12xf32>, vector<2x12x12xf32>, vector<2x12x12xf32>, vector<2x12x12xf32>, vector<2x12x12xf32>, vector<2x12x12xf32>, vector<2x12x12xf32>, vector<2x12x12xf32>, vector<2x12x12xf32>, vector<2x12x12xf32>, vector<2x12x12xf32> -> vector<2x12x144xf32>
    %c16_47 = arith.constant 16 : index
    %c0_48 = arith.constant 0 : index
    %300 = vector.load %arg3[%c16_47, %c0_48] : memref<27x144xf32, #tpu.memory_space<vmem>>, vector<1x144xf32>
    %301 = vector.shape_cast %300 : vector<1x144xf32> to vector<1x1x144xf32>
    %302 = vector.broadcast %301 : vector<1x1x144xf32> to vector<2x12x144xf32>
    %303 = arith.mulf %299, %302 : vector<2x12x144xf32>
    %304 = arith.addf %297, %303 : vector<2x12x144xf32>
    %305 = vector.extract_strided_slice %120 {offsets = [0, 2, 2], sizes = [2, 12, 12], strides = [1, 1, 1]} : vector<2x14x14xf32> to vector<2x12x12xf32>
    %306 = tpu.concatenate %305, %305, %305, %305, %305, %305, %305, %305, %305, %305, %305, %305 in 2 : vector<2x12x12xf32>, vector<2x12x12xf32>, vector<2x12x12xf32>, vector<2x12x12xf32>, vector<2x12x12xf32>, vector<2x12x12xf32>, vector<2x12x12xf32>, vector<2x12x12xf32>, vector<2x12x12xf32>, vector<2x12x12xf32>, vector<2x12x12xf32>, vector<2x12x12xf32> -> vector<2x12x144xf32>
    %c17_49 = arith.constant 17 : index
    %c0_50 = arith.constant 0 : index
    %307 = vector.load %arg3[%c17_49, %c0_50] : memref<27x144xf32, #tpu.memory_space<vmem>>, vector<1x144xf32>
    %308 = vector.shape_cast %307 : vector<1x144xf32> to vector<1x1x144xf32>
    %309 = vector.broadcast %308 : vector<1x1x144xf32> to vector<2x12x144xf32>
    %310 = arith.mulf %306, %309 : vector<2x12x144xf32>
    %311 = arith.addf %304, %310 : vector<2x12x144xf32>
    %312 = vector.extract_strided_slice %180 {offsets = [0, 0, 0], sizes = [2, 12, 12], strides = [1, 1, 1]} : vector<2x14x14xf32> to vector<2x12x12xf32>
    %313 = tpu.concatenate %312, %312, %312, %312, %312, %312, %312, %312, %312, %312, %312, %312 in 2 : vector<2x12x12xf32>, vector<2x12x12xf32>, vector<2x12x12xf32>, vector<2x12x12xf32>, vector<2x12x12xf32>, vector<2x12x12xf32>, vector<2x12x12xf32>, vector<2x12x12xf32>, vector<2x12x12xf32>, vector<2x12x12xf32>, vector<2x12x12xf32>, vector<2x12x12xf32> -> vector<2x12x144xf32>
    %c18_51 = arith.constant 18 : index
    %c0_52 = arith.constant 0 : index
    %314 = vector.load %arg3[%c18_51, %c0_52] : memref<27x144xf32, #tpu.memory_space<vmem>>, vector<1x144xf32>
    %315 = vector.shape_cast %314 : vector<1x144xf32> to vector<1x1x144xf32>
    %316 = vector.broadcast %315 : vector<1x1x144xf32> to vector<2x12x144xf32>
    %317 = arith.mulf %313, %316 : vector<2x12x144xf32>
    %318 = arith.addf %311, %317 : vector<2x12x144xf32>
    %319 = vector.extract_strided_slice %180 {offsets = [0, 0, 1], sizes = [2, 12, 12], strides = [1, 1, 1]} : vector<2x14x14xf32> to vector<2x12x12xf32>
    %320 = tpu.concatenate %319, %319, %319, %319, %319, %319, %319, %319, %319, %319, %319, %319 in 2 : vector<2x12x12xf32>, vector<2x12x12xf32>, vector<2x12x12xf32>, vector<2x12x12xf32>, vector<2x12x12xf32>, vector<2x12x12xf32>, vector<2x12x12xf32>, vector<2x12x12xf32>, vector<2x12x12xf32>, vector<2x12x12xf32>, vector<2x12x12xf32>, vector<2x12x12xf32> -> vector<2x12x144xf32>
    %c19_53 = arith.constant 19 : index
    %c0_54 = arith.constant 0 : index
    %321 = vector.load %arg3[%c19_53, %c0_54] : memref<27x144xf32, #tpu.memory_space<vmem>>, vector<1x144xf32>
    %322 = vector.shape_cast %321 : vector<1x144xf32> to vector<1x1x144xf32>
    %323 = vector.broadcast %322 : vector<1x1x144xf32> to vector<2x12x144xf32>
    %324 = arith.mulf %320, %323 : vector<2x12x144xf32>
    %325 = arith.addf %318, %324 : vector<2x12x144xf32>
    %326 = vector.extract_strided_slice %180 {offsets = [0, 0, 2], sizes = [2, 12, 12], strides = [1, 1, 1]} : vector<2x14x14xf32> to vector<2x12x12xf32>
    %327 = tpu.concatenate %326, %326, %326, %326, %326, %326, %326, %326, %326, %326, %326, %326 in 2 : vector<2x12x12xf32>, vector<2x12x12xf32>, vector<2x12x12xf32>, vector<2x12x12xf32>, vector<2x12x12xf32>, vector<2x12x12xf32>, vector<2x12x12xf32>, vector<2x12x12xf32>, vector<2x12x12xf32>, vector<2x12x12xf32>, vector<2x12x12xf32>, vector<2x12x12xf32> -> vector<2x12x144xf32>
    %c20_55 = arith.constant 20 : index
    %c0_56 = arith.constant 0 : index
    %328 = vector.load %arg3[%c20_55, %c0_56] : memref<27x144xf32, #tpu.memory_space<vmem>>, vector<1x144xf32>
    %329 = vector.shape_cast %328 : vector<1x144xf32> to vector<1x1x144xf32>
    %330 = vector.broadcast %329 : vector<1x1x144xf32> to vector<2x12x144xf32>
    %331 = arith.mulf %327, %330 : vector<2x12x144xf32>
    %332 = arith.addf %325, %331 : vector<2x12x144xf32>
    %333 = vector.extract_strided_slice %180 {offsets = [0, 1, 0], sizes = [2, 12, 12], strides = [1, 1, 1]} : vector<2x14x14xf32> to vector<2x12x12xf32>
    %334 = tpu.concatenate %333, %333, %333, %333, %333, %333, %333, %333, %333, %333, %333, %333 in 2 : vector<2x12x12xf32>, vector<2x12x12xf32>, vector<2x12x12xf32>, vector<2x12x12xf32>, vector<2x12x12xf32>, vector<2x12x12xf32>, vector<2x12x12xf32>, vector<2x12x12xf32>, vector<2x12x12xf32>, vector<2x12x12xf32>, vector<2x12x12xf32>, vector<2x12x12xf32> -> vector<2x12x144xf32>
    %c21_57 = arith.constant 21 : index
    %c0_58 = arith.constant 0 : index
    %335 = vector.load %arg3[%c21_57, %c0_58] : memref<27x144xf32, #tpu.memory_space<vmem>>, vector<1x144xf32>
    %336 = vector.shape_cast %335 : vector<1x144xf32> to vector<1x1x144xf32>
    %337 = vector.broadcast %336 : vector<1x1x144xf32> to vector<2x12x144xf32>
    %338 = arith.mulf %334, %337 : vector<2x12x144xf32>
    %339 = arith.addf %332, %338 : vector<2x12x144xf32>
    %340 = vector.extract_strided_slice %180 {offsets = [0, 1, 1], sizes = [2, 12, 12], strides = [1, 1, 1]} : vector<2x14x14xf32> to vector<2x12x12xf32>
    %341 = tpu.concatenate %340, %340, %340, %340, %340, %340, %340, %340, %340, %340, %340, %340 in 2 : vector<2x12x12xf32>, vector<2x12x12xf32>, vector<2x12x12xf32>, vector<2x12x12xf32>, vector<2x12x12xf32>, vector<2x12x12xf32>, vector<2x12x12xf32>, vector<2x12x12xf32>, vector<2x12x12xf32>, vector<2x12x12xf32>, vector<2x12x12xf32>, vector<2x12x12xf32> -> vector<2x12x144xf32>
    %c22_59 = arith.constant 22 : index
    %c0_60 = arith.constant 0 : index
    %342 = vector.load %arg3[%c22_59, %c0_60] : memref<27x144xf32, #tpu.memory_space<vmem>>, vector<1x144xf32>
    %343 = vector.shape_cast %342 : vector<1x144xf32> to vector<1x1x144xf32>
    %344 = vector.broadcast %343 : vector<1x1x144xf32> to vector<2x12x144xf32>
    %345 = arith.mulf %341, %344 : vector<2x12x144xf32>
    %346 = arith.addf %339, %345 : vector<2x12x144xf32>
    %347 = vector.extract_strided_slice %180 {offsets = [0, 1, 2], sizes = [2, 12, 12], strides = [1, 1, 1]} : vector<2x14x14xf32> to vector<2x12x12xf32>
    %348 = tpu.concatenate %347, %347, %347, %347, %347, %347, %347, %347, %347, %347, %347, %347 in 2 : vector<2x12x12xf32>, vector<2x12x12xf32>, vector<2x12x12xf32>, vector<2x12x12xf32>, vector<2x12x12xf32>, vector<2x12x12xf32>, vector<2x12x12xf32>, vector<2x12x12xf32>, vector<2x12x12xf32>, vector<2x12x12xf32>, vector<2x12x12xf32>, vector<2x12x12xf32> -> vector<2x12x144xf32>
    %c23_61 = arith.constant 23 : index
    %c0_62 = arith.constant 0 : index
    %349 = vector.load %arg3[%c23_61, %c0_62] : memref<27x144xf32, #tpu.memory_space<vmem>>, vector<1x144xf32>
    %350 = vector.shape_cast %349 : vector<1x144xf32> to vector<1x1x144xf32>
    %351 = vector.broadcast %350 : vector<1x1x144xf32> to vector<2x12x144xf32>
    %352 = arith.mulf %348, %351 : vector<2x12x144xf32>
    %353 = arith.addf %346, %352 : vector<2x12x144xf32>
    %354 = vector.extract_strided_slice %180 {offsets = [0, 2, 0], sizes = [2, 12, 12], strides = [1, 1, 1]} : vector<2x14x14xf32> to vector<2x12x12xf32>
    %355 = tpu.concatenate %354, %354, %354, %354, %354, %354, %354, %354, %354, %354, %354, %354 in 2 : vector<2x12x12xf32>, vector<2x12x12xf32>, vector<2x12x12xf32>, vector<2x12x12xf32>, vector<2x12x12xf32>, vector<2x12x12xf32>, vector<2x12x12xf32>, vector<2x12x12xf32>, vector<2x12x12xf32>, vector<2x12x12xf32>, vector<2x12x12xf32>, vector<2x12x12xf32> -> vector<2x12x144xf32>
    %c24_63 = arith.constant 24 : index
    %c0_64 = arith.constant 0 : index
    %356 = vector.load %arg3[%c24_63, %c0_64] : memref<27x144xf32, #tpu.memory_space<vmem>>, vector<1x144xf32>
    %357 = vector.shape_cast %356 : vector<1x144xf32> to vector<1x1x144xf32>
    %358 = vector.broadcast %357 : vector<1x1x144xf32> to vector<2x12x144xf32>
    %359 = arith.mulf %355, %358 : vector<2x12x144xf32>
    %360 = arith.addf %353, %359 : vector<2x12x144xf32>
    %361 = vector.extract_strided_slice %180 {offsets = [0, 2, 1], sizes = [2, 12, 12], strides = [1, 1, 1]} : vector<2x14x14xf32> to vector<2x12x12xf32>
    %362 = tpu.concatenate %361, %361, %361, %361, %361, %361, %361, %361, %361, %361, %361, %361 in 2 : vector<2x12x12xf32>, vector<2x12x12xf32>, vector<2x12x12xf32>, vector<2x12x12xf32>, vector<2x12x12xf32>, vector<2x12x12xf32>, vector<2x12x12xf32>, vector<2x12x12xf32>, vector<2x12x12xf32>, vector<2x12x12xf32>, vector<2x12x12xf32>, vector<2x12x12xf32> -> vector<2x12x144xf32>
    %c25_65 = arith.constant 25 : index
    %c0_66 = arith.constant 0 : index
    %363 = vector.load %arg3[%c25_65, %c0_66] : memref<27x144xf32, #tpu.memory_space<vmem>>, vector<1x144xf32>
    %364 = vector.shape_cast %363 : vector<1x144xf32> to vector<1x1x144xf32>
    %365 = vector.broadcast %364 : vector<1x1x144xf32> to vector<2x12x144xf32>
    %366 = arith.mulf %362, %365 : vector<2x12x144xf32>
    %367 = arith.addf %360, %366 : vector<2x12x144xf32>
    %368 = vector.extract_strided_slice %180 {offsets = [0, 2, 2], sizes = [2, 12, 12], strides = [1, 1, 1]} : vector<2x14x14xf32> to vector<2x12x12xf32>
    %369 = tpu.concatenate %368, %368, %368, %368, %368, %368, %368, %368, %368, %368, %368, %368 in 2 : vector<2x12x12xf32>, vector<2x12x12xf32>, vector<2x12x12xf32>, vector<2x12x12xf32>, vector<2x12x12xf32>, vector<2x12x12xf32>, vector<2x12x12xf32>, vector<2x12x12xf32>, vector<2x12x12xf32>, vector<2x12x12xf32>, vector<2x12x12xf32>, vector<2x12x12xf32> -> vector<2x12x144xf32>
    %c26_67 = arith.constant 26 : index
    %c0_68 = arith.constant 0 : index
    %370 = vector.load %arg3[%c26_67, %c0_68] : memref<27x144xf32, #tpu.memory_space<vmem>>, vector<1x144xf32>
    %371 = vector.shape_cast %370 : vector<1x144xf32> to vector<1x1x144xf32>
    %372 = vector.broadcast %371 : vector<1x1x144xf32> to vector<2x12x144xf32>
    %373 = arith.mulf %369, %372 : vector<2x12x144xf32>
    %374 = arith.addf %367, %373 : vector<2x12x144xf32>
    %cst_69 = arith.constant 0.000000e+00 : f32
    %375 = vector.broadcast %cst_69 : f32 to vector<2x12x144xf32>
    %376 = arith.maximumf %374, %375 : vector<2x12x144xf32>
    %c0_70 = arith.constant 0 : index
    %c0_71 = arith.constant 0 : index
    %c0_72 = arith.constant 0 : index
    %377 = vector.load %arg12[%c0_70, %c0_71, %c0_72] : memref<2x12x144xf32, #tpu.memory_space<vmem>>, vector<2x12x144xf32>
    tpu.vector_store %arg12[%c0_70, %c0_71, %c0_72], %376 {strides = array<i32>} : memref<2x12x144xf32, #tpu.memory_space<vmem>>, vector<2x12x144xf32>,
    %c0_73 = arith.constant 0 : index
    %c0_74 = arith.constant 0 : index
    %c0_75 = arith.constant 0 : index
    %378 = vector.load %arg12[%c0_73, %c0_74, %c0_75] : memref<2x12x144xf32, #tpu.memory_space<vmem>>, vector<2x1x144xf32>
    %379 = vector.shape_cast %378 : vector<2x1x144xf32> to vector<2x144xf32>
    %c0_76 = arith.constant 0 : index
    %c1_77 = arith.constant 1 : index
    %c0_78 = arith.constant 0 : index
    %380 = vector.load %arg12[%c0_76, %c1_77, %c0_78] : memref<2x12x144xf32, #tpu.memory_space<vmem>>, vector<2x1x144xf32>
    %381 = vector.shape_cast %380 : vector<2x1x144xf32> to vector<2x144xf32>
    %c0_79 = arith.constant 0 : index
    %c2_80 = arith.constant 2 : index
    %c0_81 = arith.constant 0 : index
    %382 = vector.load %arg12[%c0_79, %c2_80, %c0_81] : memref<2x12x144xf32, #tpu.memory_space<vmem>>, vector<2x1x144xf32>
    %383 = vector.shape_cast %382 : vector<2x1x144xf32> to vector<2x144xf32>
    %c0_82 = arith.constant 0 : index
    %c3_83 = arith.constant 3 : index
    %c0_84 = arith.constant 0 : index
    %384 = vector.load %arg12[%c0_82, %c3_83, %c0_84] : memref<2x12x144xf32, #tpu.memory_space<vmem>>, vector<2x1x144xf32>
    %385 = vector.shape_cast %384 : vector<2x1x144xf32> to vector<2x144xf32>
    %c0_85 = arith.constant 0 : index
    %c4_86 = arith.constant 4 : index
    %c0_87 = arith.constant 0 : index
    %386 = vector.load %arg12[%c0_85, %c4_86, %c0_87] : memref<2x12x144xf32, #tpu.memory_space<vmem>>, vector<2x1x144xf32>
    %387 = vector.shape_cast %386 : vector<2x1x144xf32> to vector<2x144xf32>
    %c0_88 = arith.constant 0 : index
    %c5_89 = arith.constant 5 : index
    %c0_90 = arith.constant 0 : index
    %388 = vector.load %arg12[%c0_88, %c5_89, %c0_90] : memref<2x12x144xf32, #tpu.memory_space<vmem>>, vector<2x1x144xf32>
    %389 = vector.shape_cast %388 : vector<2x1x144xf32> to vector<2x144xf32>
    %c0_91 = arith.constant 0 : index
    %c6_92 = arith.constant 6 : index
    %c0_93 = arith.constant 0 : index
    %390 = vector.load %arg12[%c0_91, %c6_92, %c0_93] : memref<2x12x144xf32, #tpu.memory_space<vmem>>, vector<2x1x144xf32>
    %391 = vector.shape_cast %390 : vector<2x1x144xf32> to vector<2x144xf32>
    %c0_94 = arith.constant 0 : index
    %c7_95 = arith.constant 7 : index
    %c0_96 = arith.constant 0 : index
    %392 = vector.load %arg12[%c0_94, %c7_95, %c0_96] : memref<2x12x144xf32, #tpu.memory_space<vmem>>, vector<2x1x144xf32>
    %393 = vector.shape_cast %392 : vector<2x1x144xf32> to vector<2x144xf32>
    %c0_97 = arith.constant 0 : index
    %c8_98 = arith.constant 8 : index
    %c0_99 = arith.constant 0 : index
    %394 = vector.load %arg12[%c0_97, %c8_98, %c0_99] : memref<2x12x144xf32, #tpu.memory_space<vmem>>, vector<2x1x144xf32>
    %395 = vector.shape_cast %394 : vector<2x1x144xf32> to vector<2x144xf32>
    %c0_100 = arith.constant 0 : index
    %c9_101 = arith.constant 9 : index
    %c0_102 = arith.constant 0 : index
    %396 = vector.load %arg12[%c0_100, %c9_101, %c0_102] : memref<2x12x144xf32, #tpu.memory_space<vmem>>, vector<2x1x144xf32>
    %397 = vector.shape_cast %396 : vector<2x1x144xf32> to vector<2x144xf32>
    %c0_103 = arith.constant 0 : index
    %c10_104 = arith.constant 10 : index
    %c0_105 = arith.constant 0 : index
    %398 = vector.load %arg12[%c0_103, %c10_104, %c0_105] : memref<2x12x144xf32, #tpu.memory_space<vmem>>, vector<2x1x144xf32>
    %399 = vector.shape_cast %398 : vector<2x1x144xf32> to vector<2x144xf32>
    %c0_106 = arith.constant 0 : index
    %c11_107 = arith.constant 11 : index
    %c0_108 = arith.constant 0 : index
    %400 = vector.load %arg12[%c0_106, %c11_107, %c0_108] : memref<2x12x144xf32, #tpu.memory_space<vmem>>, vector<2x1x144xf32>
    %401 = vector.shape_cast %400 : vector<2x1x144xf32> to vector<2x144xf32>
    %402 = tpu.concatenate %379, %381, %383, %385, %387, %389, %391, %393, %395, %397, %399, %401 in 1 : vector<2x144xf32>, vector<2x144xf32>, vector<2x144xf32>, vector<2x144xf32>, vector<2x144xf32>, vector<2x144xf32>, vector<2x144xf32>, vector<2x144xf32>, vector<2x144xf32>, vector<2x144xf32>, vector<2x144xf32>, vector<2x144xf32> -> vector<2x1728xf32>
    %c0_109 = arith.constant 0 : index
    %c0_110 = arith.constant 0 : index
    %403 = vector.load %arg5[%c0_109, %c0_110] : memref<1728x120xf32, #tpu.memory_space<vmem>>, vector<1728x120xf32>
    %cst_111 = arith.constant dense<0.000000e+00> : vector<2x120xf32>
    %404 = tpu.matmul %402, %403, %cst_111 {dimension_numbers = #tpu.dot_dimension_numbers<[1], [0], [0], [1], [0, 0, 1, 1], [], []>} : vector<2x1728xf32>, vector<1728x120xf32>, vector<2x120xf32> -> vector<2x120xf32>
    %c0_112 = arith.constant 0 : index
    %c0_113 = arith.constant 0 : index
    %405 = vector.load %arg6[%c0_112, %c0_113] : memref<1x120xf32, #tpu.memory_space<vmem>>, vector<1x120xf32>
    %406 = vector.broadcast %405 : vector<1x120xf32> to vector<2x120xf32>
    %407 = arith.addf %404, %406 : vector<2x120xf32>
    %cst_114 = arith.constant 0.000000e+00 : f32
    %408 = vector.broadcast %cst_114 : f32 to vector<2x120xf32>
    %409 = arith.maximumf %407, %408 : vector<2x120xf32>
    %c0_115 = arith.constant 0 : index
    %c0_116 = arith.constant 0 : index
    %410 = vector.load %arg7[%c0_115, %c0_116] : memref<120x84xf32, #tpu.memory_space<vmem>>, vector<120x84xf32>
    %cst_117 = arith.constant dense<0.000000e+00> : vector<2x84xf32>
    %411 = tpu.matmul %409, %410, %cst_117 {dimension_numbers = #tpu.dot_dimension_numbers<[1], [0], [0], [1], [0, 0, 1, 1], [], []>} : vector<2x120xf32>, vector<120x84xf32>, vector<2x84xf32> -> vector<2x84xf32>
    %c0_118 = arith.constant 0 : index
    %c0_119 = arith.constant 0 : index
    %412 = vector.load %arg8[%c0_118, %c0_119] : memref<1x84xf32, #tpu.memory_space<vmem>>, vector<1x84xf32>
    %413 = vector.broadcast %412 : vector<1x84xf32> to vector<2x84xf32>
    %414 = arith.addf %411, %413 : vector<2x84xf32>
    %cst_120 = arith.constant 0.000000e+00 : f32
    %415 = vector.broadcast %cst_120 : f32 to vector<2x84xf32>
    %416 = arith.maximumf %414, %415 : vector<2x84xf32>
    %c0_121 = arith.constant 0 : index
    %c0_122 = arith.constant 0 : index
    %417 = vector.load %arg9[%c0_121, %c0_122] : memref<84x10xf32, #tpu.memory_space<vmem>>, vector<84x10xf32>
    %cst_123 = arith.constant dense<0.000000e+00> : vector<2x10xf32>
    %418 = tpu.matmul %416, %417, %cst_123 {dimension_numbers = #tpu.dot_dimension_numbers<[1], [0], [0], [1], [0, 0, 1, 1], [], []>} : vector<2x84xf32>, vector<84x10xf32>, vector<2x10xf32> -> vector<2x10xf32>
    %c0_124 = arith.constant 0 : index
    %c0_125 = arith.constant 0 : index
    %419 = vector.load %arg10[%c0_124, %c0_125] : memref<1x10xf32, #tpu.memory_space<vmem>>, vector<1x10xf32>
    %420 = vector.broadcast %419 : vector<1x10xf32> to vector<2x10xf32>
    %421 = arith.addf %418, %420 : vector<2x10xf32>
    %c0_126 = arith.constant 0 : index
    %c0_127 = arith.constant 0 : index
    %422 = vector.load %arg11[%c0_126, %c0_127] : memref<2x10xf32, #tpu.memory_space<vmem>>, vector<2x10xf32>
    tpu.vector_store %arg11[%c0_126, %c0_127], %421 {strides = array<i32>} : memref<2x10xf32, #tpu.memory_space<vmem>>, vector<2x10xf32>,
    return
  }
}

</mosaic_0001>

<bundles_post_ra>
// kernel: tpu_custom_call.1
= control target key start
LH: loop header
LB: loop body
LE: loop exit
PB: predicated region body
PF: predicated region fallthrough
CT: control target
= control target key end

     0   :  { %s11504_s0 = inlined_call_operand.vmem [shape: f32[2,1,16,16], index: 0, kind: input, shape index: {}]   ;;  %s11505_s1 = inlined_call_operand.vmem [shape: f32[27], index: 1, kind: input, shape index: {}]   ;;  %s11506_s2 = inlined_call_operand.vmem [shape: f32[3], index: 2, kind: input, shape index: {}]   ;;  %s11507_s3 = inlined_call_operand.vmem [shape: f32[27,144], index: 3, kind: input, shape index: {}]   ;;  %s11508_s4 = inlined_call_operand.vmem [shape: f32[1,144], index: 4, kind: input, shape index: {}]   ;;  %s11509_s5 = inlined_call_operand.vmem [shape: f32[1728,120], index: 5, kind: input, shape index: {}]   ;;  %s11510_s6 = inlined_call_operand.vmem [shape: f32[1,120], index: 6, kind: input, shape index: {}]   ;;  %s11511_s7 = inlined_call_operand.vmem [shape: f32[120,84], index: 7, kind: input, shape index: {}]   ;;  %s11512_s8 = inlined_call_operand.vmem [shape: f32[1,84], index: 8, kind: input, shape index: {}]   ;;  %s11513_s9 = inlined_call_operand.vmem [shape: f32[84,10], index: 9, kind: input, shape index: {}]   ;;  %s11514_s10 = inlined_call_operand.vmem [shape: f32[1,10], index: 10, kind: input, shape index: {}]   ;;  %s11515_s11 = inlined_call_operand.hbm [shape: f32[2,10], index: 11, kind: output, shape index: {}]  }
   0x1   :  { %11722 = sst [smem:[#allocation279_spill]] %s11509_s5 }
   0x2   :  { %11723 = sst [smem:[#allocation280_spill]] %s11510_s6 }
   0x3   :  { %11724 = sst [smem:[#allocation281_spill]] %s11511_s7 }
   0x4   :  { %11725 = sst [smem:[#allocation282_spill]] %s11512_s8 }
   0x5   :  { %11726 = sst [smem:[#allocation283_spill]] %s11513_s9 }
   0x6   :  { %11727 = sst [smem:[#allocation284_spill]] %s11514_s10 }
   0x7   :  { %11728 = sst [smem:[#allocation285_spill]] %s11515_s11 }
   0x8   :  { %16 = vsyncpa [#allocation5], 0 }
   0x9   :  { %17 = vsyncpa [#allocation7], 0 }
   0xa   :  { %18 = vsyncpa [#allocation4], 0  ;;  %s27_s19 = sshll.u32 %s11505_s1, 4  ;;  %s37_s22 = sshll.u32 %s11506_s2, 4  ;;  %s28_s19 = int_to_ptr.vmem [resolvable:$true] %s27_s19  ;;  %s38_s22 = int_to_ptr.vmem [resolvable:$true] %s37_s22 }
   0xb   :  { %s5868_s23 = scalar_lea.vmem %s28_s19, 16  ;;  %p5873_p1 = scmp.lt.s32.totalorder %s28_s19, %s28_s19 }
   0xc   :  { %p5869_p0 = scmp.ne.s32.totalorder %s28_s19, %s5868_s23  ;;  %p5874_p2 = scmp.lt.s32.totalorder %s5868_s23, %s5868_s23 }
   0xe   :  { %p5875_p3 = por %p5874_p2, %p5873_p1 }
  0x10   :  { %p5876_p4 = pnand %p5875_p3, %p5869_p0 }
  0x12   :  { %5879 = shalt.err (!%p5876_p4)
}
  0x13   :  { %s5920_s24 = smov [#allocation3]   ;;  %s5880_s25 = scalar_lea.vmem %s38_s22, 16 }
  0x14   :  { %30 = dma.vmem_to_smem %s28_s19, 16, %s5920_s24, [#allocation5]  }
  0x15   :  { %p5881_p5 = scmp.ne.s32.totalorder %s38_s22, %s5880_s25  ;;  %p5885_p6 = scmp.lt.s32.totalorder %s38_s22, %s38_s22 }
  0x16   :  { %p5886_p7 = scmp.lt.s32.totalorder %s5880_s25, %s5880_s25 }
  0x18   :  { %p5887_p8 = por %p5886_p7, %p5885_p6 }
  0x1a   :  { %p5888_p9 = pnand %p5887_p8, %p5881_p5 }
  0x1c   :  { %5891 = shalt.err (!%p5888_p9)
}
  0x1d   :  { %s5921_s1 = smov [#allocation6]  }
  0x1e   :  { %40 = dma.vmem_to_smem %s38_s22, 16, %s5921_s1, [#allocation7]  }
  0x1f   :  { %5914 = dma.done.wait [#allocation5], 16  }
  0x20   :  { %5915 = vsyncadd [#allocation5], 4294967280 }
  0x21   :  { %5916 = dma.done.wait [#allocation7], 16  }
  0x22   :  { %5917 = vsyncadd [#allocation7], 4294967280 }
  0x23   :  { %63 = sfence }
  0x24   :  { %s5162_s2 = sld [smem:[#allocation3 + $0x2]]  ;;  %s5161_s26 = sld [smem:[#allocation3 + $0x1]]  ;;  %v6036_v0 = vld [vmem:[%s11504_s0] sm:$0xff]  ;;  %v6041_v2 = vld [vmem:[%s11504_s0 + $0x10] sm:$0xff]  ;;  %v6052_v8 = vld [vmem:[%s11504_s0 + $0x18] sm:$0xff]  ;;  %vm143_vm0 = vcmask 1046528  }
  0x25   :  { %s5164_s27 = sld [smem:[#allocation3 + $0x4]]  ;;  %s5165_s13 = sld [smem:[#allocation3 + $0x5]]  ;;  %v6057_v9 = vld [vmem:[%s11504_s0 + $0x8] sm:$0xff]  ;;  %vm232_vm1 = vcmask 1045504   ;;  %vm955_vm2 = vcmask 97280   ;;  %vm960_vm3 = vcmask 195584  }
  0x26   :  { %s11550_s14 = smov 126   ;;  %s11561_s15 = smov 127   ;;  %vm965_vm4 = vcmask 293888   ;;  %vm970_vm5 = vcmask 392192   ;;  %vm975_vm6 = vcmask 490496   ;;  %vm980_vm7 = vcmask 588800  }
  0x27   :  { %s5167_s20 = sld [smem:[#allocation3 + $0x7]]  ;;  %s5168_s21 = sld [smem:[#allocation3 + $0x8]]  ;;  %vm985_vm8 = vcmask 687104   ;;  %vm990_vm9 = vcmask 785408   ;;  %vm995_vm10 = vcmask 883712   ;;  %vm1000_vm11 = vcmask 982016  }
  0x28   :  { %s5171_s22 = sld [smem:[#allocation3 + $0xa]]  ;;  %s5172_s23 = sld [smem:[#allocation3 + $0xb]]  ;;  %vm1005_vm12 = vcmask 31744   ;;  %vm3793_vm13 = vcmask 130048   ;;  %vm3796_vm14 = vcmask 125952   ;;  %vm4002_vm15 = vcmask 523264  }
  0x29   :  { %s5174_s24 = sld [smem:[#allocation3 + $0xd]]  ;;  %s5175_s25 = sld [smem:[#allocation3 + $0xe]] }
  0x2a   :  { %v108_v1 = vstv %s5162_s2  ;;  %v82_v4 = vstv %s5161_s26  ;;  %s5177_s1 = sld [smem:[#allocation3 + $0x10]]  ;;  %s5178_s2 = sld [smem:[#allocation3 + $0x11]] }
  0x2b   :  { %v109_v3 = vmul.f32 %v108_v1, %v6036_v0  ;;  %v83_v5 = vmul.f32 %v82_v4, %v6036_v0  ;;  %v111_v6 = vmul.f32 %v108_v1, %v6041_v2  ;;  %v85_v7 = vmul.f32 %v82_v4, %v6041_v2  ;;  %s5181_s26 = sld [smem:[#allocation3 + $0x13]]  ;;  %s5184_s28 = sld [smem:[#allocation3 + $0x16]] }
  0x2c   :  { %v159_v10 = vstv %s5164_s27  ;;  %v86_v11 = vmul.f32 %v82_v4, %v6052_v8  ;;  %v84_v12 = vmul.f32 %v82_v4, %v6057_v9  ;;  %v191_v17 = vstv %s5165_s13  ;;  %s5182_s27 = sld [smem:[#allocation3 + $0x14]]  ;;  %s5185_s29 = sld [smem:[#allocation3 + $0x17]] }
  0x2d   :  { %117 = vrot.lane.b32.xlu1 %v109_v3, %s11550_s14  ;;  %91 = vrot.lane.b32.xlu0 %v83_v5, %s11561_s15  ;;  %v162_v13 = vmul.f32 %v159_v10, %v6041_v2  ;;  %v163_v14 = vmul.f32 %v159_v10, %v6052_v8  ;;  %v160_v15 = vmul.f32 %v159_v10, %v6036_v0  ;;  %v248_v36 = vstv %s5167_s20  ;;  %s5187_s30 = sld [smem:[#allocation3 + $0x19]]  ;;  %s5188_s12 = sld [smem:[#allocation3 + $0x1a]] }
  0x2e   :  { %v161_v16 = vmul.f32 %v159_v10, %v6057_v9  ;;  %v112_v18 = vmul.f32 %v108_v1, %v6052_v8  ;;  %v110_v19 = vmul.f32 %v108_v1, %v6057_v9  ;;  %v194_v22 = vmul.f32 %v191_v17, %v6041_v2  ;;  %s71_s13 = sld [smem:[#allocation3]]  ;;  %s5163_s17 = sld [smem:[#allocation3 + $0x3]] }
  0x2f   :  { %v171_v20 = vrot.slane %v162_v13, 1  ;;  %v172_v21 = vrot.slane %v163_v14, 1  ;;  %v195_v23 = vmul.f32 %v191_v17, %v6052_v8  ;;  %v168_v24 = vrot.slane %v160_v15, 1  ;;  %s68_s16 = sld [smem:[#allocation6]]  ;;  %s5166_s18 = sld [smem:[#allocation3 + $0x6]] }
  0x30   :  { %v169_v25 = vrot.slane %v161_v16, 1  ;;  %v192_v26 = vmul.f32 %v191_v17, %v6036_v0  ;;  %v193_v27 = vmul.f32 %v191_v17, %v6057_v9  ;;  %v203_v29 = vrot.slane %v194_v22, 1  ;;  %s11578_s19 = smov 12   ;;  %s11576_s20 = smov 24  }
  0x31   :  { %121 = vrot.lane.b32.xlu1 %v111_v6, %s11550_s14  ;;  %95 = vrot.lane.b32.xlu0 %v85_v7, %s11561_s15  ;;  %v173_v28 = vsel %vm143_vm0, %v171_v20, %v172_v21  ;;  %v204_v30 = vrot.slane %v195_v23, 1  ;;  %v251_v37 = vmul.f32 %v248_v36, %v6041_v2  ;;  %v252_v38 = vmul.f32 %v248_v36, %v6052_v8  ;;  %s11944_s11 = smov 106   ;;  %s11947_s10 = smov 107  }
  0x32   :  { %v170_v31 = vsel %vm143_vm0, %v168_v24, %v169_v25  ;;  %v200_v32 = vrot.slane %v192_v26, 1  ;;  %v201_v33 = vrot.slane %v193_v27, 1  ;;  %v249_v39 = vmul.f32 %v248_v36, %v6036_v0  ;;  %s11950_s8 = smov 82   ;;  %s11959_s9 = smov 119  }
  0x33   :  { %v205_v34 = vsel %vm143_vm0, %v203_v29, %v204_v30  ;;  %v250_v40 = vmul.f32 %v248_v36, %v6057_v9  ;;  %v280_v41 = vstv %s5168_s21  ;;  %v260_v42 = vrot.slane %v251_v37, 2  ;;  %s11574_s21 = smov 36   ;;  %s11975_s6 = smov 12  }
  0x34   :  { %v202_v35 = vsel %vm143_vm0, %v200_v32, %v201_v33  ;;  %v261_v43 = vrot.slane %v252_v38, 2  ;;  %v283_v44 = vmul.f32 %v280_v41, %v6041_v2  ;;  %v284_v45 = vmul.f32 %v280_v41, %v6052_v8  ;;  %s11980_s7 = smov 24   ;;  %s11985_s5 = smov 36  }
  0x35   :  { %97 = vrot.lane.b32.xlu1 %v86_v11, %s11561_s15  ;;  %93 = vrot.lane.b32.xlu0 %v84_v12, %s11561_s15  ;;  %v257_v46 = vrot.slane %v249_v39, 2  ;;  %v258_v47 = vrot.slane %v250_v40, 2  ;;  %v281_v48 = vmul.f32 %v280_v41, %v6036_v0  ;;  %v282_v49 = vmul.f32 %v280_v41, %v6057_v9 }
  0x36   :  { %v262_v50 = vsel %vm232_vm1, %v260_v42, %v261_v43  ;;  %v292_v51 = vrot.slane %v283_v44, 2  ;;  %v293_v52 = vrot.slane %v284_v45, 2  ;;  %v329_v58 = vstv %s5171_s22  ;;  %s11556_s22 = smov 11  }
  0x37   :  { %v259_v53 = vsel %vm232_vm1, %v257_v46, %v258_v47  ;;  %v289_v54 = vrot.slane %v281_v48, 2  ;;  %v290_v55 = vrot.slane %v282_v49, 2  ;;  %v332_v59 = vmul.f32 %v329_v58, %v6041_v2 }
  0x38   :  { %v294_v56 = vsel %vm232_vm1, %v292_v51, %v293_v52  ;;  %v330_v60 = vmul.f32 %v329_v58, %v6036_v0  ;;  %v355_v61 = vstv %s5172_s23  ;;  %v405_v1 = vstv %s5174_s24  ;;  %s11558_s23 = smov 48   ;;  %s11565_s24 = smov 23  }
  0x39   :  { %123 = vrot.lane.b32.xlu1 %v112_v18, %s11550_s14  ;;  %119 = vrot.lane.b32.xlu0 %v110_v19, %s11550_s14  ;;  %v291_v57 = vsel %vm232_vm1, %v289_v54, %v290_v55  ;;  %v358_v62 = vmul.f32 %v355_v61, %v6041_v2  ;;  %v356_v63 = vmul.f32 %v355_v61, %v6036_v0  ;;  %v437_v11 = vstv %s5175_s25  ;;  %s11568_s25 = smov 60  }
  0x3a   :  { %v333_v3 = vmul.f32 %v329_v58, %v6052_v8  ;;  %v331_v4 = vmul.f32 %v329_v58, %v6057_v9  ;;  %v408_v5 = vmul.f32 %v405_v1, %v6041_v2  ;;  %v409_v6 = vmul.f32 %v405_v1, %v6052_v8 }
  0x3b   :  { %v406_v7 = vmul.f32 %v405_v1, %v6036_v0  ;;  %v407_v10 = vmul.f32 %v405_v1, %v6057_v9  ;;  %v359_v12 = vmul.f32 %v355_v61, %v6052_v8  ;;  %v357_v13 = vmul.f32 %v355_v61, %v6057_v9 }
  0x3c   :  { %v417_v14 = vrot.slane %v408_v5, 1  ;;  %v418_v15 = vrot.slane %v409_v6, 1  ;;  %v440_v16 = vmul.f32 %v437_v11, %v6041_v2  ;;  %v441_v17 = vmul.f32 %v437_v11, %v6052_v8 }
  0x3d   :  { %178 = vrot.lane.b32.xlu1 %v173_v28, %s11561_s15  ;;  %174 = vrot.lane.b32.xlu0 %v170_v31, %s11561_s15  ;;  %v414_v18 = vrot.slane %v406_v7, 1  ;;  %v415_v19 = vrot.slane %v407_v10, 1  ;;  %v438_v20 = vmul.f32 %v437_v11, %v6036_v0  ;;  %v650_v58 = vstv %s5184_s28  ;;  %s11520_s28 = smov 22  }
  0x3e   :  { %v419_v22 = vsel %vm143_vm0, %v417_v14, %v418_v15  ;;  %v449_v23 = vrot.slane %v440_v16, 1  ;;  %v450_v24 = vrot.slane %v441_v17, 1  ;;  %v653_v61 = vmul.f32 %v650_v58, %v6041_v2 }
  0x3f   :  { %v446_v26 = vrot.slane %v438_v20, 1  ;;  %v652_v1 = vmul.f32 %v650_v58, %v6057_v9 }
  0x40   :  { %v451_v28 = vsel %vm143_vm0, %v449_v23, %v450_v24  ;;  %v662_v6 = vrot.slane %v653_v61, 1 }
  0x41   :  { %210 = vrot.lane.b32.xlu1 %v205_v34, %s11550_s14  ;;  %206 = vrot.lane.b32.xlu0 %v202_v35, %s11550_s14  ;;  %v525_v35 = vstv %s5178_s2  ;;  %s11522_s2 = smov 10  }
  0x42   :  { %v528_v38 = vmul.f32 %v525_v35, %v6041_v2  ;;  %v529_v39 = vmul.f32 %v525_v35, %v6052_v8  ;;  %v526_v42 = vmul.f32 %v525_v35, %v6036_v0 }
  0x44   :  { %v537_v45 = vrot.slane %v528_v38, 2  ;;  %v538_v46 = vrot.slane %v529_v39, 2  ;;  %v534_v48 = vrot.slane %v526_v42, 2 }
  0x45   :  { %180 = vrot.lane.b32.xlu1 %v172_v21, %s11561_s15  ;;  %176 = vrot.lane.b32.xlu0 %v169_v25, %s11561_s15  ;;  %v439_v21 = vmul.f32 %v437_v11, %v6057_v9  ;;  %v416_v25 = vsel %vm143_vm0, %v414_v18, %v415_v19 }
  0x47   :  { %v447_v27 = vrot.slane %v439_v21, 1 }
  0x49   :  { %212 = vrot.lane.b32.xlu1 %v204_v30, %s11550_s14  ;;  %208 = vrot.lane.b32.xlu0 %v201_v33, %s11550_s14  ;;  %v448_v29 = vsel %vm143_vm0, %v446_v26, %v447_v27  ;;  %v493_v30 = vstv %s5177_s1  ;;  %s11572_s1 = smov 35  }
  0x4a   :  { %v496_v31 = vmul.f32 %v493_v30, %v6041_v2  ;;  %v497_v32 = vmul.f32 %v493_v30, %v6052_v8  ;;  %v494_v33 = vmul.f32 %v493_v30, %v6036_v0  ;;  %v495_v34 = vmul.f32 %v493_v30, %v6057_v9 }
  0x4c   :  { %v505_v36 = vrot.slane %v496_v31, 2  ;;  %v506_v37 = vrot.slane %v497_v32, 2  ;;  %v502_v40 = vrot.slane %v494_v33, 2  ;;  %v503_v41 = vrot.slane %v495_v34, 2 }
  0x4d   :  { %267 = vrot.lane.b32.xlu1 %v262_v50, %s11561_s15  ;;  %263 = vrot.lane.b32.xlu0 %v259_v53, %s11561_s15  ;;  %v539_v50 = vsel %vm232_vm1, %v537_v45, %v538_v46  ;;  %v770_v32 = vstv %s5188_s12  ;;  %v6205_v34 = vstv %s71_s13  ;;  %s11528_s12 = smov 34   ;;  %s11544_s13 = smov 96  }
  0x4e   :  { %v507_v44 = vsel %vm232_vm1, %v505_v36, %v506_v37  ;;  %v774_v38 = vmul.f32 %v770_v32, %v6052_v8  ;;  %v771_v42 = vmul.f32 %v770_v32, %v6036_v0 }
  0x51   :  { %299 = vrot.lane.b32.xlu1 %v294_v56, %s11550_s14  ;;  %295 = vrot.lane.b32.xlu0 %v291_v57, %s11550_s14 }
  0x55   :  { %269 = vrot.lane.b32.xlu1 %v261_v43, %s11561_s15  ;;  %265 = vrot.lane.b32.xlu0 %v258_v47, %s11561_s15  ;;  %v527_v43 = vmul.f32 %v525_v35, %v6057_v9  ;;  %v504_v47 = vsel %vm232_vm1, %v502_v40, %v503_v41 }
  0x57   :  { %v535_v49 = vrot.slane %v527_v43, 2  ;;  %v772_v43 = vmul.f32 %v770_v32, %v6057_v9 }
  0x59   :  { %301 = vrot.lane.b32.xlu1 %v293_v52, %s11550_s14  ;;  %297 = vrot.lane.b32.xlu0 %v290_v55, %s11550_s14  ;;  %v536_v51 = vsel %vm232_vm1, %v534_v48, %v535_v49  ;;  %v574_v52 = vstv %s5181_s26  ;;  %v600_v55 = vstv %s5182_s27  ;;  %s11516_s26 = smov 72   ;;  %s11518_s27 = smov 47  }
  0x5a   :  { %v577_v53 = vmul.f32 %v574_v52, %v6041_v2  ;;  %v575_v54 = vmul.f32 %v574_v52, %v6036_v0  ;;  %v603_v56 = vmul.f32 %v600_v55, %v6041_v2  ;;  %v601_v57 = vmul.f32 %v600_v55, %v6036_v0 }
  0x5b   :  { %v602_v5 = vmul.f32 %v600_v55, %v6057_v9 }
  0x5d   :  { %342 = vrot.lane.b32.xlu1 %v332_v59, %s11561_s15  ;;  %338 = vrot.lane.b32.xlu0 %v330_v60, %s11561_s15  ;;  %v578_v59 = vmul.f32 %v574_v52, %v6052_v8  ;;  %v576_v60 = vmul.f32 %v574_v52, %v6057_v9 }
  0x61   :  { %368 = vrot.lane.b32.xlu1 %v358_v62, %s11550_s14  ;;  %364 = vrot.lane.b32.xlu0 %v356_v63, %s11550_s14  ;;  %v654_v62 = vmul.f32 %v650_v58, %v6052_v8  ;;  %v651_v63 = vmul.f32 %v650_v58, %v6036_v0 }
  0x63   :  { %v663_v7 = vrot.slane %v654_v62, 1 }
  0x65   :  { %344 = vrot.lane.b32.xlu1 %v333_v3, %s11561_s15  ;;  %340 = vrot.lane.b32.xlu0 %v331_v4, %s11561_s15  ;;  %v682_v3 = vstv %s5185_s29  ;;  %v604_v4 = vmul.f32 %v600_v55, %v6052_v8  ;;  %v664_v16 = vsel %vm143_vm0, %v662_v6, %v663_v7  ;;  %v780_v55 = vrot.slane %v772_v43, 2  ;;  %s11524_s29 = smov 84  }
  0x66   :  { %v685_v10 = vmul.f32 %v682_v3, %v6041_v2  ;;  %v686_v11 = vmul.f32 %v682_v3, %v6052_v8  ;;  %v683_v14 = vmul.f32 %v682_v3, %v6036_v0 }
  0x68   :  { %v694_v17 = vrot.slane %v685_v10, 1  ;;  %v695_v18 = vrot.slane %v686_v11, 1  ;;  %v691_v20 = vrot.slane %v683_v14, 1 }
  0x69   :  { %370 = vrot.lane.b32.xlu1 %v359_v12, %s11550_s14  ;;  %366 = vrot.lane.b32.xlu0 %v357_v13, %s11550_s14  ;;  %v659_v12 = vrot.slane %v651_v63, 1  ;;  %v660_v13 = vrot.slane %v652_v1, 1 }
  0x6d   :  { %424 = vrot.lane.b32.xlu1 %v419_v22, %s11561_s15  ;;  %420 = vrot.lane.b32.xlu0 %v416_v25, %s11561_s15  ;;  %v696_v22 = vsel %vm143_vm0, %v694_v17, %v695_v18  ;;  %v738_v25 = vstv %s5187_s30  ;;  %s11526_s30 = smov 59  }
  0x6e   :  { %v739_v30 = vmul.f32 %v738_v25, %v6036_v0  ;;  %v6203_v31 = vmul.f32 %v738_v25, %v6057_v9 }
  0x70   :  { %v747_v40 = vrot.slane %v739_v30, 2 }
  0x71   :  { %456 = vrot.lane.b32.xlu1 %v451_v28, %s11550_s14  ;;  %452 = vrot.lane.b32.xlu0 %v448_v29, %s11550_s14  ;;  %v742_v28 = vmul.f32 %v738_v25, %v6052_v8 }
  0x73   :  { %v751_v36 = vrot.slane %v742_v28, 2 }
  0x75   :  { %426 = vrot.lane.b32.xlu1 %v418_v15, %s11561_s15  ;;  %422 = vrot.lane.b32.xlu0 %v415_v19, %s11561_s15  ;;  %v684_v15 = vmul.f32 %v682_v3, %v6057_v9  ;;  %v661_v19 = vsel %vm143_vm0, %v659_v12, %v660_v13 }
  0x77   :  { %v692_v21 = vrot.slane %v684_v15, 1 }
  0x79   :  { %458 = vrot.lane.b32.xlu1 %v450_v24, %s11550_s14  ;;  %454 = vrot.lane.b32.xlu0 %v447_v27, %s11550_s14  ;;  %v693_v24 = vsel %vm143_vm0, %v691_v20, %v692_v21  ;;  %v741_v27 = vmul.f32 %v738_v25, %v6041_v2 }
  0x7b   :  { %v750_v35 = vrot.slane %v741_v27, 2 }
  0x7d   :  { %512 = vrot.lane.b32.xlu1 %v507_v44, %s11561_s15  ;;  %508 = vrot.lane.b32.xlu0 %v504_v47, %s11561_s15  ;;  %v75_v44 = vmul.f32 %v6205_v34, %v6041_v2  ;;  %v6223_v47 = vstv %s68_s16  ;;  %v752_v48 = vsel %vm232_vm1, %v750_v35, %v751_v36  ;;  %s11530_s16 = smov 71  }
  0x81   :  { %544 = vrot.lane.b32.xlu1 %v539_v50, %s11550_s14  ;;  %540 = vrot.lane.b32.xlu0 %v536_v51, %s11550_s14  ;;  %v783_v50 = vrot.slane %v774_v38, 2 }
  0x85   :  { %514 = vrot.lane.b32.xlu1 %v506_v37, %s11561_s15  ;;  %510 = vrot.lane.b32.xlu0 %v503_v41, %s11561_s15  ;;  %v773_v37 = vmul.f32 %v770_v32, %v6041_v2  ;;  %v748_v41 = vrot.slane %v6203_v31, 2 }
  0x87   :  { %v749_v52 = vsel %vm232_vm1, %v747_v40, %v748_v41 }
  0x89   :  { %546 = vrot.lane.b32.xlu1 %v538_v46, %s11550_s14  ;;  %542 = vrot.lane.b32.xlu0 %v535_v49, %s11550_s14  ;;  %v73_v46 = vmul.f32 %v6205_v34, %v6036_v0  ;;  %v782_v49 = vrot.slane %v773_v37, 2  ;;  %v74_v37 = vmul.f32 %v6205_v34, %v6057_v9 }
  0x8b   :  { %v77_v58 = vadd.f32 %v73_v46, %v6223_v47  ;;  %v784_v63 = vsel %vm232_vm1, %v782_v49, %v783_v50 }
  0x8d   :  { %587 = vrot.lane.b32.xlu1 %v577_v53, %s11561_s15  ;;  %583 = vrot.lane.b32.xlu0 %v575_v54, %s11561_s15  ;;  %v134_v53 = vstv %s5163_s17  ;;  %v779_v54 = vrot.slane %v771_v42, 2  ;;  %s11532_s17 = smov 46  }
  0x8e   :  { %v135_v61 = vmul.f32 %v134_v53, %v6036_v0  ;;  %v6242_v62 = vmul.f32 %v134_v53, %v6057_v9 }
  0x8f   :  { %v781_v3 = vsel %vm232_vm1, %v779_v54, %v780_v55 }
  0x90   :  { %v144_v11 = vrot.slane %v135_v61, 1  ;;  %v145_v12 = vrot.slane %v6242_v62, 1 }
  0x91   :  { %613 = vrot.lane.b32.xlu1 %v603_v56, %s11550_s14  ;;  %609 = vrot.lane.b32.xlu0 %v601_v57, %s11550_s14  ;;  %v79_v56 = vadd.f32 %v75_v44, %v6223_v47 }
  0x95   :  { %589 = vrot.lane.b32.xlu1 %v578_v59, %s11561_s15  ;;  %585 = vrot.lane.b32.xlu0 %v576_v60, %s11561_s15  ;;  %v137_v59 = vmul.f32 %v134_v53, %v6041_v2  ;;  %v6237_v60 = vmul.f32 %v134_v53, %v6052_v8 }
  0x97   :  { %v148_v10 = vrot.slane %v6237_v60, 1 }
  0x99   :  { %615 = vrot.lane.b32.xlu1 %v604_v4, %s11550_s14  ;;  %611 = vrot.lane.b32.xlu0 %v602_v5, %s11550_s14 }
  0x9d   :  { %669 = vrot.lane.b32.xlu1 %v664_v16, %s11561_s15  ;;  %665 = vrot.lane.b32.xlu0 %v661_v19, %s11561_s15 }
  0x9f   :  { %v6194_v23 = vpop.permute.xlu1 %117  ;;  %v92_v26 = vpop.permute.xlu0 %91 }
  0xa0   :  { %v103_v6 = vadd.f32 %v92_v26, %v77_v58 }
  0xa1   :  { %701 = vrot.lane.b32.xlu1 %v696_v22, %s11550_s14  ;;  %697 = vrot.lane.b32.xlu0 %v693_v24, %s11550_s14 }
  0xa2   :  { %v129_v17 = vadd.f32 %v6194_v23, %v103_v6 }
  0xa3   :  { %v122_v29 = vpop.permute.xlu1 %121  ;;  %v96_v33 = vpop.permute.xlu0 %95 }
  0xa4   :  { %v105_v4 = vadd.f32 %v96_v33, %v79_v56 }
  0xa5   :  { %671 = vrot.lane.b32.xlu1 %v663_v7, %s11561_s15  ;;  %667 = vrot.lane.b32.xlu0 %v660_v13, %s11561_s15  ;;  %v147_v7 = vrot.slane %v137_v59, 1  ;;  %v223_v13 = vstv %s5166_s18  ;;  %s11534_s18 = smov 108  }
  0xa6   :  { %v131_v15 = vadd.f32 %v122_v29, %v105_v4  ;;  %v226_v19 = vmul.f32 %v223_v13, %v6041_v2  ;;  %v6255_v20 = vmul.f32 %v223_v13, %v6052_v8  ;;  %v224_v22 = vmul.f32 %v223_v13, %v6036_v0 }
  0xa7   :  { %v6211_v39 = vpop.permute.xlu1 %97  ;;  %v6218_v45 = vpop.permute.xlu0 %93  ;;  %v225_v24 = vmul.f32 %v223_v13, %v6057_v9  ;;  %v76_v0 = vmul.f32 %v6205_v34, %v6052_v8 }
  0xa8   :  { %v236_v28 = vrot.slane %v226_v19, 2  ;;  %v237_v2 = vrot.slane %v6255_v20, 2  ;;  %v233_v30 = vrot.slane %v224_v22, 2 }
  0xa9   :  { %703 = vrot.lane.b32.xlu1 %v695_v18, %s11550_s14  ;;  %699 = vrot.lane.b32.xlu0 %v692_v21, %s11550_s14  ;;  %v149_v18 = vsel %vm143_vm0, %v147_v7, %v148_v10  ;;  %v146_v21 = vsel %vm143_vm0, %v144_v11, %v145_v12  ;;  %v234_v31 = vrot.slane %v225_v24, 2  ;;  %v80_v43 = vadd.f32 %v76_v0, %v6223_v47 }
  0xaa   :  { %v156_v26 = vadd.f32 %v149_v18, %v131_v15  ;;  %v154_v27 = vadd.f32 %v146_v21, %v129_v17  ;;  %v238_v40 = vsel %vm232_vm1, %v236_v28, %v237_v2 }
  0xab   :  { %v6227_v51 = vpop.permute.xlu1 %123  ;;  %v6231_v57 = vpop.permute.xlu0 %119  ;;  %v106_v53 = vadd.f32 %v6211_v39, %v80_v43 }
  0xad   :  { %757 = vrot.lane.b32.xlu1 %v752_v48, %s11561_s15  ;;  %753 = vrot.lane.b32.xlu0 %v749_v52, %s11561_s15  ;;  %v78_v48 = vadd.f32 %v74_v37, %v6223_v47  ;;  %v132_v56 = vadd.f32 %v6227_v51, %v106_v53 }
  0xaf   :  { %v179_v1 = vpop.permute.xlu1 %178  ;;  %v175_v5 = vpop.permute.xlu0 %174  ;;  %v104_v34 = vadd.f32 %v6218_v45, %v78_v48  ;;  %v157_v39 = vadd.f32 %v148_v10, %v132_v56 }
  0xb0   :  { %v188_v29 = vadd.f32 %v179_v1, %v156_v26  ;;  %v186_v32 = vadd.f32 %v175_v5, %v154_v27 }
  0xb1   :  { %789 = vrot.lane.b32.xlu1 %v784_v63, %s11550_s14  ;;  %785 = vrot.lane.b32.xlu0 %v781_v3, %s11550_s14  ;;  %v130_v59 = vadd.f32 %v6231_v57, %v104_v34 }
  0xb3   :  { %v211_v14 = vpop.permute.xlu1 %210  ;;  %v207_v16 = vpop.permute.xlu0 %206  ;;  %v155_v45 = vadd.f32 %v145_v12, %v130_v59 }
  0xb4   :  { %v220_v35 = vadd.f32 %v211_v14, %v188_v29  ;;  %v218_v38 = vadd.f32 %v207_v16, %v186_v32 }
  0xb5   :  { %759 = vrot.lane.b32.xlu1 %v751_v36, %s11561_s15  ;;  %755 = vrot.lane.b32.xlu0 %v748_v41, %s11561_s15  ;;  %v235_v41 = vsel %vm232_vm1, %v233_v30, %v234_v31 }
  0xb6   :  { %v245_v44 = vadd.f32 %v238_v40, %v220_v35  ;;  %v243_v49 = vadd.f32 %v235_v41, %v218_v38 }
  0xb7   :  { %v181_v25 = vpop.permute.xlu1 %180  ;;  %v177_v23 = vpop.permute.xlu0 %176 }
  0xb8   :  { %v189_v63 = vadd.f32 %v181_v25, %v157_v39  ;;  %v187_v57 = vadd.f32 %v177_v23, %v155_v45 }
  0xb9   :  { %791 = vrot.lane.b32.xlu1 %v783_v50, %s11550_s14  ;;  %787 = vrot.lane.b32.xlu0 %v780_v55, %s11550_s14 }
  0xbb   :  { %v213_v33 = vpop.permute.xlu1 %212  ;;  %v209_v36 = vpop.permute.xlu0 %208 }
  0xbc   :  { %v221_v1 = vadd.f32 %v213_v33, %v189_v63  ;;  %v219_v3 = vadd.f32 %v209_v36, %v187_v57 }
  0xbe   :  { %v246_v6 = vadd.f32 %v237_v2, %v221_v1  ;;  %v244_v7 = vadd.f32 %v234_v31, %v219_v3 }
  0xbf   :  { %v268_v42 = vpop.permute.xlu1 %267  ;;  %v264_v46 = vpop.permute.xlu0 %263 }
  0xc0   :  { %v277_v50 = vadd.f32 %v268_v42, %v245_v44  ;;  %v275_v8 = vadd.f32 %v264_v46, %v243_v49 }
  0xc3   :  { %v300_v52 = vpop.permute.xlu1 %299  ;;  %v296_v9 = vpop.permute.xlu0 %295 }
  0xc4   :  { %v309_v54 = vadd.f32 %v300_v52, %v277_v50  ;;  %v307_v55 = vadd.f32 %v296_v9, %v275_v8 }
  0xc6   :  { %v6275_v58 = vmax.f32 %v309_v54, 0.0  ;;  %v6278_v60 = vmax.f32 %v307_v55, 0.0 }
  0xc7   :  { %v270_v47 = vpop.permute.xlu1 %269  ;;  %v266_v61 = vpop.permute.xlu0 %265 }
  0xc8   :  { %827 = vrot.lane.b32.xlu1 %v6275_v58, %s11578_s19  ;;  %823 = vrot.lane.b32.xlu0 %v6278_v60, %s11578_s19  ;;  %v278_v11 = vadd.f32 %v270_v47, %v246_v6  ;;  %v276_v13 = vadd.f32 %v266_v61, %v244_v7 }
  0xcb   :  { %v302_v62 = vpop.permute.xlu1 %301  ;;  %v298_v51 = vpop.permute.xlu0 %297 }
  0xcc   :  { %839 = vrot.lane.b32.xlu1 %v6275_v58, %s11576_s20  ;;  %835 = vrot.lane.b32.xlu0 %v6278_v60, %s11576_s20  ;;  %v310_v14 = vadd.f32 %v302_v62, %v278_v11  ;;  %v308_v15 = vadd.f32 %v298_v51, %v276_v13 }
  0xce   :  { %v6312_v18 = vmax.f32 %v310_v14, 0.0  ;;  %v6314_v19 = vmax.f32 %v308_v15, 0.0 }
  0xcf   :  { %v6288_v4 = vpop.permute.xlu1 %342  ;;  %v6290_v5 = vpop.permute.xlu0 %338 }
  0xd0   :  { %851 = vrot.lane.b32.xlu1 %v6275_v58, %s11574_s21  ;;  %847 = vrot.lane.b32.xlu0 %v6278_v60, %s11574_s21 }
  0xd3   :  { %v6296_v10 = vpop.permute.xlu1 %368  ;;  %v6298_v12 = vpop.permute.xlu0 %364 }
  0xd4   :  { %1042 = vrot.lane.b32.xlu1 %v6275_v58, %s11561_s15  ;;  %1038 = vrot.lane.b32.xlu0 %v6278_v60, %s11561_s15 }
  0xd7   :  { %v6304_v16 = vpop.permute.xlu1 %344  ;;  %v6306_v17 = vpop.permute.xlu0 %340 }
  0xd8   :  { %1054 = vrot.lane.b32.xlu1 %v6275_v58, %s11556_s22  ;;  %1050 = vrot.lane.b32.xlu0 %v6278_v60, %s11556_s22 }
  0xdb   :  { %v6316_v20 = vpop.permute.xlu1 %370  ;;  %v6318_v21 = vpop.permute.xlu0 %366 }
  0xdc   :  { %829 = vrot.lane.b32.xlu1 %v6312_v18, %s11578_s19  ;;  %825 = vrot.lane.b32.xlu0 %v6314_v19, %s11578_s19 }
  0xdf   :  { %v6324_v22 = vpop.permute.xlu1 %424  ;;  %v6326_v24 = vpop.permute.xlu0 %420 }
  0xe0   :  { %863 = vrot.lane.b32.xlu1 %v6275_v58, %s11558_s23  ;;  %859 = vrot.lane.b32.xlu0 %v6278_v60, %s11558_s23 }
  0xe3   :  { %v6332_v25 = vpop.permute.xlu1 %456  ;;  %v6334_v26 = vpop.permute.xlu0 %452 }
  0xe4   :  { %1066 = vrot.lane.b32.xlu1 %v6275_v58, %s11565_s24  ;;  %1062 = vrot.lane.b32.xlu0 %v6278_v60, %s11565_s24 }
  0xe7   :  { %v6340_v23 = vpop.permute.xlu1 %426  ;;  %v6342_v27 = vpop.permute.xlu0 %422 }
  0xe8   :  { %841 = vrot.lane.b32.xlu1 %v6312_v18, %s11576_s20  ;;  %837 = vrot.lane.b32.xlu0 %v6314_v19, %s11576_s20 }
  0xeb   :  { %v6348_v28 = vpop.permute.xlu1 %458  ;;  %v6350_v2 = vpop.permute.xlu0 %454 }
  0xec   :  { %875 = vrot.lane.b32.xlu1 %v6275_v58, %s11568_s25  ;;  %871 = vrot.lane.b32.xlu0 %v6278_v60, %s11568_s25 }
  0xef   :  { %v6356_v29 = vpop.permute.xlu1 %512  ;;  %v6358_v30 = vpop.permute.xlu0 %508 }
  0xf0   :  { %1078 = vrot.lane.b32.xlu1 %v6275_v58, %s11572_s1  ;;  %1074 = vrot.lane.b32.xlu0 %v6278_v60, %s11572_s1 }
  0xf3   :  { %v6364_v31 = vpop.permute.xlu1 %544  ;;  %v6366_v32 = vpop.permute.xlu0 %540 }
  0xf4   :  { %1259 = vrot.lane.b32.xlu1 %v6275_v58, %s11550_s14  ;;  %1255 = vrot.lane.b32.xlu0 %v6278_v60, %s11550_s14 }
  0xf7   :  { %v6372_v33 = vpop.permute.xlu1 %514  ;;  %v6374_v0 = vpop.permute.xlu0 %510 }
  0xf8   :  { %1271 = vrot.lane.b32.xlu1 %v6275_v58, %s11522_s2  ;;  %1267 = vrot.lane.b32.xlu0 %v6278_v60, %s11522_s2 }
  0xfb   :  { %v6380_v35 = vpop.permute.xlu1 %546  ;;  %v6382_v36 = vpop.permute.xlu0 %542 }
  0xfc   :  { %853 = vrot.lane.b32.xlu1 %v6312_v18, %s11574_s21  ;;  %849 = vrot.lane.b32.xlu0 %v6314_v19, %s11574_s21 }
  0xff   :  { %v6388_v37 = vpop.permute.xlu1 %587  ;;  %v6390_v38 = vpop.permute.xlu0 %583 }
 0x100   :  { %887 = vrot.lane.b32.xlu1 %v6275_v58, %s11516_s26  ;;  %883 = vrot.lane.b32.xlu0 %v6278_v60, %s11516_s26 }
 0x103   :  { %v6396_v40 = vpop.permute.xlu1 %613  ;;  %v6398_v41 = vpop.permute.xlu0 %609 }
 0x104   :  { %1044 = vrot.lane.b32.xlu1 %v6312_v18, %s11561_s15  ;;  %1040 = vrot.lane.b32.xlu0 %v6314_v19, %s11561_s15 }
 0x107   :  { %v6404_v42 = vpop.permute.xlu1 %589  ;;  %v6406_v43 = vpop.permute.xlu0 %585 }
 0x108   :  { %1056 = vrot.lane.b32.xlu1 %v6312_v18, %s11556_s22  ;;  %1052 = vrot.lane.b32.xlu0 %v6314_v19, %s11556_s22 }
 0x10b   :  { %v6412_v44 = vpop.permute.xlu1 %615  ;;  %v6414_v46 = vpop.permute.xlu0 %611 }
 0x10c   :  { %1090 = vrot.lane.b32.xlu1 %v6275_v58, %s11518_s27  ;;  %1086 = vrot.lane.b32.xlu0 %v6278_v60, %s11518_s27 }
 0x10f   :  { %v6420_v48 = vpop.permute.xlu1 %669  ;;  %v6422_v49 = vpop.permute.xlu0 %665 }
 0x110   :  { %1283 = vrot.lane.b32.xlu1 %v6275_v58, %s11520_s28  ;;  %1279 = vrot.lane.b32.xlu0 %v6278_v60, %s11520_s28 }
 0x113   :  { %v6428_v50 = vpop.permute.xlu1 %701  ;;  %v6430_v8 = vpop.permute.xlu0 %697 }
 0x114   :  { %865 = vrot.lane.b32.xlu1 %v6312_v18, %s11558_s23  ;;  %861 = vrot.lane.b32.xlu0 %v6314_v19, %s11558_s23 }
 0x117   :  { %v6436_v52 = vpop.permute.xlu1 %671  ;;  %v6440_v53 = vpop.permute.xlu0 %667 }
 0x118   :  { %11729 = vst [vmem:[#allocation12_spill] sm:$0xff] %v6436_v52  ;;  %899 = vrot.lane.b32.xlu1 %v6275_v58, %s11524_s29  ;;  %11730 = vst [vmem:[#allocation13_spill] sm:$0xff] %v6440_v53  ;;  %895 = vrot.lane.b32.xlu0 %v6278_v60, %s11524_s29 }
 0x11b   :  { %v6448_v54 = vpop.permute.xlu1 %703  ;;  %v6450_v9 = vpop.permute.xlu0 %699 }
 0x11c   :  { %1068 = vrot.lane.b32.xlu1 %v6312_v18, %s11565_s24  ;;  %1064 = vrot.lane.b32.xlu0 %v6314_v19, %s11565_s24  ;;  %11731 = vst [vmem:[#allocation14_spill] sm:$0xff] %v6448_v54  ;;  %11732 = vst [vmem:[#allocation15_spill] sm:$0xff] %v6450_v9 }
 0x11f   :  { %v6456_v34 = vpop.permute.xlu1 %757  ;;  %v6460_v55 = vpop.permute.xlu0 %753 }
 0x120   :  { %1102 = vrot.lane.b32.xlu1 %v6275_v58, %s11526_s30  ;;  %1098 = vrot.lane.b32.xlu0 %v6278_v60, %s11526_s30 }
 0x123   :  { %v6468_v56 = vpop.permute.xlu1 %789  ;;  %v6470_v59 = vpop.permute.xlu0 %785 }
 0x124   :  { %1295 = vrot.lane.b32.xlu1 %v6275_v58, %s11528_s12  ;;  %1291 = vrot.lane.b32.xlu0 %v6278_v60, %s11528_s12 }
 0x127   :  { %v6476_v47 = vpop.permute.xlu1 %759  ;;  %v6480_v61 = vpop.permute.xlu0 %755 }
 0x128   :  { %877 = vrot.lane.b32.xlu1 %v6312_v18, %s11568_s25  ;;  %873 = vrot.lane.b32.xlu0 %v6314_v19, %s11568_s25  ;;  %11733 = vst [vmem:[#allocation16_spill] sm:$0xff] %v6476_v47  ;;  %11734 = vst [vmem:[#allocation17_spill] sm:$0xff] %v6480_v61 }
 0x12b   :  { %v6488_v39 = vpop.permute.xlu1 %791  ;;  %v6490_v45 = vpop.permute.xlu0 %787 }
 0x12c   :  { %911 = vrot.lane.b32.xlu1 %v6275_v58, %s11544_s13  ;;  %907 = vrot.lane.b32.xlu0 %v6278_v60, %s11544_s13  ;;  %11735 = vst [vmem:[#allocation18_spill] sm:$0xff] %v6488_v39  ;;  %11736 = vst [vmem:[#allocation19_spill] sm:$0xff] %v6490_v45  ;;  %v6782_v45 = vld [vmem:[%s11504_s0 + $0x18] sm:$0xff] }
 0x130   :  { %1080 = vrot.lane.b32.xlu1 %v6312_v18, %s11572_s1  ;;  %1076 = vrot.lane.b32.xlu0 %v6314_v19, %s11572_s1 }
 0x134   :  { %1114 = vrot.lane.b32.xlu1 %v6275_v58, %s11530_s16  ;;  %1110 = vrot.lane.b32.xlu0 %v6278_v60, %s11530_s16 }
 0x138   :  { %1261 = vrot.lane.b32.xlu1 %v6312_v18, %s11550_s14  ;;  %1257 = vrot.lane.b32.xlu0 %v6314_v19, %s11550_s14  ;;  %s11829_s14 = smov 126  }
 0x13a   :  { %v6496_v62 = vpop.permute.xlu1 %827  ;;  %v6498_v63 = vpop.permute.xlu0 %823 }
 0x13b   :  { %11737 = vst [vmem:[#allocation20_spill] sm:$0xff] %v6496_v62  ;;  %11738 = vst [vmem:[#allocation21_spill] sm:$0xff] %v6498_v63 }
 0x13c   :  { %1273 = vrot.lane.b32.xlu1 %v6312_v18, %s11522_s2  ;;  %1269 = vrot.lane.b32.xlu0 %v6314_v19, %s11522_s2  ;;  %s11540_s2 = smov 4  }
 0x13e   :  { %v6504_v51 = vpop.permute.xlu1 %839  ;;  %v6506_v57 = vpop.permute.xlu0 %835 }
 0x13f   :  { %11739 = vst [vmem:[#allocation22_spill] sm:$0xff] %v6504_v51  ;;  %11740 = vst [vmem:[#allocation23_spill] sm:$0xff] %v6506_v57 }
 0x140   :  { %1307 = vrot.lane.b32.xlu1 %v6275_v58, %s11532_s17  ;;  %1303 = vrot.lane.b32.xlu0 %v6278_v60, %s11532_s17 }
 0x142   :  { %v6512_v1 = vpop.permute.xlu1 %851  ;;  %v6514_v3 = vpop.permute.xlu0 %847 }
 0x143   :  { %11741 = vst [vmem:[#allocation24_spill] sm:$0xff] %v6512_v1  ;;  %11742 = vst [vmem:[#allocation25_spill] sm:$0xff] %v6514_v3 }
 0x144   :  { %889 = vrot.lane.b32.xlu1 %v6312_v18, %s11516_s26  ;;  %885 = vrot.lane.b32.xlu0 %v6314_v19, %s11516_s26  ;;  %s11536_s26 = smov 83  }
 0x146   :  { %v6520_v6 = vpop.permute.xlu1 %1042  ;;  %v6522_v7 = vpop.permute.xlu0 %1038 }
 0x147   :  { %11743 = vst [vmem:[#allocation26_spill] sm:$0xff] %v6520_v6  ;;  %11744 = vst [vmem:[#allocation27_spill] sm:$0xff] %v6522_v7 }
 0x148   :  { %923 = vrot.lane.b32.xlu1 %v6275_v58, %s11534_s18  ;;  %919 = vrot.lane.b32.xlu0 %v6278_v60, %s11534_s18 }
 0x14a   :  { %v6528_v11 = vpop.permute.xlu1 %1054  ;;  %v6530_v13 = vpop.permute.xlu0 %1050 }
 0x14b   :  { %11745 = vst [vmem:[#allocation28_spill] sm:$0xff] %v6528_v11  ;;  %11746 = vst [vmem:[#allocation29_spill] sm:$0xff] %v6530_v13 }
 0x14c   :  { %1092 = vrot.lane.b32.xlu1 %v6312_v18, %s11518_s27  ;;  %1088 = vrot.lane.b32.xlu0 %v6314_v19, %s11518_s27  ;;  %s11542_s27 = smov 58  }
 0x14e   :  { %v6536_v14 = vpop.permute.xlu1 %829  ;;  %v6538_v15 = vpop.permute.xlu0 %825 }
 0x14f   :  { %11747 = vst [vmem:[#allocation30_spill] sm:$0xff] %v6536_v14  ;;  %11748 = vst [vmem:[#allocation31_spill] sm:$0xff] %v6538_v15 }
 0x150   :  { %1126 = vrot.lane.b32.xlu1 %v6275_v58, %s11536_s26  ;;  %1122 = vrot.lane.b32.xlu0 %v6278_v60, %s11536_s26 }
 0x152   :  { %v6544_v7 = vpop.permute.xlu1 %863  ;;  %v6546_v13 = vpop.permute.xlu0 %859 }
 0x153   :  { %11749 = vst [vmem:[#allocation32_spill] sm:$0xff] %v6544_v7  ;;  %11750 = vst [vmem:[#allocation33_spill] sm:$0xff] %v6546_v13 }
 0x154   :  { %1285 = vrot.lane.b32.xlu1 %v6312_v18, %s11520_s28  ;;  %1281 = vrot.lane.b32.xlu0 %v6314_v19, %s11520_s28  ;;  %s11538_s28 = smov 120  }
 0x156   :  { %v6552_v14 = vpop.permute.xlu1 %1066  ;;  %v6554_v15 = vpop.permute.xlu0 %1062 }
 0x157   :  { %11751 = vst [vmem:[#allocation34_spill] sm:$0xff] %v6552_v14  ;;  %11752 = vst [vmem:[#allocation35_spill] sm:$0xff] %v6554_v15 }
 0x158   :  { %1319 = vrot.lane.b32.xlu1 %v6275_v58, %s11542_s27  ;;  %1315 = vrot.lane.b32.xlu0 %v6278_v60, %s11542_s27 }
 0x15a   :  { %v6560_v7 = vpop.permute.xlu1 %841  ;;  %v6562_v13 = vpop.permute.xlu0 %837 }
 0x15b   :  { %11753 = vst [vmem:[#allocation36_spill] sm:$0xff] %v6560_v7  ;;  %11754 = vst [vmem:[#allocation37_spill] sm:$0xff] %v6562_v13 }
 0x15c   :  { %901 = vrot.lane.b32.xlu1 %v6312_v18, %s11524_s29  ;;  %897 = vrot.lane.b32.xlu0 %v6314_v19, %s11524_s29  ;;  %s11548_s29 = smov 95  }
 0x15e   :  { %v6568_v14 = vpop.permute.xlu1 %875  ;;  %v6570_v15 = vpop.permute.xlu0 %871 }
 0x15f   :  { %11755 = vst [vmem:[#allocation38_spill] sm:$0xff] %v6568_v14  ;;  %11756 = vst [vmem:[#allocation39_spill] sm:$0xff] %v6570_v15 }
 0x160   :  { %935 = vrot.lane.b32.xlu1 %v6275_v58, %s11538_s28  ;;  %931 = vrot.lane.b32.xlu0 %v6278_v60, %s11538_s28 }
 0x162   :  { %v6576_v7 = vpop.permute.xlu1 %1078  ;;  %v6578_v13 = vpop.permute.xlu0 %1074 }
 0x163   :  { %11757 = vst [vmem:[#allocation40_spill] sm:$0xff] %v6576_v7  ;;  %11758 = vst [vmem:[#allocation41_spill] sm:$0xff] %v6578_v13 }
 0x164   :  { %947 = vrot.lane.b32.xlu1 %v6275_v58, %s11540_s2  ;;  %943 = vrot.lane.b32.xlu0 %v6278_v60, %s11540_s2 }
 0x166   :  { %v6584_v14 = vpop.permute.xlu1 %1259  ;;  %v6586_v15 = vpop.permute.xlu0 %1255 }
 0x167   :  { %11759 = vst [vmem:[#allocation42_spill] sm:$0xff] %v6584_v14  ;;  %11760 = vst [vmem:[#allocation43_spill] sm:$0xff] %v6586_v15 }
 0x168   :  { %1104 = vrot.lane.b32.xlu1 %v6312_v18, %s11526_s30  ;;  %1100 = vrot.lane.b32.xlu0 %v6314_v19, %s11526_s30  ;;  %s11546_s30 = smov 70  }
 0x16a   :  { %v6592_v7 = vpop.permute.xlu1 %1271  ;;  %v6594_v13 = vpop.permute.xlu0 %1267 }
 0x16b   :  { %11761 = vst [vmem:[#allocation44_spill] sm:$0xff] %v6592_v7  ;;  %11762 = vst [vmem:[#allocation45_spill] sm:$0xff] %v6594_v13 }
 0x16c   :  { %1138 = vrot.lane.b32.xlu1 %v6275_v58, %s11548_s29  ;;  %1134 = vrot.lane.b32.xlu0 %v6278_v60, %s11548_s29 }
 0x16e   :  { %v6600_v14 = vpop.permute.xlu1 %853  ;;  %v6602_v15 = vpop.permute.xlu0 %849 }
 0x16f   :  { %11763 = vst [vmem:[#allocation46_spill] sm:$0xff] %v6600_v14  ;;  %11764 = vst [vmem:[#allocation47_spill] sm:$0xff] %v6602_v15 }
 0x170   :  { %1297 = vrot.lane.b32.xlu1 %v6312_v18, %s11528_s12  ;;  %1293 = vrot.lane.b32.xlu0 %v6314_v19, %s11528_s12  ;;  %s11594_s12 = smov 107  }
 0x172   :  { %v6608_v7 = vpop.permute.xlu1 %887  ;;  %v6610_v13 = vpop.permute.xlu0 %883 }
 0x173   :  { %11765 = vst [vmem:[#allocation48_spill] sm:$0xff] %v6608_v7  ;;  %11766 = vst [vmem:[#allocation49_spill] sm:$0xff] %v6610_v13 }
 0x174   :  { %1331 = vrot.lane.b32.xlu1 %v6275_v58, %s11546_s30  ;;  %1327 = vrot.lane.b32.xlu0 %v6278_v60, %s11546_s30 }
 0x176   :  { %v6616_v14 = vpop.permute.xlu1 %1044  ;;  %v6618_v15 = vpop.permute.xlu0 %1040 }
 0x177   :  { %11767 = vst [vmem:[#allocation50_spill] sm:$0xff] %v6616_v14  ;;  %11768 = vst [vmem:[#allocation51_spill] sm:$0xff] %v6618_v15 }
 0x178   :  { %913 = vrot.lane.b32.xlu1 %v6312_v18, %s11544_s13  ;;  %909 = vrot.lane.b32.xlu0 %v6314_v19, %s11544_s13  ;;  %s11584_s13 = smov 106  }
 0x17a   :  { %v6624_v7 = vpop.permute.xlu1 %1056  ;;  %v6626_v13 = vpop.permute.xlu0 %1052 }
 0x17b   :  { %11769 = vst [vmem:[#allocation52_spill] sm:$0xff] %v6624_v7  ;;  %11770 = vst [vmem:[#allocation53_spill] sm:$0xff] %v6626_v13 }
 0x17c   :  { %1116 = vrot.lane.b32.xlu1 %v6312_v18, %s11530_s16  ;;  %1112 = vrot.lane.b32.xlu0 %v6314_v19, %s11530_s16  ;;  %s11592_s16 = smov 82  }
 0x17e   :  { %v6632_v6 = vpop.permute.xlu1 %1090  ;;  %v6634_v14 = vpop.permute.xlu0 %1086 }
 0x17f   :  { %11771 = vst [vmem:[#allocation54_spill] sm:$0xff] %v6632_v6  ;;  %11772 = vst [vmem:[#allocation55_spill] sm:$0xff] %v6634_v14 }
 0x180   :  { %1150 = vrot.lane.b32.xlu1 %v6275_v58, %s11594_s12  ;;  %1146 = vrot.lane.b32.xlu0 %v6278_v60, %s11594_s12 }
 0x182   :  { %v6640_v15 = vpop.permute.xlu1 %1283  ;;  %v6642_v13 = vpop.permute.xlu0 %1279 }
 0x183   :  { %11773 = vst [vmem:[#allocation56_spill] sm:$0xff] %v6640_v15  ;;  %11774 = vst [vmem:[#allocation57_spill] sm:$0xff] %v6642_v13 }
 0x184   :  { %1309 = vrot.lane.b32.xlu1 %v6312_v18, %s11532_s17  ;;  %1305 = vrot.lane.b32.xlu0 %v6314_v19, %s11532_s17  ;;  %s11588_s17 = smov 119  }
 0x186   :  { %v6648_v6 = vpop.permute.xlu1 %865  ;;  %v6650_v14 = vpop.permute.xlu0 %861 }
 0x187   :  { %11775 = vst [vmem:[#allocation58_spill] sm:$0xff] %v6648_v6  ;;  %11776 = vst [vmem:[#allocation59_spill] sm:$0xff] %v6650_v14 }
 0x188   :  { %1343 = vrot.lane.b32.xlu1 %v6275_v58, %s11592_s16  ;;  %1339 = vrot.lane.b32.xlu0 %v6278_v60, %s11592_s16 }
 0x18a   :  { %v6656_v15 = vpop.permute.xlu1 %899  ;;  %v6658_v13 = vpop.permute.xlu0 %895 }
 0x18b   :  { %11777 = vst [vmem:[#allocation60_spill] sm:$0xff] %v6656_v15  ;;  %11778 = vst [vmem:[#allocation61_spill] sm:$0xff] %v6658_v13 }
 0x18c   :  { %925 = vrot.lane.b32.xlu1 %v6312_v18, %s11534_s18  ;;  %921 = vrot.lane.b32.xlu0 %v6314_v19, %s11534_s18  ;;  %s11590_s18 = smov 3  }
 0x18e   :  { %v6664_v6 = vpop.permute.xlu1 %1068  ;;  %v6666_v14 = vpop.permute.xlu0 %1064 }
 0x18f   :  { %11779 = vst [vmem:[#allocation62_spill] sm:$0xff] %v6664_v6  ;;  %11780 = vst [vmem:[#allocation63_spill] sm:$0xff] %v6666_v14 }
 0x190   :  { %1128 = vrot.lane.b32.xlu1 %v6312_v18, %s11536_s26  ;;  %1124 = vrot.lane.b32.xlu0 %v6314_v19, %s11536_s26  ;;  %s11586_s26 = smov 94  }
 0x192   :  { %v6672_v7 = vpop.permute.xlu1 %1102  ;;  %v6674_v15 = vpop.permute.xlu0 %1098 }
 0x193   :  { %11781 = vst [vmem:[#allocation64_spill] sm:$0xff] %v6672_v7  ;;  %11782 = vst [vmem:[#allocation65_spill] sm:$0xff] %v6674_v15 }
 0x194   :  { %1162 = vrot.lane.b32.xlu1 %v6275_v58, %s11588_s17  ;;  %1158 = vrot.lane.b32.xlu0 %v6278_v60, %s11588_s17 }
 0x196   :  { %v6680_v6 = vpop.permute.xlu1 %1295  ;;  %v6682_v14 = vpop.permute.xlu0 %1291 }
 0x197   :  { %11783 = vst [vmem:[#allocation66_spill] sm:$0xff] %v6680_v6  ;;  %11784 = vst [vmem:[#allocation67_spill] sm:$0xff] %v6682_v14 }
 0x198   :  { %1174 = vrot.lane.b32.xlu1 %v6275_v58, %s11590_s18  ;;  %1170 = vrot.lane.b32.xlu0 %v6278_v60, %s11590_s18 }
 0x19a   :  { %v6688_v7 = vpop.permute.xlu1 %877  ;;  %v6690_v15 = vpop.permute.xlu0 %873 }
 0x19b   :  { %11785 = vst [vmem:[#allocation68_spill] sm:$0xff] %v6688_v7  ;;  %11786 = vst [vmem:[#allocation69_spill] sm:$0xff] %v6690_v15 }
 0x19c   :  { %1321 = vrot.lane.b32.xlu1 %v6312_v18, %s11542_s27  ;;  %1317 = vrot.lane.b32.xlu0 %v6314_v19, %s11542_s27  ;;  %s5173_s27 = sld [smem:[#allocation3 + $0xc]] }
 0x19e   :  { %v6696_v6 = vpop.permute.xlu1 %911  ;;  %v6698_v14 = vpop.permute.xlu0 %907 }
 0x19f   :  { %11787 = vst [vmem:[#allocation70_spill] sm:$0xff] %v6696_v6  ;;  %11788 = vst [vmem:[#allocation71_spill] sm:$0xff] %v6698_v14 }
 0x1a0   :  { %1355 = vrot.lane.b32.xlu1 %v6275_v58, %s11586_s26  ;;  %1351 = vrot.lane.b32.xlu0 %v6278_v60, %s11586_s26 }
 0x1a2   :  { %v6704_v7 = vpop.permute.xlu1 %1080  ;;  %v6706_v15 = vpop.permute.xlu0 %1076  ;;  %v381_v57 = vstv %s5173_s27  ;;  %s11837_s27 = smov 72  }
 0x1a3   :  { %11789 = vst [vmem:[#allocation72_spill] sm:$0xff] %v6704_v7  ;;  %11790 = vst [vmem:[#allocation73_spill] sm:$0xff] %v6706_v15 }
 0x1a4   :  { %937 = vrot.lane.b32.xlu1 %v6312_v18, %s11538_s28  ;;  %933 = vrot.lane.b32.xlu0 %v6314_v19, %s11538_s28  ;;  %s5170_s28 = sld [smem:[#allocation3 + $0x9]] }
 0x1a6   :  { %v6712_v6 = vpop.permute.xlu1 %1114  ;;  %v6714_v14 = vpop.permute.xlu0 %1110 }
 0x1a7   :  { %11791 = vst [vmem:[#allocation74_spill] sm:$0xff] %v6712_v6  ;;  %11792 = vst [vmem:[#allocation75_spill] sm:$0xff] %v6714_v14 }
 0x1a8   :  { %949 = vrot.lane.b32.xlu1 %v6312_v18, %s11540_s2  ;;  %945 = vrot.lane.b32.xlu0 %v6314_v19, %s11540_s2  ;;  %s5169_s2 = sld [smem:[#allocation6 + $0x1]] }
 0x1aa   :  { %v6720_v13 = vpop.permute.xlu1 %1261  ;;  %v6722_v7 = vpop.permute.xlu0 %1257 }
 0x1ab   :  { %11793 = vst [vmem:[#allocation76_spill] sm:$0xff] %v6720_v13  ;;  %11794 = vst [vmem:[#allocation77_spill] sm:$0xff] %v6722_v7 }
 0x1ac   :  { %1140 = vrot.lane.b32.xlu1 %v6312_v18, %s11548_s29  ;;  %1136 = vrot.lane.b32.xlu0 %v6314_v19, %s11548_s29  ;;  %s11844_s29 = smov 47  }
 0x1ae   :  { %v6728_v15 = vpop.permute.xlu1 %1273  ;;  %v6730_v14 = vpop.permute.xlu0 %1269  ;;  %v6760_v3 = vstv %s5169_s2  ;;  %s11832_s2 = smov 10  }
 0x1af   :  { %11795 = vst [vmem:[#allocation78_spill] sm:$0xff] %v6728_v15  ;;  %11796 = vst [vmem:[#allocation79_spill] sm:$0xff] %v6730_v14  ;;  %v319_v15 = vstv %s5170_s28  ;;  %s11582_s28 = smov 118  }
 0x1b0   :  { %1333 = vrot.lane.b32.xlu1 %v6312_v18, %s11546_s30  ;;  %1329 = vrot.lane.b32.xlu0 %v6314_v19, %s11546_s30  ;;  %s5176_s30 = sld [smem:[#allocation3 + $0xf]] }
 0x1b2   :  { %v6736_v13 = vpop.permute.xlu1 %1307  ;;  %v6738_v7 = vpop.permute.xlu0 %1303 }
 0x1b3   :  { %11797 = vst [vmem:[#allocation80_spill] sm:$0xff] %v6736_v13  ;;  %11798 = vst [vmem:[#allocation81_spill] sm:$0xff] %v6738_v7  ;;  %v6755_v7 = vld [vmem:[%s11504_s0 + $0x10] sm:$0xff] }
 0x1b4   :  { %1367 = vrot.lane.b32.xlu1 %v6275_v58, %s11584_s13  ;;  %1363 = vrot.lane.b32.xlu0 %v6278_v60, %s11584_s13  ;;  %v322_v13 = vmul.f32 %v6755_v7, %v319_v15  ;;  %v384_v62 = vmul.f32 %v6755_v7, %v381_v57 }
 0x1b6   :  { %v6744_v14 = vpop.permute.xlu1 %889  ;;  %v6746_v6 = vpop.permute.xlu0 %885  ;;  %v393_v9 = vrot.slane %v384_v62, 1 }
 0x1b7   :  { %11799 = vst [vmem:[#allocation82_spill] sm:$0xff] %v6744_v14  ;;  %11800 = vst [vmem:[#allocation83_spill] sm:$0xff] %v6746_v6  ;;  %v6765_v6 = vld [vmem:[%s11504_s0] sm:$0xff] }
 0x1b8   :  { %1152 = vrot.lane.b32.xlu1 %v6312_v18, %s11594_s12  ;;  %1148 = vrot.lane.b32.xlu0 %v6314_v19, %s11594_s12  ;;  %v320_v14 = vmul.f32 %v6765_v6, %v319_v15  ;;  %v382_v61 = vmul.f32 %v6765_v6, %v381_v57 }
 0x1ba   :  { %v6758_v11 = vpop.permute.xlu1 %923  ;;  %v6768_v1 = vpop.permute.xlu0 %919  ;;  %v324_v63 = vadd.f32 %v320_v14, %v6760_v3 }
 0x1bb   :  { %11801 = vst [vmem:[#allocation84_spill] sm:$0xff] %v6758_v11  ;;  %11802 = vst [vmem:[#allocation85_spill] sm:$0xff] %v6768_v1  ;;  %v326_v11 = vadd.f32 %v322_v13, %v6760_v3  ;;  %v6785_v1 = vmul.f32 %v6782_v45, %v381_v57  ;;  %v6793_v13 = vld [vmem:[%s11504_s0 + $0x8] sm:$0xff]  ;;  %s11580_s0 = smov 2  }
 0x1bc   :  { %1345 = vrot.lane.b32.xlu1 %v6312_v18, %s11592_s16  ;;  %1341 = vrot.lane.b32.xlu0 %v6314_v19, %s11592_s16  ;;  %v6796_v14 = vmul.f32 %v6793_v13, %v381_v57  ;;  %v350_v47 = vadd.f32 %v6290_v5, %v324_v63  ;;  %v390_v57 = vrot.slane %v382_v61, 1 }
 0x1bd   :  { %v11552_v54 = vrot.slane %v6785_v1, 1 }
 0x1be   :  { %v6775_v51 = vpop.permute.xlu1 %1092  ;;  %v6787_v39 = vpop.permute.xlu0 %1088  ;;  %v11553_v52 = vrot.slane %v6796_v14, 1  ;;  %v376_v5 = vadd.f32 %v6298_v12, %v350_v47 }
 0x1bf   :  { %11803 = vst [vmem:[#allocation86_spill] sm:$0xff] %v6775_v51  ;;  %11804 = vst [vmem:[#allocation87_spill] sm:$0xff] %v6787_v39  ;;  %v352_v39 = vadd.f32 %v6288_v4, %v326_v11  ;;  %v395_v62 = vsel %vm143_vm0, %v393_v9, %v11552_v54 }
 0x1c0   :  { %1379 = vrot.lane.b32.xlu1 %v6275_v58, %s11582_s28  ;;  %1375 = vrot.lane.b32.xlu0 %v6278_v60, %s11582_s28  ;;  %v392_v63 = vsel %vm143_vm0, %v390_v57, %v11553_v52 }
 0x1c1   :  { %v378_v4 = vadd.f32 %v6296_v10, %v352_v39  ;;  %v400_v12 = vadd.f32 %v392_v63, %v376_v5  ;;  %v321_v63 = vmul.f32 %v6793_v13, %v319_v15 }
 0x1c2   :  { %v6803_v51 = vpop.permute.xlu1 %1126  ;;  %v6807_v53 = vpop.permute.xlu0 %1122 }
 0x1c3   :  { %11805 = vst [vmem:[#allocation88_spill] sm:$0xff] %v6803_v51  ;;  %11806 = vst [vmem:[#allocation89_spill] sm:$0xff] %v6807_v53  ;;  %v469_v53 = vstv %s5176_s30  ;;  %v402_v10 = vadd.f32 %v395_v62, %v378_v4  ;;  %v323_v4 = vmul.f32 %v6782_v45, %v319_v15  ;;  %s11847_s30 = smov 22  }
 0x1c4   :  { %1391 = vrot.lane.b32.xlu1 %v6275_v58, %s11580_s0  ;;  %1387 = vrot.lane.b32.xlu0 %v6278_v60, %s11580_s0  ;;  %v472_v47 = vmul.f32 %v6755_v7, %v469_v53  ;;  %v6834_v9 = vmul.f32 %v6782_v45, %v469_v53  ;;  %v470_v57 = vmul.f32 %v6765_v6, %v469_v53 }
 0x1c5   :  { %v6840_v52 = vmul.f32 %v6793_v13, %v469_v53  ;;  %v434_v5 = vadd.f32 %v6324_v22, %v402_v10  ;;  %v327_v22 = vadd.f32 %v323_v4, %v6760_v3 }
 0x1c6   :  { %v6815_v11 = vpop.permute.xlu1 %1285  ;;  %v6821_v61 = vpop.permute.xlu0 %1281  ;;  %v482_v53 = vrot.slane %v6834_v9, 2 }
 0x1c7   :  { %11807 = vst [vmem:[#allocation90_spill] sm:$0xff] %v6815_v11  ;;  %11808 = vst [vmem:[#allocation91_spill] sm:$0xff] %v6821_v61  ;;  %v478_v11 = vrot.slane %v470_v57, 2  ;;  %v479_v51 = vrot.slane %v6840_v52, 2  ;;  %v466_v15 = vadd.f32 %v6332_v25, %v434_v5  ;;  %v353_v25 = vadd.f32 %v6304_v16, %v327_v22 }
 0x1c8   :  { %1164 = vrot.lane.b32.xlu1 %v6312_v18, %s11588_s17  ;;  %1160 = vrot.lane.b32.xlu0 %v6314_v19, %s11588_s17 }
 0x1c9   :  { %v480_v52 = vsel %vm232_vm1, %v478_v11, %v479_v51  ;;  %v379_v16 = vadd.f32 %v6316_v20, %v353_v25 }
 0x1ca   :  { %v6830_v39 = vpop.permute.xlu1 %1319  ;;  %v6836_v54 = vpop.permute.xlu0 %1315 }
 0x1cb   :  { %11809 = vst [vmem:[#allocation92_spill] sm:$0xff] %v6830_v39  ;;  %11810 = vst [vmem:[#allocation93_spill] sm:$0xff] %v6836_v54  ;;  %v432_v54 = vadd.f32 %v6326_v24, %v400_v12  ;;  %v481_v39 = vrot.slane %v472_v47, 2  ;;  %v325_v24 = vadd.f32 %v321_v63, %v6760_v3 }
 0x1cc   :  { %1176 = vrot.lane.b32.xlu1 %v6312_v18, %s11590_s18  ;;  %1172 = vrot.lane.b32.xlu0 %v6314_v19, %s11590_s18 }
 0x1cd   :  { %v464_v12 = vadd.f32 %v6334_v26, %v432_v54  ;;  %v483_v47 = vsel %vm232_vm1, %v481_v39, %v482_v53  ;;  %v351_v3 = vadd.f32 %v6306_v17, %v325_v24  ;;  %v11813_v24 = vrot.slane %v6796_v14, 1 }
 0x1ce   :  { %v6848_v62 = vpop.permute.xlu1 %901  ;;  %v6853_v61 = vpop.permute.xlu0 %897  ;;  %v490_v57 = vadd.f32 %v483_v47, %v466_v15 }
 0x1cf   :  { %v488_v26 = vadd.f32 %v480_v52, %v464_v12  ;;  %v377_v17 = vadd.f32 %v6318_v21, %v351_v3 }
 0x1d0   :  { %1357 = vrot.lane.b32.xlu1 %v6312_v18, %s11586_s26  ;;  %1353 = vrot.lane.b32.xlu0 %v6314_v19, %s11586_s26  ;;  %v522_v39 = vadd.f32 %v6356_v29, %v490_v57  ;;  %v11811_v29 = vrot.slane %v6785_v1, 1  ;;  %s11910_s26 = smov 70  }
 0x1d1   :  { %v520_v11 = vadd.f32 %v6358_v30, %v488_v26  ;;  %v401_v21 = vadd.f32 %v11813_v24, %v377_v17 }
 0x1d2   :  { %v6862_v10 = vpop.permute.xlu1 %935  ;;  %v6867_v9 = vpop.permute.xlu0 %931  ;;  %v554_v5 = vadd.f32 %v6364_v31, %v522_v39  ;;  %v403_v30 = vadd.f32 %v11811_v29, %v379_v16 }
 0x1d3   :  { %v552_v22 = vadd.f32 %v6366_v32, %v520_v11  ;;  %v433_v52 = vadd.f32 %v6342_v27, %v401_v21 }
 0x1d4   :  { %1369 = vrot.lane.b32.xlu1 %v6312_v18, %s11584_s13  ;;  %1365 = vrot.lane.b32.xlu0 %v6314_v19, %s11584_s13  ;;  %v6900_v20 = vmax.f32 %v554_v5, 0.0  ;;  %v435_v1 = vadd.f32 %v6340_v23, %v403_v30  ;;  %s11905_s13 = smov 95  }
 0x1d5   :  { %v6906_v12 = vmax.f32 %v552_v22, 0.0  ;;  %v465_v3 = vadd.f32 %v6350_v2, %v433_v52 }
 0x1d6   :  { %v6875_v4 = vpop.permute.xlu1 %947  ;;  %v6878_v54 = vpop.permute.xlu0 %943  ;;  %11812 = vst [vmem:[#allocation94_spill] sm:$0xff] %v6900_v20  ;;  %v467_v14 = vadd.f32 %v6348_v28, %v435_v1 }
 0x1d7   :  { %11814 = vst [vmem:[#allocation95_spill] sm:$0xff] %v6906_v12  ;;  %v489_v39 = vadd.f32 %v479_v51, %v465_v3 }
 0x1d8   :  { %1381 = vrot.lane.b32.xlu1 %v6312_v18, %s11582_s28  ;;  %1377 = vrot.lane.b32.xlu0 %v6314_v19, %s11582_s28  ;;  %v491_v23 = vadd.f32 %v482_v53, %v467_v14  ;;  %s11900_s28 = smov 4  }
 0x1d9   :  { %v521_v2 = vadd.f32 %v6374_v0, %v489_v39 }
 0x1da   :  { %v6888_v63 = vpop.permute.xlu1 %1104  ;;  %v6892_v15 = vpop.permute.xlu0 %1100  ;;  %v523_v28 = vadd.f32 %v6372_v33, %v491_v23 }
 0x1db   :  { %v553_v53 = vadd.f32 %v6382_v36, %v521_v2 }
 0x1dc   :  { %1393 = vrot.lane.b32.xlu1 %v6312_v18, %s11580_s0  ;;  %1389 = vrot.lane.b32.xlu0 %v6314_v19, %s11580_s0  ;;  %v555_v16 = vadd.f32 %v6380_v35, %v523_v28  ;;  %s11897_s0 = smov 120  }
 0x1dd   :  { %v6958_v51 = vmax.f32 %v553_v53, 0.0 }
 0x1de   :  { %v6902_v31 = vpop.permute.xlu1 %1138  ;;  %v6908_v32 = vpop.permute.xlu0 %1134  ;;  %v6954_v33 = vmax.f32 %v555_v16, 0.0 }
 0x1df   :  { %11817 = vst [vmem:[#allocation98_spill] sm:$0xff] %v6958_v51 }
 0x1e0   :  { %1822 = vrot.lane.b32.xlu1 %v6900_v20, %s11578_s19  ;;  %1818 = vrot.lane.b32.xlu0 %v6906_v12, %s11578_s19  ;;  %11816 = vst [vmem:[#allocation97_spill] sm:$0xff] %v6954_v33 }
 0x1e2   :  { %v6915_v47 = vpop.permute.xlu1 %1297  ;;  %v6918_v25 = vpop.permute.xlu0 %1293 }
 0x1e4   :  { %1834 = vrot.lane.b32.xlu1 %v6900_v20, %s11576_s20  ;;  %1830 = vrot.lane.b32.xlu0 %v6906_v12, %s11576_s20 }
 0x1e6   :  { %v6925_v57 = vpop.permute.xlu1 %1331  ;;  %v6928_v26 = vpop.permute.xlu0 %1327 }
 0x1e8   :  { %1846 = vrot.lane.b32.xlu1 %v6900_v20, %s11574_s21  ;;  %1842 = vrot.lane.b32.xlu0 %v6906_v12, %s11574_s21 }
 0x1ea   :  { %v6934_v27 = vpop.permute.xlu1 %913  ;;  %v6936_v11 = vpop.permute.xlu0 %909 }
 0x1ec   :  { %2027 = vrot.lane.b32.xlu1 %v6900_v20, %s11561_s15  ;;  %2023 = vrot.lane.b32.xlu0 %v6906_v12, %s11561_s15 }
 0x1ee   :  { %v6945_v5 = vpop.permute.xlu1 %1116  ;;  %v6948_v17 = vpop.permute.xlu0 %1112 }
 0x1ef   :  { %11815 = vst [vmem:[#allocation96_spill] sm:$0xff] %v6948_v17 }
 0x1f0   :  { %2039 = vrot.lane.b32.xlu1 %v6900_v20, %s11556_s22  ;;  %2035 = vrot.lane.b32.xlu0 %v6906_v12, %s11556_s22 }
 0x1f2   :  { %v6956_v0 = vpop.permute.xlu1 %1150  ;;  %v6960_v22 = vpop.permute.xlu0 %1146 }
 0x1f4   :  { %1824 = vrot.lane.b32.xlu1 %v6954_v33, %s11578_s19  ;;  %1820 = vrot.lane.b32.xlu0 %v6958_v51, %s11578_s19  ;;  %s11892_s19 = smov 58  }
 0x1f6   :  { %v6966_v35 = vpop.permute.xlu1 %1309  ;;  %v6968_v36 = vpop.permute.xlu0 %1305 }
 0x1f7   :  { %11818 = vst [vmem:[#allocation99_spill] sm:$0xff] %v6966_v35  ;;  %11819 = vst [vmem:[#allocation100_spill] sm:$0xff] %v6968_v36 }
 0x1f8   :  { %1858 = vrot.lane.b32.xlu1 %v6900_v20, %s11558_s23  ;;  %1854 = vrot.lane.b32.xlu0 %v6906_v12, %s11558_s23 }
 0x1fa   :  { %v6974_v29 = vpop.permute.xlu1 %1343  ;;  %v6976_v30 = vpop.permute.xlu0 %1339 }
 0x1fb   :  { %11820 = vst [vmem:[#allocation101_spill] sm:$0xff] %v6974_v29  ;;  %11821 = vst [vmem:[#allocation102_spill] sm:$0xff] %v6976_v30 }
 0x1fc   :  { %2051 = vrot.lane.b32.xlu1 %v6900_v20, %s11565_s24  ;;  %2047 = vrot.lane.b32.xlu0 %v6906_v12, %s11565_s24 }
 0x1fe   :  { %v6982_v24 = vpop.permute.xlu1 %925  ;;  %v6984_v21 = vpop.permute.xlu0 %921 }
 0x1ff   :  { %11822 = vst [vmem:[#allocation103_spill] sm:$0xff] %v6982_v24  ;;  %11823 = vst [vmem:[#allocation104_spill] sm:$0xff] %v6984_v21 }
 0x200   :  { %1836 = vrot.lane.b32.xlu1 %v6954_v33, %s11576_s20  ;;  %1832 = vrot.lane.b32.xlu0 %v6958_v51, %s11576_s20  ;;  %s11887_s20 = smov 83  }
 0x202   :  { %v6990_v1 = vpop.permute.xlu1 %1128  ;;  %v6992_v52 = vpop.permute.xlu0 %1124 }
 0x203   :  { %11824 = vst [vmem:[#allocation105_spill] sm:$0xff] %v6990_v1  ;;  %11825 = vst [vmem:[#allocation106_spill] sm:$0xff] %v6992_v52 }
 0x204   :  { %1870 = vrot.lane.b32.xlu1 %v6900_v20, %s11568_s25  ;;  %1866 = vrot.lane.b32.xlu0 %v6906_v12, %s11568_s25 }
 0x206   :  { %v6998_v14 = vpop.permute.xlu1 %1162  ;;  %v7000_v3 = vpop.permute.xlu0 %1158 }
 0x207   :  { %11826 = vst [vmem:[#allocation107_spill] sm:$0xff] %v7000_v3 }
 0x208   :  { %2063 = vrot.lane.b32.xlu1 %v6900_v20, %s11572_s1  ;;  %2059 = vrot.lane.b32.xlu0 %v6906_v12, %s11572_s1 }
 0x20a   :  { %v7006_v23 = vpop.permute.xlu1 %1174  ;;  %v7008_v39 = vpop.permute.xlu0 %1170 }
 0x20b   :  { %11827 = vst [vmem:[#allocation108_spill] sm:$0xff] %v7006_v23  ;;  %11828 = vst [vmem:[#allocation109_spill] sm:$0xff] %v7008_v39 }
 0x20c   :  { %2244 = vrot.lane.b32.xlu1 %v6900_v20, %s11829_s14  ;;  %2240 = vrot.lane.b32.xlu0 %v6906_v12, %s11829_s14 }
 0x20e   :  { %v7014_v28 = vpop.permute.xlu1 %1321  ;;  %v7016_v2 = vpop.permute.xlu0 %1317 }
 0x20f   :  { %11830 = vst [vmem:[#allocation110_spill] sm:$0xff] %v7014_v28  ;;  %11831 = vst [vmem:[#allocation111_spill] sm:$0xff] %v7016_v2 }
 0x210   :  { %2256 = vrot.lane.b32.xlu1 %v6900_v20, %s11832_s2  ;;  %2252 = vrot.lane.b32.xlu0 %v6906_v12, %s11832_s2 }
 0x212   :  { %v7022_v16 = vpop.permute.xlu1 %1355  ;;  %v7024_v53 = vpop.permute.xlu0 %1351 }
 0x213   :  { %11833 = vst [vmem:[#allocation112_spill] sm:$0xff] %v7022_v16  ;;  %11834 = vst [vmem:[#allocation113_spill] sm:$0xff] %v7024_v53 }
 0x214   :  { %1848 = vrot.lane.b32.xlu1 %v6954_v33, %s11574_s21  ;;  %1844 = vrot.lane.b32.xlu0 %v6958_v51, %s11574_s21  ;;  %s11882_s21 = smov 108  }
 0x216   :  { %v7030_v52 = vpop.permute.xlu1 %937  ;;  %v7032_v28 = vpop.permute.xlu0 %933 }
 0x217   :  { %11835 = vst [vmem:[#allocation114_spill] sm:$0xff] %v7030_v52  ;;  %11836 = vst [vmem:[#allocation115_spill] sm:$0xff] %v7032_v28 }
 0x218   :  { %1882 = vrot.lane.b32.xlu1 %v6900_v20, %s11837_s27  ;;  %1878 = vrot.lane.b32.xlu0 %v6906_v12, %s11837_s27 }
 0x21a   :  { %v7038_v2 = vpop.permute.xlu1 %949  ;;  %v7040_v16 = vpop.permute.xlu0 %945 }
 0x21b   :  { %11838 = vst [vmem:[#allocation116_spill] sm:$0xff] %v7038_v2  ;;  %11839 = vst [vmem:[#allocation117_spill] sm:$0xff] %v7040_v16 }
 0x21c   :  { %2029 = vrot.lane.b32.xlu1 %v6954_v33, %s11561_s15  ;;  %2025 = vrot.lane.b32.xlu0 %v6958_v51, %s11561_s15  ;;  %s11860_s15 = smov 34  }
 0x21e   :  { %v7046_v53 = vpop.permute.xlu1 %1140  ;;  %v7048_v52 = vpop.permute.xlu0 %1136 }
 0x21f   :  { %11840 = vst [vmem:[#allocation118_spill] sm:$0xff] %v7046_v53  ;;  %11841 = vst [vmem:[#allocation119_spill] sm:$0xff] %v7048_v52 }
 0x220   :  { %2041 = vrot.lane.b32.xlu1 %v6954_v33, %s11556_s22  ;;  %2037 = vrot.lane.b32.xlu0 %v6958_v51, %s11556_s22  ;;  %s11852_s22 = smov 84  }
 0x222   :  { %v7054_v28 = vpop.permute.xlu1 %1333  ;;  %v7056_v2 = vpop.permute.xlu0 %1329 }
 0x223   :  { %11842 = vst [vmem:[#allocation120_spill] sm:$0xff] %v7054_v28  ;;  %11843 = vst [vmem:[#allocation121_spill] sm:$0xff] %v7056_v2 }
 0x224   :  { %2075 = vrot.lane.b32.xlu1 %v6900_v20, %s11844_s29  ;;  %2071 = vrot.lane.b32.xlu0 %v6906_v12, %s11844_s29 }
 0x226   :  { %v7062_v16 = vpop.permute.xlu1 %1367  ;;  %v7064_v53 = vpop.permute.xlu0 %1363 }
 0x227   :  { %11845 = vst [vmem:[#allocation122_spill] sm:$0xff] %v7062_v16  ;;  %11846 = vst [vmem:[#allocation123_spill] sm:$0xff] %v7064_v53 }
 0x228   :  { %2268 = vrot.lane.b32.xlu1 %v6900_v20, %s11847_s30  ;;  %2264 = vrot.lane.b32.xlu0 %v6906_v12, %s11847_s30 }
 0x22a   :  { %v7070_v52 = vpop.permute.xlu1 %1152  ;;  %v7072_v28 = vpop.permute.xlu0 %1148 }
 0x22b   :  { %11848 = vst [vmem:[#allocation124_spill] sm:$0xff] %v7070_v52  ;;  %11849 = vst [vmem:[#allocation125_spill] sm:$0xff] %v7072_v28 }
 0x22c   :  { %1860 = vrot.lane.b32.xlu1 %v6954_v33, %s11558_s23  ;;  %1856 = vrot.lane.b32.xlu0 %v6958_v51, %s11558_s23  ;;  %s11857_s23 = smov 59  }
 0x22e   :  { %v7078_v2 = vpop.permute.xlu1 %1345  ;;  %v7080_v16 = vpop.permute.xlu0 %1341 }
 0x22f   :  { %11850 = vst [vmem:[#allocation126_spill] sm:$0xff] %v7078_v2  ;;  %11851 = vst [vmem:[#allocation127_spill] sm:$0xff] %v7080_v16 }
 0x230   :  { %1894 = vrot.lane.b32.xlu1 %v6900_v20, %s11852_s22  ;;  %1890 = vrot.lane.b32.xlu0 %v6906_v12, %s11852_s22 }
 0x232   :  { %v7086_v53 = vpop.permute.xlu1 %1379  ;;  %v7088_v52 = vpop.permute.xlu0 %1375 }
 0x233   :  { %11853 = vst [vmem:[#allocation128_spill] sm:$0xff] %v7086_v53  ;;  %11854 = vst [vmem:[#allocation129_spill] sm:$0xff] %v7088_v52 }
 0x234   :  { %2053 = vrot.lane.b32.xlu1 %v6954_v33, %s11565_s24  ;;  %2049 = vrot.lane.b32.xlu0 %v6958_v51, %s11565_s24  ;;  %s11865_s24 = smov 96  }
 0x236   :  { %v7094_v28 = vpop.permute.xlu1 %1391  ;;  %v7096_v2 = vpop.permute.xlu0 %1387 }
 0x237   :  { %11855 = vst [vmem:[#allocation130_spill] sm:$0xff] %v7094_v28  ;;  %11856 = vst [vmem:[#allocation131_spill] sm:$0xff] %v7096_v2 }
 0x238   :  { %2087 = vrot.lane.b32.xlu1 %v6900_v20, %s11857_s23  ;;  %2083 = vrot.lane.b32.xlu0 %v6906_v12, %s11857_s23 }
 0x23a   :  { %v7102_v16 = vpop.permute.xlu1 %1164  ;;  %v7104_v53 = vpop.permute.xlu0 %1160 }
 0x23b   :  { %11858 = vst [vmem:[#allocation132_spill] sm:$0xff] %v7102_v16  ;;  %11859 = vst [vmem:[#allocation133_spill] sm:$0xff] %v7104_v53 }
 0x23c   :  { %2280 = vrot.lane.b32.xlu1 %v6900_v20, %s11860_s15  ;;  %2276 = vrot.lane.b32.xlu0 %v6906_v12, %s11860_s15 }
 0x23e   :  { %v7110_v52 = vpop.permute.xlu1 %1176  ;;  %v7112_v28 = vpop.permute.xlu0 %1172 }
 0x23f   :  { %11861 = vst [vmem:[#allocation134_spill] sm:$0xff] %v7110_v52  ;;  %11862 = vst [vmem:[#allocation135_spill] sm:$0xff] %v7112_v28 }
 0x240   :  { %1872 = vrot.lane.b32.xlu1 %v6954_v33, %s11568_s25  ;;  %1868 = vrot.lane.b32.xlu0 %v6958_v51, %s11568_s25  ;;  %s11870_s25 = smov 71  }
 0x242   :  { %v7118_v2 = vpop.permute.xlu1 %1357  ;;  %v7120_v16 = vpop.permute.xlu0 %1353 }
 0x243   :  { %11863 = vst [vmem:[#allocation136_spill] sm:$0xff] %v7118_v2  ;;  %11864 = vst [vmem:[#allocation137_spill] sm:$0xff] %v7120_v16 }
 0x244   :  { %1906 = vrot.lane.b32.xlu1 %v6900_v20, %s11865_s24  ;;  %1902 = vrot.lane.b32.xlu0 %v6906_v12, %s11865_s24 }
 0x246   :  { %v7126_v53 = vpop.permute.xlu1 %1369  ;;  %v7128_v52 = vpop.permute.xlu0 %1365 }
 0x247   :  { %11866 = vst [vmem:[#allocation138_spill] sm:$0xff] %v7126_v53  ;;  %11867 = vst [vmem:[#allocation139_spill] sm:$0xff] %v7128_v52 }
 0x248   :  { %2065 = vrot.lane.b32.xlu1 %v6954_v33, %s11572_s1  ;;  %2061 = vrot.lane.b32.xlu0 %v6958_v51, %s11572_s1  ;;  %s11877_s1 = smov 46  }
 0x24a   :  { %v7134_v28 = vpop.permute.xlu1 %1381  ;;  %v7136_v2 = vpop.permute.xlu0 %1377 }
 0x24b   :  { %11868 = vst [vmem:[#allocation140_spill] sm:$0xff] %v7134_v28  ;;  %11869 = vst [vmem:[#allocation141_spill] sm:$0xff] %v7136_v2 }
 0x24c   :  { %2099 = vrot.lane.b32.xlu1 %v6900_v20, %s11870_s25  ;;  %2095 = vrot.lane.b32.xlu0 %v6906_v12, %s11870_s25 }
 0x24e   :  { %v7142_v16 = vpop.permute.xlu1 %1393  ;;  %v7144_v53 = vpop.permute.xlu0 %1389 }
 0x24f   :  { %11871 = vst [vmem:[#allocation142_spill] sm:$0xff] %v7142_v16  ;;  %11872 = vst [vmem:[#allocation143_spill] sm:$0xff] %v7144_v53 }
 0x250   :  { %2246 = vrot.lane.b32.xlu1 %v6954_v33, %s11829_s14  ;;  %2242 = vrot.lane.b32.xlu0 %v6958_v51, %s11829_s14 }
 0x252   :  { %v7150_v52 = vpop.permute.xlu1 %1822  ;;  %v7152_v28 = vpop.permute.xlu0 %1818 }
 0x253   :  { %11873 = vst [vmem:[#allocation144_spill] sm:$0xff] %v7150_v52  ;;  %11874 = vst [vmem:[#allocation145_spill] sm:$0xff] %v7152_v28 }
 0x254   :  { %2258 = vrot.lane.b32.xlu1 %v6954_v33, %s11832_s2  ;;  %2254 = vrot.lane.b32.xlu0 %v6958_v51, %s11832_s2 }
 0x256   :  { %v7158_v2 = vpop.permute.xlu1 %1834  ;;  %v7160_v16 = vpop.permute.xlu0 %1830 }
 0x257   :  { %11875 = vst [vmem:[#allocation146_spill] sm:$0xff] %v7158_v2  ;;  %11876 = vst [vmem:[#allocation147_spill] sm:$0xff] %v7160_v16 }
 0x258   :  { %2292 = vrot.lane.b32.xlu1 %v6900_v20, %s11877_s1  ;;  %2288 = vrot.lane.b32.xlu0 %v6906_v12, %s11877_s1 }
 0x25a   :  { %v7166_v53 = vpop.permute.xlu1 %1846  ;;  %v7168_v52 = vpop.permute.xlu0 %1842 }
 0x25b   :  { %11878 = vst [vmem:[#allocation148_spill] sm:$0xff] %v7166_v53  ;;  %11879 = vst [vmem:[#allocation149_spill] sm:$0xff] %v7168_v52 }
 0x25c   :  { %1884 = vrot.lane.b32.xlu1 %v6954_v33, %s11837_s27  ;;  %1880 = vrot.lane.b32.xlu0 %v6958_v51, %s11837_s27 }
 0x25e   :  { %v7174_v28 = vpop.permute.xlu1 %2027  ;;  %v7176_v2 = vpop.permute.xlu0 %2023 }
 0x25f   :  { %11880 = vst [vmem:[#allocation150_spill] sm:$0xff] %v7174_v28  ;;  %11881 = vst [vmem:[#allocation151_spill] sm:$0xff] %v7176_v2 }
 0x260   :  { %1918 = vrot.lane.b32.xlu1 %v6900_v20, %s11882_s21  ;;  %1914 = vrot.lane.b32.xlu0 %v6906_v12, %s11882_s21 }
 0x262   :  { %v7182_v16 = vpop.permute.xlu1 %2039  ;;  %v7184_v53 = vpop.permute.xlu0 %2035 }
 0x263   :  { %11883 = vst [vmem:[#allocation152_spill] sm:$0xff] %v7182_v16  ;;  %11884 = vst [vmem:[#allocation153_spill] sm:$0xff] %v7184_v53 }
 0x264   :  { %2077 = vrot.lane.b32.xlu1 %v6954_v33, %s11844_s29  ;;  %2073 = vrot.lane.b32.xlu0 %v6958_v51, %s11844_s29 }
 0x266   :  { %v7190_v52 = vpop.permute.xlu1 %1824  ;;  %v7192_v28 = vpop.permute.xlu0 %1820 }
 0x267   :  { %11885 = vst [vmem:[#allocation154_spill] sm:$0xff] %v7190_v52  ;;  %11886 = vst [vmem:[#allocation155_spill] sm:$0xff] %v7192_v28 }
 0x268   :  { %2111 = vrot.lane.b32.xlu1 %v6900_v20, %s11887_s20  ;;  %2107 = vrot.lane.b32.xlu0 %v6906_v12, %s11887_s20 }
 0x26a   :  { %v7198_v2 = vpop.permute.xlu1 %1858  ;;  %v7200_v16 = vpop.permute.xlu0 %1854 }
 0x26b   :  { %11888 = vst [vmem:[#allocation156_spill] sm:$0xff] %v7198_v2  ;;  %11889 = vst [vmem:[#allocation157_spill] sm:$0xff] %v7200_v16 }
 0x26c   :  { %2270 = vrot.lane.b32.xlu1 %v6954_v33, %s11847_s30  ;;  %2266 = vrot.lane.b32.xlu0 %v6958_v51, %s11847_s30 }
 0x26e   :  { %v7206_v53 = vpop.permute.xlu1 %2051  ;;  %v7208_v52 = vpop.permute.xlu0 %2047 }
 0x26f   :  { %11890 = vst [vmem:[#allocation158_spill] sm:$0xff] %v7206_v53  ;;  %11891 = vst [vmem:[#allocation159_spill] sm:$0xff] %v7208_v52 }
 0x270   :  { %2304 = vrot.lane.b32.xlu1 %v6900_v20, %s11892_s19  ;;  %2300 = vrot.lane.b32.xlu0 %v6906_v12, %s11892_s19 }
 0x272   :  { %v7214_v28 = vpop.permute.xlu1 %1836  ;;  %v7216_v2 = vpop.permute.xlu0 %1832 }
 0x273   :  { %11893 = vst [vmem:[#allocation160_spill] sm:$0xff] %v7214_v28  ;;  %11894 = vst [vmem:[#allocation161_spill] sm:$0xff] %v7216_v2 }
 0x274   :  { %1896 = vrot.lane.b32.xlu1 %v6954_v33, %s11852_s22  ;;  %1892 = vrot.lane.b32.xlu0 %v6958_v51, %s11852_s22 }
 0x276   :  { %v7222_v16 = vpop.permute.xlu1 %1870  ;;  %v7224_v53 = vpop.permute.xlu0 %1866 }
 0x277   :  { %11895 = vst [vmem:[#allocation162_spill] sm:$0xff] %v7222_v16  ;;  %11896 = vst [vmem:[#allocation163_spill] sm:$0xff] %v7224_v53 }
 0x278   :  { %1930 = vrot.lane.b32.xlu1 %v6900_v20, %s11897_s0  ;;  %1926 = vrot.lane.b32.xlu0 %v6906_v12, %s11897_s0 }
 0x27a   :  { %v7230_v52 = vpop.permute.xlu1 %2063  ;;  %v7232_v28 = vpop.permute.xlu0 %2059 }
 0x27b   :  { %11898 = vst [vmem:[#allocation164_spill] sm:$0xff] %v7230_v52  ;;  %11899 = vst [vmem:[#allocation165_spill] sm:$0xff] %v7232_v28 }
 0x27c   :  { %1942 = vrot.lane.b32.xlu1 %v6900_v20, %s11900_s28  ;;  %1938 = vrot.lane.b32.xlu0 %v6906_v12, %s11900_s28 }
 0x27e   :  { %v7238_v2 = vpop.permute.xlu1 %2244  ;;  %v7240_v16 = vpop.permute.xlu0 %2240 }
 0x27f   :  { %11901 = vst [vmem:[#allocation166_spill] sm:$0xff] %v7238_v2  ;;  %11902 = vst [vmem:[#allocation167_spill] sm:$0xff] %v7240_v16 }
 0x280   :  { %2089 = vrot.lane.b32.xlu1 %v6954_v33, %s11857_s23  ;;  %2085 = vrot.lane.b32.xlu0 %v6958_v51, %s11857_s23 }
 0x282   :  { %v7246_v53 = vpop.permute.xlu1 %2256  ;;  %v7248_v52 = vpop.permute.xlu0 %2252 }
 0x283   :  { %11903 = vst [vmem:[#allocation168_spill] sm:$0xff] %v7246_v53  ;;  %11904 = vst [vmem:[#allocation169_spill] sm:$0xff] %v7248_v52 }
 0x284   :  { %2123 = vrot.lane.b32.xlu1 %v6900_v20, %s11905_s13  ;;  %2119 = vrot.lane.b32.xlu0 %v6906_v12, %s11905_s13 }
 0x286   :  { %v7254_v28 = vpop.permute.xlu1 %1848  ;;  %v7256_v2 = vpop.permute.xlu0 %1844 }
 0x287   :  { %11906 = vst [vmem:[#allocation170_spill] sm:$0xff] %v7254_v28  ;;  %11907 = vst [vmem:[#allocation171_spill] sm:$0xff] %v7256_v2 }
 0x288   :  { %2282 = vrot.lane.b32.xlu1 %v6954_v33, %s11860_s15  ;;  %2278 = vrot.lane.b32.xlu0 %v6958_v51, %s11860_s15 }
 0x28a   :  { %v7262_v16 = vpop.permute.xlu1 %1882  ;;  %v7264_v53 = vpop.permute.xlu0 %1878 }
 0x28b   :  { %11908 = vst [vmem:[#allocation172_spill] sm:$0xff] %v7262_v16  ;;  %11909 = vst [vmem:[#allocation173_spill] sm:$0xff] %v7264_v53 }
 0x28c   :  { %2316 = vrot.lane.b32.xlu1 %v6900_v20, %s11910_s26  ;;  %2312 = vrot.lane.b32.xlu0 %v6906_v12, %s11910_s26 }
 0x28e   :  { %v7270_v52 = vpop.permute.xlu1 %2029  ;;  %v7272_v28 = vpop.permute.xlu0 %2025 }
 0x28f   :  { %11911 = vst [vmem:[#allocation174_spill] sm:$0xff] %v7270_v52  ;;  %11912 = vst [vmem:[#allocation175_spill] sm:$0xff] %v7272_v28 }
 0x290   :  { %1908 = vrot.lane.b32.xlu1 %v6954_v33, %s11865_s24  ;;  %1904 = vrot.lane.b32.xlu0 %v6958_v51, %s11865_s24 }
 0x292   :  { %v7278_v2 = vpop.permute.xlu1 %2041  ;;  %v7280_v16 = vpop.permute.xlu0 %2037 }
 0x293   :  { %11913 = vst [vmem:[#allocation176_spill] sm:$0xff] %v7278_v2  ;;  %11914 = vst [vmem:[#allocation177_spill] sm:$0xff] %v7280_v16 }
 0x294   :  { %2101 = vrot.lane.b32.xlu1 %v6954_v33, %s11870_s25  ;;  %2097 = vrot.lane.b32.xlu0 %v6958_v51, %s11870_s25 }
 0x296   :  { %v7286_v53 = vpop.permute.xlu1 %2075  ;;  %v7288_v52 = vpop.permute.xlu0 %2071 }
 0x297   :  { %11915 = vst [vmem:[#allocation178_spill] sm:$0xff] %v7286_v53  ;;  %11916 = vst [vmem:[#allocation179_spill] sm:$0xff] %v7288_v52 }
 0x298   :  { %2135 = vrot.lane.b32.xlu1 %v6900_v20, %s11594_s12  ;;  %2131 = vrot.lane.b32.xlu0 %v6906_v12, %s11594_s12  ;;  %s5183_s12 = sld [smem:[#allocation3 + $0x15]] }
 0x29a   :  { %v7294_v28 = vpop.permute.xlu1 %2268  ;;  %v7296_v2 = vpop.permute.xlu0 %2264 }
 0x29b   :  { %11917 = vst [vmem:[#allocation180_spill] sm:$0xff] %v7294_v28  ;;  %11918 = vst [vmem:[#allocation181_spill] sm:$0xff] %v7296_v2 }
 0x29c   :  { %2294 = vrot.lane.b32.xlu1 %v6954_v33, %s11877_s1  ;;  %2290 = vrot.lane.b32.xlu0 %v6958_v51, %s11877_s1 }
 0x29e   :  { %v7302_v16 = vpop.permute.xlu1 %1860  ;;  %v7304_v53 = vpop.permute.xlu0 %1856  ;;  %v626_v39 = vstv %s5183_s12  ;;  %s5186_s12 = sld [smem:[#allocation3 + $0x18]] }
 0x29f   :  { %11919 = vst [vmem:[#allocation182_spill] sm:$0xff] %v7302_v16  ;;  %11920 = vst [vmem:[#allocation183_spill] sm:$0xff] %v7304_v53  ;;  %v629_v30 = vmul.f32 %v6755_v7, %v626_v39  ;;  %v7426_v36 = vmul.f32 %v6793_v13, %v626_v39 }
 0x2a0   :  { %2328 = vrot.lane.b32.xlu1 %v6900_v20, %s11592_s16  ;;  %2324 = vrot.lane.b32.xlu0 %v6906_v12, %s11592_s16  ;;  %s5179_s16 = sld [smem:[#allocation6 + $0x2]] }
 0x2a1   :  { %v638_v3 = vrot.slane %v629_v30, 1  ;;  %v11600_v17 = vrot.slane %v7426_v36, 1 }
 0x2a2   :  { %v7310_v52 = vpop.permute.xlu1 %1894  ;;  %v7312_v28 = vpop.permute.xlu0 %1890 }
 0x2a3   :  { %11921 = vst [vmem:[#allocation184_spill] sm:$0xff] %v7310_v52  ;;  %11922 = vst [vmem:[#allocation185_spill] sm:$0xff] %v7312_v28 }
 0x2a4   :  { %1920 = vrot.lane.b32.xlu1 %v6954_v33, %s11882_s21  ;;  %1916 = vrot.lane.b32.xlu0 %v6958_v51, %s11882_s21 }
 0x2a6   :  { %v7318_v2 = vpop.permute.xlu1 %2053  ;;  %v7320_v16 = vpop.permute.xlu0 %2049  ;;  %v561_v1 = vstv %s5179_s16  ;;  %s11953_s16 = smov 118  }
 0x2a7   :  { %11923 = vst [vmem:[#allocation186_spill] sm:$0xff] %v7318_v2  ;;  %11924 = vst [vmem:[#allocation187_spill] sm:$0xff] %v7320_v16 }
 0x2a8   :  { %2113 = vrot.lane.b32.xlu1 %v6954_v33, %s11887_s20  ;;  %2109 = vrot.lane.b32.xlu0 %v6958_v51, %s11887_s20 }
 0x2aa   :  { %v7326_v53 = vpop.permute.xlu1 %2087  ;;  %v7328_v52 = vpop.permute.xlu0 %2083 }
 0x2ab   :  { %11925 = vst [vmem:[#allocation188_spill] sm:$0xff] %v7326_v53  ;;  %11926 = vst [vmem:[#allocation189_spill] sm:$0xff] %v7328_v52 }
 0x2ac   :  { %2147 = vrot.lane.b32.xlu1 %v6900_v20, %s11588_s17  ;;  %2143 = vrot.lane.b32.xlu0 %v6906_v12, %s11588_s17  ;;  %s11933_s17 = smov 94  }
 0x2ae   :  { %v7334_v28 = vpop.permute.xlu1 %2280  ;;  %v7336_v2 = vpop.permute.xlu0 %2276 }
 0x2af   :  { %11927 = vst [vmem:[#allocation190_spill] sm:$0xff] %v7334_v28  ;;  %11928 = vst [vmem:[#allocation191_spill] sm:$0xff] %v7336_v2 }
 0x2b0   :  { %2159 = vrot.lane.b32.xlu1 %v6900_v20, %s11590_s18  ;;  %2155 = vrot.lane.b32.xlu0 %v6906_v12, %s11590_s18  ;;  %s5180_s18 = sld [smem:[#allocation3 + $0x12]] }
 0x2b2   :  { %v7342_v16 = vpop.permute.xlu1 %1872  ;;  %v7344_v53 = vpop.permute.xlu0 %1868 }
 0x2b3   :  { %11929 = vst [vmem:[#allocation192_spill] sm:$0xff] %v7342_v16  ;;  %11930 = vst [vmem:[#allocation193_spill] sm:$0xff] %v7344_v53 }
 0x2b4   :  { %2306 = vrot.lane.b32.xlu1 %v6954_v33, %s11892_s19  ;;  %2302 = vrot.lane.b32.xlu0 %v6958_v51, %s11892_s19 }
 0x2b6   :  { %v7350_v52 = vpop.permute.xlu1 %1906  ;;  %v7352_v28 = vpop.permute.xlu0 %1902 }
 0x2b7   :  { %11931 = vst [vmem:[#allocation194_spill] sm:$0xff] %v7350_v52  ;;  %11932 = vst [vmem:[#allocation195_spill] sm:$0xff] %v7352_v28 }
 0x2b8   :  { %2340 = vrot.lane.b32.xlu1 %v6900_v20, %s11933_s17  ;;  %2336 = vrot.lane.b32.xlu0 %v6906_v12, %s11933_s17 }
 0x2ba   :  { %v7358_v2 = vpop.permute.xlu1 %2065  ;;  %v7360_v16 = vpop.permute.xlu0 %2061 }
 0x2bb   :  { %11934 = vst [vmem:[#allocation196_spill] sm:$0xff] %v7358_v2  ;;  %11935 = vst [vmem:[#allocation197_spill] sm:$0xff] %v7360_v16 }
 0x2bc   :  { %1932 = vrot.lane.b32.xlu1 %v6954_v33, %s11897_s0  ;;  %1928 = vrot.lane.b32.xlu0 %v6958_v51, %s11897_s0 }
 0x2be   :  { %v7366_v53 = vpop.permute.xlu1 %2099  ;;  %v7368_v52 = vpop.permute.xlu0 %2095 }
 0x2bf   :  { %11936 = vst [vmem:[#allocation198_spill] sm:$0xff] %v7366_v53  ;;  %11937 = vst [vmem:[#allocation199_spill] sm:$0xff] %v7368_v52 }
 0x2c0   :  { %1944 = vrot.lane.b32.xlu1 %v6954_v33, %s11900_s28  ;;  %1940 = vrot.lane.b32.xlu0 %v6958_v51, %s11900_s28 }
 0x2c2   :  { %v7374_v28 = vpop.permute.xlu1 %2246  ;;  %v7376_v2 = vpop.permute.xlu0 %2242 }
 0x2c3   :  { %11938 = vst [vmem:[#allocation200_spill] sm:$0xff] %v7374_v28  ;;  %11939 = vst [vmem:[#allocation201_spill] sm:$0xff] %v7376_v2 }
 0x2c4   :  { %2125 = vrot.lane.b32.xlu1 %v6954_v33, %s11905_s13  ;;  %2121 = vrot.lane.b32.xlu0 %v6958_v51, %s11905_s13 }
 0x2c6   :  { %v7382_v16 = vpop.permute.xlu1 %2258  ;;  %v7384_v52 = vpop.permute.xlu0 %2254 }
 0x2c7   :  { %11940 = vst [vmem:[#allocation202_spill] sm:$0xff] %v7382_v16  ;;  %11941 = vst [vmem:[#allocation203_spill] sm:$0xff] %v7384_v52  ;;  %v564_v52 = vstv %s5180_s18  ;;  %s11956_s18 = smov 2  }
 0x2c8   :  { %2318 = vrot.lane.b32.xlu1 %v6954_v33, %s11910_s26  ;;  %2314 = vrot.lane.b32.xlu0 %v6958_v51, %s11910_s26  ;;  %v565_v21 = vmul.f32 %v6765_v6, %v564_v52 }
 0x2ca   :  { %v7390_v28 = vpop.permute.xlu1 %2292  ;;  %v7392_v2 = vpop.permute.xlu0 %2288  ;;  %v569_v23 = vadd.f32 %v565_v21, %v561_v1 }
 0x2cb   :  { %11942 = vst [vmem:[#allocation204_spill] sm:$0xff] %v7390_v28  ;;  %11943 = vst [vmem:[#allocation205_spill] sm:$0xff] %v7392_v2  ;;  %v567_v2 = vmul.f32 %v6755_v7, %v564_v52 }
 0x2cc   :  { %2352 = vrot.lane.b32.xlu1 %v6900_v20, %s11944_s11  ;;  %2348 = vrot.lane.b32.xlu0 %v6906_v12, %s11944_s11 }
 0x2ce   :  { %v7398_v16 = vpop.permute.xlu1 %1884  ;;  %v7400_v53 = vpop.permute.xlu0 %1880 }
 0x2cf   :  { %11945 = vst [vmem:[#allocation206_spill] sm:$0xff] %v7398_v16  ;;  %11946 = vst [vmem:[#allocation207_spill] sm:$0xff] %v7400_v53  ;;  %v571_v53 = vadd.f32 %v567_v2, %v561_v1 }
 0x2d0   :  { %2137 = vrot.lane.b32.xlu1 %v6954_v33, %s11947_s10  ;;  %2133 = vrot.lane.b32.xlu0 %v6958_v51, %s11947_s10 }
 0x2d1   :  { %v597_v21 = vadd.f32 %v6388_v37, %v571_v53 }
 0x2d2   :  { %v7407_v28 = vpop.permute.xlu1 %1918  ;;  %v7410_v24 = vpop.permute.xlu0 %1914 }
 0x2d3   :  { %11948 = vst [vmem:[#allocation208_spill] sm:$0xff] %v7407_v28  ;;  %11949 = vst [vmem:[#allocation209_spill] sm:$0xff] %v7410_v24  ;;  %v7420_v28 = vmul.f32 %v6782_v45, %v626_v39  ;;  %v627_v24 = vmul.f32 %v6765_v6, %v626_v39  ;;  %v623_v37 = vadd.f32 %v6396_v40, %v597_v21 }
 0x2d4   :  { %2330 = vrot.lane.b32.xlu1 %v6954_v33, %s11950_s8  ;;  %2326 = vrot.lane.b32.xlu0 %v6958_v51, %s11950_s8 }
 0x2d5   :  { %v635_v39 = vrot.slane %v627_v24, 1 }
 0x2d6   :  { %v7416_v16 = vpop.permute.xlu1 %2077  ;;  %v7422_v29 = vpop.permute.xlu0 %2073 }
 0x2d7   :  { %11951 = vst [vmem:[#allocation210_spill] sm:$0xff] %v7416_v16  ;;  %11952 = vst [vmem:[#allocation211_spill] sm:$0xff] %v7422_v29  ;;  %v595_v16 = vadd.f32 %v6390_v38, %v569_v23  ;;  %v11599_v29 = vrot.slane %v7420_v28, 1  ;;  %v637_v24 = vsel %vm143_vm0, %v635_v39, %v11600_v17 }
 0x2d8   :  { %2364 = vrot.lane.b32.xlu1 %v6900_v20, %s11953_s16  ;;  %2360 = vrot.lane.b32.xlu0 %v6906_v12, %s11953_s16 }
 0x2d9   :  { %v621_v38 = vadd.f32 %v6398_v41, %v595_v16  ;;  %v640_v30 = vsel %vm143_vm0, %v638_v3, %v11599_v29 }
 0x2da   :  { %v7433_v2 = vpop.permute.xlu1 %2111  ;;  %v7437_v35 = vpop.permute.xlu0 %2107  ;;  %v647_v40 = vadd.f32 %v640_v30, %v623_v37  ;;  %v568_v37 = vmul.f32 %v6782_v45, %v564_v52  ;;  %v566_v30 = vmul.f32 %v6793_v13, %v564_v52 }
 0x2db   :  { %11954 = vst [vmem:[#allocation212_spill] sm:$0xff] %v7433_v2  ;;  %11955 = vst [vmem:[#allocation213_spill] sm:$0xff] %v7437_v35  ;;  %v714_v35 = vstv %s5186_s12  ;;  %v645_v41 = vadd.f32 %v637_v24, %v621_v38  ;;  %s11962_s12 = smov 3  }
 0x2dc   :  { %2376 = vrot.lane.b32.xlu1 %v6900_v20, %s11956_s18  ;;  %2372 = vrot.lane.b32.xlu0 %v6906_v12, %s11956_s18  ;;  %v717_v16 = vmul.f32 %v6755_v7, %v714_v35  ;;  %v7464_v3 = vmul.f32 %v6782_v45, %v714_v35  ;;  %v715_v39 = vmul.f32 %v6765_v6, %v714_v35  ;;  %v12111_v12 = vld [vmem:[#allocation66_spill] sm:$0xff]  ;;  %v12112_v20 = vld [vmem:[#allocation67_spill] sm:$0xff] }
 0x2dd   :  { %v7470_v17 = vmul.f32 %v6793_v13, %v714_v35  ;;  %v679_v7 = vadd.f32 %v6420_v48, %v647_v40  ;;  %v677_v24 = vadd.f32 %v6422_v49, %v645_v41  ;;  %v572_v48 = vadd.f32 %v568_v37, %v561_v1 }
 0x2de   :  { %v7445_v53 = vpop.permute.xlu1 %2270  ;;  %v7451_v23 = vpop.permute.xlu0 %2266  ;;  %v726_v6 = vrot.slane %v717_v16, 2  ;;  %v727_v35 = vrot.slane %v7464_v3, 2  ;;  %v570_v49 = vadd.f32 %v566_v30, %v561_v1 }
 0x2df   :  { %11957 = vst [vmem:[#allocation214_spill] sm:$0xff] %v7445_v53  ;;  %11958 = vst [vmem:[#allocation215_spill] sm:$0xff] %v7451_v23  ;;  %v724_v23 = vrot.slane %v7470_v17, 2  ;;  %v711_v45 = vadd.f32 %v6428_v50, %v679_v7  ;;  %v709_v52 = vadd.f32 %v6430_v8, %v677_v24  ;;  %v598_v16 = vadd.f32 %v6404_v42, %v572_v48 }
 0x2e0   :  { %2149 = vrot.lane.b32.xlu1 %v6954_v33, %s11959_s9  ;;  %2145 = vrot.lane.b32.xlu0 %v6958_v51, %s11959_s9  ;;  %v728_v40 = vsel %vm232_vm1, %v726_v6, %v727_v35  ;;  %v596_v1 = vadd.f32 %v6406_v43, %v570_v49  ;;  %v11973_v48 = vrot.slane %v7426_v36, 1  ;;  %v11976_v49 = vld [vmem:[#allocation12_spill] sm:$0xff]  ;;  %v11981_v36 = vld [vmem:[#allocation14_spill] sm:$0xff] }
 0x2e1   :  { %v735_v50 = vadd.f32 %v728_v40, %v711_v45  ;;  %v624_v42 = vadd.f32 %v6412_v44, %v598_v16  ;;  %v11978_v40 = vld [vmem:[#allocation13_spill] sm:$0xff] }
 0x2e2   :  { %v7460_v21 = vpop.permute.xlu1 %2304  ;;  %v7466_v29 = vpop.permute.xlu0 %2300  ;;  %v622_v43 = vadd.f32 %v6414_v46, %v596_v1 }
 0x2e3   :  { %11960 = vst [vmem:[#allocation216_spill] sm:$0xff] %v7460_v21  ;;  %11961 = vst [vmem:[#allocation217_spill] sm:$0xff] %v7466_v29  ;;  %v723_v21 = vrot.slane %v715_v39, 2  ;;  %v767_v37 = vadd.f32 %v6456_v34, %v735_v50  ;;  %v11971_v34 = vrot.slane %v7420_v28, 1 }
 0x2e4   :  { %2161 = vrot.lane.b32.xlu1 %v6954_v33, %s11962_s12  ;;  %2157 = vrot.lane.b32.xlu0 %v6958_v51, %s11962_s12  ;;  %v646_v46 = vadd.f32 %v11973_v48, %v622_v43  ;;  %v11990_v48 = vld [vmem:[#allocation17_spill] sm:$0xff]  ;;  %s12011_s12 = smov 35  }
 0x2e5   :  { %v725_v17 = vsel %vm232_vm1, %v723_v21, %v724_v23  ;;  %v799_v7 = vadd.f32 %v6468_v56, %v767_v37 }
 0x2e6   :  { %v7478_v38 = vpop.permute.xlu1 %1896  ;;  %v7483_v29 = vpop.permute.xlu0 %1892  ;;  %v733_v8 = vadd.f32 %v725_v17, %v709_v52  ;;  %v678_v17 = vadd.f32 %v11978_v40, %v646_v46 }
 0x2e7   :  { %11963 = vst [vmem:[#allocation218_spill] sm:$0xff] %v7478_v38  ;;  %11964 = vst [vmem:[#allocation219_spill] sm:$0xff] %v7483_v29  ;;  %v7528_v44 = vmax.f32 %v799_v7, 0.0  ;;  %v5195_v29 = vld [vmem:[%s11507_s3 + $0x7] ss:$8 sm:$0x3] }
 0x2e8   :  { %2342 = vrot.lane.b32.xlu1 %v6954_v33, %s11933_s17  ;;  %2338 = vrot.lane.b32.xlu0 %v6958_v51, %s11933_s17  ;;  %v765_v21 = vadd.f32 %v6460_v55, %v733_v8  ;;  %v648_v55 = vadd.f32 %v11971_v34, %v624_v42  ;;  %v11983_v8 = vld [vmem:[#allocation15_spill] sm:$0xff]  ;;  %v11988_v34 = vld [vmem:[#allocation16_spill] sm:$0xff]  ;;  %s12003_s17 = smov 23  }
 0x2e9   :  { %v710_v37 = vadd.f32 %v11983_v8, %v678_v17 }
 0x2ea   :  { %v7491_v13 = vpop.permute.xlu1 %1930  ;;  %v7495_v41 = vpop.permute.xlu0 %1926  ;;  %v797_v24 = vadd.f32 %v6470_v59, %v765_v21  ;;  %v680_v28 = vadd.f32 %v11976_v49, %v648_v55  ;;  %v11991_v49 = vld [vmem:[#allocation18_spill] sm:$0xff] }
 0x2eb   :  { %11965 = vst [vmem:[#allocation220_spill] sm:$0xff] %v7491_v13  ;;  %11966 = vst [vmem:[#allocation221_spill] sm:$0xff] %v7495_v41  ;;  %v734_v43 = vadd.f32 %v724_v23, %v710_v37  ;;  %v12094_v41 = vld [vmem:[#allocation55_spill] sm:$0xff] }
 0x2ec   :  { %2354 = vrot.lane.b32.xlu1 %v6954_v33, %s11944_s11  ;;  %2350 = vrot.lane.b32.xlu0 %v6958_v51, %s11944_s11  ;;  %v7534_v45 = vmax.f32 %v797_v24, 0.0  ;;  %v712_v50 = vadd.f32 %v11981_v36, %v680_v28  ;;  %s12000_s11 = smov 48  }
 0x2ed   :  { %v766_v46 = vadd.f32 %v11990_v48, %v734_v43 }
 0x2ee   :  { %v7503_v3 = vpop.permute.xlu1 %1942  ;;  %v7506_v39 = vpop.permute.xlu0 %1938  ;;  %v736_v42 = vadd.f32 %v727_v35, %v712_v50  ;;  %v11993_v35 = vld [vmem:[#allocation19_spill] sm:$0xff] }
 0x2ef   :  { %11967 = vst [vmem:[#allocation222_spill] sm:$0xff] %v7503_v3  ;;  %11968 = vst [vmem:[#allocation223_spill] sm:$0xff] %v7506_v39  ;;  %v798_v17 = vadd.f32 %v11993_v35, %v766_v46  ;;  %v12092_v39 = vld [vmem:[#allocation54_spill] sm:$0xff] }
 0x2f0   :  { %2366 = vrot.lane.b32.xlu1 %v6954_v33, %s11953_s16  ;;  %2362 = vrot.lane.b32.xlu0 %v6958_v51, %s11953_s16  ;;  %v768_v55 = vadd.f32 %v11988_v34, %v736_v42  ;;  %s11995_s16 = smov 11  }
 0x2f1   :  { %v7586_v8 = vmax.f32 %v798_v17, 0.0 }
 0x2f2   :  { %v7516_v30 = vpop.permute.xlu1 %2089  ;;  %v7520_v6 = vpop.permute.xlu0 %2085  ;;  %v800_v28 = vadd.f32 %v11991_v49, %v768_v55 }
 0x2f3   :  { %11969 = vst [vmem:[#allocation224_spill] sm:$0xff] %v7516_v30  ;;  %11970 = vst [vmem:[#allocation225_spill] sm:$0xff] %v7520_v6  ;;  %v12075_v6 = vld [vmem:[#allocation38_spill] sm:$0xff]  ;;  %v12078_v30 = vld [vmem:[#allocation41_spill] sm:$0xff] }
 0x2f4   :  { %2378 = vrot.lane.b32.xlu1 %v6954_v33, %s11956_s18  ;;  %2374 = vrot.lane.b32.xlu0 %v6958_v51, %s11956_s18  ;;  %s11989_s18 = smov 127   ;;  %v7582_v23 = vmax.f32 %v800_v28, 0.0  ;;  %v12107_v51 = vld [vmem:[#allocation63_spill] sm:$0xff] }
 0x2f6   :  { %v7530_v56 = vpop.permute.xlu1 %2123  ;;  %v7536_v59 = vpop.permute.xlu0 %2119 }
 0x2f7   :  { %11972 = vst [vmem:[#allocation226_spill] sm:$0xff] %v7530_v56  ;;  %11974 = vst [vmem:[#allocation227_spill] sm:$0xff] %v7536_v59  ;;  %v12074_v56 = vld [vmem:[#allocation37_spill] sm:$0xff] }
 0x2f8   :  { %2807 = vrot.lane.b32.xlu1 %v7528_v44, %s11975_s6  ;;  %2803 = vrot.lane.b32.xlu0 %v7534_v45, %s11975_s6 }
 0x2fa   :  { %v7543_v52 = vpop.permute.xlu1 %2282  ;;  %v7546_v16 = vpop.permute.xlu0 %2278 }
 0x2fb   :  { %11977 = vst [vmem:[#allocation12_spill] sm:$0xff] %v7543_v52  ;;  %11979 = vst [vmem:[#allocation13_spill] sm:$0xff] %v7546_v16 }
 0x2fc   :  { %2819 = vrot.lane.b32.xlu1 %v7528_v44, %s11980_s7  ;;  %2815 = vrot.lane.b32.xlu0 %v7534_v45, %s11980_s7 }
 0x2fe   :  { %v7553_v1 = vpop.permute.xlu1 %2316  ;;  %v7556_v21 = vpop.permute.xlu0 %2312 }
 0x2ff   :  { %11982 = vst [vmem:[#allocation14_spill] sm:$0xff] %v7553_v1  ;;  %11984 = vst [vmem:[#allocation15_spill] sm:$0xff] %v7556_v21  ;;  %v12064_v21 = vld [vmem:[#allocation27_spill] sm:$0xff] }
 0x300   :  { %2831 = vrot.lane.b32.xlu1 %v7528_v44, %s11985_s5  ;;  %2827 = vrot.lane.b32.xlu0 %v7534_v45, %s11985_s5 }
 0x302   :  { %v7562_v7 = vpop.permute.xlu1 %1908  ;;  %v7564_v24 = vpop.permute.xlu0 %1904 }
 0x303   :  { %11986 = vst [vmem:[#allocation228_spill] sm:$0xff] %v7562_v7  ;;  %11987 = vst [vmem:[#allocation229_spill] sm:$0xff] %v7564_v24  ;;  %v12062_v7 = vld [vmem:[#allocation26_spill] sm:$0xff] }
 0x304   :  { %3012 = vrot.lane.b32.xlu1 %v7528_v44, %s11989_s18  ;;  %3008 = vrot.lane.b32.xlu0 %v7534_v45, %s11989_s18 }
 0x306   :  { %v7573_v40 = vpop.permute.xlu1 %2101  ;;  %v7576_v36 = vpop.permute.xlu0 %2097 }
 0x307   :  { %11992 = vst [vmem:[#allocation16_spill] sm:$0xff] %v7573_v40  ;;  %11994 = vst [vmem:[#allocation17_spill] sm:$0xff] %v7576_v36  ;;  %v12057_v36 = vld [vmem:[#allocation24_spill] sm:$0xff] }
 0x308   :  { %3024 = vrot.lane.b32.xlu1 %v7528_v44, %s11995_s16  ;;  %3020 = vrot.lane.b32.xlu0 %v7534_v45, %s11995_s16 }
 0x30a   :  { %v7584_v50 = vpop.permute.xlu1 %2135  ;;  %v7588_v37 = vpop.permute.xlu0 %2131 }
 0x30b   :  { %11996 = vst [vmem:[#allocation18_spill] sm:$0xff] %v7584_v50  ;;  %11997 = vst [vmem:[#allocation19_spill] sm:$0xff] %v7588_v37  ;;  %v12056_v37 = vld [vmem:[#allocation23_spill] sm:$0xff] }
 0x30c   :  { %2809 = vrot.lane.b32.xlu1 %v7582_v23, %s11975_s6  ;;  %2805 = vrot.lane.b32.xlu0 %v7586_v8, %s11975_s6  ;;  %s12008_s6 = smov 60  }
 0x30e   :  { %v7594_v42 = vpop.permute.xlu1 %2294  ;;  %v7596_v43 = vpop.permute.xlu0 %2290 }
 0x30f   :  { %11998 = vst [vmem:[#allocation230_spill] sm:$0xff] %v7594_v42  ;;  %11999 = vst [vmem:[#allocation231_spill] sm:$0xff] %v7596_v43 }
 0x310   :  { %2843 = vrot.lane.b32.xlu1 %v7528_v44, %s12000_s11  ;;  %2839 = vrot.lane.b32.xlu0 %v7534_v45, %s12000_s11 }
 0x312   :  { %v7602_v34 = vpop.permute.xlu1 %2328  ;;  %v7604_v55 = vpop.permute.xlu0 %2324 }
 0x313   :  { %12001 = vst [vmem:[#allocation232_spill] sm:$0xff] %v7602_v34  ;;  %12002 = vst [vmem:[#allocation233_spill] sm:$0xff] %v7604_v55 }
 0x314   :  { %3036 = vrot.lane.b32.xlu1 %v7528_v44, %s12003_s17  ;;  %3032 = vrot.lane.b32.xlu0 %v7534_v45, %s12003_s17 }
 0x316   :  { %v7610_v48 = vpop.permute.xlu1 %1920  ;;  %v7612_v46 = vpop.permute.xlu0 %1916 }
 0x317   :  { %12004 = vst [vmem:[#allocation234_spill] sm:$0xff] %v7610_v48  ;;  %12005 = vst [vmem:[#allocation235_spill] sm:$0xff] %v7612_v46 }
 0x318   :  { %2821 = vrot.lane.b32.xlu1 %v7582_v23, %s11980_s7  ;;  %2817 = vrot.lane.b32.xlu0 %v7586_v8, %s11980_s7 }
 0x31a   :  { %v7618_v49 = vpop.permute.xlu1 %2113  ;;  %v7620_v28 = vpop.permute.xlu0 %2109 }
 0x31b   :  { %12006 = vst [vmem:[#allocation236_spill] sm:$0xff] %v7618_v49  ;;  %12007 = vst [vmem:[#allocation237_spill] sm:$0xff] %v7620_v28 }
 0x31c   :  { %2855 = vrot.lane.b32.xlu1 %v7528_v44, %s12008_s6  ;;  %2851 = vrot.lane.b32.xlu0 %v7534_v45, %s12008_s6 }
 0x31e   :  { %v7626_v35 = vpop.permute.xlu1 %2147  ;;  %v7628_v17 = vpop.permute.xlu0 %2143 }
 0x31f   :  { %12009 = vst [vmem:[#allocation238_spill] sm:$0xff] %v7626_v35  ;;  %12010 = vst [vmem:[#allocation239_spill] sm:$0xff] %v7628_v17  ;;  %v12054_v35 = vld [vmem:[#allocation22_spill] sm:$0xff] }
 0x320   :  { %3048 = vrot.lane.b32.xlu1 %v7528_v44, %s12011_s12  ;;  %3044 = vrot.lane.b32.xlu0 %v7534_v45, %s12011_s12 }
 0x322   :  { %v7634_v46 = vpop.permute.xlu1 %2159  ;;  %v7636_v49 = vpop.permute.xlu0 %2155 }
 0x323   :  { %12012 = vst [vmem:[#allocation240_spill] sm:$0xff] %v7634_v46  ;;  %12013 = vst [vmem:[#allocation241_spill] sm:$0xff] %v7636_v49 }
 0x324   :  { %3229 = vrot.lane.b32.xlu1 %v7528_v44, %s11829_s14  ;;  %3225 = vrot.lane.b32.xlu0 %v7534_v45, %s11829_s14 }
 0x326   :  { %v7642_v28 = vpop.permute.xlu1 %2306  ;;  %v7644_v48 = vpop.permute.xlu0 %2302 }
 0x327   :  { %12014 = vst [vmem:[#allocation242_spill] sm:$0xff] %v7642_v28  ;;  %12015 = vst [vmem:[#allocation243_spill] sm:$0xff] %v7644_v48 }
 0x328   :  { %3241 = vrot.lane.b32.xlu1 %v7528_v44, %s11832_s2  ;;  %3237 = vrot.lane.b32.xlu0 %v7534_v45, %s11832_s2 }
 0x32a   :  { %v7650_v17 = vpop.permute.xlu1 %2340  ;;  %v7652_v46 = vpop.permute.xlu0 %2336 }
 0x32b   :  { %12016 = vst [vmem:[#allocation244_spill] sm:$0xff] %v7650_v17  ;;  %12017 = vst [vmem:[#allocation245_spill] sm:$0xff] %v7652_v46 }
 0x32c   :  { %2833 = vrot.lane.b32.xlu1 %v7582_v23, %s11985_s5  ;;  %2829 = vrot.lane.b32.xlu0 %v7586_v8, %s11985_s5  ;;  %s12696_s5 = sld [smem:[#allocation282_spill]] }
 0x32e   :  { %v7658_v49 = vpop.permute.xlu1 %1932  ;;  %v7660_v28 = vpop.permute.xlu0 %1928 }
 0x32f   :  { %12018 = vst [vmem:[#allocation246_spill] sm:$0xff] %v7658_v49  ;;  %12019 = vst [vmem:[#allocation247_spill] sm:$0xff] %v7660_v28 }
 0x330   :  { %2867 = vrot.lane.b32.xlu1 %v7528_v44, %s11837_s27  ;;  %2863 = vrot.lane.b32.xlu0 %v7534_v45, %s11837_s27 }
 0x332   :  { %v7666_v48 = vpop.permute.xlu1 %1944  ;;  %v7668_v17 = vpop.permute.xlu0 %1940 }
 0x333   :  { %12020 = vst [vmem:[#allocation248_spill] sm:$0xff] %v7666_v48  ;;  %12021 = vst [vmem:[#allocation249_spill] sm:$0xff] %v7668_v17 }
 0x334   :  { %3014 = vrot.lane.b32.xlu1 %v7582_v23, %s11989_s18  ;;  %3010 = vrot.lane.b32.xlu0 %v7586_v8, %s11989_s18  ;;  %s5962_s18 = smov 112  }
 0x336   :  { %v7674_v46 = vpop.permute.xlu1 %2125  ;;  %v7676_v49 = vpop.permute.xlu0 %2121 }
 0x337   :  { %12022 = vst [vmem:[#allocation250_spill] sm:$0xff] %v7674_v46  ;;  %12023 = vst [vmem:[#allocation251_spill] sm:$0xff] %v7676_v49 }
 0x338   :  { %3026 = vrot.lane.b32.xlu1 %v7582_v23, %s11995_s16  ;;  %3022 = vrot.lane.b32.xlu0 %v7586_v8, %s11995_s16  ;;  %s5958_s16 = smov 16  }
 0x33a   :  { %v7682_v28 = vpop.permute.xlu1 %2318  ;;  %v7684_v48 = vpop.permute.xlu0 %2314 }
 0x33b   :  { %12024 = vst [vmem:[#allocation252_spill] sm:$0xff] %v7682_v28  ;;  %12025 = vst [vmem:[#allocation253_spill] sm:$0xff] %v7684_v48 }
 0x33c   :  { %3060 = vrot.lane.b32.xlu1 %v7528_v44, %s11844_s29  ;;  %3056 = vrot.lane.b32.xlu0 %v7534_v45, %s11844_s29 }
 0x33e   :  { %v7690_v17 = vpop.permute.xlu1 %2352  ;;  %v7692_v46 = vpop.permute.xlu0 %2348 }
 0x33f   :  { %12026 = vst [vmem:[#allocation254_spill] sm:$0xff] %v7690_v17  ;;  %12027 = vst [vmem:[#allocation255_spill] sm:$0xff] %v7692_v46 }
 0x340   :  { %3253 = vrot.lane.b32.xlu1 %v7528_v44, %s11847_s30  ;;  %3249 = vrot.lane.b32.xlu0 %v7534_v45, %s11847_s30 }
 0x342   :  { %v7698_v49 = vpop.permute.xlu1 %2137  ;;  %v7700_v28 = vpop.permute.xlu0 %2133 }
 0x343   :  { %12028 = vst [vmem:[#allocation256_spill] sm:$0xff] %v7698_v49  ;;  %12029 = vst [vmem:[#allocation257_spill] sm:$0xff] %v7700_v28 }
 0x344   :  { %2845 = vrot.lane.b32.xlu1 %v7582_v23, %s12000_s11  ;;  %2841 = vrot.lane.b32.xlu0 %v7586_v8, %s12000_s11 }
 0x346   :  { %v7706_v48 = vpop.permute.xlu1 %2330  ;;  %v7708_v17 = vpop.permute.xlu0 %2326 }
 0x347   :  { %12030 = vst [vmem:[#allocation258_spill] sm:$0xff] %v7706_v48  ;;  %12031 = vst [vmem:[#allocation259_spill] sm:$0xff] %v7708_v17 }
 0x348   :  { %2879 = vrot.lane.b32.xlu1 %v7528_v44, %s11852_s22  ;;  %2875 = vrot.lane.b32.xlu0 %v7534_v45, %s11852_s22 }
 0x34a   :  { %v7714_v46 = vpop.permute.xlu1 %2364  ;;  %v7716_v49 = vpop.permute.xlu0 %2360 }
 0x34b   :  { %12032 = vst [vmem:[#allocation260_spill] sm:$0xff] %v7714_v46  ;;  %12033 = vst [vmem:[#allocation261_spill] sm:$0xff] %v7716_v49 }
 0x34c   :  { %3038 = vrot.lane.b32.xlu1 %v7582_v23, %s12003_s17  ;;  %3034 = vrot.lane.b32.xlu0 %v7586_v8, %s12003_s17 }
 0x34e   :  { %v7722_v28 = vpop.permute.xlu1 %2376  ;;  %v7724_v48 = vpop.permute.xlu0 %2372 }
 0x34f   :  { %12034 = vst [vmem:[#allocation262_spill] sm:$0xff] %v7722_v28  ;;  %12035 = vst [vmem:[#allocation263_spill] sm:$0xff] %v7724_v48 }
 0x350   :  { %3072 = vrot.lane.b32.xlu1 %v7528_v44, %s11857_s23  ;;  %3068 = vrot.lane.b32.xlu0 %v7534_v45, %s11857_s23 }
 0x352   :  { %v7730_v17 = vpop.permute.xlu1 %2149  ;;  %v7732_v46 = vpop.permute.xlu0 %2145 }
 0x353   :  { %12036 = vst [vmem:[#allocation264_spill] sm:$0xff] %v7730_v17  ;;  %12037 = vst [vmem:[#allocation265_spill] sm:$0xff] %v7732_v46 }
 0x354   :  { %3265 = vrot.lane.b32.xlu1 %v7528_v44, %s11860_s15  ;;  %3261 = vrot.lane.b32.xlu0 %v7534_v45, %s11860_s15 }
 0x356   :  { %v7738_v49 = vpop.permute.xlu1 %2161  ;;  %v7740_v28 = vpop.permute.xlu0 %2157 }
 0x357   :  { %12038 = vst [vmem:[#allocation266_spill] sm:$0xff] %v7738_v49  ;;  %12039 = vst [vmem:[#allocation267_spill] sm:$0xff] %v7740_v28 }
 0x358   :  { %2857 = vrot.lane.b32.xlu1 %v7582_v23, %s12008_s6  ;;  %2853 = vrot.lane.b32.xlu0 %v7586_v8, %s12008_s6 }
 0x35a   :  { %v7746_v48 = vpop.permute.xlu1 %2342  ;;  %v7748_v17 = vpop.permute.xlu0 %2338 }
 0x35b   :  { %12040 = vst [vmem:[#allocation268_spill] sm:$0xff] %v7746_v48  ;;  %12041 = vst [vmem:[#allocation269_spill] sm:$0xff] %v7748_v17  ;;  %v807_v17 = vlaneseq }
 0x35c   :  { %2891 = vrot.lane.b32.xlu1 %v7528_v44, %s11865_s24  ;;  %2887 = vrot.lane.b32.xlu0 %v7534_v45, %s11865_s24 }
 0x35d   :  { %v7776_v55 = vshrl.u32 %v807_v17, 7  ;;  %v805_v17 = vld [vmem:[%s11508_s4] sm:$0x3]  ;;  %s12695_s4 = sld [smem:[#allocation283_spill]] }
 0x35e   :  { %v7754_v46 = vpop.permute.xlu1 %2354  ;;  %v7756_v49 = vpop.permute.xlu0 %2350 }
 0x35f   :  { %12042 = vst [vmem:[#allocation270_spill] sm:$0xff] %v7754_v46  ;;  %12043 = vst [vmem:[#allocation271_spill] sm:$0xff] %v7756_v49 }
 0x360   :  { %3050 = vrot.lane.b32.xlu1 %v7582_v23, %s12011_s12  ;;  %3046 = vrot.lane.b32.xlu0 %v7586_v8, %s12011_s12  ;;  %12048 = vst [vmem:[#allocation276_spill] sm:$0xff] %v7776_v55 }
 0x362   :  { %v7762_v28 = vpop.permute.xlu1 %2366  ;;  %v7764_v48 = vpop.permute.xlu0 %2362 }
 0x363   :  { %12044 = vst [vmem:[#allocation272_spill] sm:$0xff] %v7762_v28  ;;  %12045 = vst [vmem:[#allocation273_spill] sm:$0xff] %v7764_v48 }
 0x364   :  { %3084 = vrot.lane.b32.xlu1 %v7528_v44, %s11870_s25  ;;  %3080 = vrot.lane.b32.xlu0 %v7534_v45, %s11870_s25 }
 0x366   :  { %v7770_v46 = vpop.permute.xlu1 %2378  ;;  %v7772_v49 = vpop.permute.xlu0 %2374 }
 0x367   :  { %12046 = vst [vmem:[#allocation274_spill] sm:$0xff] %v7770_v46  ;;  %12047 = vst [vmem:[#allocation275_spill] sm:$0xff] %v7772_v49  ;;  %v12051_v49 = vld [vmem:[#allocation20_spill] sm:$0xff] }
 0x368   :  { %3231 = vrot.lane.b32.xlu1 %v7582_v23, %s11829_s14  ;;  %3227 = vrot.lane.b32.xlu0 %v7586_v8, %s11829_s14  ;;  %v958_v46 = vsel %vm955_vm2, %v6275_v58, %v12051_v49  ;;  %v1010_v58 = vld [vmem:[%s11507_s3] ss:$8 sm:$0x3]  ;;  %v5191_v49 = vld [vmem:[%s11507_s3 + $0x3] ss:$8 sm:$0x3] }
 0x369   :  { %v963_v43 = vsel %vm960_vm3, %v958_v46, %v12054_v35  ;;  %v7818_v46 = vsub.s32 1, %v7776_v55  ;;  %v12060_v35 = vld [vmem:[#allocation25_spill] sm:$0xff]  ;;  %s12693_s14 = sld [smem:[#allocation281_spill]] }
 0x36a   :  { %v7780_v48 = vpop.permute.xlu1 %2807  ;;  %v7782_v28 = vpop.permute.xlu0 %2803  ;;  %v968_v40 = vsel %vm965_vm4, %v963_v43, %v12057_v36  ;;  %v12065_v43 = vld [vmem:[#allocation30_spill] sm:$0xff] }
 0x36b   :  { %12049 = vst [vmem:[#allocation277_spill] sm:$0xff] %v7780_v48  ;;  %12050 = vst [vmem:[#allocation278_spill] sm:$0xff] %v7782_v28  ;;  %v7793_v48 = vsub.s32 0, %v7776_v55  ;;  %v12053_v28 = vld [vmem:[#allocation21_spill] sm:$0xff]  ;;  %v959_v1 = vsel %vm955_vm2, %v6312_v18, %v12065_v43  ;;  %v12066_v55 = vld [vmem:[#allocation31_spill] sm:$0xff]  ;;  %v7863_v52 = vrot.slane %v805_v17, %v7818_v46 }
 0x36c   :  { %3243 = vrot.lane.b32.xlu1 %v7582_v23, %s11832_s2  ;;  %3239 = vrot.lane.b32.xlu0 %v7586_v8, %s11832_s2  ;;  %v956_v34 = vsel %vm955_vm2, %v6278_v60, %v12053_v28  ;;  %v5194_v60 = vld [vmem:[%s11507_s3 + $0x6] ss:$8 sm:$0x3]  ;;  %12058 = vst [vmem:[#allocation22_spill] sm:$0xff] %v7818_v46 }
 0x36d   :  { %12052 = vst [vmem:[#allocation20_spill] sm:$0xff] %v7793_v48  ;;  %v961_v50 = vsel %vm960_vm3, %v956_v34, %v12056_v37  ;;  %v12063_v34 = vld [vmem:[#allocation29_spill] sm:$0xff] }
 0x36e   :  { %v7808_v42 = vpop.permute.xlu1 %2819  ;;  %v7820_v28 = vpop.permute.xlu0 %2815  ;;  %v966_v24 = vsel %vm965_vm4, %v961_v50, %v12060_v35  ;;  %v1182_v36 = vsel %vm955_vm2, %v12064_v21, %v12063_v34  ;;  %v12067_v50 = vld [vmem:[#allocation32_spill] sm:$0xff]  ;;  %v12068_v18 = vld [vmem:[#allocation33_spill] sm:$0xff]  ;;  %v12069_v34 = vld [vmem:[#allocation34_spill] sm:$0xff] }
 0x36f   :  { %12055 = vst [vmem:[#allocation21_spill] sm:$0xff] %v7808_v42  ;;  %12059 = vst [vmem:[#allocation23_spill] sm:$0xff] %v7820_v28  ;;  %v12061_v42 = vld [vmem:[#allocation28_spill] sm:$0xff]  ;;  %v957_v28 = vsel %vm955_vm2, %v6314_v19, %v12066_v55  ;;  %v973_v35 = vsel %vm970_vm5, %v968_v40, %v12067_v50  ;;  %v971_v21 = vsel %vm970_vm5, %v966_v24, %v12068_v18  ;;  %v12071_v50 = vld [vmem:[#allocation35_spill] sm:$0xff] }
 0x370   :  { %v1184_v37 = vsel %vm955_vm2, %v12062_v7, %v12061_v42  ;;  %3277 = vrot.lane.b32.xlu1 %v7528_v44, %s11877_s1  ;;  %v7841_v7 = vrot.slane %v805_v17, %v7793_v48  ;;  %v7844_v42 = vrot.slane %v1010_v58, %v7793_v48  ;;  %3273 = vrot.lane.b32.xlu0 %v7534_v45, %s11877_s1 }
 0x371   :  { %v1188_v43 = vsel %vm960_vm3, %v1184_v37, %v12069_v34  ;;  %v7853_v19 = vrot.slane %v5191_v49, %v7793_v48  ;;  %v7856_v40 = vrot.slane %v5194_v60, %v7793_v48  ;;  %v1186_v16 = vsel %vm960_vm3, %v1182_v36, %v12071_v50  ;;  %v12073_v34 = vld [vmem:[#allocation36_spill] sm:$0xff] }
 0x372   :  { %v7858_v55 = vpop.permute.xlu1 %2831  ;;  %v7866_v24 = vrot.slane %v1010_v58, %v7818_v46  ;;  %v7869_v37 = vrot.slane %v5191_v49, %v7818_v46  ;;  %v7871_v18 = vpop.permute.xlu0 %2827  ;;  %v964_v59 = vsel %vm960_vm3, %v959_v1, %v12073_v34  ;;  %v978_v36 = vsel %vm975_vm6, %v973_v35, %v12075_v6  ;;  %v12076_v58 = vld [vmem:[#allocation39_spill] sm:$0xff]  ;;  %v12077_v50 = vld [vmem:[#allocation40_spill] sm:$0xff] }
 0x373   :  { %12070 = vst [vmem:[#allocation24_spill] sm:$0xff] %v7858_v55  ;;  %12072 = vst [vmem:[#allocation25_spill] sm:$0xff] %v7871_v18  ;;  %v962_v55 = vsel %vm960_vm3, %v957_v28, %v12074_v56  ;;  %v7880_v17 = vrot.slane %v5194_v60, %v7818_v46  ;;  %v976_v49 = vsel %vm975_vm6, %v971_v21, %v12076_v58  ;;  %v12079_v34 = vld [vmem:[#allocation44_spill] sm:$0xff]  ;;  %v12080_v56 = vld [vmem:[#allocation42_spill] sm:$0xff] }
 0x374   :  { %2869 = vrot.lane.b32.xlu1 %v7582_v23, %s11837_s27  ;;  %v1192_v18 = vsel %vm965_vm4, %v1188_v43, %v12077_v50  ;;  %v1190_v1 = vsel %vm965_vm4, %v1186_v16, %v12078_v30  ;;  %v1401_v28 = vsel %vm955_vm2, %v12080_v56, %v12079_v34  ;;  %v5189_v6 = vld [vmem:[%s11507_s3 + $0x1] ss:$8 sm:$0x3]  ;;  %2865 = vrot.lane.b32.xlu0 %v7586_v8, %s11837_s27  ;;  %v12081_v60 = vld [vmem:[#allocation45_spill] sm:$0xff]  ;;  %v12083_v43 = vld [vmem:[#allocation46_spill] sm:$0xff]  ;;  %s5966_s27 = smov [#allocation8]  }
 0x375   :  { %v12082_v35 = vld [vmem:[#allocation43_spill] sm:$0xff]  ;;  %v969_v58 = vsel %vm965_vm4, %v964_v59, %v12083_v43  ;;  %v12085_v50 = vld [vmem:[#allocation48_spill] sm:$0xff]  ;;  %v12089_v43 = vld [vmem:[#allocation50_spill] sm:$0xff]  ;;  %v1196_v3 = vsel %vm970_vm5, %v1192_v18, %v12092_v39  ;;  %v1194_v2 = vsel %vm970_vm5, %v1190_v1, %v12094_v41 }
 0x376   :  { %v1399_v21 = vsel %vm955_vm2, %v12082_v35, %v12081_v60  ;;  %v12084_v30 = vld [vmem:[#allocation47_spill] sm:$0xff]  ;;  %v983_v34 = vsel %vm980_vm7, %v978_v36, %v12085_v50  ;;  %v5192_v56 = vld [vmem:[%s11507_s3 + $0x4] ss:$8 sm:$0x3]  ;;  %v7913_v38 = vpop.permute.xlu1 %3012  ;;  %v7925_v53 = vpop.permute.xlu0 %3008 }
 0x377   :  { %v967_v16 = vsel %vm965_vm4, %v962_v55, %v12084_v30  ;;  %12086 = vst [vmem:[#allocation28_spill] sm:$0xff] %v7913_v38  ;;  %v12087_v60 = vld [vmem:[#allocation49_spill] sm:$0xff]  ;;  %v12088_v35 = vld [vmem:[#allocation52_spill] sm:$0xff]  ;;  %v12091_v36 = vld [vmem:[#allocation51_spill] sm:$0xff]  ;;  %v7943_v41 = vrot.slane %v5192_v56, %v7793_v48 }
 0x378   :  { %v981_v59 = vsel %vm980_vm7, %v976_v49, %v12087_v60  ;;  %v1185_v55 = vsel %vm955_vm2, %v12089_v43, %v12088_v35  ;;  %v12090_v30 = vld [vmem:[#allocation53_spill] sm:$0xff]  ;;  %12093 = vst [vmem:[#allocation26_spill] sm:$0xff] %v7925_v53  ;;  %v12095_v38 = vld [vmem:[#allocation56_spill] sm:$0xff]  ;;  %v7934_v35 = vrot.slane %v5189_v6, %v7793_v48  ;;  %2903 = vrot.lane.b32.xlu1 %v7528_v44, %s11882_s21  ;;  %v12097_v43 = vld [vmem:[#allocation58_spill] sm:$0xff] }
 0x379   :  { %v1183_v50 = vsel %vm955_vm2, %v12091_v36, %v12090_v30  ;;  %v1405_v13 = vsel %vm960_vm3, %v1401_v28, %v12095_v38  ;;  %v12096_v49 = vld [vmem:[#allocation57_spill] sm:$0xff]  ;;  %v974_v39 = vsel %vm970_vm5, %v969_v58, %v12097_v43  ;;  %v12098_v18 = vld [vmem:[#allocation59_spill] sm:$0xff]  ;;  %v7946_v38 = vrot.slane %v5195_v29, %v7793_v48  ;;  %2899 = vrot.lane.b32.xlu0 %v7534_v45, %s11882_s21  ;;  %v12100_v1 = vld [vmem:[#allocation60_spill] sm:$0xff] }
 0x37a   :  { %v1403_v60 = vsel %vm960_vm3, %v1399_v21, %v12096_v49  ;;  %v972_v30 = vsel %vm970_vm5, %v967_v16, %v12098_v18  ;;  %v988_v28 = vsel %vm985_vm8, %v983_v34, %v12100_v1  ;;  %v7953_v21 = vrot.slane %v5189_v6, %v7818_v46  ;;  %v7961_v36 = vpop.permute.xlu1 %3024  ;;  %v12105_v49 = vld [vmem:[#allocation61_spill] sm:$0xff]  ;;  %v12106_v18 = vld [vmem:[#allocation62_spill] sm:$0xff]  ;;  %v12108_v1 = vld [vmem:[#allocation64_spill] sm:$0xff]  ;;  %v7971_v33 = vpop.permute.xlu0 %3020 }
 0x37b   :  { %12099 = vst [vmem:[#allocation29_spill] sm:$0xff] %v7946_v38  ;;  %v7956_v58 = vrot.slane %v5192_v56, %v7818_v46  ;;  %v7959_v16 = vrot.slane %v5195_v29, %v7818_v46  ;;  %12104 = vst [vmem:[#allocation32_spill] sm:$0xff] %v7961_v36  ;;  %v986_v43 = vsel %vm985_vm8, %v981_v59, %v12105_v49  ;;  %v12110_v56 = vld [vmem:[#allocation65_spill] sm:$0xff]  ;;  %v12113_v49 = vld [vmem:[#allocation68_spill] sm:$0xff] }
 0x37c   :  { %12101 = vst [vmem:[#allocation27_spill] sm:$0xff] %v7953_v21  ;;  %v1189_v53 = vsel %vm960_vm3, %v1185_v55, %v12106_v18  ;;  %v1187_v34 = vsel %vm960_vm3, %v1183_v50, %v12107_v51  ;;  %v1200_v6 = vsel %vm975_vm6, %v1196_v3, %v12108_v1  ;;  %12109 = vst [vmem:[#allocation33_spill] sm:$0xff] %v7971_v33  ;;  %v5190_v51 = vld [vmem:[%s11507_s3 + $0x2] ss:$8 sm:$0x3]  ;;  %3062 = vrot.lane.b32.xlu1 %v7582_v23, %s11844_s29  ;;  %v12116_v50 = vld [vmem:[#allocation71_spill] sm:$0xff] }
 0x37d   :  { %12102 = vst [vmem:[#allocation30_spill] sm:$0xff] %v7956_v58  ;;  %12103 = vst [vmem:[#allocation31_spill] sm:$0xff] %v7959_v16  ;;  %v1198_v29 = vsel %vm975_vm6, %v1194_v2, %v12110_v56  ;;  %v1409_v36 = vsel %vm965_vm4, %v1405_v13, %v12111_v12  ;;  %v1407_v59 = vsel %vm965_vm4, %v1403_v60, %v12112_v20  ;;  %v5193_v3 = vld [vmem:[%s11507_s3 + $0x5] ss:$8 sm:$0x3]  ;;  %v12115_v13 = vld [vmem:[#allocation70_spill] sm:$0xff]  ;;  %3058 = vrot.lane.b32.xlu0 %v7586_v8, %s11844_s29 }
 0x37e   :  { %v979_v55 = vsel %vm975_vm6, %v974_v39, %v12113_v49  ;;  %v12114_v2 = vld [vmem:[#allocation69_spill] sm:$0xff]  ;;  %v993_v20 = vsel %vm990_vm9, %v988_v28, %v12115_v13  ;;  %v991_v60 = vsel %vm990_vm9, %v986_v43, %v12116_v50  ;;  %v12117_v39 = vld [vmem:[#allocation72_spill] sm:$0xff]  ;;  %v12120_v28 = vld [vmem:[#allocation75_spill] sm:$0xff] }
 0x37f   :  { %v977_v12 = vsel %vm975_vm6, %v972_v30, %v12114_v2  ;;  %v1193_v18 = vsel %vm965_vm4, %v1189_v53, %v12117_v39  ;;  %v5196_v1 = vld [vmem:[%s11507_s3 + $0x10] ss:$8 sm:$0x3]  ;;  %v1202_v13 = vsel %vm980_vm7, %v1198_v29, %v12120_v28  ;;  %v12122_v50 = vld [vmem:[#allocation76_spill] sm:$0xff]  ;;  %v8011_v39 = vpop.permute.xlu1 %2809  ;;  %v12124_v33 = vld [vmem:[#allocation79_spill] sm:$0xff]  ;;  %v8024_v29 = vpop.permute.xlu0 %2805 }
 0x380   :  { %v12118_v56 = vld [vmem:[#allocation73_spill] sm:$0xff]  ;;  %v12119_v30 = vld [vmem:[#allocation74_spill] sm:$0xff]  ;;  %12123 = vst [vmem:[#allocation34_spill] sm:$0xff] %v8011_v39  ;;  %v12126_v21 = vld [vmem:[#allocation80_spill] sm:$0xff]  ;;  %3096 = vrot.lane.b32.xlu1 %v7528_v44, %s11887_s20 }
 0x381   :  { %v1191_v49 = vsel %vm965_vm4, %v1187_v34, %v12118_v56  ;;  %v1204_v2 = vsel %vm980_vm7, %v1200_v6, %v12119_v30  ;;  %v12121_v43 = vld [vmem:[#allocation78_spill] sm:$0xff]  ;;  %v12125_v16 = vld [vmem:[#allocation77_spill] sm:$0xff]  ;;  %v1413_v38 = vsel %vm970_vm5, %v1409_v36, %v12126_v21  ;;  %v8019_v34 = vrot.slane %v5190_v51, %v7793_v48  ;;  %12127 = vst [vmem:[#allocation35_spill] sm:$0xff] %v8024_v29  ;;  %v12131_v21 = vld [vmem:[#allocation83_spill] sm:$0xff] }
 0x382   :  { %v1402_v53 = vsel %vm955_vm2, %v12122_v50, %v12121_v43  ;;  %v1400_v58 = vsel %vm955_vm2, %v12125_v16, %v12124_v33  ;;  %v8022_v6 = vrot.slane %v5193_v3, %v7793_v48  ;;  %v12128_v56 = vld [vmem:[#allocation81_spill] sm:$0xff]  ;;  %v12129_v28 = vld [vmem:[#allocation82_spill] sm:$0xff]  ;;  %v12130_v50 = vld [vmem:[#allocation84_spill] sm:$0xff]  ;;  %v8033_v16 = vrot.slane %v5196_v1, %v7793_v48  ;;  %3092 = vrot.lane.b32.xlu0 %v7534_v45, %s11887_s20 }
 0x383   :  { %v1411_v30 = vsel %vm970_vm5, %v1407_v59, %v12128_v56  ;;  %v984_v43 = vsel %vm980_vm7, %v979_v55, %v12129_v28  ;;  %v998_v33 = vsel %vm995_vm10, %v993_v20, %v12130_v50  ;;  %v982_v36 = vsel %vm980_vm7, %v977_v12, %v12131_v21  ;;  %v12132_v39 = vld [vmem:[#allocation85_spill] sm:$0xff]  ;;  %v12133_v20 = vld [vmem:[#allocation86_spill] sm:$0xff]  ;;  %v12137_v50 = vld [vmem:[#allocation87_spill] sm:$0xff] }
 0x384   :  { %v996_v29 = vsel %vm995_vm10, %v991_v60, %v12132_v39  ;;  %v1003_v59 = vsel %vm1000_vm11, %v998_v33, %v6862_v10  ;;  %v8044_v55 = vrot.slane %v5190_v51, %v7818_v46  ;;  %v1197_v56 = vsel %vm970_vm5, %v1193_v18, %v12133_v20  ;;  %v8058_v39 = vpop.permute.xlu1 %2843  ;;  %v12138_v33 = vld [vmem:[#allocation88_spill] sm:$0xff]  ;;  %v12139_v48 = vld [vmem:[#allocation89_spill] sm:$0xff]  ;;  %v12141_v20 = vld [vmem:[#allocation90_spill] sm:$0xff]  ;;  %3255 = vrot.lane.b32.xlu1 %v7582_v23, %s11847_s30 }
 0x385   :  { %v1001_v28 = vsel %vm1000_vm11, %v996_v29, %v6867_v9  ;;  %v8053_v12 = vrot.slane %v5193_v3, %v7818_v46  ;;  %v8056_v60 = vrot.slane %v5196_v1, %v7818_v46  ;;  %12136 = vst [vmem:[#allocation38_spill] sm:$0xff] %v8058_v39  ;;  %v1195_v51 = vsel %vm970_vm5, %v1191_v49, %v12137_v50  ;;  %v8069_v3 = vpop.permute.xlu0 %2839  ;;  %v12142_v46 = vld [vmem:[#allocation91_spill] sm:$0xff] }
 0x386   :  { %v1208_v21 = vsel %vm985_vm8, %v1204_v2, %v12138_v33  ;;  %v1206_v18 = vsel %vm985_vm8, %v1202_v13, %v12139_v48  ;;  %v1008_v29 = vsel %vm1005_vm12, %v6862_v10, %v6875_v4  ;;  %12140 = vst [vmem:[#allocation39_spill] sm:$0xff] %v8069_v3  ;;  %v1406_v1 = vsel %vm960_vm3, %v1402_v53, %v12141_v20 }
 0x387   :  { %12134 = vst [vmem:[#allocation36_spill] sm:$0xff] %v8053_v12  ;;  %12135 = vst [vmem:[#allocation37_spill] sm:$0xff] %v8056_v60  ;;  %v1404_v39 = vsel %vm960_vm3, %v1400_v58, %v12142_v46  ;;  %v1026_v49 = vmul.f32 %v7844_v42, %v1003_v59  ;;  %v1006_v2 = vsel %vm1005_vm12, %v6867_v9, %v6878_v54  ;;  %3251 = vrot.lane.b32.xlu0 %v7586_v8, %s11847_s30  ;;  %v12146_v60 = vld [vmem:[#allocation93_spill] sm:$0xff]  ;;  %s5961_s30 = smov 32  }
 0x388   :  { %v8082_v48 = vmul.f32 %v7853_v19, %v1003_v59  ;;  %v8085_v10 = vmul.f32 %v7856_v40, %v1003_v59  ;;  %v1022_v4 = vmul.f32 %v7844_v42, %v1001_v28  ;;  %v8089_v13 = vmul.f32 %v7853_v19, %v1001_v28  ;;  %v8103_v53 = vpop.permute.xlu1 %3036  ;;  %v12144_v59 = vld [vmem:[#allocation92_spill] sm:$0xff]  ;;  %3289 = vrot.lane.b32.xlu1 %v7528_v44, %s11892_s19 }
 0x389   :  { %v8094_v46 = vmul.f32 %v7856_v40, %v1001_v28  ;;  %v1027_v9 = vmul.f32 %v7866_v24, %v1008_v29  ;;  %v8098_v54 = vmul.f32 %v7869_v37, %v1008_v29  ;;  %v8101_v58 = vmul.f32 %v7880_v17, %v1008_v29  ;;  %12143 = vst [vmem:[#allocation40_spill] sm:$0xff] %v8103_v53  ;;  %v8114_v3 = vpop.permute.xlu0 %3032 }
 0x38a   :  { %v1417_v50 = vsel %vm975_vm6, %v1413_v38, %v12144_v59  ;;  %v1023_v33 = vmul.f32 %v7866_v24, %v1006_v2  ;;  %v8109_v20 = vmul.f32 %v7869_v37, %v1006_v2  ;;  %v8112_v28 = vmul.f32 %v7880_v17, %v1006_v2  ;;  %12145 = vst [vmem:[#allocation41_spill] sm:$0xff] %v8114_v3 }
 0x38b   :  { %v1415_v12 = vsel %vm975_vm6, %v1411_v30, %v12146_v60  ;;  %v989_v29 = vsel %vm985_vm8, %v984_v43, %v6848_v62  ;;  %v987_v53 = vsel %vm985_vm8, %v982_v36, %v6853_v61  ;;  %v8123_v38 = vadd.f32 %v1026_v49, %v7841_v7  ;;  %3285 = vrot.lane.b32.xlu0 %v7534_v45, %s11892_s19 }
 0x38c   :  { %v8130_v3 = vadd.f32 %v1022_v4, %v7841_v7  ;;  %v8137_v62 = vadd.f32 %v1027_v9, %v7863_v52  ;;  %v8141_v60 = vpop.permute.xlu1 %2821  ;;  %v8144_v49 = vadd.f32 %v1023_v33, %v7863_v52  ;;  %v1201_v2 = vsel %vm975_vm6, %v1197_v56, %v6888_v63  ;;  %2881 = vrot.lane.b32.xlu1 %v7582_v23, %s11852_s22 }
 0x38d   :  { %12147 = vst [vmem:[#allocation44_spill] sm:$0xff] %v8141_v60  ;;  %v8150_v61 = vpop.permute.xlu0 %2817  ;;  %v1199_v9 = vsel %vm975_vm6, %v1195_v51, %v6892_v15  ;;  %v1212_v43 = vsel %vm990_vm9, %v1208_v21, %v6902_v31  ;;  %v1210_v36 = vsel %vm990_vm9, %v1206_v18, %v6908_v32  ;;  %v1410_v33 = vsel %vm965_vm4, %v1406_v1, %v6915_v47  ;;  %v12151_v51 = vld [vmem:[#allocation99_spill] sm:$0xff] }
 0x38e   :  { %12148 = vst [vmem:[#allocation42_spill] sm:$0xff] %v8150_v61  ;;  %v1408_v63 = vsel %vm965_vm4, %v1404_v39, %v6918_v25  ;;  %v1421_v56 = vsel %vm980_vm7, %v1417_v50, %v6925_v57  ;;  %v1419_v15 = vsel %vm980_vm7, %v1415_v12, %v6928_v26  ;;  %v1216_v31 = vsel %vm995_vm10, %v1212_v43, %v6956_v0  ;;  %v12150_v0 = vld [vmem:[#allocation96_spill] sm:$0xff]  ;;  %v12152_v21 = vld [vmem:[#allocation107_spill] sm:$0xff] }
 0x38f   :  { %2877 = vrot.lane.b32.xlu0 %v7586_v8, %s11852_s22  ;;  %v994_v32 = vsel %vm990_vm9, %v989_v29, %v6934_v27  ;;  %v992_v47 = vsel %vm990_vm9, %v987_v53, %v6936_v11  ;;  %v1214_v25 = vsel %vm995_vm10, %v1210_v36, %v6960_v22  ;;  %v1220_v57 = vsel %vm1000_vm11, %v1216_v31, %v6998_v14  ;;  %v12154_v22 = vld [vmem:[#allocation100_spill] sm:$0xff]  ;;  %v12155_v53 = vld [vmem:[#allocation101_spill] sm:$0xff]  ;;  %v12156_v29 = vld [vmem:[#allocation102_spill] sm:$0xff] }
 0x390   :  { %v8180_v39 = vpop.permute.xlu1 %2855  ;;  %v1205_v26 = vsel %vm980_vm7, %v1201_v2, %v6945_v5  ;;  %v1203_v12 = vsel %vm980_vm7, %v1199_v9, %v12150_v0  ;;  %v1414_v27 = vsel %vm970_vm5, %v1410_v33, %v12151_v51  ;;  %v1218_v11 = vsel %vm1000_vm11, %v1214_v25, %v12152_v21  ;;  %v12157_v2 = vld [vmem:[#allocation108_spill] sm:$0xff]  ;;  %2915 = vrot.lane.b32.xlu1 %v7528_v44, %s11897_s0  ;;  %v12158_v33 = vld [vmem:[#allocation29_spill] sm:$0xff] }
 0x391   :  { %12149 = vst [vmem:[#allocation45_spill] sm:$0xff] %v8180_v39  ;;  %v8190_v18 = vpop.permute.xlu0 %2851  ;;  %v1412_v1 = vsel %vm970_vm5, %v1408_v63, %v12154_v22  ;;  %v1425_v50 = vsel %vm985_vm8, %v1421_v56, %v12155_v53  ;;  %v1423_v5 = vsel %vm985_vm8, %v1419_v15, %v12156_v29  ;;  %v1224_v43 = vsel %vm1005_vm12, %v6998_v14, %v12157_v2  ;;  %v12160_v31 = vld [vmem:[#allocation109_spill] sm:$0xff]  ;;  %v12161_v15 = vld [vmem:[#allocation103_spill] sm:$0xff]  ;;  %v12162_v25 = vld [vmem:[#allocation104_spill] sm:$0xff] }
 0x392   :  { %12153 = vst [vmem:[#allocation43_spill] sm:$0xff] %v8190_v18  ;;  %v1243_v36 = vmul.f32 %v7934_v35, %v1220_v57  ;;  %v8205_v9 = vmul.f32 %v7943_v41, %v1220_v57  ;;  %v8208_v63 = vmul.f32 %v12158_v33, %v1220_v57  ;;  %v1222_v56 = vsel %vm1005_vm12, %v12152_v21, %v12160_v31  ;;  %v12164_v53 = vld [vmem:[#allocation105_spill] sm:$0xff]  ;;  %v12166_v2 = vld [vmem:[#allocation27_spill] sm:$0xff] }
 0x393   :  { %2911 = vrot.lane.b32.xlu0 %v7534_v45, %s11897_s0  ;;  %v999_v14 = vsel %vm995_vm10, %v994_v32, %v12161_v15  ;;  %v997_v0 = vsel %vm995_vm10, %v992_v47, %v12162_v25  ;;  %v1239_v51 = vmul.f32 %v7934_v35, %v1218_v11  ;;  %v8221_v22 = vmul.f32 %v7943_v41, %v1218_v11  ;;  %v12167_v32 = vld [vmem:[#allocation30_spill] sm:$0xff]  ;;  %v12169_v25 = vld [vmem:[#allocation31_spill] sm:$0xff] }
 0x394   :  { %12159 = vst [vmem:[#allocation46_spill] sm:$0xff] %v8208_v63  ;;  %v8223_v57 = vpop.permute.xlu1 %3048  ;;  %v8227_v29 = vsel %vm985_vm8, %v1205_v26, %v12164_v53  ;;  %v8230_v21 = vmul.f32 %v12158_v33, %v1218_v11  ;;  %v1244_v31 = vmul.f32 %v12166_v2, %v1224_v43  ;;  %v8234_v15 = vmul.f32 %v12167_v32, %v1224_v43  ;;  %v12171_v26 = vld [vmem:[#allocation114_spill] sm:$0xff] }
 0x395   :  { %12163 = vst [vmem:[#allocation47_spill] sm:$0xff] %v8223_v57  ;;  %v8236_v47 = vpop.permute.xlu0 %3044  ;;  %v8239_v4 = vmul.f32 %v12169_v25, %v1224_v43  ;;  %v1240_v30 = vmul.f32 %v12166_v2, %v1222_v56  ;;  %v8243_v59 = vmul.f32 %v12167_v32, %v1222_v56  ;;  %v1004_v53 = vsel %vm1000_vm11, %v999_v14, %v12171_v26  ;;  %v12172_v11 = vld [vmem:[#allocation106_spill] sm:$0xff] }
 0x396   :  { %12165 = vst [vmem:[#allocation48_spill] sm:$0xff] %v8230_v21  ;;  %12168 = vst [vmem:[#allocation49_spill] sm:$0xff] %v8236_v47  ;;  %2927 = vrot.lane.b32.xlu1 %v7528_v44, %s11900_s28  ;;  %v8251_v18 = vsel %vm985_vm8, %v1203_v12, %v12172_v11  ;;  %v8254_v47 = vadd.f32 %v1243_v36, %v8123_v38  ;;  %v8261_v61 = vadd.f32 %v1239_v51, %v8130_v3  ;;  %v12174_v12 = vld [vmem:[#allocation115_spill] sm:$0xff]  ;;  %v12176_v3 = vld [vmem:[#allocation116_spill] sm:$0xff] }
 0x397   :  { %12170 = vst [vmem:[#allocation52_spill] sm:$0xff] %v8239_v4  ;;  %2923 = vrot.lane.b32.xlu0 %v7534_v45, %s11900_s28  ;;  %v8265_v60 = vmul.f32 %v12169_v25, %v1222_v56  ;;  %v1002_v11 = vsel %vm1000_vm11, %v997_v0, %v12174_v12  ;;  %v8273_v39 = vadd.f32 %v1244_v31, %v8137_v62  ;;  %v12183_v4 = vld [vmem:[#allocation112_spill] sm:$0xff] }
 0x398   :  { %v8269_v38 = vpop.permute.xlu1 %3229  ;;  %v8276_v43 = vmul.f32 %v7856_v40, %v1004_v53  ;;  %v1009_v51 = vsel %vm1005_vm12, %v12171_v26, %v12176_v3  ;;  %v8292_v62 = vmul.f32 %v7853_v19, %v1004_v53  ;;  %v8295_v31 = vmul.f32 %v7853_v19, %v1002_v11  ;;  %v12178_v3 = vld [vmem:[#allocation117_spill] sm:$0xff] }
 0x399   :  { %12173 = vst [vmem:[#allocation50_spill] sm:$0xff] %v8265_v60  ;;  %12175 = vst [vmem:[#allocation53_spill] sm:$0xff] %v8269_v38  ;;  %v8281_v14 = vpop.permute.xlu0 %3225  ;;  %v8286_v38 = vadd.f32 %v1240_v30, %v8144_v49  ;;  %v8298_v26 = vmul.f32 %v7856_v40, %v1002_v11  ;;  %v1007_v0 = vsel %vm1005_vm12, %v12174_v12, %v12178_v3  ;;  %v12179_v49 = vld [vmem:[#allocation110_spill] sm:$0xff]  ;;  %v12182_v40 = vld [vmem:[#allocation111_spill] sm:$0xff] }
 0x39a   :  { %12177 = vst [vmem:[#allocation51_spill] sm:$0xff] %v8281_v14  ;;  %3074 = vrot.lane.b32.xlu1 %v7582_v23, %s11857_s23  ;;  %v1418_v36 = vsel %vm975_vm6, %v1414_v27, %v12179_v49  ;;  %v1028_v56 = vmul.f32 %v7844_v42, %v1004_v53  ;;  %v8310_v19 = vmul.f32 %v7880_v17, %v1009_v51  ;;  %v11637_v3 = vrot.slane %v8276_v43, 2  ;;  %v12185_v27 = vld [vmem:[#allocation113_spill] sm:$0xff] }
 0x39b   :  { %3070 = vrot.lane.b32.xlu0 %v7586_v8, %s11857_s23  ;;  %v1416_v57 = vsel %vm975_vm6, %v1412_v1, %v12182_v40  ;;  %v1429_v12 = vsel %vm990_vm9, %v1425_v50, %v12183_v4  ;;  %v1024_v30 = vmul.f32 %v7844_v42, %v1002_v11  ;;  %v1427_v53 = vsel %vm990_vm9, %v1423_v5, %v12185_v27  ;;  %v12187_v40 = vld [vmem:[#allocation122_spill] sm:$0xff] }
 0x39c   :  { %12180 = vst [vmem:[#allocation54_spill] sm:$0xff] %v8310_v19  ;;  %v8312_v14 = vpop.permute.xlu1 %3241  ;;  %v8325_v49 = vmul.f32 %v7869_v37, %v1009_v51  ;;  %v8331_v1 = vmul.f32 %v7880_v17, %v1007_v0  ;;  %v1029_v5 = vmul.f32 %v7866_v24, %v1009_v51  ;;  %v1025_v11 = vmul.f32 %v7866_v24, %v1007_v0 }
 0x39d   :  { %12181 = vst [vmem:[#allocation55_spill] sm:$0xff] %v8312_v14  ;;  %v8320_v60 = vpop.permute.xlu0 %3237  ;;  %v8328_v14 = vmul.f32 %v7869_v37, %v1007_v0  ;;  %v8342_v37 = vadd.f32 %v1028_v56, %v7841_v7  ;;  %v1433_v27 = vsel %vm995_vm10, %v1429_v12, %v12187_v40  ;;  %v12189_v42 = vrot.slane %v8085_v10, 2  ;;  %v12191_v56 = vld [vmem:[#allocation123_spill] sm:$0xff] }
 0x39e   :  { %12184 = vst [vmem:[#allocation56_spill] sm:$0xff] %v8320_v60  ;;  %12186 = vst [vmem:[#allocation57_spill] sm:$0xff] %v8331_v1  ;;  %3108 = vrot.lane.b32.xlu1 %v7528_v44, %s11905_s13  ;;  %v8358_v50 = vadd.f32 %v1024_v30, %v7841_v7  ;;  %v1431_v17 = vsel %vm995_vm10, %v1427_v53, %v12191_v56  ;;  %v12192_v60 = vld [vmem:[#allocation128_spill] sm:$0xff]  ;;  %v12195_v7 = vrot.slane %v8298_v26, 2  ;;  %v12196_v30 = vrot.slane %v8094_v46, 2 }
 0x39f   :  { %3104 = vrot.lane.b32.xlu0 %v7534_v45, %s11905_s13  ;;  %v8355_v51 = vsel %vm232_vm1, %v12189_v42, %v11637_v3  ;;  %v1437_v24 = vsel %vm1000_vm11, %v1433_v27, %v12192_v60  ;;  %v8381_v27 = vadd.f32 %v1029_v5, %v7863_v52  ;;  %v12198_v56 = vrot.slane %v8292_v62, 1 }
 0x3a0   :  { %v8348_v4 = vpop.permute.xlu1 %2833  ;;  %12190 = vst [vmem:[#allocation59_spill] sm:$0xff] %v8355_v51  ;;  %v8378_v53 = vsel %vm232_vm1, %v12196_v30, %v12195_v7  ;;  %v12199_v3 = vrot.slane %v8082_v48, 1  ;;  %v12201_v12 = vrot.slane %v8089_v13, 1  ;;  %v12202_v46 = vrot.slane %v8310_v19, 2 }
 0x3a1   :  { %12188 = vst [vmem:[#allocation58_spill] sm:$0xff] %v8348_v4  ;;  %v8364_v0 = vpop.permute.xlu0 %2829  ;;  %v12194_v4 = vld [vmem:[#allocation129_spill] sm:$0xff]  ;;  %12197 = vst [vmem:[#allocation61_spill] sm:$0xff] %v8378_v53  ;;  %v12203_v5 = vrot.slane %v8101_v58, 2  ;;  %v8407_v48 = vadd.f32 %v1025_v11, %v7863_v52  ;;  %v8419_v58 = vmul.f32 %v8022_v6, %v1437_v24 }
 0x3a2   :  { %12193 = vst [vmem:[#allocation60_spill] sm:$0xff] %v8364_v0  ;;  %v1435_v42 = vsel %vm1000_vm11, %v1431_v17, %v12194_v4  ;;  %3267 = vrot.lane.b32.xlu1 %v7582_v23, %s11860_s15  ;;  %v8388_v40 = vsel %vm143_vm0, %v12199_v3, %v12198_v56  ;;  %v12200_v17 = vrot.slane %v8295_v31, 1  ;;  %v12205_v3 = vld [vmem:[#allocation118_spill] sm:$0xff]  ;;  %v12207_v56 = vld [vmem:[#allocation119_spill] sm:$0xff]  ;;  %v12215_v0 = vrot.slane %v8098_v54, 1  ;;  %v12220_v54 = vld [vmem:[#allocation125_spill] sm:$0xff] }
 0x3a3   :  { %3263 = vrot.lane.b32.xlu0 %v7586_v8, %s11860_s15  ;;  %v8404_v7 = vsel %vm232_vm1, %v12203_v5, %v12202_v46  ;;  %v1213_v13 = vsel %vm990_vm9, %v8227_v29, %v12205_v3  ;;  %v8422_v46 = vmul.f32 %v8033_v16, %v1437_v24  ;;  %v1456_v52 = vmul.f32 %v8019_v34, %v1435_v42  ;;  %s12287_s15 = smov 3  }
 0x3a4   :  { %v8395_v10 = vsel %vm143_vm0, %v12201_v12, %v12200_v17  ;;  %12204 = vst [vmem:[#allocation62_spill] sm:$0xff] %v8404_v7  ;;  %v1460_v12 = vmul.f32 %v8019_v34, %v1437_v24  ;;  %v8413_v30 = vpop.permute.xlu1 %2867  ;;  %v1211_v17 = vsel %vm990_vm9, %v8251_v18, %v12207_v56  ;;  %v12210_v29 = vrot.slane %v8331_v1, 2 }
 0x3a5   :  { %12206 = vst [vmem:[#allocation63_spill] sm:$0xff] %v8413_v30  ;;  %12208 = vst [vmem:[#allocation64_spill] sm:$0xff] %v8422_v46  ;;  %v8425_v11 = vpop.permute.xlu0 %2863  ;;  %v12211_v5 = vrot.slane %v8112_v28, 2  ;;  %v12213_v30 = vld [vmem:[#allocation120_spill] sm:$0xff]  ;;  %v12214_v56 = vrot.slane %v8325_v49, 1  ;;  %v12216_v7 = vrot.slane %v8328_v14, 1 }
 0x3a6   :  { %12209 = vst [vmem:[#allocation65_spill] sm:$0xff] %v8425_v11  ;;  %v1422_v18 = vsel %vm980_vm7, %v1418_v36, %v12213_v30  ;;  %v12217_v11 = vrot.slane %v8109_v20, 1  ;;  %3301 = vrot.lane.b32.xlu1 %v7528_v44, %s11910_s26  ;;  %v12218_v28 = vld [vmem:[#allocation121_spill] sm:$0xff]  ;;  %v12219_v30 = vld [vmem:[#allocation124_spill] sm:$0xff]  ;;  %v12221_v20 = vld [vmem:[#allocation126_spill] sm:$0xff] }
 0x3a7   :  { %v8432_v3 = vsel %vm232_vm1, %v12211_v5, %v12210_v29  ;;  %v8441_v24 = vsel %vm143_vm0, %v12215_v0, %v12214_v56  ;;  %v1420_v36 = vsel %vm980_vm7, %v1416_v57, %v12218_v28  ;;  %v1217_v29 = vsel %vm995_vm10, %v1213_v13, %v12219_v30  ;;  %3297 = vrot.lane.b32.xlu0 %v7534_v45, %s11910_s26  ;;  %v12238_v46 = vld [vmem:[#allocation142_spill] sm:$0xff] }
 0x3a8   :  { %12212 = vst [vmem:[#allocation66_spill] sm:$0xff] %v8432_v3  ;;  %v8448_v53 = vsel %vm143_vm0, %v12217_v11, %v12216_v7  ;;  %v1215_v0 = vsel %vm995_vm10, %v1211_v17, %v12220_v54  ;;  %v8459_v5 = vmul.f32 %v8022_v6, %v1435_v42  ;;  %v1426_v7 = vsel %vm985_vm8, %v1422_v18, %v12221_v20  ;;  %v12222_v11 = vld [vmem:[#allocation127_spill] sm:$0xff]  ;;  %v8471_v13 = vpop.permute.xlu1 %3014  ;;  %v12225_v3 = vld [vmem:[#allocation130_spill] sm:$0xff] }
 0x3a9   :  { %v1424_v56 = vsel %vm985_vm8, %v1420_v36, %v12222_v11  ;;  %v1468_v57 = vadd.f32 %v1460_v12, %v8254_v47  ;;  %v8469_v28 = vmul.f32 %v8033_v16, %v1435_v42  ;;  %12224 = vst [vmem:[#allocation68_spill] sm:$0xff] %v8471_v13  ;;  %v1464_v54 = vadd.f32 %v1456_v52, %v8261_v61  ;;  %v8479_v20 = vpop.permute.xlu0 %3010  ;;  %v12227_v36 = vld [vmem:[#allocation132_spill] sm:$0xff]  ;;  %v12228_v12 = vld [vmem:[#allocation133_spill] sm:$0xff] }
 0x3aa   :  { %v1441_v18 = vsel %vm1005_vm12, %v12192_v60, %v12225_v3  ;;  %12226 = vst [vmem:[#allocation69_spill] sm:$0xff] %v8479_v20  ;;  %v1221_v47 = vsel %vm1000_vm11, %v1217_v29, %v12227_v36  ;;  %v8485_v42 = vsel %vm1000_vm11, %v1215_v0, %v12228_v12  ;;  %v12229_v11 = vld [vmem:[#allocation136_spill] sm:$0xff]  ;;  %v12230_v13 = vld [vmem:[#allocation137_spill] sm:$0xff]  ;;  %2893 = vrot.lane.b32.xlu1 %v7582_v23, %s11865_s24  ;;  %v12231_v60 = vld [vmem:[#allocation134_spill] sm:$0xff] }
 0x3ab   :  { %12223 = vst [vmem:[#allocation67_spill] sm:$0xff] %v8469_v28  ;;  %v1430_v17 = vsel %vm990_vm9, %v1426_v7, %v12229_v11  ;;  %v1428_v30 = vsel %vm990_vm9, %v1424_v56, %v12230_v13  ;;  %v8497_v52 = vsel %vm1005_vm12, %v12227_v36, %v12231_v60  ;;  %v12232_v3 = vld [vmem:[#allocation138_spill] sm:$0xff]  ;;  %v12233_v0 = vld [vmem:[#allocation139_spill] sm:$0xff]  ;;  %2889 = vrot.lane.b32.xlu0 %v7586_v8, %s11865_s24  ;;  %v12235_v11 = vld [vmem:[#allocation140_spill] sm:$0xff] }
 0x3ac   :  { %v1434_v29 = vsel %vm995_vm10, %v1430_v17, %v12232_v3  ;;  %v1432_v20 = vsel %vm995_vm10, %v1428_v30, %v12233_v0  ;;  %v1461_v7 = vmul.f32 %v8044_v55, %v1441_v18  ;;  %v12234_v56 = vld [vmem:[#allocation135_spill] sm:$0xff]  ;;  %v12236_v60 = vld [vmem:[#allocation141_spill] sm:$0xff]  ;;  %v8519_v3 = vpop.permute.xlu1 %3026  ;;  %v1245_v0 = vmul.f32 %v7934_v35, %v1221_v47 }
 0x3ad   :  { %v8509_v13 = vsel %vm1005_vm12, %v12228_v12, %v12234_v56  ;;  %v8513_v36 = vsel %vm1000_vm11, %v1434_v29, %v12235_v11  ;;  %v8517_v17 = vsel %vm1000_vm11, %v1432_v20, %v12236_v60  ;;  %12237 = vst [vmem:[#allocation70_spill] sm:$0xff] %v8519_v3  ;;  %v1241_v61 = vmul.f32 %v7934_v35, %v8485_v42  ;;  %v8530_v29 = vpop.permute.xlu0 %3022  ;;  %v12240_v56 = vld [vmem:[#allocation36_spill] sm:$0xff]  ;;  %v12241_v20 = vld [vmem:[#allocation37_spill] sm:$0xff]  ;;  %v12242_v3 = vld [vmem:[#allocation143_spill] sm:$0xff] }
 0x3ae   :  { %v8528_v12 = vsel %vm1005_vm12, %v12235_v11, %v12238_v46  ;;  %12239 = vst [vmem:[#allocation71_spill] sm:$0xff] %v8530_v29  ;;  %v8533_v1 = vmul.f32 %v12240_v56, %v1441_v18  ;;  %v8536_v51 = vmul.f32 %v12241_v20, %v1441_v18  ;;  %v1246_v30 = vmul.f32 %v12166_v2, %v8497_v52  ;;  %v12243_v46 = vld [vmem:[#allocation131_spill] sm:$0xff] }
 0x3af   :  { %v8543_v35 = vsel %vm1005_vm12, %v12236_v60, %v12242_v3  ;;  %3086 = vrot.lane.b32.xlu1 %v7582_v23, %s11870_s25  ;;  %v1439_v11 = vsel %vm1005_vm12, %v12194_v4, %v12243_v46  ;;  %v1242_v29 = vmul.f32 %v12166_v2, %v8509_v13  ;;  %v1462_v18 = vmul.f32 %v8019_v34, %v8513_v36 }
 0x3b0   :  { %v1458_v28 = vmul.f32 %v8019_v34, %v8517_v17  ;;  %3082 = vrot.lane.b32.xlu0 %v7586_v8, %s11870_s25  ;;  %v1525_v60 = vadd.f32 %v8388_v40, %v1468_v57  ;;  %v8560_v3 = vadd.f32 %v8395_v10, %v1464_v54  ;;  %v1469_v19 = vadd.f32 %v1461_v7, %v8273_v39  ;;  %v8565_v2 = vpop.permute.xlu1 %3060  ;;  %s12614_s25 = sld [smem:[#allocation279_spill]] }
 0x3b1   :  { %v1463_v4 = vmul.f32 %v8044_v55, %v8528_v12  ;;  %v1253_v46 = vadd.f32 %v1245_v0, %v8342_v37  ;;  %v1548_v21 = vmul.f32 %v7943_v41, %v1221_v47  ;;  %v1249_v34 = vadd.f32 %v1241_v61, %v8358_v50  ;;  %v8572_v40 = vpop.permute.xlu0 %3056 }
 0x3b2   :  { %v1459_v63 = vmul.f32 %v8044_v55, %v8543_v35  ;;  %12244 = vst [vmem:[#allocation72_spill] sm:$0xff] %v8572_v40  ;;  %v1457_v57 = vmul.f32 %v8044_v55, %v1439_v11  ;;  %v1254_v54 = vadd.f32 %v1246_v30, %v8381_v27  ;;  %v1544_v37 = vmul.f32 %v7943_v41, %v8485_v42 }
 0x3b3   :  { %3120 = vrot.lane.b32.xlu1 %v7528_v44, %s11947_s10  ;;  %v1250_v50 = vadd.f32 %v1242_v29, %v8407_v48  ;;  %v1470_v61 = vadd.f32 %v1462_v18, %v1253_v46  ;;  %v1466_v7 = vadd.f32 %v1458_v28, %v1249_v34  ;;  %v1600_v0 = vmul.f32 %v12240_v56, %v1439_v11 }
 0x3b4   :  { %3116 = vrot.lane.b32.xlu0 %v7534_v45, %s11947_s10  ;;  %v8587_v39 = vmul.f32 %v12241_v20, %v1439_v11  ;;  %v1549_v55 = vmul.f32 %v12167_v32, %v8497_v52  ;;  %v1471_v27 = vadd.f32 %v1463_v4, %v1254_v54  ;;  %v8591_v30 = vpop.permute.xlu1 %3253  ;;  %v1565_v10 = vrot.slane %v1548_v21, 1 }
 0x3b5   :  { %v1545_v41 = vmul.f32 %v12167_v32, %v8509_v13  ;;  %v1605_v48 = vmul.f32 %v8022_v6, %v8513_v36  ;;  %v1467_v28 = vadd.f32 %v1459_v63, %v1250_v50  ;;  %v8597_v29 = vpop.permute.xlu0 %3249  ;;  %v1465_v18 = vadd.f32 %v1457_v57, %v8286_v38 }
 0x3b6   :  { %v8601_v11 = vmul.f32 %v12158_v33, %v1221_v47  ;;  %v1601_v4 = vmul.f32 %v8022_v6, %v8517_v17  ;;  %v1606_v21 = vmul.f32 %v12240_v56, %v8528_v12  ;;  %v1559_v32 = vrot.slane %v1544_v37, 1 }
 0x3b7   :  { %3279 = vrot.lane.b32.xlu1 %v7582_v23, %s11877_s1  ;;  %v12245_v46 = vrot.slane %v8292_v62, 1  ;;  %v12246_v34 = vrot.slane %v8295_v31, 1  ;;  %v1602_v38 = vmul.f32 %v12240_v56, %v8543_v35  ;;  %v1526_v6 = vadd.f32 %v8441_v24, %v1469_v19 }
 0x3b8   :  { %3275 = vrot.lane.b32.xlu0 %v7586_v8, %s11877_s1  ;;  %v1618_v47 = vrot.slane %v1600_v0, 1  ;;  %v1568_v57 = vrot.slane %v1549_v55, 1  ;;  %v12247_v50 = vrot.slane %v8325_v49, 1  ;;  %v8620_v37 = vpop.permute.xlu1 %2845  ;;  %v12248_v62 = vrot.slane %v8205_v9, 1 }
 0x3b9   :  { %v1527_v63 = vadd.f32 %v12245_v46, %v1470_v61  ;;  %v1523_v54 = vadd.f32 %v12246_v34, %v1466_v7  ;;  %v1562_v61 = vrot.slane %v1545_v41, 1  ;;  %v1622_v7 = vrot.slane %v1605_v48, 1  ;;  %v8627_v34 = vpop.permute.xlu0 %2841 }
 0x3ba   :  { %v1528_v40 = vadd.f32 %v12247_v50, %v1471_v27  ;;  %v1566_v31 = vsel %vm143_vm0, %v12248_v62, %v1565_v10  ;;  %v12249_v56 = vrot.slane %v8328_v14, 1  ;;  %v1522_v19 = vadd.f32 %v8448_v53, %v1465_v18 }
 0x3bb   :  { %v1736_v24 = vrot.slane %v8601_v11, 2  ;;  %v1616_v0 = vrot.slane %v1601_v4, 1  ;;  %v1625_v49 = vrot.slane %v1606_v21, 1  ;;  %3313 = vrot.lane.b32.xlu1 %v7528_v44, %s11950_s8  ;;  %v12250_v9 = vrot.slane %v8221_v22, 1 }
 0x3bc   :  { %v1524_v46 = vadd.f32 %v12249_v56, %v1467_v28  ;;  %v1584_v27 = vadd.f32 %v1565_v10, %v1527_v63  ;;  %v1580_v41 = vadd.f32 %v1559_v32, %v1523_v54  ;;  %v1619_v48 = vrot.slane %v1602_v38, 1  ;;  %3309 = vrot.lane.b32.xlu0 %v7534_v45, %s11950_s8  ;;  %v8643_v21 = vpop.permute.xlu1 %2879 }
 0x3bd   :  { %v1560_v55 = vsel %vm143_vm0, %v12250_v9, %v1559_v32  ;;  %v1582_v14 = vadd.f32 %v1566_v31, %v1525_v60  ;;  %v1715_v53 = vmul.f32 %v12158_v33, %v8485_v42  ;;  %v12251_v28 = vrot.slane %v8234_v15, 1  ;;  %12252 = vst [vmem:[#allocation73_spill] sm:$0xff] %v8643_v21  ;;  %v8653_v33 = vpop.permute.xlu0 %2875  ;;  %v12399_v21 = vld [vmem:[#allocation219_spill] sm:$0xff] }
 0x3be   :  { %v1585_v4 = vadd.f32 %v1568_v57, %v1528_v40  ;;  %v1720_v22 = vmul.f32 %v12169_v25, %v8497_v52  ;;  %v12253_v10 = vrot.slane %v8243_v59, 1  ;;  %v12254_v63 = vrot.slane %v8419_v58, 1  ;;  %12255 = vst [vmem:[#allocation74_spill] sm:$0xff] %v8653_v33 }
 0x3bf   :  { %v1569_v18 = vsel %vm143_vm0, %v12251_v28, %v1568_v57  ;;  %v1581_v54 = vadd.f32 %v1562_v61, %v1524_v46  ;;  %v1578_v15 = vadd.f32 %v1560_v55, %v8560_v3  ;;  %v1716_v42 = vmul.f32 %v12169_v25, %v8509_v13  ;;  %2905 = vrot.lane.b32.xlu1 %v7582_v23, %s11882_s21 }
 0x3c0   :  { %v1563_v32 = vsel %vm143_vm0, %v12253_v10, %v1562_v61  ;;  %v1623_v60 = vsel %vm143_vm0, %v12254_v63, %v1622_v7  ;;  %v12256_v40 = vrot.slane %v8459_v5, 1  ;;  %v12257_v59 = vrot.slane %v8533_v1, 1  ;;  %2901 = vrot.lane.b32.xlu0 %v7586_v8, %s11882_s21  ;;  %v8669_v31 = vpop.permute.xlu1 %3038 }
 0x3c1   :  { %v1583_v58 = vadd.f32 %v1569_v18, %v1526_v6  ;;  %v1641_v57 = vadd.f32 %v1622_v7, %v1584_v27  ;;  %v1637_v50 = vadd.f32 %v1616_v0, %v1580_v41  ;;  %v1620_v62 = vsel %vm143_vm0, %v1618_v47, %v1619_v48  ;;  %12258 = vst [vmem:[#allocation75_spill] sm:$0xff] %v8669_v31  ;;  %v8672_v9 = vpop.permute.xlu0 %3034  ;;  %v12266_v18 = vld [vmem:[#allocation54_spill] sm:$0xff]  ;;  %v12366_v31 = vld [vmem:[#allocation200_spill] sm:$0xff] }
 0x3c2   :  { %v1617_v52 = vsel %vm143_vm0, %v12256_v40, %v1616_v0  ;;  %v1626_v38 = vsel %vm143_vm0, %v12257_v59, %v1625_v49  ;;  %v1730_v25 = vrot.slane %v1715_v53, 2  ;;  %v1579_v13 = vadd.f32 %v1563_v32, %v1522_v19  ;;  %12259 = vst [vmem:[#allocation78_spill] sm:$0xff] %v8672_v9  ;;  %v12274_v59 = vld [vmem:[#allocation52_spill] sm:$0xff]  ;;  %v12365_v9 = vld [vmem:[#allocation202_spill] sm:$0xff] }
 0x3c3   :  { %v1639_v5 = vadd.f32 %v1623_v60, %v1582_v14  ;;  %v1642_v3 = vadd.f32 %v1625_v49, %v1585_v4  ;;  %v1789_v1 = vrot.slane %v8587_v39, 2  ;;  %v1635_v61 = vadd.f32 %v1617_v52, %v1578_v15  ;;  %3098 = vrot.lane.b32.xlu1 %v7582_v23, %s11887_s20  ;;  %v12304_v39 = vld [vmem:[#allocation155_spill] sm:$0xff] }
 0x3c4   :  { %v1640_v56 = vadd.f32 %v1626_v38, %v1583_v58  ;;  %v1638_v46 = vadd.f32 %v1619_v48, %v1581_v54  ;;  %v1739_v6 = vrot.slane %v1720_v22, 2  ;;  %v1733_v7 = vrot.slane %v1716_v42, 2  ;;  %3094 = vrot.lane.b32.xlu0 %v7586_v8, %s11887_s20  ;;  %v8699_v10 = vpop.permute.xlu1 %3072  ;;  %v12271_v54 = vld [vmem:[#allocation61_spill] sm:$0xff]  ;;  %v12272_v42 = vld [vmem:[#allocation62_spill] sm:$0xff]  ;;  %s5960_s20 = smov 80  }
 0x3c5   :  { %v1776_v47 = vmul.f32 %v8033_v16, %v8513_v36  ;;  %v1636_v0 = vadd.f32 %v1620_v62, %v1579_v13  ;;  %v12260_v19 = vrot.slane %v8276_v43, 2  ;;  %v12261_v55 = vrot.slane %v8298_v26, 2  ;;  %v12262_v36 = vld [vmem:[#allocation46_spill] sm:$0xff]  ;;  %v12264_v43 = vld [vmem:[#allocation48_spill] sm:$0xff]  ;;  %v8707_v52 = vpop.permute.xlu0 %3068 }
 0x3c6   :  { %v1772_v41 = vmul.f32 %v8033_v16, %v8517_v17  ;;  %v1777_v48 = vmul.f32 %v12241_v20, %v8528_v12  ;;  %v12263_v14 = vrot.slane %v12262_v36, 2  ;;  %v12265_v28 = vrot.slane %v12264_v43, 2  ;;  %v12268_v16 = vld [vmem:[#allocation59_spill] sm:$0xff]  ;;  %v12269_v12 = vld [vmem:[#allocation57_spill] sm:$0xff]  ;;  %12273 = vst [vmem:[#allocation76_spill] sm:$0xff] %v8707_v52 }
 0x3c7   :  { %v1698_v49 = vadd.f32 %v12260_v19, %v1641_v57  ;;  %v1694_v27 = vadd.f32 %v12261_v55, %v1637_v50  ;;  %v12267_v4 = vrot.slane %v12266_v18, 2  ;;  %v1696_v17 = vadd.f32 %v12268_v16, %v1639_v5  ;;  %v12276_v57 = vld [vmem:[#allocation50_spill] sm:$0xff]  ;;  %3132 = vrot.lane.b32.xlu1 %v7528_v44, %s11959_s9  ;;  %v12279_v19 = vld [vmem:[#allocation144_spill] sm:$0xff]  ;;  %v12353_v52 = vld [vmem:[#allocation189_spill] sm:$0xff] }
 0x3c8   :  { %v1737_v53 = vsel %vm232_vm1, %v12263_v14, %v1736_v24  ;;  %v1731_v26 = vsel %vm232_vm1, %v12265_v28, %v1730_v25  ;;  %v12270_v32 = vrot.slane %v12269_v12, 2  ;;  %v1773_v60 = vmul.f32 %v12241_v20, %v8543_v35  ;;  %v12278_v5 = vld [vmem:[#allocation66_spill] sm:$0xff]  ;;  %3128 = vrot.lane.b32.xlu0 %v7534_v45, %s11959_s9  ;;  %v12282_v14 = vld [vmem:[#allocation95_spill] sm:$0xff]  ;;  %v8728_v28 = vpop.permute.xlu1 %3265 }
 0x3c9   :  { %v1699_v22 = vadd.f32 %v12267_v4, %v1642_v3  ;;  %v1692_v15 = vadd.f32 %v12271_v54, %v1635_v61  ;;  %v1697_v40 = vadd.f32 %v12272_v42, %v1640_v56  ;;  %v12275_v38 = vrot.slane %v12274_v59, 2  ;;  %v12280_v55 = vld [vmem:[#allocation94_spill] sm:$0xff]  ;;  %v12285_v4 = vld [vmem:[#allocation64_spill] sm:$0xff] }
 0x3ca   :  { %v1695_v63 = vadd.f32 %v12270_v32, %v1638_v46  ;;  %v12277_v50 = vrot.slane %v12276_v57, 2  ;;  %v1793_v13 = vrot.slane %v1776_v47, 2  ;;  %v1693_v3 = vadd.f32 %v12278_v5, %v1636_v0  ;;  %v12281_v47 = vld [vmem:[#allocation145_spill] sm:$0xff]  ;;  %v5200_v42 = vld [vmem:[%s11507_s3 + $0x14] ss:$8 sm:$0x3] }
 0x3cb   :  { %v1740_v58 = vsel %vm232_vm1, %v12275_v38, %v1739_v6  ;;  %v1755_v20 = vadd.f32 %v1736_v24, %v1698_v49  ;;  %v1751_v35 = vadd.f32 %v1730_v25, %v1694_v27  ;;  %v1787_v61 = vrot.slane %v1772_v41, 2  ;;  %v8730_v27 = vpop.permute.xlu0 %3261  ;;  %v12283_v41 = vld [vmem:[#allocation146_spill] sm:$0xff]  ;;  %3144 = vrot.lane.b32.xlu1 %v7528_v44, %s12287_s15  ;;  %v12291_v32 = vld [vmem:[#allocation149_spill] sm:$0xff] }
 0x3cc   :  { %v1734_v62 = vsel %vm232_vm1, %v12277_v50, %v1733_v7  ;;  %v1796_v56 = vrot.slane %v1777_v48, 2  ;;  %v1756_v46 = vadd.f32 %v1739_v6, %v1699_v22  ;;  %v1952_v36 = vsel %vm955_vm2, %v12280_v55, %v12279_v19  ;;  %v12284_v48 = vld [vmem:[#allocation147_spill] sm:$0xff]  ;;  %3140 = vrot.lane.b32.xlu0 %v7534_v45, %s12287_s15  ;;  %v8767_v50 = vpop.permute.xlu1 %2857 }
 0x3cd   :  { %v1950_v0 = vsel %vm955_vm2, %v12282_v14, %v12281_v47  ;;  %v1753_v43 = vadd.f32 %v1737_v53, %v1696_v17  ;;  %v1752_v11 = vadd.f32 %v1733_v7, %v1695_v63  ;;  %v1790_v24 = vrot.slane %v1773_v60, 2  ;;  %v12301_v19 = vld [vmem:[#allocation151_spill] sm:$0xff]  ;;  %v12303_v47 = vld [vmem:[#allocation97_spill] sm:$0xff] }
 0x3ce   :  { %v1749_v25 = vadd.f32 %v1731_v26, %v1692_v15  ;;  %v1754_v49 = vadd.f32 %v1740_v58, %v1697_v40  ;;  %v1956_v6 = vsel %vm960_vm3, %v1952_v36, %v12283_v41  ;;  %v1954_v18 = vsel %vm960_vm3, %v1950_v0, %v12284_v48  ;;  %v12290_v26 = vld [vmem:[#allocation148_spill] sm:$0xff]  ;;  %v5197_v15 = vld [vmem:[%s11507_s3 + $0x11] ss:$8 sm:$0x3]  ;;  %v12293_v40 = vld [vmem:[#allocation67_spill] sm:$0xff] }
 0x3cf   :  { %v12286_v22 = vrot.slane %v12285_v4, 2  ;;  %v1750_v12 = vadd.f32 %v1734_v62, %v1693_v3  ;;  %v8741_v7 = vadd.f32 %v1793_v13, %v1755_v20  ;;  %v8743_v53 = vadd.f32 %v1787_v61, %v1751_v35  ;;  %v8781_v35 = vpop.permute.xlu0 %2853  ;;  %v12302_v36 = vld [vmem:[#allocation154_spill] sm:$0xff]  ;;  %3291 = vrot.lane.b32.xlu1 %v7582_v23, %s11892_s19 }
 0x3d0   :  { %v1960_v17 = vsel %vm965_vm4, %v1956_v6, %v12290_v26  ;;  %v1958_v63 = vsel %vm965_vm4, %v1954_v18, %v12291_v32  ;;  %v8751_v60 = vadd.f32 %v1796_v56, %v1756_v46  ;;  %v12294_v59 = vrot.slane %v12293_v40, 2  ;;  %12297 = vst [vmem:[#allocation82_spill] sm:$0xff] %v8781_v35  ;;  %v12300_v46 = vld [vmem:[#allocation153_spill] sm:$0xff]  ;;  %3287 = vrot.lane.b32.xlu0 %v7586_v8, %s11892_s19  ;;  %v12310_v18 = vld [vmem:[#allocation158_spill] sm:$0xff]  ;;  %v8819_v26 = vpop.permute.xlu1 %2891  ;;  %v12314_v40 = vld [vmem:[#allocation160_spill] sm:$0xff]  ;;  %s12321_s19 = smov 94  }
 0x3d1   :  { %v1794_v16 = vsel %vm232_vm1, %v12286_v22, %v1793_v13  ;;  %12288 = vst [vmem:[#allocation79_spill] sm:$0xff] %v8741_v7  ;;  %12289 = vst [vmem:[#allocation77_spill] sm:$0xff] %v8743_v53  ;;  %v12295_v58 = vrot.slane %v8536_v51, 2  ;;  %v8769_v62 = vadd.f32 %v1790_v24, %v1752_v11  ;;  %v5203_v13 = vld [vmem:[%s11507_s3 + $0x17] ss:$8 sm:$0x3]  ;;  %v1791_v20 = vsel %vm232_vm1, %v1789_v1, %v1790_v24 }
 0x3d2   :  { %12292 = vst [vmem:[#allocation80_spill] sm:$0xff] %v8751_v60  ;;  %v8753_v54 = vadd.f32 %v1794_v16, %v1753_v43  ;;  %v1788_v38 = vsel %vm232_vm1, %v12294_v59, %v1787_v61  ;;  %v12298_v51 = vld [vmem:[#allocation152_spill] sm:$0xff]  ;;  %v12299_v61 = vld [vmem:[#allocation150_spill] sm:$0xff]  ;;  %v2167_v55 = vsel %vm955_vm2, %v12301_v19, %v12300_v46  ;;  %v1953_v14 = vsel %vm955_vm2, %v12303_v47, %v12302_v36  ;;  %v12309_v6 = vld [vmem:[#allocation157_spill] sm:$0xff] }
 0x3d3   :  { %v1797_v57 = vsel %vm232_vm1, %v12295_v58, %v1796_v56  ;;  %12296 = vst [vmem:[#allocation81_spill] sm:$0xff] %v8769_v62  ;;  %v8774_v5 = vadd.f32 %v1788_v38, %v1749_v25  ;;  %v2169_v56 = vsel %vm955_vm2, %v12299_v61, %v12298_v51  ;;  %v8792_v0 = vadd.f32 %v1791_v20, %v1750_v12  ;;  %v12305_v1 = vld [vmem:[#allocation98_spill] sm:$0xff]  ;;  %v12306_v11 = vld [vmem:[#allocation156_spill] sm:$0xff]  ;;  %v8831_v58 = vpop.permute.xlu0 %2887  ;;  %v12319_v61 = vld [vmem:[#allocation163_spill] sm:$0xff] }
 0x3d4   :  { %v8776_v3 = vadd.f32 %v1797_v57, %v1754_v49  ;;  %v1951_v43 = vsel %vm955_vm2, %v12305_v1, %v12304_v39  ;;  %v1964_v24 = vsel %vm970_vm5, %v1960_v17, %v12306_v11  ;;  %v12307_v25 = vld [vmem:[#allocation20_spill] sm:$0xff]  ;;  %v1962_v48 = vsel %vm970_vm5, %v1958_v63, %v12309_v6  ;;  %v12311_v16 = vld [vmem:[#allocation22_spill] sm:$0xff]  ;;  %12312 = vst [vmem:[#allocation83_spill] sm:$0xff] %v8819_v26  ;;  %v12313_v17 = vld [vmem:[#allocation159_spill] sm:$0xff] }
 0x3d5   :  { %v8802_v49 = vrot.slane %v5197_v15, %v12307_v25  ;;  %v8805_v41 = vrot.slane %v5200_v42, %v12307_v25  ;;  %v2173_v4 = vsel %vm960_vm3, %v2169_v56, %v12310_v18  ;;  %v8814_v22 = vrot.slane %v5203_v13, %v12307_v25  ;;  %12316 = vst [vmem:[#allocation86_spill] sm:$0xff] %v8831_v58  ;;  %v12317_v57 = vld [vmem:[#allocation161_spill] sm:$0xff]  ;;  %v12318_v20 = vld [vmem:[#allocation162_spill] sm:$0xff]  ;;  %v12320_v46 = vld [vmem:[#allocation164_spill] sm:$0xff] }
 0x3d6   :  { %v8817_v12 = vrot.slane %v5197_v15, %v12311_v16  ;;  %v2171_v32 = vsel %vm960_vm3, %v2167_v55, %v12313_v17  ;;  %v1957_v59 = vsel %vm960_vm3, %v1953_v14, %v12314_v40  ;;  %v8826_v38 = vrot.slane %v5200_v42, %v12311_v16  ;;  %3325 = vrot.lane.b32.xlu1 %v7528_v44, %s12321_s19  ;;  %v12322_v42 = vld [vmem:[#allocation165_spill] sm:$0xff]  ;;  %v12323_v55 = vld [vmem:[#allocation168_spill] sm:$0xff]  ;;  %v12324_v36 = vld [vmem:[#allocation166_spill] sm:$0xff] }
 0x3d7   :  { %12308 = vst [vmem:[#allocation84_spill] sm:$0xff] %v8805_v41  ;;  %v8829_v63 = vrot.slane %v5203_v13, %v12311_v16  ;;  %v1955_v15 = vsel %vm960_vm3, %v1951_v43, %v12317_v57  ;;  %v1968_v51 = vsel %vm975_vm6, %v1964_v24, %v12318_v20  ;;  %v1966_v56 = vsel %vm975_vm6, %v1962_v48, %v12319_v61  ;;  %v12325_v14 = vld [vmem:[#allocation169_spill] sm:$0xff]  ;;  %v12326_v39 = vld [vmem:[#allocation167_spill] sm:$0xff]  ;;  %v12327_v43 = vld [vmem:[#allocation170_spill] sm:$0xff] }
 0x3d8   :  { %v2177_v19 = vsel %vm965_vm4, %v2173_v4, %v12320_v46  ;;  %v2175_v13 = vsel %vm965_vm4, %v2171_v32, %v12322_v42  ;;  %v2386_v47 = vsel %vm955_vm2, %v12324_v36, %v12323_v55  ;;  %v2384_v1 = vsel %vm955_vm2, %v12326_v39, %v12325_v14  ;;  %v5198_v24 = vld [vmem:[%s11507_s3 + $0x12] ss:$8 sm:$0x3]  ;;  %v5201_v6 = vld [vmem:[%s11507_s3 + $0x15] ss:$8 sm:$0x3]  ;;  %3321 = vrot.lane.b32.xlu0 %v7534_v45, %s12321_s19  ;;  %v8873_v46 = vpop.permute.xlu1 %3050 }
 0x3d9   :  { %12315 = vst [vmem:[#allocation85_spill] sm:$0xff] %v8829_v63  ;;  %v1961_v11 = vsel %vm965_vm4, %v1957_v59, %v12327_v43  ;;  %v12328_v48 = vld [vmem:[#allocation171_spill] sm:$0xff]  ;;  %v12329_v4 = vld [vmem:[#allocation172_spill] sm:$0xff]  ;;  %v12330_v32 = vld [vmem:[#allocation173_spill] sm:$0xff]  ;;  %v8891_v62 = vrot.slane %v5198_v24, %v12307_v25  ;;  %v2387_v53 = vsel %vm955_vm2, %v12366_v31, %v12365_v9 }
 0x3da   :  { %v1959_v18 = vsel %vm965_vm4, %v1955_v15, %v12328_v48  ;;  %v1972_v17 = vsel %vm980_vm7, %v1968_v51, %v12329_v4  ;;  %v1970_v40 = vsel %vm980_vm7, %v1966_v56, %v12330_v32  ;;  %v12331_v59 = vld [vmem:[#allocation176_spill] sm:$0xff]  ;;  %v12332_v57 = vld [vmem:[#allocation174_spill] sm:$0xff]  ;;  %12333 = vst [vmem:[#allocation87_spill] sm:$0xff] %v8873_v46  ;;  %v12334_v42 = vld [vmem:[#allocation177_spill] sm:$0xff]  ;;  %v8884_v48 = vpop.permute.xlu0 %3046  ;;  %2917 = vrot.lane.b32.xlu1 %v7582_v23, %s11897_s0 }
 0x3db   :  { %v2170_v20 = vsel %vm955_vm2, %v12332_v57, %v12331_v59  ;;  %v5204_v61 = vld [vmem:[%s11507_s3 + $0x20] ss:$8 sm:$0x3]  ;;  %v12336_v36 = vld [vmem:[#allocation178_spill] sm:$0xff]  ;;  %12339 = vst [vmem:[#allocation88_spill] sm:$0xff] %v8884_v48  ;;  %v12340_v4 = vld [vmem:[#allocation181_spill] sm:$0xff] }
 0x3dc   :  { %v12335_v55 = vld [vmem:[#allocation175_spill] sm:$0xff]  ;;  %v2181_v51 = vsel %vm970_vm5, %v2177_v19, %v12336_v36  ;;  %v12338_v39 = vld [vmem:[#allocation180_spill] sm:$0xff]  ;;  %v2388_v32 = vsel %vm960_vm3, %v2384_v1, %v12340_v4  ;;  %v12341_v59 = vld [vmem:[#allocation182_spill] sm:$0xff]  ;;  %12342 = vst [vmem:[#allocation89_spill] sm:$0xff] %v8891_v62  ;;  %v8903_v1 = vrot.slane %v5204_v61, %v12307_v25  ;;  %2913 = vrot.lane.b32.xlu0 %v7586_v8, %s11897_s0  ;;  %s12697_s0 = sld [smem:[#allocation284_spill]] }
 0x3dd   :  { %v2168_v15 = vsel %vm955_vm2, %v12335_v55, %v12334_v42  ;;  %v12337_v14 = vld [vmem:[#allocation179_spill] sm:$0xff]  ;;  %v2390_v43 = vsel %vm960_vm3, %v2386_v47, %v12338_v39  ;;  %v1965_v57 = vsel %vm970_vm5, %v1961_v11, %v12341_v59  ;;  %v8894_v42 = vrot.slane %v5201_v6, %v12307_v25  ;;  %v12345_v47 = vld [vmem:[#allocation184_spill] sm:$0xff]  ;;  %v12348_v36 = vld [vmem:[#allocation185_spill] sm:$0xff]  ;;  %v8920_v59 = vpop.permute.xlu1 %3084 }
 0x3de   :  { %v2179_v56 = vsel %vm970_vm5, %v2175_v13, %v12337_v14  ;;  %v12344_v19 = vld [vmem:[#allocation183_spill] sm:$0xff]  ;;  %v1976_v55 = vsel %vm985_vm8, %v1972_v17, %v12345_v47  ;;  %12346 = vst [vmem:[#allocation91_spill] sm:$0xff] %v8903_v1  ;;  %v8906_v11 = vrot.slane %v5198_v24, %v12311_v16  ;;  %v1974_v14 = vsel %vm985_vm8, %v1970_v40, %v12348_v36  ;;  %v12349_v39 = vld [vmem:[#allocation186_spill] sm:$0xff]  ;;  %v12352_v47 = vld [vmem:[#allocation188_spill] sm:$0xff] }
 0x3df   :  { %12343 = vst [vmem:[#allocation90_spill] sm:$0xff] %v8894_v42  ;;  %v1963_v13 = vsel %vm970_vm5, %v1959_v18, %v12344_v19  ;;  %v2174_v4 = vsel %vm960_vm3, %v2170_v20, %v12349_v39  ;;  %v8915_v18 = vrot.slane %v5201_v6, %v12311_v16  ;;  %v8918_v17 = vrot.slane %v5204_v61, %v12311_v16  ;;  %v12351_v19 = vld [vmem:[#allocation187_spill] sm:$0xff]  ;;  %v12354_v36 = vld [vmem:[#allocation190_spill] sm:$0xff]  ;;  %v8933_v61 = vpop.permute.xlu0 %3080  ;;  %v12357_v46 = vld [vmem:[#allocation192_spill] sm:$0xff] }
 0x3e0   :  { %12347 = vst [vmem:[#allocation92_spill] sm:$0xff] %v8906_v11  ;;  %v2172_v24 = vsel %vm960_vm3, %v2168_v15, %v12351_v19  ;;  %v2185_v60 = vsel %vm975_vm6, %v2181_v51, %v12352_v47  ;;  %v2183_v40 = vsel %vm975_vm6, %v2179_v56, %v12353_v52  ;;  %v2394_v20 = vsel %vm965_vm4, %v2390_v43, %v12354_v36  ;;  %v5199_v6 = vld [vmem:[%s11507_s3 + $0x13] ss:$8 sm:$0x3]  ;;  %v12358_v19 = vld [vmem:[#allocation193_spill] sm:$0xff]  ;;  %v12376_v58 = vld [vmem:[#allocation208_spill] sm:$0xff] }
 0x3e1   :  { %12350 = vst [vmem:[#allocation93_spill] sm:$0xff] %v8915_v18  ;;  %12355 = vst [vmem:[#allocation96_spill] sm:$0xff] %v8933_v61  ;;  %v12356_v39 = vld [vmem:[#allocation191_spill] sm:$0xff]  ;;  %v1969_v15 = vsel %vm975_vm6, %v1965_v57, %v12357_v46  ;;  %v1967_v51 = vsel %vm975_vm6, %v1963_v13, %v12358_v19  ;;  %v12359_v47 = vld [vmem:[#allocation194_spill] sm:$0xff]  ;;  %2929 = vrot.lane.b32.xlu1 %v7582_v23, %s11900_s28  ;;  %2925 = vrot.lane.b32.xlu0 %v7586_v8, %s11900_s28 }
 0x3e2   :  { %v2392_v48 = vsel %vm965_vm4, %v2388_v32, %v12356_v39  ;;  %v1980_v52 = vsel %vm990_vm9, %v1976_v55, %v12359_v47  ;;  %v5202_v56 = vld [vmem:[%s11507_s3 + $0x16] ss:$8 sm:$0x3]  ;;  %v5205_v43 = vld [vmem:[%s11507_s3 + $0x21] ss:$8 sm:$0x3] }
 0x3e3   :  { %v12360_v32 = vld [vmem:[#allocation195_spill] sm:$0xff]  ;;  %v12361_v57 = vld [vmem:[#allocation196_spill] sm:$0xff]  ;;  %v12362_v36 = vld [vmem:[#allocation197_spill] sm:$0xff]  ;;  %v3228_v31 = vpop.permute.xlu0 %3227  ;;  %v1984_v26 = vsel %vm995_vm10, %v1980_v52, %v12376_v58 }
 0x3e4   :  { %v1978_v46 = vsel %vm990_vm9, %v1974_v14, %v12360_v32  ;;  %v2178_v13 = vsel %vm965_vm4, %v2174_v4, %v12361_v57  ;;  %v2176_v55 = vsel %vm965_vm4, %v2172_v24, %v12362_v36  ;;  %v12363_v39 = vld [vmem:[#allocation198_spill] sm:$0xff]  ;;  %v12364_v47 = vld [vmem:[#allocation199_spill] sm:$0xff]  ;;  %v12368_v32 = vld [vmem:[#allocation201_spill] sm:$0xff]  ;;  %v8970_v57 = vrot.slane %v5199_v6, %v12307_v25  ;;  %v3232_v24 = vpop.permute.xlu1 %3231 }
 0x3e5   :  { %v2189_v19 = vsel %vm980_vm7, %v2185_v60, %v12363_v39  ;;  %v2187_v61 = vsel %vm980_vm7, %v2183_v40, %v12364_v47  ;;  %v12367_v14 = vld [vmem:[#allocation203_spill] sm:$0xff]  ;;  %v12370_v36 = vld [vmem:[#allocation204_spill] sm:$0xff]  ;;  %v12371_v39 = vld [vmem:[#allocation205_spill] sm:$0xff]  ;;  %v8977_v40 = vrot.slane %v5202_v56, %v12307_v25  ;;  %v8980_v47 = vrot.slane %v5205_v43, %v12307_v25  ;;  %3110 = vrot.lane.b32.xlu1 %v7582_v23, %s11905_s13 }
 0x3e6   :  { %v2385_v4 = vsel %vm955_vm2, %v12368_v32, %v12367_v14  ;;  %12369 = vst [vmem:[#allocation99_spill] sm:$0xff] %v8970_v57  ;;  %v2398_v60 = vsel %vm970_vm5, %v2394_v20, %v12370_v36  ;;  %v2396_v7 = vsel %vm970_vm5, %v2392_v48, %v12371_v39  ;;  %v12374_v9 = vld [vmem:[#allocation206_spill] sm:$0xff]  ;;  %v12375_v32 = vld [vmem:[#allocation207_spill] sm:$0xff]  ;;  %v8989_v20 = vrot.slane %v5199_v6, %v12311_v16  ;;  %v12378_v48 = vld [vmem:[#allocation209_spill] sm:$0xff] }
 0x3e7   :  { %12372 = vst [vmem:[#allocation107_spill] sm:$0xff] %v8977_v40  ;;  %12373 = vst [vmem:[#allocation100_spill] sm:$0xff] %v8980_v47  ;;  %v1973_v14 = vsel %vm980_vm7, %v1969_v15, %v12374_v9  ;;  %v1971_v57 = vsel %vm980_vm7, %v1967_v51, %v12375_v32  ;;  %v1982_v36 = vsel %vm995_vm10, %v1978_v46, %v12378_v48  ;;  %v12379_v39 = vld [vmem:[#allocation220_spill] sm:$0xff]  ;;  %3106 = vrot.lane.b32.xlu0 %v7586_v8, %s11905_s13  ;;  %v12382_v58 = vld [vmem:[#allocation210_spill] sm:$0xff] }
 0x3e8   :  { %12377 = vst [vmem:[#allocation101_spill] sm:$0xff] %v8989_v20  ;;  %v1988_v25 = vsel %vm1000_vm11, %v1984_v26, %v12379_v39  ;;  %v8998_v15 = vrot.slane %v5202_v56, %v12311_v16  ;;  %v9001_v51 = vrot.slane %v5205_v43, %v12311_v16  ;;  %v2182_v6 = vsel %vm970_vm5, %v2178_v13, %v12382_v58  ;;  %v12383_v52 = vld [vmem:[#allocation211_spill] sm:$0xff]  ;;  %v12384_v32 = vld [vmem:[#allocation212_spill] sm:$0xff]  ;;  %v12385_v48 = vld [vmem:[#allocation221_spill] sm:$0xff]  ;;  %v3244_v56 = vpop.permute.xlu1 %3243 }
 0x3e9   :  { %v2180_v9 = vsel %vm970_vm5, %v2176_v55, %v12383_v52  ;;  %v2193_v46 = vsel %vm985_vm8, %v2189_v19, %v12384_v32  ;;  %v1986_v26 = vsel %vm1000_vm11, %v1982_v36, %v12385_v48  ;;  %v12387_v16 = vld [vmem:[#allocation214_spill] sm:$0xff]  ;;  %v9021_v58 = vsel %vm955_vm2, %v3232_v24, %v3244_v56  ;;  %v3240_v55 = vpop.permute.xlu0 %3239  ;;  %v12389_v52 = vld [vmem:[#allocation215_spill] sm:$0xff]  ;;  %3303 = vrot.lane.b32.xlu1 %v7582_v23, %s11910_s26  ;;  %v12394_v56 = vld [vmem:[#allocation216_spill] sm:$0xff] }
 0x3ea   :  { %12380 = vst [vmem:[#allocation102_spill] sm:$0xff] %v8998_v15  ;;  %12381 = vst [vmem:[#allocation108_spill] sm:$0xff] %v9001_v51  ;;  %v12386_v15 = vld [vmem:[#allocation213_spill] sm:$0xff]  ;;  %v2391_v51 = vsel %vm960_vm3, %v2387_v53, %v12387_v16  ;;  %v12388_v20 = vld [vmem:[#allocation222_spill] sm:$0xff]  ;;  %v2389_v19 = vsel %vm960_vm3, %v2385_v4, %v12389_v52  ;;  %v2011_v36 = vmul.f32 %v8802_v49, %v1988_v25 }
 0x3eb   :  { %v2191_v43 = vsel %vm985_vm8, %v2187_v61, %v12386_v15  ;;  %v1992_v13 = vsel %vm1005_vm12, %v12379_v39, %v12388_v20  ;;  %v12390_v32 = vld [vmem:[#allocation223_spill] sm:$0xff]  ;;  %v9030_v15 = vsel %vm955_vm2, %v3228_v31, %v3240_v55  ;;  %v9035_v53 = vmul.f32 %v8805_v41, %v1988_v25  ;;  %3299 = vrot.lane.b32.xlu0 %v7586_v8, %s11910_s26  ;;  %v12397_v40 = vld [vmem:[#allocation217_spill] sm:$0xff]  ;;  %s12400_s26 = smov 106  }
 0x3ec   :  { %v1990_v61 = vsel %vm1005_vm12, %v12385_v48, %v12390_v32  ;;  %v9038_v16 = vmul.f32 %v8814_v22, %v1988_v25  ;;  %v2007_v4 = vmul.f32 %v8802_v49, %v1986_v26  ;;  %v9042_v24 = vmul.f32 %v8805_v41, %v1986_v26  ;;  %v9056_v25 = vpop.permute.xlu1 %3277 }
 0x3ed   :  { %v9047_v31 = vmul.f32 %v8814_v22, %v1986_v26  ;;  %v2012_v20 = vmul.f32 %v8817_v12, %v1992_v13  ;;  %v9051_v39 = vmul.f32 %v8826_v38, %v1992_v13  ;;  %v9054_v48 = vmul.f32 %v8829_v63, %v1992_v13  ;;  %v9067_v47 = vpop.permute.xlu0 %3273  ;;  %v12398_v13 = vld [vmem:[#allocation218_spill] sm:$0xff]  ;;  %3337 = vrot.lane.b32.xlu1 %v7528_v44, %s12400_s26 }
 0x3ee   :  { %12391 = vst [vmem:[#allocation29_spill] sm:$0xff] %v9042_v24  ;;  %v2402_v55 = vsel %vm975_vm6, %v2398_v60, %v12394_v56  ;;  %v2008_v52 = vmul.f32 %v8817_v12, %v1990_v61  ;;  %v9062_v32 = vmul.f32 %v8826_v38, %v1990_v61  ;;  %v9065_v26 = vmul.f32 %v8829_v63, %v1990_v61 }
 0x3ef   :  { %12392 = vst [vmem:[#allocation109_spill] sm:$0xff] %v9051_v39  ;;  %12393 = vst [vmem:[#allocation103_spill] sm:$0xff] %v9054_v48  ;;  %v2400_v33 = vsel %vm975_vm6, %v2396_v7, %v12397_v40  ;;  %v1977_v41 = vsel %vm985_vm8, %v1973_v14, %v12398_v13  ;;  %v1975_v35 = vsel %vm985_vm8, %v1971_v57, %v12399_v21  ;;  %3333 = vrot.lane.b32.xlu0 %v7534_v45, %s12400_s26  ;;  %v12401_v13 = vld [vmem:[#allocation224_spill] sm:$0xff]  ;;  %v12403_v57 = vld [vmem:[#allocation226_spill] sm:$0xff] }
 0x3f0   :  { %12395 = vst [vmem:[#allocation104_spill] sm:$0xff] %v9062_v32  ;;  %12396 = vst [vmem:[#allocation105_spill] sm:$0xff] %v9065_v26  ;;  %v9076_v60 = vadd.f32 %v2011_v36, %v8753_v54  ;;  %v9083_v63 = vadd.f32 %v2007_v4, %v8774_v5  ;;  %v9090_v54 = vadd.f32 %v2012_v20, %v8776_v3  ;;  %v9094_v14 = vpop.permute.xlu1 %2869  ;;  %v12402_v3 = vld [vmem:[#allocation225_spill] sm:$0xff]  ;;  %v12404_v21 = vld [vmem:[#allocation227_spill] sm:$0xff] }
 0x3f1   :  { %v9097_v36 = vadd.f32 %v2008_v52, %v8792_v0  ;;  %v2186_v7 = vsel %vm975_vm6, %v2182_v6, %v12401_v13  ;;  %v9103_v61 = vpop.permute.xlu0 %2865  ;;  %v2184_v20 = vsel %vm975_vm6, %v2180_v9, %v12402_v3  ;;  %v2197_v40 = vsel %vm990_vm9, %v2193_v46, %v12403_v57  ;;  %v12405_v0 = vld [vmem:[#allocation12_spill] sm:$0xff]  ;;  %3122 = vrot.lane.b32.xlu1 %v7582_v23, %s11947_s10  ;;  %v12406_v5 = vld [vmem:[#allocation13_spill] sm:$0xff]  ;;  %v12407_v13 = vld [vmem:[#allocation14_spill] sm:$0xff] }
 0x3f2   :  { %v2195_v56 = vsel %vm990_vm9, %v2191_v43, %v12404_v21  ;;  %v2395_v52 = vsel %vm965_vm4, %v2391_v51, %v12405_v0  ;;  %v2393_v6 = vsel %vm965_vm4, %v2389_v19, %v12406_v5  ;;  %v2406_v4 = vsel %vm980_vm7, %v2402_v55, %v12407_v13  ;;  %v12408_v32 = vld [vmem:[#allocation15_spill] sm:$0xff]  ;;  %v12409_v3 = vld [vmem:[#allocation228_spill] sm:$0xff]  ;;  %v12410_v43 = vld [vmem:[#allocation229_spill] sm:$0xff] }
 0x3f3   :  { %v2404_v9 = vsel %vm980_vm7, %v2400_v33, %v12408_v32  ;;  %v1981_v46 = vsel %vm990_vm9, %v1977_v41, %v12409_v3  ;;  %3118 = vrot.lane.b32.xlu0 %v7586_v8, %s11947_s10  ;;  %v1979_v51 = vsel %vm990_vm9, %v1975_v35, %v12410_v43  ;;  %v12411_v21 = vld [vmem:[#allocation16_spill] sm:$0xff]  ;;  %v12412_v0 = vld [vmem:[#allocation17_spill] sm:$0xff]  ;;  %v12413_v5 = vld [vmem:[#allocation18_spill] sm:$0xff]  ;;  %s12438_s10 = smov 2  }
 0x3f4   :  { %v2190_v57 = vsel %vm980_vm7, %v2186_v7, %v12411_v21  ;;  %v2188_v19 = vsel %vm980_vm7, %v2184_v20, %v12412_v0  ;;  %v2201_v55 = vsel %vm995_vm10, %v2197_v40, %v12413_v5  ;;  %v9133_v13 = vpop.permute.xlu1 %2903  ;;  %v12414_v33 = vld [vmem:[#allocation19_spill] sm:$0xff]  ;;  %v12415_v32 = vld [vmem:[#allocation230_spill] sm:$0xff]  ;;  %v12418_v21 = vld [vmem:[#allocation232_spill] sm:$0xff] }
 0x3f5   :  { %v2199_v41 = vsel %vm995_vm10, %v2195_v56, %v12414_v33  ;;  %v9139_v3 = vsel %vm970_vm5, %v2395_v52, %v12415_v32  ;;  %v12416_v39 = vld [vmem:[#allocation231_spill] sm:$0xff]  ;;  %v12417_v7 = vld [vmem:[#allocation238_spill] sm:$0xff]  ;;  %v9147_v20 = vpop.permute.xlu0 %2899  ;;  %v9151_v40 = vsel %vm985_vm8, %v2406_v4, %v12418_v21  ;;  %v12419_v0 = vld [vmem:[#allocation233_spill] sm:$0xff]  ;;  %3315 = vrot.lane.b32.xlu1 %v7582_v23, %s11950_s8 }
 0x3f6   :  { %v9143_v35 = vsel %vm970_vm5, %v2393_v6, %v12416_v39  ;;  %v2205_v43 = vsel %vm1000_vm11, %v2201_v55, %v12417_v7  ;;  %v9155_v56 = vsel %vm985_vm8, %v2404_v9, %v12419_v0  ;;  %v12420_v5 = vld [vmem:[#allocation234_spill] sm:$0xff]  ;;  %v12421_v33 = vld [vmem:[#allocation239_spill] sm:$0xff]  ;;  %v12423_v32 = vld [vmem:[#allocation236_spill] sm:$0xff] }
 0x3f7   :  { %v1985_v52 = vsel %vm995_vm10, %v1981_v46, %v12420_v5  ;;  %v2203_v39 = vsel %vm1000_vm11, %v2199_v41, %v12421_v33  ;;  %v12422_v6 = vld [vmem:[#allocation235_spill] sm:$0xff]  ;;  %v9167_v4 = vsel %vm985_vm8, %v2190_v57, %v12423_v32  ;;  %v12425_v21 = vld [vmem:[#allocation240_spill] sm:$0xff]  ;;  %3311 = vrot.lane.b32.xlu0 %v7586_v8, %s11950_s8  ;;  %v2228_v41 = vmul.f32 %v8891_v62, %v2205_v43  ;;  %s12432_s8 = smov 118  }
 0x3f8   :  { %v1983_v55 = vsel %vm995_vm10, %v1979_v51, %v12422_v6  ;;  %12424 = vst [vmem:[#allocation27_spill] sm:$0xff] %v9167_v4  ;;  %v2209_v9 = vsel %vm1005_vm12, %v12417_v7, %v12425_v21  ;;  %v12426_v0 = vld [vmem:[#allocation32_spill] sm:$0xff]  ;;  %v9179_v5 = vmul.f32 %v8894_v42, %v2205_v43  ;;  %v12428_v51 = vld [vmem:[#allocation241_spill] sm:$0xff]  ;;  %v9186_v7 = vpop.permute.xlu1 %3062  ;;  %v9189_v21 = vmul.f32 %v8903_v1, %v2205_v43  ;;  %v12430_v4 = vld [vmem:[#allocation47_spill] sm:$0xff] }
 0x3f9   :  { %v12427_v26 = vld [vmem:[#allocation28_spill] sm:$0xff]  ;;  %v2207_v57 = vsel %vm1005_vm12, %v12421_v33, %v12428_v51  ;;  %v9197_v24 = vpop.permute.xlu0 %3058  ;;  %v9200_v33 = vmul.f32 %v8903_v1, %v2203_v39  ;;  %v9204_v51 = vmul.f32 %v8915_v18, %v2209_v9  ;;  %3349 = vrot.lane.b32.xlu1 %v7528_v44, %s12432_s8  ;;  %v12435_v1 = vld [vmem:[#allocation237_spill] sm:$0xff] }
 0x3fa   :  { %v3154_v46 = vsel %vm955_vm2, %v12427_v26, %v12426_v0  ;;  %v12429_v6 = vld [vmem:[#allocation40_spill] sm:$0xff]  ;;  %v2224_v26 = vmul.f32 %v8891_v62, %v2203_v39  ;;  %v9193_v0 = vmul.f32 %v8894_v42, %v2203_v39 }
 0x3fb   :  { %v3158_v32 = vsel %vm960_vm3, %v3154_v46, %v12429_v6  ;;  %12431 = vst [vmem:[#allocation30_spill] sm:$0xff] %v9200_v33  ;;  %v2229_v46 = vmul.f32 %v8906_v11, %v2209_v9  ;;  %v9211_v6 = vmul.f32 %v8918_v17, %v2209_v9  ;;  %3345 = vrot.lane.b32.xlu0 %v7534_v45, %s12432_s8  ;;  %v12446_v33 = vld [vmem:[#allocation56_spill] sm:$0xff] }
 0x3fc   :  { %v3162_v48 = vsel %vm965_vm4, %v3158_v32, %v12430_v4  ;;  %v2225_v4 = vmul.f32 %v8906_v11, %v2207_v57  ;;  %v9215_v32 = vmul.f32 %v8915_v18, %v2207_v57  ;;  %v9229_v9 = vmul.f32 %v8918_v17, %v2207_v57  ;;  %v3097_v18 = vpop.permute.xlu1 %3096 }
 0x3fd   :  { %v3166_v43 = vsel %vm970_vm5, %v3162_v48, %v8565_v2  ;;  %12433 = vst [vmem:[#allocation31_spill] sm:$0xff] %v9211_v6  ;;  %v9223_v2 = vsel %vm985_vm8, %v2188_v19, %v12435_v1  ;;  %v9226_v48 = vadd.f32 %v2228_v41, %v9076_v60  ;;  %v9242_v60 = vpop.permute.xlu0 %3092  ;;  %v9245_v19 = vadd.f32 %v2224_v26, %v9083_v63  ;;  %v12442_v63 = vld [vmem:[#allocation278_spill] sm:$0xff]  ;;  %v12445_v6 = vld [vmem:[#allocation21_spill] sm:$0xff] }
 0x3fe   :  { %12434 = vst [vmem:[#allocation114_spill] sm:$0xff] %v9215_v32  ;;  %v3170_v39 = vsel %vm975_vm6, %v3166_v43, %v8699_v10  ;;  %12436 = vst [vmem:[#allocation106_spill] sm:$0xff] %v9229_v9  ;;  %v12437_v43 = vld [vmem:[#allocation246_spill] sm:$0xff]  ;;  %v9250_v57 = vadd.f32 %v2229_v46, %v9090_v54  ;;  %3361 = vrot.lane.b32.xlu1 %v7528_v44, %s12438_s10  ;;  %v2935_v26 = vsel %vm955_vm2, %v7534_v45, %v12442_v63  ;;  %v12444_v10 = vld [vmem:[#allocation53_spill] sm:$0xff] }
 0x3ff   :  { %v3174_v11 = vsel %vm980_vm7, %v3170_v39, %v8920_v59  ;;  %v9237_v42 = vsel %vm1000_vm11, %v1985_v52, %v12437_v43  ;;  %3357 = vrot.lane.b32.xlu0 %v7534_v45, %s12438_s10  ;;  %v12440_v39 = vld [vmem:[#allocation247_spill] sm:$0xff] }
 0x400   :  { %v9240_v1 = vsel %vm985_vm8, %v3174_v11, %v3097_v18  ;;  %v9257_v18 = vadd.f32 %v2225_v4, %v9097_v36  ;;  %v9265_v54 = vmul.f32 %v8802_v49, %v9237_v42  ;;  %v9269_v46 = vmul.f32 %v8814_v22, %v9237_v42  ;;  %v3256_v36 = vpop.permute.xlu1 %3255  ;;  %v12441_v4 = vld [vmem:[#allocation277_spill] sm:$0xff]  ;;  %v12443_v52 = vld [vmem:[#allocation55_spill] sm:$0xff] }
 0x401   :  { %v1987_v11 = vsel %vm1000_vm11, %v1983_v55, %v12440_v39  ;;  %v2937_v59 = vsel %vm955_vm2, %v7528_v44, %v12441_v4  ;;  %v3371_v41 = vsel %vm955_vm2, %v12444_v10, %v12443_v52  ;;  %v9284_v62 = vsel %vm960_vm3, %v9021_v58, %v3256_v36  ;;  %v3252_v9 = vpop.permute.xlu0 %3251  ;;  %v12447_v32 = vld [vmem:[#allocation51_spill] sm:$0xff]  ;;  %v12449_v52 = vld [vmem:[#allocation34_spill] sm:$0xff] }
 0x402   :  { %12439 = vst [vmem:[#allocation115_spill] sm:$0xff] %v9269_v46  ;;  %v2941_v55 = vsel %vm960_vm3, %v2937_v59, %v12445_v6  ;;  %v3369_v44 = vsel %vm955_vm2, %v12447_v32, %v12446_v33  ;;  %v3375_v4 = vsel %vm960_vm3, %v3371_v41, %v8591_v30  ;;  %v9295_v45 = vsel %vm960_vm3, %v9030_v15, %v3252_v9  ;;  %v12448_v58 = vld [vmem:[#allocation23_spill] sm:$0xff]  ;;  %v12451_v9 = vld [vmem:[#allocation44_spill] sm:$0xff]  ;;  %v12453_v36 = vld [vmem:[#allocation58_spill] sm:$0xff] }
 0x403   :  { %3134 = vrot.lane.b32.xlu1 %v7582_v23, %s11959_s9  ;;  %v2939_v10 = vsel %vm960_vm3, %v2935_v26, %v12448_v58  ;;  %v2938_v6 = vsel %vm955_vm2, %v7582_v23, %v12449_v52  ;;  %v3373_v33 = vsel %vm960_vm3, %v3369_v44, %v8597_v29  ;;  %v3379_v30 = vsel %vm965_vm4, %v3375_v4, %v8728_v28  ;;  %v12450_v15 = vld [vmem:[#allocation35_spill] sm:$0xff]  ;;  %v12452_v26 = vld [vmem:[#allocation42_spill] sm:$0xff] }
 0x404   :  { %3130 = vrot.lane.b32.xlu0 %v7586_v8, %s11959_s9  ;;  %v2936_v32 = vsel %vm955_vm2, %v7586_v8, %v12450_v15  ;;  %v2942_v41 = vsel %vm960_vm3, %v2938_v6, %v12451_v9  ;;  %v3377_v59 = vsel %vm965_vm4, %v3373_v33, %v8730_v27  ;;  %v3383_v63 = vsel %vm970_vm5, %v3379_v30, %v9056_v25  ;;  %v3290_v29 = vpop.permute.xlu1 %3289  ;;  %v12454_v6 = vld [vmem:[#allocation24_spill] sm:$0xff]  ;;  %v12457_v9 = vld [vmem:[#allocation38_spill] sm:$0xff] }
 0x405   :  { %v2940_v28 = vsel %vm960_vm3, %v2936_v32, %v12452_v26  ;;  %v2946_v44 = vsel %vm965_vm4, %v2942_v41, %v12453_v36  ;;  %v3381_v4 = vsel %vm970_vm5, %v3377_v59, %v9067_v47  ;;  %v9326_v58 = vsel %vm975_vm6, %v3383_v63, %v3290_v29  ;;  %v3286_v52 = vpop.permute.xlu0 %3285  ;;  %v12455_v33 = vld [vmem:[#allocation60_spill] sm:$0xff]  ;;  %v12456_v47 = vld [vmem:[#allocation25_spill] sm:$0xff] }
 0x406   :  { %v2945_v27 = vsel %vm965_vm4, %v2941_v55, %v12454_v6  ;;  %v2944_v25 = vsel %vm965_vm4, %v2940_v28, %v12455_v33  ;;  %v2950_v30 = vsel %vm970_vm5, %v2946_v44, %v8620_v37  ;;  %v9335_v15 = vsel %vm975_vm6, %v3381_v4, %v3286_v52  ;;  %v12458_v37 = vld [vmem:[#allocation39_spill] sm:$0xff]  ;;  %v12459_v29 = vld [vmem:[#allocation45_spill] sm:$0xff]  ;;  %v12460_v28 = vld [vmem:[#allocation82_spill] sm:$0xff] }
 0x407   :  { %3146 = vrot.lane.b32.xlu1 %v7582_v23, %s12287_s15  ;;  %v2943_v32 = vsel %vm965_vm4, %v2939_v10, %v12456_v47  ;;  %v2949_v41 = vsel %vm970_vm5, %v2945_v27, %v12457_v9  ;;  %v2948_v55 = vsel %vm970_vm5, %v2944_v25, %v8627_v34  ;;  %v2954_v59 = vsel %vm975_vm6, %v2950_v30, %v8767_v50  ;;  %v12461_v34 = vld [vmem:[#allocation43_spill] sm:$0xff]  ;;  %v12464_v30 = vld [vmem:[#allocation65_spill] sm:$0xff] }
 0x408   :  { %3142 = vrot.lane.b32.xlu0 %v7586_v8, %s12287_s15  ;;  %v2947_v63 = vsel %vm970_vm5, %v2943_v32, %v12458_v37  ;;  %v2953_v26 = vsel %vm975_vm6, %v2949_v41, %v12459_v29  ;;  %v2952_v10 = vsel %vm975_vm6, %v2948_v55, %v12460_v28  ;;  %v2958_v36 = vsel %vm980_vm7, %v2954_v59, %v9094_v14  ;;  %v2882_v44 = vpop.permute.xlu1 %2881  ;;  %v12462_v50 = vld [vmem:[#allocation63_spill] sm:$0xff]  ;;  %v12465_v47 = vld [vmem:[#allocation73_spill] sm:$0xff]  ;;  %v12471_v28 = vld [vmem:[#allocation86_spill] sm:$0xff] }
 0x409   :  { %v2951_v4 = vsel %vm975_vm6, %v2947_v63, %v12461_v34  ;;  %v2957_v52 = vsel %vm980_vm7, %v2953_v26, %v12462_v50  ;;  %v2956_v6 = vsel %vm980_vm7, %v2952_v10, %v9103_v61  ;;  %v9364_v27 = vsel %vm985_vm8, %v2958_v36, %v2882_v44  ;;  %v2878_v33 = vpop.permute.xlu0 %2877  ;;  %v12466_v61 = vld [vmem:[#allocation84_spill] sm:$0xff]  ;;  %v12469_v37 = vld [vmem:[#allocation83_spill] sm:$0xff]  ;;  %v12472_v36 = vld [vmem:[#allocation242_spill] sm:$0xff] }
 0x40a   :  { %v9367_v25 = vmul.f32 %v8814_v22, %v1987_v11  ;;  %v2955_v14 = vsel %vm980_vm7, %v2951_v4, %v12464_v30  ;;  %v2961_v32 = vsel %vm985_vm8, %v2957_v52, %v12465_v47  ;;  %v9374_v9 = vsel %vm985_vm8, %v2956_v6, %v2878_v33  ;;  %v12468_v22 = vld [vmem:[#allocation74_spill] sm:$0xff]  ;;  %v12473_v34 = vld [vmem:[#allocation248_spill] sm:$0xff]  ;;  %v12475_v6 = vld [vmem:[#allocation243_spill] sm:$0xff] }
 0x40b   :  { %3327 = vrot.lane.b32.xlu1 %v7582_v23, %s12321_s19  ;;  %v9380_v41 = vmul.f32 %v12466_v61, %v9237_v42  ;;  %v2009_v55 = vmul.f32 %v8802_v49, %v1987_v11  ;;  %v2959_v59 = vsel %vm985_vm8, %v2955_v14, %v12468_v22  ;;  %v2965_v63 = vsel %vm990_vm9, %v2961_v32, %v12469_v37  ;;  %v12476_v33 = vld [vmem:[#allocation244_spill] sm:$0xff]  ;;  %v12479_v47 = vld [vmem:[#allocation79_spill] sm:$0xff] }
 0x40c   :  { %12463 = vst [vmem:[#allocation116_spill] sm:$0xff] %v9367_v25  ;;  %3323 = vrot.lane.b32.xlu0 %v7586_v8, %s12321_s19  ;;  %v11676_v29 = vrot.slane %v9269_v46, 2  ;;  %v9391_v26 = vmul.f32 %v12466_v61, %v1987_v11  ;;  %v2963_v42 = vsel %vm990_vm9, %v2959_v59, %v12471_v28  ;;  %v2969_v49 = vsel %vm995_vm10, %v2965_v63, %v9133_v13  ;;  %v2916_v10 = vpop.permute.xlu1 %2915  ;;  %v12480_v61 = vld [vmem:[#allocation77_spill] sm:$0xff] }
 0x40d   :  { %12467 = vst [vmem:[#allocation117_spill] sm:$0xff] %v9380_v41  ;;  %v9400_v44 = vsel %vm975_vm6, %v9139_v3, %v12472_v36  ;;  %v1993_v4 = vsel %vm1005_vm12, %v12437_v43, %v12473_v34  ;;  %v2967_v11 = vsel %vm995_vm10, %v2963_v42, %v9147_v20  ;;  %v9408_v50 = vsel %vm1000_vm11, %v2969_v49, %v2916_v10  ;;  %v2912_v52 = vpop.permute.xlu0 %2911  ;;  %v12478_v20 = vld [vmem:[#allocation245_spill] sm:$0xff]  ;;  %v12486_v36 = vld [vmem:[#allocation70_spill] sm:$0xff] }
 0x40e   :  { %12470 = vst [vmem:[#allocation110_spill] sm:$0xff] %v9391_v26  ;;  %12474 = vst [vmem:[#allocation111_spill] sm:$0xff] %v9408_v50  ;;  %v9413_v13 = vsel %vm975_vm6, %v9143_v35, %v12475_v6  ;;  %v2414_v3 = vsel %vm990_vm9, %v9151_v40, %v12476_v33  ;;  %v11675_v30 = vrot.slane %v9367_v25, 2  ;;  %v9420_v43 = vsel %vm1000_vm11, %v2967_v11, %v2912_v52  ;;  %v12485_v42 = vld [vmem:[#allocation249_spill] sm:$0xff] }
 0x40f   :  { %12477 = vst [vmem:[#allocation112_spill] sm:$0xff] %v9420_v43  ;;  %3339 = vrot.lane.b32.xlu1 %v7582_v23, %s12400_s26  ;;  %v2412_v14 = vsel %vm990_vm9, %v9155_v56, %v12478_v20  ;;  %v9429_v35 = vadd.f32 %v9265_v54, %v12479_v47  ;;  %v11678_v32 = vrot.slane %v9380_v41, 1  ;;  %v9433_v40 = vadd.f32 %v2009_v55, %v12480_v61  ;;  %v12483_v55 = vld [vmem:[#allocation85_spill] sm:$0xff] }
 0x410   :  { %3335 = vrot.lane.b32.xlu0 %v7586_v8, %s12400_s26  ;;  %v12481_v22 = vrot.slane %v9038_v16, 2  ;;  %v11677_v56 = vrot.slane %v9391_v26, 1  ;;  %v2014_v54 = vmul.f32 %v8817_v12, %v1993_v4  ;;  %v9447_v37 = vmul.f32 %v8826_v38, %v1993_v4  ;;  %v2928_v63 = vpop.permute.xlu1 %2927  ;;  %v12487_v16 = vld [vmem:[#allocation68_spill] sm:$0xff]  ;;  %v12491_v47 = vld [vmem:[#allocation69_spill] sm:$0xff]  ;;  %v12538_v26 = vld [vmem:[#allocation258_spill] sm:$0xff] }
 0x411   :  { %v9450_v28 = vmul.f32 %v12483_v55, %v1993_v4  ;;  %v1991_v49 = vsel %vm1005_vm12, %v12440_v39, %v12485_v42  ;;  %v3155_v34 = vsel %vm955_vm2, %v12487_v16, %v12486_v36  ;;  %v9459_v11 = vsel %vm1005_vm12, %v2916_v10, %v2928_v63  ;;  %v2924_v6 = vpop.permute.xlu0 %2923  ;;  %v12490_v4 = vld [vmem:[#allocation71_spill] sm:$0xff]  ;;  %v12495_v63 = vld [vmem:[#allocation33_spill] sm:$0xff]  ;;  %v12496_v36 = vld [vmem:[#allocation26_spill] sm:$0xff] }
 0x412   :  { %v9442_v59 = vsel %vm232_vm1, %v12481_v22, %v11676_v29  ;;  %12482 = vst [vmem:[#allocation113_spill] sm:$0xff] %v9447_v37  ;;  %12488 = vst [vmem:[#allocation123_spill] sm:$0xff] %v9459_v11  ;;  %v12489_v33 = vrot.slane %v9047_v31, 2  ;;  %v3153_v61 = vsel %vm955_vm2, %v12491_v47, %v12490_v4  ;;  %v12492_v39 = vld [vmem:[#allocation75_spill] sm:$0xff]  ;;  %v9474_v42 = vsel %vm1005_vm12, %v2912_v52, %v2924_v6  ;;  %v12536_v46 = vld [vmem:[#allocation101_spill] sm:$0xff] }
 0x413   :  { %12484 = vst [vmem:[#allocation122_spill] sm:$0xff] %v9450_v28  ;;  %v3159_v22 = vsel %vm960_vm3, %v3155_v34, %v12492_v39  ;;  %12493 = vst [vmem:[#allocation128_spill] sm:$0xff] %v9474_v42  ;;  %3351 = vrot.lane.b32.xlu1 %v7582_v23, %s12432_s8  ;;  %v12494_v31 = vrot.slane %v9035_v53, 1  ;;  %v3152_v16 = vsel %vm955_vm2, %v12496_v36, %v12495_v63  ;;  %v12498_v4 = vld [vmem:[#allocation87_spill] sm:$0xff]  ;;  %v12500_v53 = vld [vmem:[#allocation41_spill] sm:$0xff]  ;;  %vm4100_vm2 = vcmask 916480  }
 0x414   :  { %v9466_v20 = vsel %vm232_vm1, %v12489_v33, %v11675_v30  ;;  %v12497_v33 = vld [vmem:[#allocation78_spill] sm:$0xff]  ;;  %v3163_v52 = vsel %vm965_vm4, %v3159_v22, %v12498_v4  ;;  %3347 = vrot.lane.b32.xlu0 %v7586_v8, %s12432_s8  ;;  %v9495_v6 = vmul.f32 %v12483_v55, %v1991_v49  ;;  %v3156_v47 = vsel %vm960_vm3, %v3152_v16, %v12500_v53  ;;  %v12501_v39 = vld [vmem:[#allocation88_spill] sm:$0xff]  ;;  %v3075_v36 = vpop.permute.xlu1 %3074  ;;  %v12503_v22 = vld [vmem:[#allocation49_spill] sm:$0xff] }
 0x415   :  { %v9483_v10 = vsel %vm143_vm0, %v12494_v31, %v11678_v32  ;;  %v3157_v34 = vsel %vm960_vm3, %v3153_v61, %v12497_v33  ;;  %v3167_v63 = vsel %vm970_vm5, %v3163_v52, %v9186_v7  ;;  %v9504_v61 = vmul.f32 %v8826_v38, %v1991_v49  ;;  %v3071_v16 = vpop.permute.xlu0 %3070  ;;  %v12547_v11 = vld [vmem:[#allocation265_spill] sm:$0xff] }
 0x416   :  { %12499 = vst [vmem:[#allocation129_spill] sm:$0xff] %v9495_v6  ;;  %v3161_v31 = vsel %vm965_vm4, %v3157_v34, %v12501_v39  ;;  %v3160_v33 = vsel %vm965_vm4, %v3156_v47, %v12503_v22  ;;  %v9511_v4 = vsel %vm975_vm6, %v3167_v63, %v3075_v36  ;;  %v11683_v53 = vrot.slane %v9447_v37, 1  ;;  %v12504_v39 = vld [vmem:[#allocation72_spill] sm:$0xff]  ;;  %v12539_v37 = vld [vmem:[#allocation259_spill] sm:$0xff] }
 0x417   :  { %12502 = vst [vmem:[#allocation118_spill] sm:$0xff] %v9504_v61  ;;  %v3165_v55 = vsel %vm970_vm5, %v3161_v31, %v9197_v24  ;;  %v11679_v34 = vrot.slane %v9450_v28, 2  ;;  %v3164_v7 = vsel %vm970_vm5, %v3160_v33, %v12504_v39  ;;  %3363 = vrot.lane.b32.xlu1 %v7582_v23, %s12438_s10  ;;  %v2010_v52 = vmul.f32 %v8817_v12, %v1991_v49  ;;  %v12505_v24 = vld [vmem:[#allocation254_spill] sm:$0xff]  ;;  %v12506_v31 = vld [vmem:[#allocation255_spill] sm:$0xff]  ;;  %v12507_v36 = vld [vmem:[#allocation76_spill] sm:$0xff] }
 0x418   :  { %v9518_v38 = vsel %vm975_vm6, %v3165_v55, %v3071_v16  ;;  %v2418_v47 = vsel %vm995_vm10, %v2414_v3, %v12505_v24  ;;  %v2416_v63 = vsel %vm995_vm10, %v2412_v14, %v12506_v31  ;;  %v3168_v22 = vsel %vm975_vm6, %v3164_v7, %v12507_v36  ;;  %3359 = vrot.lane.b32.xlu0 %v7586_v8, %s12438_s10  ;;  %v12508_v55 = vld [vmem:[#allocation260_spill] sm:$0xff]  ;;  %v12509_v23 = vld [vmem:[#allocation261_spill] sm:$0xff]  ;;  %v3109_v39 = vpop.permute.xlu1 %3108  ;;  %s5959_s10 = smov 64  }
 0x419   :  { %v11681_v33 = vrot.slane %v9495_v6, 2  ;;  %v2422_v16 = vsel %vm1000_vm11, %v2418_v47, %v12508_v55  ;;  %v2420_v12 = vsel %vm1000_vm11, %v2416_v63, %v12509_v23  ;;  %v12510_v49 = vld [vmem:[#allocation96_spill] sm:$0xff]  ;;  %v12511_v7 = vld [vmem:[#allocation29_spill] sm:$0xff]  ;;  %v9548_v47 = vsel %vm990_vm9, %v9240_v1, %v3109_v39  ;;  %v3105_v63 = vpop.permute.xlu0 %3104  ;;  %v12519_v39 = vld [vmem:[#allocation251_spill] sm:$0xff] }
 0x41a   :  { %v3172_v3 = vsel %vm980_vm7, %v3168_v22, %v12510_v49  ;;  %v12512_v24 = vrot.slane %v12511_v7, 1  ;;  %v12513_v36 = vld [vmem:[#allocation80_spill] sm:$0xff]  ;;  %v12514_v22 = vld [vmem:[#allocation103_spill] sm:$0xff]  ;;  %v12516_v7 = vld [vmem:[#allocation250_spill] sm:$0xff]  ;;  %vm5964_vm3 = vmmov 0  }
 0x41b   :  { %v3176_v31 = vsel %vm985_vm8, %v3172_v3, %v9242_v60  ;;  %v9551_v30 = vadd.f32 %v2014_v54, %v12513_v36  ;;  %v12515_v49 = vrot.slane %v12514_v22, 2  ;;  %v12518_v1 = vld [vmem:[#allocation81_spill] sm:$0xff]  ;;  %v2196_v54 = vsel %vm990_vm9, %v9223_v2, %v12519_v39  ;;  %v12520_v36 = vld [vmem:[#allocation99_spill] sm:$0xff] }
 0x41c   :  { %v2488_v8 = vsel %vm143_vm0, %v12512_v24, %v11677_v56  ;;  %v12517_v24 = vld [vmem:[#allocation27_spill] sm:$0xff]  ;;  %v9564_v60 = vsel %vm990_vm9, %v3176_v31, %v3105_v63  ;;  %v9567_v3 = vadd.f32 %v2010_v52, %v12518_v1  ;;  %v2445_v32 = vmul.f32 %v12520_v36, %v2422_v16  ;;  %v12523_v31 = vld [vmem:[#allocation252_spill] sm:$0xff]  ;;  %v12524_v63 = vld [vmem:[#allocation109_spill] sm:$0xff]  ;;  %v3268_v14 = vpop.permute.xlu1 %3267 }
 0x41d   :  { %v9558_v29 = vsel %vm232_vm1, %v12515_v49, %v11679_v34  ;;  %v2198_v56 = vsel %vm990_vm9, %v12517_v24, %v12516_v7  ;;  %v2441_v22 = vmul.f32 %v12520_v36, %v2420_v12  ;;  %v12521_v49 = vld [vmem:[#allocation105_spill] sm:$0xff]  ;;  %v2407_v52 = vsel %vm980_vm7, %v9400_v44, %v12523_v31  ;;  %v12526_v1 = vld [vmem:[#allocation262_spill] sm:$0xff]  ;;  %v12530_v31 = vld [vmem:[#allocation104_spill] sm:$0xff] }
 0x41e   :  { %v12522_v34 = vrot.slane %v12521_v49, 2  ;;  %v12525_v24 = vrot.slane %v12524_v63, 1  ;;  %v2426_v39 = vsel %vm1005_vm12, %v12508_v55, %v12526_v1  ;;  %v12527_v6 = vld [vmem:[#allocation253_spill] sm:$0xff]  ;;  %v12528_v49 = vld [vmem:[#allocation107_spill] sm:$0xff]  ;;  %v12529_v44 = vrot.slane %v9504_v61, 1  ;;  %v3264_v55 = vpop.permute.xlu0 %3263  ;;  %v12532_v1 = vld [vmem:[#allocation100_spill] sm:$0xff] }
 0x41f   :  { %v12531_v25 = vrot.slane %v12530_v31, 1  ;;  %v9620_v31 = vsel %vm965_vm4, %v9295_v45, %v3264_v55  ;;  %v12537_v28 = vld [vmem:[#allocation257_spill] sm:$0xff]  ;;  %v12540_v45 = vld [vmem:[#allocation102_spill] sm:$0xff] }
 0x420   :  { %v9579_v7 = vsel %vm232_vm1, %v12522_v34, %v11681_v33  ;;  %v2497_v2 = vsel %vm143_vm0, %v12525_v24, %v11683_v53  ;;  %v2405_v34 = vsel %vm980_vm7, %v9413_v13, %v12527_v6  ;;  %v9596_v33 = vmul.f32 %v12528_v49, %v2422_v16  ;;  %v3302_v42 = vpop.permute.xlu1 %3301 }
 0x421   :  { %v9603_v63 = vsel %vm143_vm0, %v12531_v25, %v12529_v44  ;;  %v9607_v24 = vsel %vm965_vm4, %v9284_v62, %v3268_v14  ;;  %v9610_v53 = vmul.f32 %v12532_v1, %v2422_v16  ;;  %v9613_v13 = vmul.f32 %v12528_v49, %v2420_v12  ;;  %v12535_v25 = vld [vmem:[#allocation256_spill] sm:$0xff] }
 0x422   :  { %v9616_v6 = vmul.f32 %v12532_v1, %v2420_v12  ;;  %v2202_v44 = vsel %vm995_vm10, %v2198_v56, %v12535_v25  ;;  %v2453_v62 = vadd.f32 %v2445_v32, %v9226_v48  ;;  %v2449_v14 = vadd.f32 %v2441_v22, %v9245_v19  ;;  %v12541_v48 = vld [vmem:[#allocation263_spill] sm:$0xff]  ;;  %v12542_v32 = vld [vmem:[#allocation264_spill] sm:$0xff] }
 0x423   :  { %12533 = vst [vmem:[#allocation119_spill] sm:$0xff] %v9610_v53  ;;  %v2446_v16 = vmul.f32 %v12536_v46, %v2426_v39  ;;  %v2200_v61 = vsel %vm995_vm10, %v2196_v54, %v12537_v28  ;;  %v2411_v12 = vsel %vm985_vm8, %v2407_v52, %v12538_v26  ;;  %v2409_v41 = vsel %vm985_vm8, %v2405_v34, %v12539_v37  ;;  %v3298_v26 = vpop.permute.xlu0 %3297  ;;  %v12545_v54 = vld [vmem:[#allocation90_spill] sm:$0xff]  ;;  %v12546_v52 = vld [vmem:[#allocation268_spill] sm:$0xff]  ;;  %v12561_v53 = vld [vmem:[#allocation275_spill] sm:$0xff] }
 0x424   :  { %12534 = vst [vmem:[#allocation120_spill] sm:$0xff] %v9616_v6  ;;  %v9634_v55 = vmul.f32 %v12540_v45, %v2426_v39  ;;  %v2424_v19 = vsel %vm1005_vm12, %v12509_v23, %v12541_v48  ;;  %v2206_v22 = vsel %vm1000_vm11, %v2202_v44, %v12542_v32  ;;  %v9644_v28 = vsel %vm980_vm7, %v9326_v58, %v3302_v42  ;;  %v12543_v48 = vld [vmem:[#allocation108_spill] sm:$0xff]  ;;  %v12550_v6 = vld [vmem:[#allocation271_spill] sm:$0xff] }
 0x425   :  { %v9651_v34 = vsel %vm980_vm7, %v9335_v15, %v3298_v26  ;;  %v2510_v23 = vadd.f32 %v9483_v10, %v2453_v62  ;;  %v9654_v25 = vadd.f32 %v2488_v8, %v2449_v14  ;;  %v2454_v44 = vadd.f32 %v2446_v16, %v9250_v57  ;;  %v2894_v26 = vpop.permute.xlu1 %2893  ;;  %v12548_v8 = vld [vmem:[#allocation269_spill] sm:$0xff]  ;;  %v12549_v62 = vld [vmem:[#allocation270_spill] sm:$0xff] }
 0x426   :  { %v9658_v58 = vmul.f32 %v12543_v48, %v2426_v39  ;;  %v2442_v37 = vmul.f32 %v12536_v46, %v2424_v19  ;;  %v9663_v56 = vmul.f32 %v12545_v54, %v2206_v22  ;;  %v2415_v15 = vsel %vm990_vm9, %v2411_v12, %v12546_v52  ;;  %v12551_v52 = vld [vmem:[#allocation272_spill] sm:$0xff] }
 0x427   :  { %v2204_v10 = vsel %vm1000_vm11, %v2200_v61, %v12547_v11  ;;  %v2413_v57 = vsel %vm990_vm9, %v2409_v41, %v12548_v8  ;;  %v2419_v39 = vsel %vm995_vm10, %v2415_v15, %v12549_v62  ;;  %v9675_v14 = vsel %vm990_vm9, %v9364_v27, %v2894_v26  ;;  %v2890_v16 = vpop.permute.xlu0 %2889  ;;  %v12552_v8 = vld [vmem:[#allocation273_spill] sm:$0xff] }
 0x428   :  { %12544 = vst [vmem:[#allocation121_spill] sm:$0xff] %v9658_v58  ;;  %v9678_v42 = vmul.f32 %v12540_v45, %v2424_v19  ;;  %v2417_v12 = vsel %vm995_vm10, %v2413_v57, %v12550_v6  ;;  %v9684_v61 = vsel %vm1000_vm11, %v2419_v39, %v12551_v52  ;;  %v9688_v41 = vsel %vm990_vm9, %v9374_v9, %v2890_v16  ;;  %v12553_v57 = vld [vmem:[#allocation89_spill] sm:$0xff]  ;;  %v12554_v9 = vld [vmem:[#allocation266_spill] sm:$0xff] }
 0x429   :  { %v9690_v15 = vadd.f32 %v2497_v2, %v2454_v44  ;;  %v9694_v26 = vmul.f32 %v12543_v48, %v2424_v19  ;;  %v9698_v62 = vsel %vm1000_vm11, %v2417_v12, %v12552_v8  ;;  %v2450_v6 = vadd.f32 %v2442_v37, %v9257_v18  ;;  %v3087_v44 = vpop.permute.xlu1 %3086  ;;  %v12555_v19 = vld [vmem:[#allocation267_spill] sm:$0xff] }
 0x42a   :  { %v2230_v39 = vmul.f32 %v12553_v57, %v2206_v22  ;;  %v9703_v43 = vmul.f32 %v12545_v54, %v2204_v10  ;;  %v2210_v2 = vsel %vm1005_vm12, %v12542_v32, %v12554_v9  ;;  %v2208_v27 = vsel %vm1005_vm12, %v12547_v11, %v12555_v19  ;;  %v12557_v9 = vld [vmem:[#allocation274_spill] sm:$0xff]  ;;  %v12559_v19 = vld [vmem:[#allocation91_spill] sm:$0xff] }
 0x42b   :  { %v9714_v12 = vmul.f32 %v12528_v49, %v9684_v61  ;;  %v9718_v18 = vsel %vm980_vm7, %v9511_v4, %v3087_v44  ;;  %v3083_v37 = vpop.permute.xlu0 %3082  ;;  %v2603_v54 = vrot.slane %v9678_v42, 1  ;;  %v9723_v32 = vmul.f32 %v12528_v49, %v9698_v62  ;;  %v12560_v44 = vld [vmem:[#allocation93_spill] sm:$0xff] }
 0x42c   :  { %12556 = vst [vmem:[#allocation124_spill] sm:$0xff] %v9718_v18  ;;  %v9728_v16 = vsel %vm1005_vm12, %v12551_v52, %v12557_v9  ;;  %v9732_v11 = vsel %vm980_vm7, %v9518_v38, %v3083_v37  ;;  %v9735_v58 = vmul.f32 %v12559_v19, %v2206_v22  ;;  %v2226_v4 = vmul.f32 %v12553_v57, %v2204_v10 }
 0x42d   :  { %12558 = vst [vmem:[#allocation125_spill] sm:$0xff] %v9732_v11  ;;  %v9739_v42 = vmul.f32 %v12560_v44, %v2210_v2  ;;  %v9744_v49 = vsel %vm1005_vm12, %v12552_v8, %v12561_v53  ;;  %v2507_v52 = vadd.f32 %v9603_v63, %v2450_v6  ;;  %v11697_v38 = vrot.slane %v9703_v43, 1  ;;  %v3121_v22 = vpop.permute.xlu1 %3120 }
 0x42e   :  { %v9750_v37 = vmul.f32 %v12560_v44, %v2208_v27  ;;  %v12562_v57 = vrot.slane %v9663_v56, 1  ;;  %v12563_v11 = vrot.slane %v9179_v5, 1  ;;  %v11698_v18 = vrot.slane %v9714_v12, 1  ;;  %v12565_v44 = vld [vmem:[#allocation92_spill] sm:$0xff] }
 0x42f   :  { %v9760_v53 = vmul.f32 %v12540_v45, %v9728_v16  ;;  %v9764_v63 = vsel %vm995_vm10, %v9548_v47, %v3121_v22  ;;  %v3117_v8 = vpop.permute.xlu0 %3116  ;;  %v2238_v6 = vadd.f32 %v2230_v39, %v9429_v35  ;;  %v9770_v5 = vmul.f32 %v12540_v45, %v9744_v49 }
 0x430   :  { %v2551_v50 = vsel %vm143_vm0, %v12563_v11, %v12562_v57  ;;  %v9774_v11 = vsel %vm995_vm10, %v9564_v60, %v3117_v8  ;;  %v9778_v9 = vadd.f32 %v2226_v4, %v9433_v40  ;;  %v9781_v47 = vmul.f32 %v12559_v19, %v2204_v10 }
 0x431   :  { %v11702_v35 = vrot.slane %v9739_v42, 1  ;;  %v2567_v39 = vadd.f32 %v2551_v50, %v2510_v23  ;;  %v12564_v45 = vrot.slane %v9193_v0, 1  ;;  %v2231_v60 = vmul.f32 %v12565_v44, %v2210_v2  ;;  %v3280_v57 = vpop.permute.xlu1 %3279 }
 0x432   :  { %v11701_v8 = vrot.slane %v9750_v37, 1  ;;  %v9792_v40 = vmul.f32 %v8918_v17, %v2210_v2  ;;  %v12566_v10 = vrot.slane %v9596_v33, 1  ;;  %v9802_v0 = vsel %vm970_vm5, %v9607_v24, %v3280_v57 }
 0x433   :  { %v2545_v22 = vsel %vm143_vm0, %v12564_v45, %v11697_v38  ;;  %v3276_v19 = vpop.permute.xlu0 %3275  ;;  %v9805_v4 = vmul.f32 %v8918_v17, %v2208_v27  ;;  %v12567_v45 = vrot.slane %v9723_v32, 1  ;;  %v12568_v2 = vrot.slane %v9613_v13, 1 }
 0x434   :  { %v2608_v50 = vsel %vm143_vm0, %v12566_v10, %v11698_v18  ;;  %v9815_v10 = vsel %vm970_vm5, %v9620_v31, %v3276_v19  ;;  %v12570_v18 = vrot.slane %v9735_v58, 2  ;;  %v12571_v24 = vrot.slane %v9189_v21, 2  ;;  %v12573_v19 = vld [vmem:[#allocation114_spill] sm:$0xff] }
 0x435   :  { %v2602_v38 = vsel %vm143_vm0, %v12568_v2, %v12567_v45  ;;  %12569 = vst [vmem:[#allocation126_spill] sm:$0xff] %v9815_v10  ;;  %v2563_v17 = vadd.f32 %v2545_v22, %v9654_v25  ;;  %v12572_v13 = vrot.slane %v9204_v51, 1  ;;  %v2239_v2 = vadd.f32 %v2231_v60, %v9551_v30  ;;  %v3314_v25 = vpop.permute.xlu1 %3313 }
 0x436   :  { %v2722_v57 = vsel %vm232_vm1, %v12571_v24, %v12570_v18  ;;  %v2227_v31 = vmul.f32 %v12565_v44, %v2208_v27  ;;  %v12574_v21 = vrot.slane %v12573_v19, 1  ;;  %v2624_v24 = vadd.f32 %v2608_v50, %v2567_v39 }
 0x437   :  { %v2554_v45 = vsel %vm143_vm0, %v12572_v13, %v11702_v35  ;;  %v11700_v22 = vrot.slane %v9792_v40, 2  ;;  %v2620_v23 = vadd.f32 %v2602_v38, %v2563_v17  ;;  %v12575_v33 = vrot.slane %v9760_v53, 1  ;;  %v3310_v27 = vpop.permute.xlu0 %3309 }
 0x438   :  { %v2548_v18 = vsel %vm143_vm0, %v12574_v21, %v11701_v8  ;;  %v12576_v51 = vrot.slane %v9634_v55, 1  ;;  %v9844_v30 = vsel %vm985_vm8, %v9644_v28, %v3314_v25  ;;  %v2568_v44 = vadd.f32 %v2554_v45, %v9690_v15 }
 0x439   :  { %v11699_v60 = vrot.slane %v9805_v4, 2  ;;  %v12577_v39 = vrot.slane %v9770_v5, 1  ;;  %v9853_v38 = vsel %vm985_vm8, %v9651_v34, %v3310_v27  ;;  %v12578_v55 = vrot.slane %v9781_v47, 2 }
 0x43a   :  { %v2611_v13 = vsel %vm143_vm0, %v12576_v51, %v12575_v33  ;;  %v12579_v33 = vld [vmem:[#allocation30_spill] sm:$0xff]  ;;  %v2564_v19 = vadd.f32 %v2548_v18, %v2507_v52  ;;  %v2447_v15 = vmul.f32 %v12520_v36, %v9684_v61  ;;  %v9864_v45 = vmul.f32 %v12532_v1, %v9684_v61  ;;  %v2906_v18 = vpop.permute.xlu1 %2905 }
 0x43b   :  { %v2605_v50 = vsel %vm143_vm0, %v2603_v54, %v12577_v39  ;;  %v12580_v17 = vrot.slane %v12579_v33, 2  ;;  %v5206_v54 = vld [vmem:[%s11507_s3 + $0x22] ss:$8 sm:$0x3]  ;;  %v9870_v34 = vadd.f32 %v2227_v31, %v9567_v3  ;;  %v9874_v21 = vmul.f32 %v12532_v1, %v9698_v62  ;;  %v2902_v3 = vpop.permute.xlu0 %2901  ;;  %v12581_v31 = vld [vmem:[#allocation31_spill] sm:$0xff] }
 0x43c   :  { %v2625_v25 = vadd.f32 %v2611_v13, %v2568_v44  ;;  %v2681_v52 = vadd.f32 %v9442_v59, %v2624_v24  ;;  %v2443_v51 = vmul.f32 %v12520_v36, %v9698_v62  ;;  %v2621_v61 = vadd.f32 %v2605_v50, %v2564_v19  ;;  %v12583_v59 = vld [vmem:[#allocation106_spill] sm:$0xff]  ;;  %v12585_v62 = vld [vmem:[#allocation20_spill] sm:$0xff] }
 0x43d   :  { %v2716_v28 = vsel %vm232_vm1, %v12580_v17, %v12578_v55  ;;  %v2677_v27 = vadd.f32 %v9466_v20, %v2620_v23  ;;  %v9882_v39 = vsel %vm995_vm10, %v9675_v14, %v2906_v18  ;;  %v12582_v1 = vrot.slane %v12581_v31, 2  ;;  %v5207_v33 = vld [vmem:[%s11507_s3 + $0x23] ss:$8 sm:$0x3] }
 0x43e   :  { %v12584_v24 = vrot.slane %v12583_v59, 2  ;;  %v9895_v44 = vrot.slane %v5206_v54, %v12585_v62  ;;  %v9899_v20 = vsel %vm995_vm10, %v9688_v41, %v2902_v3  ;;  %v2455_v14 = vadd.f32 %v2447_v15, %v2238_v6  ;;  %v3099_v15 = vpop.permute.xlu1 %3098  ;;  %v12586_v31 = vld [vmem:[#allocation124_spill] sm:$0xff] }
 0x43f   :  { %v2725_v13 = vsel %vm232_vm1, %v12582_v1, %v11700_v22  ;;  %v11703_v23 = vrot.slane %v9864_v45, 2  ;;  %v2448_v50 = vmul.f32 %v12536_v46, %v9728_v16  ;;  %v9906_v55 = vmul.f32 %v12543_v48, %v9728_v16  ;;  %v3095_v59 = vpop.permute.xlu0 %3094  ;;  %v12589_v22 = vld [vmem:[#allocation22_spill] sm:$0xff] }
 0x440   :  { %v2719_v36 = vsel %vm232_vm1, %v12584_v24, %v11699_v60  ;;  %v11704_v17 = vrot.slane %v9874_v21, 2  ;;  %v9914_v41 = vmul.f32 %v12543_v48, %v9744_v49  ;;  %v2738_v6 = vadd.f32 %v2722_v57, %v2681_v52  ;;  %v12588_v24 = vld [vmem:[#allocation111_spill] sm:$0xff]  ;;  %v12590_v57 = vld [vmem:[#allocation125_spill] sm:$0xff] }
 0x441   :  { %v2682_v19 = vadd.f32 %v9558_v29, %v2625_v25  ;;  %v2451_v18 = vadd.f32 %v2443_v51, %v9778_v9  ;;  %v2734_v3 = vadd.f32 %v2716_v28, %v2677_v27  ;;  %v2678_v16 = vadd.f32 %v9579_v7, %v2621_v61  ;;  %v12593_v25 = vld [vmem:[#allocation119_spill] sm:$0xff]  ;;  %v12595_v61 = vld [vmem:[#allocation112_spill] sm:$0xff] }
 0x442   :  { %v9921_v1 = vsel %vm985_vm8, %v12586_v31, %v3099_v15  ;;  %v2996_v60 = vmul.f32 %v9895_v44, %v12588_v24  ;;  %v9926_v48 = vrot.slane %v5206_v54, %v12589_v22  ;;  %v9930_v29 = vsel %vm985_vm8, %v12590_v57, %v3095_v59  ;;  %v12596_v31 = vld [vmem:[#allocation120_spill] sm:$0xff]  ;;  %v3133_v57 = vpop.permute.xlu1 %3132 }
 0x443   :  { %12587 = vst [vmem:[#allocation127_spill] sm:$0xff] %v9921_v1  ;;  %12591 = vst [vmem:[#allocation130_spill] sm:$0xff] %v9930_v29  ;;  %v9933_v9 = vrot.slane %v5207_v33, %v12585_v62  ;;  %v2456_v28 = vadd.f32 %v2448_v50, %v2239_v2  ;;  %v11705_v7 = vrot.slane %v9906_v55, 2  ;;  %v12594_v52 = vrot.slane %v12593_v25, 2 }
 0x444   :  { %v2992_v54 = vmul.f32 %v9895_v44, %v12595_v61  ;;  %v12597_v59 = vrot.slane %v12596_v31, 2  ;;  %v2739_v50 = vadd.f32 %v2725_v13, %v2682_v19  ;;  %v2735_v35 = vadd.f32 %v2719_v36, %v2678_v16 }
 0x445   :  { %12592 = vst [vmem:[#allocation132_spill] sm:$0xff] %v9933_v9  ;;  %v2779_v51 = vsel %vm232_vm1, %v12594_v52, %v11703_v23  ;;  %v9951_v25 = vsel %vm1000_vm11, %v9764_v63, %v3133_v57  ;;  %v3129_v52 = vpop.permute.xlu0 %3128  ;;  %v9954_v23 = vrot.slane %v5207_v33, %v12589_v22  ;;  %v12600_v63 = vld [vmem:[#allocation121_spill] sm:$0xff]  ;;  %v12602_v33 = vld [vmem:[#allocation128_spill] sm:$0xff]  ;;  %vm5069_vm4 = vcmask 1043456  }
 0x446   :  { %v2795_v15 = vadd.f32 %v2779_v51, %v2738_v6  ;;  %v2773_v2 = vsel %vm232_vm1, %v12597_v59, %v11704_v17  ;;  %v12599_v6 = vld [vmem:[#allocation123_spill] sm:$0xff]  ;;  %v3213_v31 = vmul.f32 %v9933_v9, %v9951_v25  ;;  %v9962_v13 = vsel %vm1000_vm11, %v9774_v11, %v3129_v52 }
 0x447   :  { %v2791_v8 = vadd.f32 %v2773_v2, %v2734_v3  ;;  %12598 = vst [vmem:[#allocation133_spill] sm:$0xff] %v9954_v23  ;;  %v2997_v51 = vmul.f32 %v9926_v48, %v12599_v6  ;;  %v12601_v19 = vrot.slane %v12600_v63, 2  ;;  %v3209_v16 = vmul.f32 %v9933_v9, %v9962_v13  ;;  %v3145_v63 = vpop.permute.xlu1 %3144 }
 0x448   :  { %v3004_v27 = vadd.f32 %v2996_v60, %v2795_v15  ;;  %v2993_v60 = vmul.f32 %v9926_v48, %v12602_v33  ;;  %v2444_v15 = vmul.f32 %v12536_v46, %v9744_v49  ;;  %v12603_v11 = vrot.slane %v9914_v41, 2  ;;  %v12609_v49 = vld [vmem:[#allocation113_spill] sm:$0xff] }
 0x449   :  { %v3000_v36 = vadd.f32 %v2992_v54, %v2791_v8  ;;  %v2782_v3 = vsel %vm232_vm1, %v12601_v19, %v11705_v7  ;;  %v12604_v8 = vrot.slane %v9694_v26, 2  ;;  %v12606_v19 = vld [vmem:[#allocation117_spill] sm:$0xff]  ;;  %v9987_v9 = vsel %vm1005_vm12, %v3133_v57, %v3145_v63  ;;  %v3141_v46 = vpop.permute.xlu0 %3140 }
 0x44a   :  { %v2796_v59 = vadd.f32 %v2782_v3, %v2739_v50  ;;  %v9980_v2 = vadd.f32 %v3213_v31, %v3004_v27  ;;  %v12607_v17 = vrot.slane %v12606_v19, 1  ;;  %v12610_v50 = vrot.slane %v12609_v49, 1  ;;  %v4237_v19 = vld [vmem:[%s12614_s25 + $0x8] sm:$0xff] }
 0x44b   :  { %v2776_v54 = vsel %vm232_vm1, %v12604_v8, %v12603_v11  ;;  %v9984_v1 = vadd.f32 %v3209_v16, %v3000_v36  ;;  %v3214_v26 = vmul.f32 %v9954_v23, %v9987_v9  ;;  %v9994_v27 = vsel %vm1005_vm12, %v3129_v52, %v3141_v46  ;;  %v10011_v52 = vpop.permute.xlu1 %3291  ;;  %v4253_v36 = vld [vmem:[%s12614_s25 + $0x88] sm:$0xff]  ;;  %v4254_v46 = vld [vmem:[%s12614_s25 + $0x90] sm:$0xff] }
 0x44c   :  { %12605 = vst [vmem:[#allocation136_spill] sm:$0xff] %v9980_v2  ;;  %v2512_v7 = vadd.f32 %v12607_v17, %v2455_v14  ;;  %v2792_v29 = vadd.f32 %v2776_v54, %v2735_v35  ;;  %v2513_v3 = vadd.f32 %v12610_v50, %v2456_v28  ;;  %v3005_v10 = vadd.f32 %v2997_v51, %v2796_v59  ;;  %v10002_v17 = vld [vmem:[%s11507_s3 + $0x25] ss:$8 sm:$0x3]  ;;  %v4238_v50 = vld [vmem:[%s12614_s25 + $0x10] sm:$0xff] }
 0x44d   :  { %12608 = vst [vmem:[#allocation137_spill] sm:$0xff] %v9984_v1  ;;  %v3210_v35 = vmul.f32 %v9954_v23, %v9994_v27  ;;  %v2452_v14 = vadd.f32 %v2444_v15, %v9870_v34  ;;  %v10007_v28 = vld [vmem:[%s11507_s3 + $0x30] ss:$8 sm:$0x3]  ;;  %v10015_v51 = vpop.permute.xlu0 %3287  ;;  %v4252_v34 = vld [vmem:[%s12614_s25 + $0x80] sm:$0xff]  ;;  %v12618_v8 = vrot.slane %v9739_v42, 1 }
 0x44e   :  { %v3001_v31 = vadd.f32 %v2993_v60, %v2792_v29  ;;  %v10009_v57 = vadd.f32 %v3214_v26, %v3005_v10  ;;  %12613 = vst [vmem:[#allocation139_spill] sm:$0xff] %v10015_v51  ;;  %v4236_v60 = vld [vmem:[%s12614_s25] sm:$0xff]  ;;  %v12615_v10 = vrot.slane %v9663_v56, 1  ;;  %v12616_v15 = vld [vmem:[#allocation110_spill] sm:$0xff]  ;;  %v5518_v63 = vpack.c.bf16 %v4253_v36, %v4252_v34 }
 0x44f   :  { %v12617_v59 = vrot.slane %v12616_v15, 1  ;;  %v2570_v54 = vadd.f32 %v12618_v8, %v2513_v3  ;;  %v4255_v56 = vld [vmem:[%s12614_s25 + $0x98] sm:$0xff]  ;;  %v3619_v42 = vrot.slane %v10007_v28, %v12585_v62  ;;  %v4256_v26 = vld [vmem:[%s12614_s25 + $0xa0] sm:$0xff]  ;;  %v10056_v36 = vpop.permute.xlu1 %3325  ;;  %v12628_v51 = vrot.slane %v9723_v32, 1 }
 0x450   :  { %12611 = vst [vmem:[#allocation134_spill] sm:$0xff] %v10009_v57  ;;  %v10013_v29 = vadd.f32 %v3210_v35, %v3001_v31  ;;  %v2569_v16 = vadd.f32 %v12615_v10, %v2512_v7  ;;  %v3448_v7 = vrot.slane %v10002_v17, %v12585_v62  ;;  %v5522_v49 = vpack.c.bf16 %v4255_v56, %v4254_v46  ;;  %v4239_v3 = vld [vmem:[%s12614_s25 + $0x18] sm:$0xff]  ;;  %v4284_v8 = vld [vmem:[%s12614_s25 + $0x180] sm:$0xff] }
 0x451   :  { %v2508_v11 = vadd.f32 %v12617_v59, %v2451_v18  ;;  %v5520_v18 = vpack.c.bf16 %v4237_v19, %v4236_v60  ;;  %v12619_v31 = vld [vmem:[#allocation118_spill] sm:$0xff]  ;;  %5519 = vmatprep.subr.bf16.mxu0 %v5518_v63  ;;  %v4257_v60 = vld [vmem:[%s12614_s25 + $0xa8] sm:$0xff]  ;;  %v10061_v10 = vpop.permute.xlu0 %3321  ;;  %v5524_v15 = vpack.c.bf16 %v4239_v3, %v4238_v50  ;;  %v4240_v59 = vld [vmem:[%s12614_s25 + $0x20] sm:$0xff]  ;;  %v12622_v63 = vrot.slane %v9703_v43, 1 }
 0x452   :  { %12612 = vst [vmem:[#allocation138_spill] sm:$0xff] %v10013_v29  ;;  %v12620_v35 = vrot.slane %v12619_v31, 1  ;;  %v5526_v56 = vpack.c.bf16 %v4257_v60, %v4256_v26  ;;  %v4258_v50 = vld [vmem:[%s12614_s25 + $0xb0] sm:$0xff]  ;;  %v4285_v3 = vld [vmem:[%s12614_s25 + $0x188] sm:$0xff]  ;;  %v3459_v43 = vmul.f32 %v3448_v7, %v12588_v24  ;;  %v4268_v31 = vld [vmem:[%s12614_s25 + $0x100] sm:$0xff]  ;;  %v3455_v60 = vmul.f32 %v3448_v7, %v12595_v61 }
 0x453   :  { %5521 = vmatpush3.bf16.msra.mxu0 %v5520_v18  ;;  %v2565_v46 = vadd.f32 %v12622_v63, %v2508_v11  ;;  %v4241_v18 = vld [vmem:[%s12614_s25 + $0x28] sm:$0xff]  ;;  %v3630_v11 = vmul.f32 %v3619_v42, %v12588_v24  ;;  %v5550_v26 = vpack.c.bf16 %v4285_v3, %v4284_v8  ;;  %v3626_v24 = vmul.f32 %v3619_v42, %v12595_v61  ;;  %v4286_v8 = vld [vmem:[%s12614_s25 + $0x190] sm:$0xff]  ;;  %v4287_v3 = vld [vmem:[%s12614_s25 + $0x198] sm:$0xff] }
 0x454   :  { %v2509_v34 = vadd.f32 %v12620_v35, %v2452_v14  ;;  %v12621_v14 = vrot.slane %v9714_v12, 1  ;;  %5523 = vmatprep.subr.bf16.mxu0 %v5522_v49  ;;  %v12623_v12 = vrot.slane %v9760_v53, 1  ;;  %v4259_v49 = vld [vmem:[%s12614_s25 + $0xb8] sm:$0xff]  ;;  %v4269_v35 = vld [vmem:[%s12614_s25 + $0x108] sm:$0xff]  ;;  %v12624_v53 = vrot.slane %v9750_v37, 1 }
 0x455   :  { %v5552_v63 = vpack.c.bf16 %v4269_v35, %v4268_v31  ;;  %v5528_v61 = vpack.c.bf16 %v4241_v18, %v4240_v59  ;;  %5551 = vmatprep.subr.bf16.mxu1 %v5550_v26  ;;  %v4270_v31 = vld [vmem:[%s12614_s25 + $0x110] sm:$0xff]  ;;  %v4243_v18 = vld [vmem:[%s12614_s25 + $0x38] sm:$0xff] }
 0x456   :  { %v10071_v19 = vadd.f32 %v12621_v14, %v2569_v16  ;;  %v2627_v16 = vadd.f32 %v12623_v12, %v2570_v54  ;;  %v2566_v54 = vadd.f32 %v12624_v53, %v2509_v34  ;;  %v10101_v14 = vpop.permute.xlu1 %2917  ;;  %v10114_v34 = vpop.permute.xlu0 %2913  ;;  %v5554_v12 = vpack.c.bf16 %v4287_v3, %v4286_v8  ;;  %v4242_v59 = vld [vmem:[%s12614_s25 + $0x30] sm:$0xff]  ;;  %v4271_v26 = vld [vmem:[%s12614_s25 + $0x118] sm:$0xff] }
 0x457   :  { %v10112_v37 = vsel %vm1000_vm11, %v9882_v39, %v10101_v14  ;;  %5525 = vmatpush3.bf16.msra.mxu0 %v5524_v15  ;;  %v10128_v39 = vsel %vm1000_vm11, %v9899_v20, %v10114_v34  ;;  %v5530_v15 = vpack.c.bf16 %v4259_v49, %v4258_v50  ;;  %v3477_v8 = vrot.slane %v3459_v43, 1  ;;  %5553 = vmatpush3.bf16.msra.mxu1 %v5552_v63  ;;  %v4261_v50 = vld [vmem:[%s12614_s25 + $0xc8] sm:$0xff] }
 0x458   :  { %v10120_v35 = vmul.f32 %v3448_v7, %v10112_v37  ;;  %v10123_v53 = vmul.f32 %v3619_v42, %v10112_v37  ;;  %5527 = vmatprep.subr.bf16.mxu0 %v5526_v56  ;;  %v3648_v3 = vrot.slane %v3630_v11, 2  ;;  %v10140_v23 = vmul.f32 %v3448_v7, %v10128_v39  ;;  %v4260_v56 = vld [vmem:[%s12614_s25 + $0xc0] sm:$0xff]  ;;  %5555 = vmatprep.subr.bf16.mxu1 %v5554_v12 }
 0x459   :  { %v10143_v20 = vmul.f32 %v3619_v42, %v10128_v39  ;;  %v3471_v49 = vrot.slane %v3455_v60, 1  ;;  %v5556_v7 = vpack.c.bf16 %v4271_v26, %v4270_v31  ;;  %v3642_v42 = vrot.slane %v3626_v24, 2  ;;  %v4244_v24 = vld [vmem:[%s12614_s25 + $0x40] sm:$0xff]  ;;  %v4245_v31 = vld [vmem:[%s12614_s25 + $0x48] sm:$0xff] }
 0x45a   :  { %12625 = vst [vmem:[#allocation135_spill] sm:$0xff] %v10123_v53  ;;  %12626 = vst [vmem:[#allocation140_spill] sm:$0xff] %v10140_v23  ;;  %v11711_v43 = vrot.slane %v10123_v53, 2  ;;  %v10153_v11 = vpop.permute.xlu1 %2929  ;;  %v11712_v63 = vrot.slane %v10140_v23, 1  ;;  %v10157_v1 = vpop.permute.xlu0 %2925  ;;  %v5532_v2 = vpack.c.bf16 %v4243_v18, %v4242_v59  ;;  %v2622_v60 = vadd.f32 %v12628_v51, %v2565_v46  ;;  %v12633_v18 = vld [vmem:[#allocation122_spill] sm:$0xff]  ;;  %v4248_v23 = vld [vmem:[%s12614_s25 + $0x60] sm:$0xff] }
 0x45b   :  { %12627 = vst [vmem:[#allocation141_spill] sm:$0xff] %v10143_v20  ;;  %v11710_v57 = vrot.slane %v10143_v20, 2  ;;  %5529 = vmatpush3.bf16.msra.mxu0 %v5528_v61  ;;  %v5534_v12 = vpack.c.bf16 %v4261_v50, %v4260_v56  ;;  %v12630_v61 = vrot.slane %v9770_v5, 1  ;;  %v12632_v51 = vrot.slane %v10120_v35, 1  ;;  %5557 = vmatpush3.bf16.msra.mxu1 %v5556_v7  ;;  %v4262_v5 = vld [vmem:[%s12614_s25 + $0xd0] sm:$0xff]  ;;  %v4289_v50 = vld [vmem:[%s12614_s25 + $0x1a8] sm:$0xff] }
 0x45c   :  { %v10164_v29 = vsel %vm232_vm1, %v3648_v3, %v11711_v43  ;;  %5531 = vmatprep.subr.bf16.mxu0 %v5530_v15  ;;  %v10187_v15 = vsel %vm143_vm0, %v3471_v49, %v11712_v63  ;;  %v12634_v26 = vrot.slane %v12633_v18, 2  ;;  %v4272_v49 = vld [vmem:[%s12614_s25 + $0x120] sm:$0xff]  ;;  %v4273_v18 = vld [vmem:[%s12614_s25 + $0x128] sm:$0xff] }
 0x45d   :  { %12629 = vst [vmem:[#allocation142_spill] sm:$0xff] %v10164_v29  ;;  %v2623_v59 = vadd.f32 %v12630_v61, %v2566_v54  ;;  %v10177_v32 = vsel %vm232_vm1, %v3642_v42, %v11710_v57  ;;  %v10182_v46 = vsel %vm143_vm0, %v3477_v8, %v12632_v51  ;;  %v4263_v54 = vld [vmem:[%s12614_s25 + $0xd8] sm:$0xff]  ;;  %v4288_v8 = vld [vmem:[%s12614_s25 + $0x1a0] sm:$0xff] }
 0x45e   :  { %12631 = vst [vmem:[#allocation36_spill] sm:$0xff] %v10177_v32  ;;  %v2684_v3 = vadd.f32 %v12634_v26, %v2627_v16  ;;  %v10197_v56 = vpop.permute.xlu1 %3110  ;;  %v12635_v7 = vld [vmem:[#allocation115_spill] sm:$0xff]  ;;  %v10211_v51 = vpop.permute.xlu0 %3106  ;;  %v5536_v16 = vpack.c.bf16 %v4245_v31, %v4244_v24  ;;  %v4290_v26 = vld [vmem:[%s12614_s25 + $0x1b0] sm:$0xff]  ;;  %v12637_v43 = vld [vmem:[#allocation116_spill] sm:$0xff]  ;;  %v5558_v32 = vpack.c.bf16 %v4289_v50, %v4288_v8 }
 0x45f   :  { %v12636_v42 = vrot.slane %v12635_v7, 2  ;;  %5533 = vmatpush3.bf16.msra.mxu0 %v5532_v2  ;;  %v4291_v57 = vld [vmem:[%s12614_s25 + $0x1b8] sm:$0xff]  ;;  %v12638_v63 = vrot.slane %v12637_v43, 2  ;;  %v4246_v2 = vld [vmem:[%s12614_s25 + $0x50] sm:$0xff]  ;;  %v4264_v31 = vld [vmem:[%s12614_s25 + $0xe0] sm:$0xff] }
 0x460   :  { %5535 = vmatprep.subr.bf16.mxu0 %v5534_v12  ;;  %v4247_v24 = vld [vmem:[%s12614_s25 + $0x58] sm:$0xff]  ;;  %v4265_v43 = vld [vmem:[%s12614_s25 + $0xe8] sm:$0xff]  ;;  %v12641_v12 = vrot.slane %v9792_v40, 2  ;;  %5559 = vmatprep.subr.bf16.mxu1 %v5558_v32  ;;  %v4266_v32 = vld [vmem:[%s12614_s25 + $0xf0] sm:$0xff] }
 0x461   :  { %v2683_v61 = vadd.f32 %v12636_v42, %v10071_v19  ;;  %v2679_v7 = vadd.f32 %v12638_v63, %v2622_v60  ;;  %v5538_v19 = vpack.c.bf16 %v4263_v54, %v4262_v5  ;;  %v12639_v42 = vld [vmem:[#allocation129_spill] sm:$0xff]  ;;  %v4275_v60 = vld [vmem:[%s12614_s25 + $0x138] sm:$0xff]  ;;  %v5542_v29 = vpack.c.bf16 %v4265_v43, %v4264_v31 }
 0x462   :  { %v12640_v20 = vrot.slane %v12639_v42, 2  ;;  %v4274_v63 = vld [vmem:[%s12614_s25 + $0x130] sm:$0xff]  ;;  %v2741_v5 = vadd.f32 %v12641_v12, %v2684_v3  ;;  %v10246_v54 = vpop.permute.xlu1 %3303  ;;  %v5560_v42 = vpack.c.bf16 %v4273_v18, %v4272_v49  ;;  %v4293_v8 = vld [vmem:[%s12614_s25 + $0x1c8] sm:$0xff]  ;;  %v12642_v3 = vrot.slane %v9735_v58, 2 }
 0x463   :  { %v5210_v50 = vld [vmem:[%s11507_s3 + $0x26] ss:$8 sm:$0x3]  ;;  %v5213_v40 = vld [vmem:[%s11507_s3 + $0x31] ss:$8 sm:$0x3]  ;;  %5537 = vmatpush3.bf16.msra.mxu0 %v5536_v16  ;;  %v5540_v18 = vpack.c.bf16 %v4247_v24, %v4246_v2 }
 0x464   :  { %v2680_v53 = vadd.f32 %v12640_v20, %v2623_v59  ;;  %v5562_v20 = vpack.c.bf16 %v4291_v57, %v4290_v26  ;;  %v4292_v59 = vld [vmem:[%s12614_s25 + $0x1c0] sm:$0xff]  ;;  %v2740_v49 = vadd.f32 %v12642_v3, %v2683_v61  ;;  %v10262_v57 = vpop.permute.xlu0 %3299  ;;  %v12643_v26 = vrot.slane %v9781_v47, 2  ;;  %5539 = vmatprep.subr.bf16.mxu0 %v5538_v19  ;;  %5561 = vmatpush3.bf16.msra.mxu1 %v5560_v42  ;;  %v4249_v58 = vld [vmem:[%s12614_s25 + $0x68] sm:$0xff] }
 0x465   :  { %v5564_v61 = vpack.c.bf16 %v4275_v60, %v4274_v63  ;;  %v12644_v16 = vrot.slane %v9805_v4, 2  ;;  %v5566_v19 = vpack.c.bf16 %v4293_v8, %v4292_v59  ;;  %v4276_v2 = vld [vmem:[%s12614_s25 + $0x140] sm:$0xff]  ;;  %v4277_v24 = vld [vmem:[%s12614_s25 + $0x148] sm:$0xff]  ;;  %v12645_v31 = vrot.slane %v9906_v55, 2 }
 0x466   :  { %v2736_v12 = vadd.f32 %v12643_v26, %v2679_v7  ;;  %5563 = vmatprep.subr.bf16.mxu1 %v5562_v20  ;;  %v4267_v7 = vld [vmem:[%s12614_s25 + $0xf8] sm:$0xff]  ;;  %v10292_v4 = vrot.slane %v10002_v17, %v12589_v22  ;;  %v10298_v63 = vpop.permute.xlu1 %3337  ;;  %v5208_v60 = vld [vmem:[%s11507_s3 + $0x24] ss:$8 sm:$0x3]  ;;  %v10304_v42 = vrot.slane %v5210_v50, %v12585_v62  ;;  %v10307_v55 = vrot.slane %v5213_v40, %v12585_v62  ;;  %v4250_v26 = vld [vmem:[%s12614_s25 + $0x70] sm:$0xff] }
 0x467   :  { %v2737_v47 = vadd.f32 %v12644_v16, %v2680_v53  ;;  %v10288_v43 = vadd.f32 %v12645_v31, %v2741_v5  ;;  %v10296_v53 = vrot.slane %v10007_v28, %v12589_v22  ;;  %v12646_v5 = vrot.slane %v9864_v45, 2  ;;  %5541 = vmatpush3.bf16.msra.mxu0 %v5540_v18  ;;  %v4251_v45 = vld [vmem:[%s12614_s25 + $0x78] sm:$0xff] }
 0x468   :  { %v10313_v20 = vpop.permute.xlu0 %3333  ;;  %v5544_v28 = vpack.c.bf16 %v4249_v58, %v4248_v23  ;;  %v12647_v59 = vrot.slane %v9874_v21, 2  ;;  %5543 = vmatprep.subr.bf16.mxu0 %v5542_v29  ;;  %5565 = vmatpush3.bf16.msra.mxu1 %v5564_v61  ;;  %v5546_v3 = vpack.c.bf16 %v4267_v7, %v4266_v32  ;;  %v12648_v16 = vrot.slane %v9914_v41, 2  ;;  %v5214_v58 = vld [vmem:[%s11507_s3 + $0x32] ss:$8 sm:$0x3] }
 0x469   :  { %v10311_v17 = vadd.f32 %v12646_v5, %v2740_v49  ;;  %v5568_v49 = vpack.c.bf16 %v4277_v24, %v4276_v2  ;;  %v10330_v21 = vrot.slane %v5210_v50, %v12589_v22  ;;  %v10333_v23 = vrot.slane %v5213_v40, %v12589_v22  ;;  %5567 = vmatprep.subr.bf16.mxu1 %v5566_v19 }
 0x46a   :  { %v10317_v8 = vadd.f32 %v12647_v59, %v2736_v12  ;;  %v10327_v18 = vadd.f32 %v12648_v16, %v2737_v47  ;;  %v10336_v29 = vrot.slane %v5208_v60, %v12585_v62  ;;  %v5211_v12 = vld [vmem:[%s11507_s3 + $0x27] ss:$8 sm:$0x3]  ;;  %v10346_v41 = vmul.f32 %v10292_v4, %v12599_v6  ;;  %v10360_v32 = vpop.permute.xlu1 %3122 }
 0x46b   :  { %v10350_v50 = vmul.f32 %v10296_v53, %v12599_v6  ;;  %v10354_v40 = vmul.f32 %v10292_v4, %v12602_v33  ;;  %v10358_v61 = vmul.f32 %v10296_v53, %v12602_v33  ;;  %v10364_v47 = vmul.f32 %v10304_v42, %v9951_v25  ;;  %5545 = vmatpush3.bf16.msra.mxu0 %v5544_v28 }
 0x46c   :  { %v10368_v7 = vmul.f32 %v10307_v55, %v9951_v25  ;;  %v10372_v6 = vmul.f32 %v10304_v42, %v9962_v13  ;;  %v10374_v19 = vpop.permute.xlu0 %3118  ;;  %v5548_v2 = vpack.c.bf16 %v4251_v45, %v4250_v26  ;;  %v10378_v33 = vmul.f32 %v10307_v55, %v9962_v13  ;;  %5547 = vmatprep.subr.bf16.mxu0 %v5546_v3  ;;  %v12654_v3 = vld [vmem:[#allocation136_spill] sm:$0xff] }
 0x46d   :  { %12649 = vst [vmem:[#allocation37_spill] sm:$0xff] %v10358_v61  ;;  %v10381_v24 = vrot.slane %v5211_v12, %v12585_v62  ;;  %v10384_v31 = vrot.slane %v5214_v58, %v12585_v62  ;;  %5569 = vmatpush3.bf16.msra.mxu1 %v5568_v49  ;;  %v10388_v25 = vmul.f32 %v10330_v21, %v9987_v9  ;;  %v3651_v62 = vrot.slane %v10350_v50, 2 }
 0x46e   :  { %v10391_v5 = vrot.slane %v5208_v60, %v12589_v22  ;;  %v10394_v28 = vrot.slane %v5211_v12, %v12589_v22  ;;  %v10397_v13 = vrot.slane %v5214_v58, %v12589_v22  ;;  %v10403_v45 = vpop.permute.xlu1 %3315  ;;  %v2978_v22 = vsel %vm1005_vm12, %v10101_v14, %v10153_v11 }
 0x46f   :  { %5549 = vmatpush3.bf16.msra.mxu0 %v5548_v2  ;;  %v10416_v50 = vmul.f32 %v10333_v23, %v9987_v9  ;;  %v10420_v26 = vmul.f32 %v10330_v21, %v9994_v27  ;;  %v10424_v16 = vmul.f32 %v10333_v23, %v9994_v27  ;;  %v3399_v14 = vsel %vm990_vm9, %v9844_v30, %v10056_v36 }
 0x470   :  { %v10411_v12 = vpop.permute.xlu0 %3311  ;;  %v3397_v11 = vsel %vm990_vm9, %v9853_v38, %v10061_v10  ;;  %v2998_v9 = vmul.f32 %v9895_v44, %v10112_v37  ;;  %v2994_v2 = vmul.f32 %v9895_v44, %v10128_v39  ;;  %v2999_v58 = vmul.f32 %v9926_v48, %v2978_v22 }
 0x471   :  { %12650 = vst [vmem:[#allocation143_spill] sm:$0xff] %v10416_v50  ;;  %12651 = vst [vmem:[#allocation131_spill] sm:$0xff] %v10424_v16  ;;  %v2976_v27 = vsel %vm1005_vm12, %v10114_v34, %v10157_v1  ;;  %v3403_v60 = vsel %vm995_vm10, %v3399_v14, %v10298_v63  ;;  %v10444_v36 = vmul.f32 %v10292_v4, %v2978_v22  ;;  %v12652_v14 = vld [vmem:[#allocation139_spill] sm:$0xff] }
 0x472   :  { %v3350_v30 = vpop.permute.xlu1 %3349  ;;  %v10447_v38 = vmul.f32 %v10296_v53, %v2978_v22  ;;  %v3401_v10 = vsel %vm995_vm10, %v3397_v11, %v10313_v20  ;;  %v3388_v22 = vsel %vm975_vm6, %v9802_v0, %v10011_v52  ;;  %v12653_v20 = vld [vmem:[#allocation126_spill] sm:$0xff]  ;;  %v10468_v11 = vmul.f32 %v10292_v4, %v2976_v27 }
 0x473   :  { %v10452_v44 = vsel %vm1000_vm11, %v3403_v60, %v3350_v30  ;;  %v3386_v60 = vsel %vm975_vm6, %v12653_v20, %v12652_v14  ;;  %v3006_v1 = vadd.f32 %v2998_v9, %v10311_v17  ;;  %v3002_v49 = vadd.f32 %v2994_v2, %v10317_v8  ;;  %v12655_v20 = vld [vmem:[#allocation137_spill] sm:$0xff] }
 0x474   :  { %v3346_v37 = vpop.permute.xlu0 %3345  ;;  %v3430_v34 = vmul.f32 %v10336_v29, %v10452_v44  ;;  %v3481_v52 = vrot.slane %v10444_v36, 1  ;;  %v11719_v14 = vrot.slane %v10447_v38, 2  ;;  %v2995_v50 = vmul.f32 %v9926_v48, %v2976_v27  ;;  %v12657_v48 = vld [vmem:[#allocation130_spill] sm:$0xff] }
 0x475   :  { %v10459_v63 = vsel %vm1000_vm11, %v3401_v10, %v3346_v37  ;;  %v10475_v10 = vadd.f32 %v2999_v58, %v10288_v43  ;;  %v10484_v17 = vmul.f32 %v10296_v53, %v2976_v27  ;;  %v12656_v58 = vld [vmem:[#allocation127_spill] sm:$0xff]  ;;  %v3181_v53 = vsel %vm990_vm9, %v12657_v48, %v10211_v51 }
 0x476   :  { %v3426_v39 = vmul.f32 %v10336_v29, %v10459_v63  ;;  %v3438_v59 = vadd.f32 %v3430_v34, %v12654_v3  ;;  %v3362_v0 = vpop.permute.xlu1 %3361  ;;  %v11718_v3 = vrot.slane %v10468_v11, 1  ;;  %v3183_v9 = vsel %vm990_vm9, %v12656_v58, %v10197_v56 }
 0x477   :  { %v3411_v61 = vsel %vm1005_vm12, %v3350_v30, %v3362_v0  ;;  %v3185_v56 = vsel %vm995_vm10, %v3181_v53, %v10374_v19  ;;  %v12659_v51 = vrot.slane %v10346_v41, 1  ;;  %v12662_v41 = vrot.slane %v10354_v40, 1 }
 0x478   :  { %v3434_v4 = vadd.f32 %v3426_v39, %v12655_v20  ;;  %v3358_v16 = vpop.permute.xlu0 %3357  ;;  %v3495_v43 = vadd.f32 %v10182_v46, %v3438_v59  ;;  %v3431_v8 = vmul.f32 %v10391_v5, %v3411_v61  ;;  %v3187_v46 = vsel %vm995_vm10, %v3183_v9, %v10360_v32  ;;  %v12658_v59 = vld [vmem:[#allocation134_spill] sm:$0xff] }
 0x479   :  { %v10494_v30 = vsel %vm1005_vm12, %v3346_v37, %v3358_v16  ;;  %v3482_v32 = vsel %vm143_vm0, %v12659_v51, %v3481_v52  ;;  %v12660_v20 = vld [vmem:[#allocation138_spill] sm:$0xff]  ;;  %v10523_v9 = vadd.f32 %v2995_v50, %v10327_v18  ;;  %v3476_v19 = vsel %vm143_vm0, %v12662_v41, %v11718_v3 }
 0x47a   :  { %v3491_v2 = vadd.f32 %v10187_v15, %v3434_v4  ;;  %v3439_v27 = vadd.f32 %v3431_v8, %v12658_v59  ;;  %v3427_v39 = vmul.f32 %v10391_v5, %v10494_v30  ;;  %v3135_v34 = vpop.permute.xlu1 %3134  ;;  %v10507_v15 = vsel %vm232_vm1, %v3651_v62, %v11719_v14  ;;  %v12661_v8 = vld [vmem:[#allocation132_spill] sm:$0xff] }
 0x47b   :  { %v3191_v16 = vsel %vm1000_vm11, %v3187_v46, %v3135_v34 }
 0x47c   :  { %v3131_v37 = vpop.permute.xlu0 %3130  ;;  %v3496_v0 = vadd.f32 %v3482_v32, %v3439_v27  ;;  %v3435_v4 = vadd.f32 %v3427_v39, %v12660_v20  ;;  %v3215_v58 = vmul.f32 %v12661_v8, %v3191_v16  ;;  %v10520_v62 = vmul.f32 %v10304_v42, %v3191_v16 }
 0x47d   :  { %v10531_v48 = vmul.f32 %v10307_v55, %v3191_v16  ;;  %v3189_v53 = vsel %vm1000_vm11, %v3185_v56, %v3131_v37  ;;  %v12663_v56 = vrot.slane %v10364_v47, 1 }
 0x47e   :  { %v3492_v46 = vadd.f32 %v3476_v19, %v3435_v4  ;;  %v10534_v59 = vadd.f32 %v3215_v58, %v3006_v1  ;;  %v3535_v27 = vrot.slane %v10520_v62, 1  ;;  %v3211_v39 = vmul.f32 %v12661_v8, %v3189_v53  ;;  %v3147_v18 = vpop.permute.xlu1 %3146 }
 0x47f   :  { %v3706_v50 = vrot.slane %v10531_v48, 2  ;;  %v10540_v51 = vmul.f32 %v10304_v42, %v3189_v53  ;;  %v10543_v40 = vmul.f32 %v10307_v55, %v3189_v53  ;;  %v3195_v32 = vsel %vm1005_vm12, %v3135_v34, %v3147_v18 }
 0x480   :  { %v3143_v16 = vpop.permute.xlu0 %3142  ;;  %v3392_v1 = vsel %vm980_vm7, %v3388_v22, %v10246_v54  ;;  %v3536_v20 = vsel %vm143_vm0, %v12663_v56, %v3535_v27  ;;  %v10553_v4 = vadd.f32 %v3211_v39, %v3002_v49  ;;  %v10556_v42 = vmul.f32 %v10330_v21, %v3195_v32 }
 0x481   :  { %v10558_v8 = vadd.f32 %v3536_v20, %v3495_v43  ;;  %v12664_v55 = vrot.slane %v10368_v7, 2  ;;  %v3529_v54 = vrot.slane %v10540_v51, 1  ;;  %v11720_v47 = vrot.slane %v10543_v40, 2 }
 0x482   :  { %v3390_v49 = vsel %vm980_vm7, %v3386_v60, %v10262_v57  ;;  %v10573_v22 = vmul.f32 %v10381_v24, %v10452_v44  ;;  %v3538_v43 = vrot.slane %v10556_v42, 1  ;;  %v3193_v58 = vsel %vm1005_vm12, %v3131_v37, %v3143_v16  ;;  %v3328_v41 = vpop.permute.xlu1 %3327 }
 0x483   :  { %v10565_v34 = vsel %vm232_vm1, %v12664_v55, %v3706_v50  ;;  %v3744_v7 = vmul.f32 %v10384_v31, %v10452_v44  ;;  %v12665_v19 = vrot.slane %v10372_v6, 1  ;;  %v12666_v57 = vrot.slane %v10378_v33, 2 }
 0x484   :  { %v10592_v39 = vmul.f32 %v10330_v21, %v3193_v58  ;;  %v3324_v37 = vpop.permute.xlu0 %3323  ;;  %v3569_v44 = vmul.f32 %v10381_v24, %v10459_v63  ;;  %v3740_v18 = vmul.f32 %v10384_v31, %v10459_v63  ;;  %v12667_v16 = vrot.slane %v10388_v25, 1 }
 0x485   :  { %v3530_v53 = vsel %vm143_vm0, %v12665_v19, %v3529_v54  ;;  %v10589_v60 = vsel %vm232_vm1, %v12666_v57, %v11720_v47  ;;  %v10604_v56 = vmul.f32 %v10394_v28, %v3411_v61  ;;  %v10607_v21 = vmul.f32 %v10397_v13, %v3411_v61  ;;  %v12668_v57 = vld [vmem:[#allocation133_spill] sm:$0xff] }
 0x486   :  { %v3548_v6 = vadd.f32 %v3530_v53, %v3491_v2  ;;  %v3539_v33 = vsel %vm143_vm0, %v12667_v16, %v3538_v43  ;;  %v11721_v55 = vrot.slane %v10592_v39, 1  ;;  %v3396_v63 = vsel %vm985_vm8, %v3392_v1, %v10403_v45  ;;  %v3340_v53 = vpop.permute.xlu1 %3339 }
 0x487   :  { %v10609_v20 = vadd.f32 %v3539_v33, %v3496_v0  ;;  %v3394_v25 = vsel %vm985_vm8, %v3390_v49, %v10411_v12  ;;  %v10619_v2 = vmul.f32 %v10394_v28, %v10494_v30  ;;  %v3591_v61 = vrot.slane %v10573_v22, 1 }
 0x488   :  { %v3216_v0 = vmul.f32 %v12668_v57, %v3195_v32  ;;  %v10624_v16 = vmul.f32 %v10333_v23, %v3195_v32  ;;  %v12669_v33 = vrot.slane %v10420_v26, 1  ;;  %v3336_v1 = vpop.permute.xlu0 %3335  ;;  %v3762_v12 = vrot.slane %v3744_v7, 2 }
 0x489   :  { %v3585_v49 = vrot.slane %v3569_v44, 1  ;;  %v3756_v19 = vrot.slane %v3740_v18, 2  ;;  %v3594_v14 = vrot.slane %v10604_v56, 1  ;;  %v10637_v32 = vmul.f32 %v10397_v13, %v10494_v30 }
 0x48a   :  { %v3533_v45 = vsel %vm143_vm0, %v12669_v33, %v11721_v55  ;;  %v3400_v47 = vsel %vm990_vm9, %v3396_v63, %v3328_v41  ;;  %v3212_v33 = vmul.f32 %v12668_v57, %v3193_v58  ;;  %v3398_v7 = vsel %vm990_vm9, %v3394_v25, %v3324_v37 }
 0x48b   :  { %v10631_v3 = vadd.f32 %v3533_v45, %v3492_v46  ;;  %v3404_v44 = vsel %vm995_vm10, %v3400_v47, %v3340_v53  ;;  %v3352_v46 = vpop.permute.xlu1 %3351  ;;  %v3224_v18 = vadd.f32 %v3216_v0, %v10475_v10  ;;  %v3709_v56 = vrot.slane %v10624_v16, 2 }
 0x48c   :  { %v3402_v45 = vsel %vm995_vm10, %v3398_v7, %v3336_v1  ;;  %v3408_v30 = vsel %vm1000_vm11, %v3404_v44, %v3352_v46  ;;  %v3348_v55 = vpop.permute.xlu0 %3347  ;;  %v10653_v47 = vmul.f32 %v10333_v23, %v3193_v58  ;;  %v3220_v0 = vadd.f32 %v3212_v33, %v10523_v9 }
 0x48d   :  { %v3432_v41 = vmul.f32 %v10336_v29, %v3408_v30  ;;  %v3575_v63 = vmul.f32 %v10381_v24, %v3408_v30  ;;  %v3746_v57 = vmul.f32 %v10384_v31, %v3408_v30  ;;  %v3406_v37 = vsel %vm1000_vm11, %v3402_v45, %v3348_v55 }
 0x48e   :  { %v3428_v10 = vmul.f32 %v10336_v29, %v3406_v37  ;;  %v3571_v25 = vmul.f32 %v10381_v24, %v3406_v37  ;;  %v3742_v53 = vmul.f32 %v10384_v31, %v3406_v37  ;;  %v12670_v58 = vrot.slane %v10120_v35, 1 }
 0x48f   :  { %v3440_v1 = vadd.f32 %v3432_v41, %v10534_v59  ;;  %v3592_v7 = vrot.slane %v3575_v63, 1  ;;  %v3763_v44 = vrot.slane %v3746_v57, 2  ;;  %v3364_v26 = vpop.permute.xlu1 %3363  ;;  %v12671_v41 = vld [vmem:[#allocation140_spill] sm:$0xff] }
 0x490   :  { %v3436_v30 = vadd.f32 %v3428_v10, %v10553_v4  ;;  %v3586_v22 = vrot.slane %v3571_v25, 1  ;;  %v3757_v45 = vrot.slane %v3742_v53, 2  ;;  %v3412_v23 = vsel %vm1005_vm12, %v3352_v46, %v3364_v26  ;;  %v3360_v33 = vpop.permute.xlu0 %3359 }
 0x491   :  { %v3497_v29 = vadd.f32 %v12670_v58, %v3440_v1  ;;  %v3593_v24 = vsel %vm143_vm0, %v3591_v61, %v3592_v7  ;;  %v3764_v31 = vsel %vm232_vm1, %v3762_v12, %v3763_v44  ;;  %v3433_v9 = vmul.f32 %v10391_v5, %v3412_v23  ;;  %v12673_v12 = vld [vmem:[#allocation142_spill] sm:$0xff]  ;;  %v12677_v58 = vld [vmem:[#allocation135_spill] sm:$0xff] }
 0x492   :  { %v3609_v59 = vadd.f32 %v3593_v24, %v10558_v8  ;;  %v12672_v63 = vrot.slane %v12671_v41, 1  ;;  %v3587_v4 = vsel %vm143_vm0, %v3585_v49, %v3586_v22  ;;  %v3758_v37 = vsel %vm232_vm1, %v3756_v19, %v3757_v45  ;;  %v12674_v49 = vld [vmem:[#allocation36_spill] sm:$0xff] }
 0x493   :  { %v3554_v35 = vadd.f32 %v3535_v27, %v3497_v29  ;;  %v3605_v26 = vadd.f32 %v3587_v4, %v3548_v6  ;;  %v3441_v46 = vadd.f32 %v3433_v9, %v3224_v18  ;;  %v3576_v61 = vmul.f32 %v10394_v28, %v3412_v23  ;;  %v12675_v6 = vld [vmem:[#allocation143_spill] sm:$0xff]  ;;  %v12679_v9 = vld [vmem:[#allocation141_spill] sm:$0xff] }
 0x494   :  { %v3493_v57 = vadd.f32 %v12672_v63, %v3436_v30  ;;  %v3666_v10 = vadd.f32 %v12673_v12, %v3609_v59  ;;  %v3747_v8 = vmul.f32 %v10397_v13, %v3412_v23  ;;  %v3410_v53 = vsel %vm1005_vm12, %v3348_v55, %v3360_v33 }
 0x495   :  { %v3611_v1 = vadd.f32 %v3592_v7, %v3554_v35  ;;  %v3662_v30 = vadd.f32 %v12674_v49, %v3605_v26  ;;  %v3498_v62 = vadd.f32 %v3481_v52, %v3441_v46  ;;  %v3595_v27 = vrot.slane %v3576_v61, 1 }
 0x496   :  { %v3550_v25 = vadd.f32 %v3529_v54, %v3493_v57  ;;  %v12676_v19 = vrot.slane %v12675_v6, 2  ;;  %v3723_v51 = vadd.f32 %v10565_v34, %v3666_v10  ;;  %v3429_v23 = vmul.f32 %v10391_v5, %v3410_v53 }
 0x497   :  { %v12678_v55 = vrot.slane %v12677_v58, 2  ;;  %v3719_v29 = vadd.f32 %v10589_v60, %v3662_v30  ;;  %v3555_v36 = vadd.f32 %v3538_v43, %v3498_v62  ;;  %v3596_v52 = vsel %vm143_vm0, %v3594_v14, %v3595_v27 }
 0x498   :  { %v3710_v18 = vsel %vm232_vm1, %v12676_v19, %v3709_v56  ;;  %v3607_v54 = vadd.f32 %v3586_v22, %v3550_v25  ;;  %v3780_v24 = vadd.f32 %v3764_v31, %v3723_v51  ;;  %v12680_v33 = vrot.slane %v12679_v9, 2 }
 0x499   :  { %v3668_v7 = vadd.f32 %v12678_v55, %v3611_v1  ;;  %v3610_v34 = vadd.f32 %v3596_v52, %v10609_v20  ;;  %v3766_v22 = vrot.slane %v3747_v8, 2  ;;  %v3776_v41 = vadd.f32 %v3758_v37, %v3719_v29 }
 0x49a   :  { %v3664_v59 = vadd.f32 %v12680_v33, %v3607_v54  ;;  %v3612_v63 = vadd.f32 %v3595_v27, %v3555_v36  ;;  %v3437_v57 = vadd.f32 %v3429_v23, %v3220_v0  ;;  %v3788_v60 = vmax.f32 %v3780_v24, 0.0 }
 0x49b   :  { %v3725_v5 = vadd.f32 %v3706_v50, %v3668_v7  ;;  %v12681_v4 = vrot.slane %v10543_v40, 2  ;;  %v3667_v43 = vadd.f32 %v10507_v15, %v3610_v34  ;;  %v3572_v14 = vmul.f32 %v10394_v28, %v3410_v53  ;;  %v4295_v34 = vld [vmem:[%s12614_s25 + $0x1d8] sm:$0xff] }
 0x49c   :  { %v3784_v35 = vmax.f32 %v3776_v41, 0.0  ;;  %v12682_v26 = vrot.slane %v10447_v38, 2  ;;  %v12683_v46 = vrot.slane %v10468_v11, 1  ;;  %3798 = vst [vmem:[#allocation2 + $0x20] sm:$0xff] %v3788_v60  ;;  %v3743_v61 = vmul.f32 %v10397_v13, %v3410_v53  ;;  %v4316_v60 = vld [vmem:[%s12614_s25 + $0x280] sm:$0xff] }
 0x49d   :  { %v3721_v42 = vadd.f32 %v12681_v4, %v3664_v59  ;;  %v3782_v31 = vadd.f32 %v3763_v44, %v3725_v5  ;;  %v3724_v37 = vadd.f32 %v3710_v18, %v3667_v43  ;;  %v3589_v0 = vrot.slane %v3572_v14, 1  ;;  %v4294_v59 = vld [vmem:[%s12614_s25 + $0x1d0] sm:$0xff]  ;;  %v4317_v4 = vld [vmem:[%s12614_s25 + $0x288] sm:$0xff] }
 0x49e   :  { %v3669_v20 = vadd.f32 %v12682_v26, %v3612_v63  ;;  %v3494_v48 = vadd.f32 %v12683_v46, %v3437_v57  ;;  %3792 = vst [vmem:[#allocation2] sm:$0xff] %v3784_v35  ;;  %v12684_v28 = vrot.slane %v10607_v21, 2  ;;  %v12685_v38 = vrot.slane %v10592_v39, 1  ;;  %v12687_v21 = vld [vmem:[#allocation131_spill] sm:$0xff]  ;;  %v12689_v39 = vld [vmem:[#allocation37_spill] sm:$0xff] }
 0x49f   :  { %v3778_v50 = vadd.f32 %v3757_v45, %v3721_v42  ;;  %v3790_v40 = vmax.f32 %v3782_v31, 0.0  ;;  %v3703_v11 = vrot.slane %v10653_v47, 2  ;;  %v12686_v25 = vrot.slane %v10619_v2, 1 }
 0x4a0   :  { %v3726_v15 = vadd.f32 %v3709_v56, %v3669_v20  ;;  %v3767_v44 = vsel %vm232_vm1, %v12684_v28, %v3766_v22  ;;  %v3551_v12 = vadd.f32 %v12685_v38, %v3494_v48  ;;  %v3702_v53 = vrot.slane %v12687_v21, 2 }
 0x4a1   :  { %v3786_v10 = vmax.f32 %v3778_v50, 0.0  ;;  %v3781_v45 = vadd.f32 %v3767_v44, %v3724_v37  ;;  %v3590_v13 = vsel %vm143_vm0, %v12686_v25, %v3589_v0  ;;  %3800 = vst [vmem:[#allocation2 + $0x30] sm:$0xf] %v3790_v40  ;;  %v12688_v1 = vrot.slane %v10484_v17, 2 }
 0x4a2   :  { %v3783_v8 = vadd.f32 %v3766_v22, %v3726_v15  ;;  %v3606_v16 = vadd.f32 %v3590_v13, %v10631_v3  ;;  %v3608_v56 = vadd.f32 %v3589_v0, %v3551_v12  ;;  %v12690_v49 = vrot.slane %v12689_v39, 2  ;;  %v12692_v22 = vld [vmem:[#allocation276_spill] sm:$0xff] }
 0x4a3   :  { %3795 = vst [vmem:[#allocation2 + $0x10] sm:$0xf] %v3786_v10  ;;  %v3789_v30 = vmax.f32 %v3781_v45, 0.0  ;;  %v3760_v62 = vrot.slane %v3743_v61, 2  ;;  %v12691_v6 = vmov %v12688_v1  ;;  %v3759_v18 = vrot.slane %v10637_v32, 2 }
 0x4a4   :  { %v3647_v47 = vsel %vm232_vm1, %v12690_v49, %v12688_v1  ;;  %v3791_v2 = vmax.f32 %v3783_v8, 0.0  ;;  %v3665_v19 = vadd.f32 %v12691_v6, %v3608_v56  ;;  %v3704_v3 = vsel %vm232_vm1, %v3702_v53, %v3703_v11 }
 0x4a5   :  { %v3663_v27 = vadd.f32 %v3647_v47, %v3606_v16  ;;  %3799 = vst.msk [vmem:[#allocation2 + $0x28] sm:$0xff] %vm3793_vm13, %v3789_v30  ;;  %v3761_v23 = vsel %vm232_vm1, %v3759_v18, %v3760_v62  ;;  %v5957_v7 = vmov 1966171168   ;;  %v5570_v57 = vpack.c.bf16 %v4295_v34, %v4294_v59 }
 0x4a6   :  { %3801 = vst.msk [vmem:[#allocation2 + $0x38] sm:$0xf] %vm3796_vm14, %v3791_v2  ;;  %v3722_v54 = vadd.f32 %v3703_v11, %v3665_v19  ;;  %v3853_v29 = vunpack.c.l.s4 %v5957_v7  ;;  %v5582_v31 = vpack.c.bf16 %v4317_v4, %v4316_v60  ;;  %v4299_v60 = vld [vmem:[%s12614_s25 + $0x1f8] sm:$0xff]  ;;  %vm4035_vm0 = vcmask 654336  }
 0x4a7   :  { %v3720_v51 = vadd.f32 %v3704_v3, %v3663_v27  ;;  %5571 = vmatprep.subr.bf16.mxu1 %v5570_v57  ;;  %v4278_v3 = vld [vmem:[%s12614_s25 + $0x150] sm:$0xff]  ;;  %vm3937_vm1 = vcmask 261120  }
 0x4a8   :  { %v3779_v55 = vadd.f32 %v3760_v62, %v3722_v54  ;;  %v3854_v17 = vunpack.c.0.s8 %v3853_v29  ;;  %5583 = vmatprep.subr.bf16.mxu0 %v5582_v31  ;;  %v4298_v57 = vld [vmem:[%s12614_s25 + $0x1f0] sm:$0xff] }
 0x4a9   :  { %v3777_v58 = vadd.f32 %v3761_v23, %v3720_v51  ;;  %v4279_v51 = vld [vmem:[%s12614_s25 + $0x158] sm:$0xff]  ;;  %v4296_v23 = vld [vmem:[%s12614_s25 + $0x1e0] sm:$0xff] }
 0x4aa   :  { %v3787_v52 = vmax.f32 %v3779_v55, 0.0  ;;  %v10744_v5 = vsub.s32 %v3854_v17, %v12692_v22  ;;  %v4280_v22 = vld [vmem:[%s12614_s25 + $0x160] sm:$0xff] }
 0x4ab   :  { %v3785_v36 = vmax.f32 %v3777_v58, 0.0  ;;  %v4297_v58 = vld [vmem:[%s12614_s25 + $0x1e8] sm:$0xff] }
 0x4ac   :  { %3797 = vst.msk [vmem:[#allocation2 + $0x18] sm:$0xf] %vm3796_vm14, %v3787_v52  ;;  %v3808_v32 = vld [vmem:[#allocation2 + $0x21] ss:$8 sm:$0x3]  ;;  %v5574_v34 = vpack.c.bf16 %v4297_v58, %v4296_v23  ;;  %v4303_v23 = vld [vmem:[%s12614_s25 + $0x218] sm:$0xff] }
 0x4ad   :  { %3794 = vst.msk [vmem:[#allocation2 + $0x8] sm:$0xff] %vm3793_vm13, %v3785_v36  ;;  %v3820_v24 = vld [vmem:[#allocation2 + $0x24] ss:$8 sm:$0x3] }
 0x4ae   :  { %v3816_v9 = vld [vmem:[#allocation2 + $0x23] ss:$8 sm:$0x3]  ;;  %v3812_v33 = vld [vmem:[#allocation2 + $0x22] ss:$8 sm:$0x3] }
 0x4af   :  { %v3824_v41 = vld [vmem:[#allocation2 + $0x25] ss:$8 sm:$0x3]  ;;  %v3832_v63 = vld [vmem:[#allocation2 + $0x27] ss:$8 sm:$0x3] }
 0x4b0   :  { %v3828_v14 = vld [vmem:[#allocation2 + $0x26] ss:$8 sm:$0x3]  ;;  %v3844_v53 = vld [vmem:[#allocation2 + $0x32] ss:$8 sm:$0x3] }
 0x4b1   :  { %v3840_v30 = vld [vmem:[#allocation2 + $0x31] ss:$8 sm:$0x3]  ;;  %v4320_v58 = vld [vmem:[%s12614_s25 + $0x2a0] sm:$0xff] }
 0x4b3   :  { %v3842_v21 = vld [vmem:[#allocation2 + $0x12] ss:$8 sm:$0x3]  ;;  %v3838_v47 = vld [vmem:[#allocation2 + $0x11] ss:$8 sm:$0x3] }
 0x4b4   :  { %v3806_v42 = vld [vmem:[#allocation2 + $0x1] ss:$8 sm:$0x3]  ;;  %v3818_v43 = vld [vmem:[#allocation2 + $0x4] ss:$8 sm:$0x3]  ;;  %v4165_v18 = vcombine.low %v3842_v21, %v3844_v53  ;;  %v4133_v54 = vcombine.low %v3838_v47, %v3840_v30 }
 0x4b5   :  { %v3878_v35 = vcombine.low %v3806_v42, %v3808_v32  ;;  %v3975_v26 = vcombine.low %v3818_v43, %v3820_v24  ;;  %v3814_v20 = vld [vmem:[#allocation2 + $0x3] ss:$8 sm:$0x3]  ;;  %v3822_v46 = vld [vmem:[#allocation2 + $0x5] ss:$8 sm:$0x3]  ;;  %v5572_v24 = vpack.c.bf16 %v4279_v51, %v4278_v3 }
 0x4b6   :  { %v3943_v48 = vcombine.low %v3814_v20, %v3816_v9  ;;  %v3810_v50 = vld [vmem:[#allocation2 + $0x2] ss:$8 sm:$0x3]  ;;  %v3830_v37 = vld [vmem:[#allocation2 + $0x7] ss:$8 sm:$0x3]  ;;  %v4008_v38 = vcombine.low %v3822_v46, %v3824_v41  ;;  %v4140_v17 = vrot.slane %v4133_v54, %v10744_v5 }
 0x4b7   :  { %v10753_v0 = vrot.slane %v3878_v35, %v10744_v5  ;;  %v3982_v61 = vrot.slane %v3975_v26, %v10744_v5  ;;  %v3910_v40 = vcombine.low %v3810_v50, %v3812_v33  ;;  %v4073_v15 = vcombine.low %v3830_v37, %v3832_v63  ;;  %v3826_v28 = vld [vmem:[#allocation2 + $0x6] ss:$8 sm:$0x3]  ;;  %v3848_v32 = vld [vmem:[#allocation2 + $0x33] ss:$8 sm:$0x3]  ;;  %5573 = vmatpush3.bf16.msra.mxu1 %v5572_v24 }
 0x4b8   :  { %v3950_v44 = vrot.slane %v3943_v48, %v10744_v5  ;;  %v4041_v45 = vcombine.low %v3826_v28, %v3828_v14  ;;  %v10767_v49 = vrot.slane %v4008_v38, %v10744_v5  ;;  %v4172_v33 = vrot.slane %v4165_v18, %v10744_v5  ;;  %v3846_v59 = vld [vmem:[#allocation2 + $0x13] ss:$8 sm:$0x3]  ;;  %v4281_v63 = vld [vmem:[%s12614_s25 + $0x168] sm:$0xff]  ;;  %5575 = vmatprep.subr.bf16.mxu1 %v5574_v34  ;;  %v4348_v37 = vld [vmem:[%s12614_s25 + $0x380] sm:$0xff] }
 0x4b9   :  { %v3893_v12 = vrot.slane %v10753_v0, %v10744_v5  ;;  %v3983_v11 = vcombine.high %v3982_v61, %v3982_v61  ;;  %v3917_v10 = vrot.slane %v3910_v40, %v10744_v5  ;;  %v4080_v13 = vrot.slane %v4073_v15, %v10744_v5  ;;  %v4282_v35 = vld [vmem:[%s12614_s25 + $0x170] sm:$0xff]  ;;  %v4283_v26 = vld [vmem:[%s12614_s25 + $0x178] sm:$0xff]  ;;  %v3802_v21 = vld [vmem:[#allocation2] ss:$8 sm:$0x3] }
 0x4ba   :  { %v3951_v25 = vcombine.high %v3950_v44, %v3950_v44  ;;  %v3990_v8 = vrot.slane %v3982_v61, %v10744_v5  ;;  %v3958_v1 = vrot.slane %v3950_v44, %v10744_v5  ;;  %v4048_v27 = vrot.slane %v4041_v45, %v10744_v5  ;;  %v3804_v53 = vld [vmem:[#allocation2 + $0x20] ss:$8 sm:$0x3]  ;;  %v4302_v54 = vld [vmem:[%s12614_s25 + $0x210] sm:$0xff] }
 0x4bb   :  { %3901 = vrot.lane.b32.xlu0 %v3893_v12, %s5958_s16  ;;  %v3997_v16 = vrot.slane %v3983_v11, %v10744_v5  ;;  %v3918_v56 = vcombine.high %v3917_v10, %v3917_v10  ;;  %v4081_v2 = vcombine.high %v4080_v13, %v4080_v13  ;;  %v4023_v55 = vrot.slane %v10767_v49, %v10744_v5  ;;  %v4300_v47 = vld [vmem:[%s12614_s25 + $0x200] sm:$0xff]  ;;  %v4301_v30 = vld [vmem:[%s12614_s25 + $0x208] sm:$0xff] }
 0x4bc   :  { %v3965_v39 = vrot.slane %v3951_v25, %v10744_v5  ;;  %v3925_v7 = vrot.slane %v3917_v10, %v10744_v5  ;;  %v3886_v29 = vcombine.high %v10753_v0, %v10753_v0  ;;  %v4049_v52 = vcombine.high %v4048_v27, %v4048_v27  ;;  %v4349_v0 = vld [vmem:[%s12614_s25 + $0x388] sm:$0xff]  ;;  %v4304_v24 = vld [vmem:[%s12614_s25 + $0x220] sm:$0xff] }
 0x4bd   :  { %v5829_v62 = vpack.i.bf16 %v3997_v16, %v3990_v8  ;;  %v3932_v19 = vrot.slane %v3918_v56, %v10744_v5  ;;  %v4095_v36 = vrot.slane %v4081_v2, %v10744_v5  ;;  %v4088_v41 = vrot.slane %v4080_v13, %v10744_v5  ;;  %v4319_v2 = vld [vmem:[%s12614_s25 + $0x298] sm:$0xff] }
 0x4be   :  { %v5834_v6 = vpack.i.bf16 %v3965_v39, %v3958_v1  ;;  %v4016_v4 = vcombine.high %v10767_v49, %v10767_v49  ;;  %v3900_v43 = vrot.slane %v3886_v29, %v10744_v5  ;;  %v4063_v14 = vrot.slane %v4049_v52, %v10744_v5 }
 0x4bf   :  { %5830 = vrot.lane.b32.xlu1 %v5829_v62, %s5959_s10  ;;  %v5839_v9 = vpack.i.bf16 %v3932_v19, %v3925_v7  ;;  %v5844_v42 = vpack.i.bf16 %v4095_v36, %v4088_v41  ;;  %v4141_v31 = vcombine.high %v4140_v17, %v4140_v17  ;;  %v4173_v20 = vcombine.high %v4172_v33, %v4172_v33  ;;  %v4318_v62 = vld [vmem:[%s12614_s25 + $0x290] sm:$0xff] }
 0x4c0   :  { %5835 = vrot.lane.b32.xlu0 %v5834_v6, %s12000_s11  ;;  %v4197_v46 = vcombine.low %v3846_v59, %v3848_v32  ;;  %v5576_v48 = vpack.c.bf16 %v4281_v63, %v4280_v22  ;;  %v5578_v50 = vpack.c.bf16 %v4299_v60, %v4298_v57  ;;  %v4056_v61 = vrot.slane %v4048_v27, %v10744_v5  ;;  %v4323_v59 = vld [vmem:[%s12614_s25 + $0x2b8] sm:$0xff]  ;;  %v4306_v63 = vld [vmem:[%s12614_s25 + $0x230] sm:$0xff] }
 0x4c1   :  { %v5580_v40 = vpack.c.bf16 %v4283_v26, %v4282_v35  ;;  %v4155_v28 = vrot.slane %v4141_v31, %v10744_v5  ;;  %v5614_v44 = vpack.c.bf16 %v4349_v0, %v4348_v37  ;;  %v4030_v38 = vrot.slane %v4016_v4, %v10744_v5  ;;  %v4307_v57 = vld [vmem:[%s12614_s25 + $0x238] sm:$0xff]  ;;  %v4324_v31 = vld [vmem:[%s12614_s25 + $0x2c0] sm:$0xff] }
 0x4c2   :  { %5577 = vmatpush3.bf16.msra.mxu1 %v5576_v48  ;;  %v5849_v15 = vpack.i.bf16 %v4063_v14, %v4056_v61  ;;  %v4187_v12 = vrot.slane %v4173_v20, %v10744_v5  ;;  %v4204_v11 = vrot.slane %v4197_v46, %v10744_v5  ;;  %v4148_v10 = vrot.slane %v4140_v17, %v10744_v5  ;;  %v4333_v14 = vld [vmem:[%s12614_s25 + $0x308] sm:$0xff]  ;;  %v4350_v46 = vld [vmem:[%s12614_s25 + $0x390] sm:$0xff]  ;;  %v4351_v48 = vld [vmem:[%s12614_s25 + $0x398] sm:$0xff] }
 0x4c3   :  { %4031 = vrot.lane.b32.xlu1 %v4023_v55, %s5960_s20  ;;  %5579 = vmatprep.subr.bf16.mxu1 %v5578_v50  ;;  %v4180_v45 = vrot.slane %v4172_v33, %v10744_v5  ;;  %v3851_v1 = vcombine.low %v3802_v21, %v3804_v53  ;;  %v5584_v19 = vpack.c.bf16 %v4301_v30, %v4300_v47  ;;  %v4321_v55 = vld [vmem:[%s12614_s25 + $0x2a8] sm:$0xff]  ;;  %v4322_v33 = vld [vmem:[%s12614_s25 + $0x2b0] sm:$0xff]  ;;  %v4311_v47 = vld [vmem:[%s12614_s25 + $0x258] sm:$0xff] }
 0x4c4   :  { %5840 = vrot.lane.b32.xlu0 %v5839_v9, %s5961_s30  ;;  %v5854_v25 = vpack.i.bf16 %v4155_v28, %v4148_v10  ;;  %v4205_v8 = vcombine.high %v4204_v11, %v4204_v11  ;;  %v4212_v16 = vrot.slane %v4204_v11, %v10744_v5  ;;  %v5586_v51 = vpack.c.bf16 %v4319_v2, %v4318_v62  ;;  %v4305_v9 = vld [vmem:[%s12614_s25 + $0x228] sm:$0xff] }
 0x4c5   :  { %v5859_v13 = vpack.i.bf16 %v4187_v12, %v4180_v45  ;;  %v3858_v39 = vrot.slane %v3851_v1, %v10744_v5  ;;  %v5588_v29 = vpack.c.bf16 %v4303_v23, %v4302_v54  ;;  %v5590_v32 = vpack.c.bf16 %v4321_v55, %v4320_v58  ;;  %v4325_v20 = vld [vmem:[%s12614_s25 + $0x2c8] sm:$0xff]  ;;  %v4334_v45 = vld [vmem:[%s12614_s25 + $0x310] sm:$0xff]  ;;  %v4355_v58 = vld [vmem:[%s12614_s25 + $0x3b8] sm:$0xff] }
 0x4c6   :  { %5581 = vmatpush3.bf16.msra.mxu1 %v5580_v40  ;;  %v4219_v56 = vrot.slane %v4205_v8, %v10744_v5  ;;  %v5592_v41 = vpack.c.bf16 %v4305_v9, %v4304_v24  ;;  %v5596_v61 = vpack.c.bf16 %v4307_v57, %v4306_v63  ;;  %v5598_v12 = vpack.c.bf16 %v4325_v20, %v4324_v31  ;;  %v4309_v10 = vld [vmem:[%s12614_s25 + $0x248] sm:$0xff]  ;;  %v4326_v8 = vld [vmem:[%s12614_s25 + $0x2d0] sm:$0xff]  ;;  %v4312_v24 = vld [vmem:[%s12614_s25 + $0x260] sm:$0xff] }
 0x4c7   :  { %3903 = vrot.lane.b32.xlu1 %v3900_v43, %s5958_s16  ;;  %5615 = vmatprep.subr.bf16.mxu1 %v5614_v44  ;;  %v3859_v49 = vcombine.high %v3858_v39, %v3858_v39  ;;  %v3866_v3 = vrot.slane %v3858_v39, %v10744_v5  ;;  %v4332_v43 = vld [vmem:[%s12614_s25 + $0x300] sm:$0xff]  ;;  %v5618_v11 = vpack.c.bf16 %v4351_v48, %v4350_v46  ;;  %v4353_v21 = vld [vmem:[%s12614_s25 + $0x3a8] sm:$0xff]  ;;  %v4354_v23 = vld [vmem:[%s12614_s25 + $0x3b0] sm:$0xff] }
 0x4c8   :  { %5845 = vrot.lane.b32.xlu0 %v5844_v42, %s5962_s18  ;;  %v5594_v42 = vpack.c.bf16 %v4323_v59, %v4322_v33  ;;  %v5616_v40 = vpack.c.bf16 %v4333_v14, %v4332_v43  ;;  %v4329_v54 = vld [vmem:[%s12614_s25 + $0x2e8] sm:$0xff]  ;;  %v4339_v63 = vld [vmem:[%s12614_s25 + $0x338] sm:$0xff]  ;;  %v4330_v57 = vld [vmem:[%s12614_s25 + $0x2f0] sm:$0xff]  ;;  %s12694_s18 = sld [smem:[#allocation280_spill]] }
 0x4c9   :  { %v3873_v27 = vrot.slane %v3859_v49, %v10744_v5  ;;  %v4310_v49 = vld [vmem:[%s12614_s25 + $0x250] sm:$0xff]  ;;  %v4313_v9 = vld [vmem:[%s12614_s25 + $0x268] sm:$0xff]  ;;  %v4356_v43 = vld [vmem:[%s12614_s25 + $0x3c0] sm:$0xff] }
 0x4ca   :  { %v4357_v14 = vld [vmem:[%s12614_s25 + $0x3c8] sm:$0xff]  ;;  %v4314_v31 = vld [vmem:[%s12614_s25 + $0x270] sm:$0xff]  ;;  %v5608_v20 = vpack.c.bf16 %v4313_v9, %v4312_v24  ;;  %v4384_v24 = vld [vmem:[%s12614_s25 + $0x4a0] sm:$0xff] }
 0x4cb   :  { %5850 = vrot.lane.b32.xlu1 %v5849_v15, %s11865_s24  ;;  %v4308_v15 = vld [vmem:[%s12614_s25 + $0x240] sm:$0xff]  ;;  %v3834_v48 = vld [vmem:[#allocation2 + $0x10] ss:$8 sm:$0x3]  ;;  %v4385_v9 = vld [vmem:[%s12614_s25 + $0x4a8] sm:$0xff] }
 0x4cc   :  { %4033 = vrot.lane.b32.xlu0 %v4030_v38, %s5960_s20  ;;  %v5600_v1 = vpack.c.bf16 %v4309_v10, %v4308_v15  ;;  %v4341_v15 = vld [vmem:[%s12614_s25 + $0x348] sm:$0xff] }
 0x4cf   :  { %5855 = vrot.lane.b32.xlu1 %v5854_v25, %s5958_s16  ;;  %v4335_v25 = vld [vmem:[%s12614_s25 + $0x318] sm:$0xff] }
 0x4d0   :  { %5860 = vrot.lane.b32.xlu0 %v5859_v13, %s5961_s30  ;;  %v5620_v39 = vpack.c.bf16 %v4335_v25, %v4334_v45 }
 0x4d3   :  { %4220 = vrot.lane.b32.xlu1 %v4212_v16, %s12000_s11  ;;  %v4327_v16 = vld [vmem:[%s12614_s25 + $0x2d8] sm:$0xff] }
 0x4d4   :  { %4222 = vrot.lane.b32.xlu0 %v4219_v56, %s12000_s11  ;;  %v4352_v56 = vld [vmem:[%s12614_s25 + $0x3a0] sm:$0xff] }
 0x52d   :  { %v3902_v6 = vpop.permute.xlu0 %3901 }
 0x52e   :  { %v4226_v18 = vsel %vm3793_vm13, %v3873_v27, %v3902_v6  ;;  %v5602_v27 = vpack.c.bf16 %v4327_v16, %v4326_v8  ;;  %v4342_v8 = vld [vmem:[%s12614_s25 + $0x350] sm:$0xff] }
 0x52f   :  { %4525 = vmatprep.mubr.f32.mxu0 %v4226_v18  ;;  %v4328_v18 = vld [vmem:[%s12614_s25 + $0x2e0] sm:$0xff] }
 0x530   :  { %4526 = vmatmul.mubr.f32.vlgmr.msra.gmra.mrb[0].mxu0 %v3866_v3  ;;  %v5606_v59 = vpack.c.bf16 %v4329_v54, %v4328_v18 }
 0x531   :  { %5585 = vmatpush3.bf16.msra.mxu0 %v5584_v19  ;;  %v10867_v7 = vpop.permute.xlu1 %5830  ;;  %v4337_v19 = vld [vmem:[%s12614_s25 + $0x328] sm:$0xff] }
 0x532   :  { %v5833_v36 = vunpack.i.h.bf16 %v10867_v7  ;;  %v5832_v52 = vunpack.i.l.bf16 %v10867_v7  ;;  %v10871_v17 = vpop.permute.xlu0 %5835  ;;  %5587 = vmatprep.subr.bf16.mxu0 %v5586_v51  ;;  %v5622_v51 = vpack.c.bf16 %v4353_v21, %v4352_v56  ;;  %v4343_v21 = vld [vmem:[%s12614_s25 + $0x358] sm:$0xff] }
 0x533   :  { %v5837_v50 = vunpack.i.l.bf16 %v10871_v17  ;;  %v5838_v10 = vunpack.i.h.bf16 %v10871_v17  ;;  %v5636_v18 = vpack.c.bf16 %v4343_v21, %v4342_v8  ;;  %v4344_v17 = vld [vmem:[%s12614_s25 + $0x360] sm:$0xff] }
 0x534   :  { %v4003_v34 = vsel %vm4002_vm15, %v5832_v52, %v5833_v36  ;;  %v5604_v36 = vpack.c.bf16 %v4311_v47, %v4310_v49  ;;  %v4360_v49 = vld [vmem:[%s12614_s25 + $0x3e0] sm:$0xff]  ;;  %v4361_v47 = vld [vmem:[%s12614_s25 + $0x3e8] sm:$0xff] }
 0x535   :  { %5589 = vmatpush3.bf16.msra.mxu0 %v5588_v29  ;;  %v10888_v22 = vpop.permute.xlu1 %4031  ;;  %v5638_v54 = vpack.c.bf16 %v4361_v47, %v4360_v49  ;;  %v4390_v49 = vld [vmem:[%s12614_s25 + $0x4d0] sm:$0xff] }
 0x536   :  { %v5841_v60 = vpop.permute.xlu0 %5840  ;;  %5591 = vmatprep.subr.bf16.mxu0 %v5590_v32  ;;  %v4230_v4 = vsel %vm4035_vm0, %v4003_v34, %v10888_v22  ;;  %v5626_v34 = vpack.c.bf16 %v4355_v58, %v4354_v23  ;;  %v4366_v23 = vld [vmem:[%s12614_s25 + $0x410] sm:$0xff]  ;;  %v4367_v58 = vld [vmem:[%s12614_s25 + $0x418] sm:$0xff] }
 0x537   :  { %v5843_v35 = vunpack.i.h.bf16 %v5841_v60  ;;  %v5842_v26 = vunpack.i.l.bf16 %v5841_v60  ;;  %4665 = vmatprep.mubr.f32.mxu0 %v4230_v4 }
 0x539   :  { %5593 = vmatpush3.bf16.msra.mxu0 %v5592_v41  ;;  %v3904_v37 = vpop.permute.xlu1 %3903  ;;  %v3938_v0 = vsel %vm3937_vm1, %v5842_v26, %v5843_v35  ;;  %v4338_v41 = vld [vmem:[%s12614_s25 + $0x330] sm:$0xff]  ;;  %v4315_v35 = vld [vmem:[%s12614_s25 + $0x278] sm:$0xff] }
 0x53a   :  { %v10921_v28 = vpop.permute.xlu0 %5845  ;;  %v3905_v44 = vsel %vm3793_vm13, %v3902_v6, %v3904_v37  ;;  %v4228_v38 = vsel %vm970_vm5, %v3938_v0, %v5837_v50  ;;  %5595 = vmatprep.subr.bf16.mxu0 %v5594_v42  ;;  %v4336_v6 = vld [vmem:[%s12614_s25 + $0x320] sm:$0xff]  ;;  %v4331_v42 = vld [vmem:[%s12614_s25 + $0x2f8] sm:$0xff]  ;;  %v5628_v46 = vpack.c.bf16 %v4339_v63, %v4338_v41  ;;  %v5612_v25 = vpack.c.bf16 %v4315_v35, %v4314_v31 }
 0x53b   :  { %4595 = vmatprep.mubr.f32.mxu1 %v4228_v38  ;;  %v4227_v13 = vsel %vm3937_vm1, %v3905_v44, %v5842_v26  ;;  %v5847_v3 = vunpack.i.l.bf16 %v10921_v28  ;;  %v5624_v32 = vpack.c.bf16 %v4337_v19, %v4336_v6  ;;  %v3836_v37 = vld [vmem:[#allocation2 + $0x30] ss:$8 sm:$0x3]  ;;  %v5610_v0 = vpack.c.bf16 %v4331_v42, %v4330_v57  ;;  %v4369_v42 = vld [vmem:[%s12614_s25 + $0x428] sm:$0xff]  ;;  %v4412_v35 = vld [vmem:[%s12614_s25 + $0x580] sm:$0xff] }
 0x53c   :  { %4596 = vmatmul.mubr.f32.vlgmr.msra.gmra.mrb[0].mxu1 %v4227_v13  ;;  %v4358_v44 = vld [vmem:[%s12614_s25 + $0x3d0] sm:$0xff]  ;;  %v4359_v38 = vld [vmem:[%s12614_s25 + $0x3d8] sm:$0xff]  ;;  %v4106_v45 = vcombine.low %v3834_v48, %v3836_v37  ;;  %v5654_v57 = vpack.c.bf16 %v4385_v9, %v4384_v24  ;;  %v4376_v9 = vld [vmem:[%s12614_s25 + $0x460] sm:$0xff] }
 0x53d   :  { %5597 = vmatpush3.bf16.msra.mxu0 %v5596_v61  ;;  %5617 = vmatpush3.bf16.msra.mxu1 %v5616_v40  ;;  %v10949_v53 = vpop.permute.xlu1 %5850  ;;  %v5630_v61 = vpack.c.bf16 %v4357_v14, %v4356_v43  ;;  %v4340_v40 = vld [vmem:[%s12614_s25 + $0x340] sm:$0xff]  ;;  %v5634_v16 = vpack.c.bf16 %v4359_v38, %v4358_v44  ;;  %v4382_v6 = vld [vmem:[%s12614_s25 + $0x490] sm:$0xff]  ;;  %v4383_v19 = vld [vmem:[%s12614_s25 + $0x498] sm:$0xff] }
 0x53e   :  { %v10957_v30 = vpop.permute.xlu0 %4033  ;;  %v5853_v62 = vunpack.i.h.bf16 %v10949_v53  ;;  %v5852_v2 = vunpack.i.l.bf16 %v10949_v53  ;;  %5599 = vmatprep.subr.bf16.mxu0 %v5598_v12  ;;  %5619 = vmatprep.subr.bf16.mxu1 %v5618_v11  ;;  %v4380_v12 = vld [vmem:[%s12614_s25 + $0x480] sm:$0xff]  ;;  %v4381_v11 = vld [vmem:[%s12614_s25 + $0x488] sm:$0xff]  ;;  %v5632_v13 = vpack.c.bf16 %v4341_v15, %v4340_v40  ;;  %v4347_v41 = vld [vmem:[%s12614_s25 + $0x378] sm:$0xff] }
 0x53f   :  { %v5646_v56 = vpack.c.bf16 %v4381_v11, %v4380_v12  ;;  %v4386_v43 = vld [vmem:[%s12614_s25 + $0x4b0] sm:$0xff]  ;;  %v4387_v31 = vld [vmem:[%s12614_s25 + $0x4b8] sm:$0xff]  ;;  %v4396_v38 = vld [vmem:[%s12614_s25 + $0x500] sm:$0xff] }
 0x540   :  { %v4068_v55 = vsel %vm990_vm9, %v5852_v2, %v5853_v62  ;;  %v3970_v62 = vsel %vm970_vm5, %v5837_v50, %v5838_v10  ;;  %v4345_v50 = vld [vmem:[%s12614_s25 + $0x368] sm:$0xff]  ;;  %v4370_v37 = vld [vmem:[%s12614_s25 + $0x430] sm:$0xff]  ;;  %v5658_v40 = vpack.c.bf16 %v4387_v31, %v4386_v43  ;;  %v4371_v44 = vld [vmem:[%s12614_s25 + $0x438] sm:$0xff] }
 0x541   :  { %5601 = vmatpush3.bf16.msra.mxu0 %v5600_v1  ;;  %5621 = vmatpush3.bf16.msra.mxu1 %v5620_v39  ;;  %v4232_v29 = vsel %vm4100_vm2, %v4068_v55, %v5847_v3  ;;  %v4364_v1 = vld [vmem:[%s12614_s25 + $0x400] sm:$0xff]  ;;  %v4365_v39 = vld [vmem:[%s12614_s25 + $0x408] sm:$0xff]  ;;  %v4362_v55 = vld [vmem:[%s12614_s25 + $0x3f0] sm:$0xff]  ;;  %v5640_v7 = vpack.c.bf16 %v4345_v50, %v4344_v17  ;;  %v11118_v14 = vpop.permute.xlu1 %5855  ;;  %v5660_v8 = vpack.c.bf16 %v4371_v44, %v4370_v37 }
 0x542   :  { %v10992_v33 = vpop.permute.xlu0 %5860  ;;  %4735 = vmatprep.mubr.f32.mxu1 %v4232_v29  ;;  %5603 = vmatprep.subr.bf16.mxu0 %v5602_v27  ;;  %v11066_v27 = vrot.slane %v4106_v45, %v10744_v5  ;;  %v4229_v29 = vsel %vm4002_vm15, %v3970_v62, %v5832_v52  ;;  %v5652_v52 = vpack.c.bf16 %v4367_v58, %v4366_v23  ;;  %v4397_v12 = vld [vmem:[%s12614_s25 + $0x508] sm:$0xff]  ;;  %v4388_v11 = vld [vmem:[%s12614_s25 + $0x4c0] sm:$0xff]  ;;  %v4374_v17 = vld [vmem:[%s12614_s25 + $0x450] sm:$0xff] }
 0x543   :  { %v5863_v60 = vunpack.i.h.bf16 %v10992_v33  ;;  %v5862_v4 = vunpack.i.l.bf16 %v10992_v33  ;;  %5623 = vmatprep.subr.bf16.mxu1 %v5622_v51  ;;  %v5648_v51 = vpack.c.bf16 %v4365_v39, %v4364_v1  ;;  %v4389_v10 = vld [vmem:[%s12614_s25 + $0x4c8] sm:$0xff]  ;;  %v4036_v45 = vsel %vm4035_vm0, %v10888_v22, %v10957_v30  ;;  %v4398_v1 = vld [vmem:[%s12614_s25 + $0x510] sm:$0xff]  ;;  %v4399_v39 = vld [vmem:[%s12614_s25 + $0x518] sm:$0xff] }
 0x544   :  { %v4373_v22 = vld [vmem:[%s12614_s25 + $0x448] sm:$0xff]  ;;  %v5662_v21 = vpack.c.bf16 %v4389_v10, %v4388_v11  ;;  %v4231_v47 = vsel %vm990_vm9, %v4036_v45, %v5852_v2  ;;  %v4375_v50 = vld [vmem:[%s12614_s25 + $0x458] sm:$0xff]  ;;  %v4400_v33 = vld [vmem:[%s12614_s25 + $0x520] sm:$0xff] }
 0x545   :  { %5605 = vmatpush3.bf16.msra.mxu0 %v5604_v36  ;;  %5625 = vmatpush3.bf16.msra.mxu1 %v5624_v32  ;;  %v11023_v26 = vsel %vm3937_vm1, %v5862_v4, %v5863_v60  ;;  %v5650_v36 = vpack.c.bf16 %v4383_v19, %v4382_v6  ;;  %v4363_v32 = vld [vmem:[%s12614_s25 + $0x3f8] sm:$0xff]  ;;  %v4368_v60 = vld [vmem:[%s12614_s25 + $0x420] sm:$0xff] }
 0x546   :  { %5607 = vmatprep.subr.bf16.mxu0 %v5606_v59  ;;  %5627 = vmatprep.subr.bf16.mxu1 %v5626_v34  ;;  %v4121_v59 = vrot.slane %v11066_v27, %v10744_v5  ;;  %v4346_v34 = vld [vmem:[%s12614_s25 + $0x370] sm:$0xff]  ;;  %v5642_v63 = vpack.c.bf16 %v4363_v32, %v4362_v55  ;;  %v5656_v48 = vpack.c.bf16 %v4369_v42, %v4368_v60  ;;  %v4391_v6 = vld [vmem:[%s12614_s25 + $0x4d8] sm:$0xff]  ;;  %v4416_v19 = vld [vmem:[%s12614_s25 + $0x5a0] sm:$0xff] }
 0x547   :  { %v4392_v58 = vld [vmem:[%s12614_s25 + $0x4e0] sm:$0xff]  ;;  %v4393_v55 = vld [vmem:[%s12614_s25 + $0x4e8] sm:$0xff]  ;;  %v5668_v32 = vpack.c.bf16 %v4375_v50, %v4374_v17  ;;  %v4407_v10 = vld [vmem:[%s12614_s25 + $0x558] sm:$0xff] }
 0x548   :  { %v4420_v60 = vld [vmem:[%s12614_s25 + $0x5c0] sm:$0xff]  ;;  %v4421_v42 = vld [vmem:[%s12614_s25 + $0x5c8] sm:$0xff]  ;;  %v4411_v50 = vld [vmem:[%s12614_s25 + $0x578] sm:$0xff] }
 0x549   :  { %5609 = vmatpush3.bf16.msra.mxu0 %v5608_v20  ;;  %5629 = vmatpush3.bf16.msra.mxu1 %v5628_v46  ;;  %v4413_v20 = vld [vmem:[%s12614_s25 + $0x588] sm:$0xff]  ;;  %v5644_v46 = vpack.c.bf16 %v4347_v41, %v4346_v34  ;;  %v4402_v34 = vld [vmem:[%s12614_s25 + $0x530] sm:$0xff]  ;;  %v4403_v41 = vld [vmem:[%s12614_s25 + $0x538] sm:$0xff] }
 0x54a   :  { %5611 = vmatprep.subr.bf16.mxu0 %v5610_v0  ;;  %5631 = vmatprep.subr.bf16.mxu1 %v5630_v61  ;;  %v5858_v0 = vunpack.i.h.bf16 %v11118_v14  ;;  %v5857_v61 = vunpack.i.l.bf16 %v11118_v14  ;;  %v5678_v15 = vpack.c.bf16 %v4413_v20, %v4412_v35  ;;  %v5692_v31 = vpack.c.bf16 %v4403_v41, %v4402_v34  ;;  %v4378_v35 = vld [vmem:[%s12614_s25 + $0x470] sm:$0xff]  ;;  %v4404_v37 = vld [vmem:[%s12614_s25 + $0x540] sm:$0xff] }
 0x54b   :  { %v4428_v45 = vld [vmem:[%s12614_s25 + $0x600] sm:$0xff]  ;;  %v4442_v41 = vld [vmem:[%s12614_s25 + $0x670] sm:$0xff] }
 0x54c   :  { %v4160_v30 = vsel %vm3793_vm13, %v5857_v61, %v5858_v0  ;;  %v4405_v0 = vld [vmem:[%s12614_s25 + $0x548] sm:$0xff]  ;;  %v4440_v14 = vld [vmem:[%s12614_s25 + $0x660] sm:$0xff] }
 0x54d   :  { %5613 = vmatpush3.bf16.msra.mxu0 %v5612_v25  ;;  %5633 = vmatpush3.bf16.msra.mxu1 %v5632_v13  ;;  %v4414_v25 = vld [vmem:[%s12614_s25 + $0x590] sm:$0xff]  ;;  %v4415_v13 = vld [vmem:[%s12614_s25 + $0x598] sm:$0xff]  ;;  %v4234_v53 = vsel %vm3937_vm1, %v4160_v30, %v5862_v4  ;;  %v4401_v4 = vld [vmem:[%s12614_s25 + $0x528] sm:$0xff] }
 0x54e   :  { %5635 = vmatprep.subr.bf16.mxu1 %v5634_v16  ;;  %5647 = vmatprep.subr.bf16.mxu0 %v5646_v56  ;;  %v5680_v16 = vpack.c.bf16 %v4397_v12, %v4396_v38  ;;  %v4372_v56 = vld [vmem:[%s12614_s25 + $0x440] sm:$0xff]  ;;  %v5682_v62 = vpack.c.bf16 %v4415_v13, %v4414_v25  ;;  %v5688_v24 = vpack.c.bf16 %v4401_v4, %v4400_v33  ;;  %v4406_v12 = vld [vmem:[%s12614_s25 + $0x550] sm:$0xff]  ;;  %v4429_v25 = vld [vmem:[%s12614_s25 + $0x608] sm:$0xff]  ;;  %v5848_v13 = vunpack.i.h.bf16 %v10921_v28 }
 0x54f   :  { %v5664_v2 = vpack.c.bf16 %v4373_v22, %v4372_v56  ;;  %v5696_v38 = vpack.c.bf16 %v4405_v0, %v4404_v37  ;;  %v5700_v56 = vpack.c.bf16 %v4407_v10, %v4406_v12  ;;  %v5711_v22 = vpack.c.bf16 %v4429_v25, %v4428_v45  ;;  %v4408_v30 = vld [vmem:[%s12614_s25 + $0x560] sm:$0xff]  ;;  %v4410_v28 = vld [vmem:[%s12614_s25 + $0x570] sm:$0xff]  ;;  %v4953_v12 = vld [vmem:[%s12693_s14 + $0x8] sm:$0xff] }
 0x550   :  { %4666 = vmatmul.mubr.f32.vlgmr.msra.gmra.mrb[2].mxu0 %v4229_v29  ;;  %v4418_v29 = vld [vmem:[%s12614_s25 + $0x5b0] sm:$0xff]  ;;  %v4114_v33 = vcombine.high %v11066_v27, %v11066_v27  ;;  %v5708_v4 = vpack.c.bf16 %v4411_v50, %v4410_v28  ;;  %v4955_v45 = vld [vmem:[%s12693_s14 + $0x18] sm:$0xff]  ;;  %v4956_v25 = vld [vmem:[%s12693_s14 + $0x20] sm:$0xff] }
 0x551   :  { %5637 = vmatpush3.bf16.msra.mxu1 %v5636_v18  ;;  %5649 = vmatpush3.bf16.msra.mxu0 %v5648_v51  ;;  %v4417_v18 = vld [vmem:[%s12614_s25 + $0x5a8] sm:$0xff]  ;;  %v5684_v51 = vpack.c.bf16 %v4399_v39, %v4398_v1  ;;  %v11279_v1 = vpop.permute.xlu1 %4220  ;;  %v5963_v39 = vmov 0.0|0.0   ;;  %v4450_v0 = vld [vmem:[%s12614_s25 + $0x6b0] sm:$0xff] }
 0x552   :  { %4805 = vmatprep.mubr.f32.mxu0 %v4121_v59  ;;  %5639 = vmatprep.subr.bf16.mxu1 %v5638_v54  ;;  %v5666_v54 = vpack.c.bf16 %v4391_v6, %v4390_v49  ;;  %v5686_v23 = vpack.c.bf16 %v4417_v18, %v4416_v19  ;;  %v4377_v59 = vld [vmem:[%s12614_s25 + $0x468] sm:$0xff]  ;;  %v4431_v6 = vld [vmem:[%s12614_s25 + $0x618] sm:$0xff]  ;;  %v4101_v19 = vsel %vm4100_vm2, %v5847_v3, %v5848_v13  ;;  %v4426_v18 = vld [vmem:[%s12614_s25 + $0x5f0] sm:$0xff] }
 0x553   :  { %5651 = vmatprep.subr.bf16.mxu0 %v5650_v36  ;;  %v4419_v36 = vld [vmem:[%s12614_s25 + $0x5b8] sm:$0xff]  ;;  %v5672_v43 = vpack.c.bf16 %v4377_v59, %v4376_v9  ;;  %v4438_v59 = vld [vmem:[%s12614_s25 + $0x650] sm:$0xff]  ;;  %v4957_v13 = vld [vmem:[%s12693_s14 + $0x28] sm:$0xff] }
 0x555   :  { %5641 = vmatpush3.bf16.msra.mxu1 %v5640_v7  ;;  %5653 = vmatpush3.bf16.msra.mxu0 %v5652_v52  ;;  %v5670_v7 = vpack.c.bf16 %v4393_v55, %v4392_v58  ;;  %v5690_v52 = vpack.c.bf16 %v4419_v36, %v4418_v29  ;;  %v4434_v55 = vld [vmem:[%s12614_s25 + $0x630] sm:$0xff]  ;;  %v4435_v29 = vld [vmem:[%s12614_s25 + $0x638] sm:$0xff]  ;;  %v4128_v36 = vrot.slane %v4114_v33, %v10744_v5 }
 0x556   :  { %5643 = vmatprep.subr.bf16.mxu1 %v5642_v63  ;;  %5655 = vmatprep.subr.bf16.mxu0 %v5654_v57  ;;  %v4394_v63 = vld [vmem:[%s12614_s25 + $0x4f0] sm:$0xff]  ;;  %v4395_v57 = vld [vmem:[%s12614_s25 + $0x4f8] sm:$0xff]  ;;  %v5720_v27 = vpack.c.bf16 %v4435_v29, %v4434_v55 }
 0x557   :  { %v5674_v20 = vpack.c.bf16 %v4395_v57, %v4394_v63  ;;  %v4233_v9 = vsel %vm3793_vm13, %v4128_v36, %v5857_v61  ;;  %v4441_v61 = vld [vmem:[%s12614_s25 + $0x668] sm:$0xff]  ;;  %v4443_v63 = vld [vmem:[%s12614_s25 + $0x678] sm:$0xff] }
 0x558   :  { %v5729_v34 = vpack.c.bf16 %v4441_v61, %v4440_v14  ;;  %v5732_v57 = vpack.c.bf16 %v4443_v63, %v4442_v41  ;;  %v5048_v63 = vld [vmem:[%s12695_s4] sm:$0xff] }
 0x559   :  { %5645 = vmatpush3.bf16.msra.mxu1 %v5644_v46  ;;  %5657 = vmatpush3.bf16.msra.mxu0 %v5656_v48  ;;  %v5694_v46 = vpack.c.bf16 %v4421_v42, %v4420_v60  ;;  %v4379_v48 = vld [vmem:[%s12614_s25 + $0x478] sm:$0xff]  ;;  %v4444_v60 = vld [vmem:[%s12614_s25 + $0x680] sm:$0xff]  ;;  %v4445_v42 = vld [vmem:[%s12614_s25 + $0x688] sm:$0xff] }
 0x55a   :  { %5659 = vmatprep.subr.bf16.mxu0 %v5658_v40  ;;  %5679 = vmatprep.subr.bf16.mxu1 %v5678_v15  ;;  %v4422_v40 = vld [vmem:[%s12614_s25 + $0x5d0] sm:$0xff]  ;;  %v4423_v15 = vld [vmem:[%s12614_s25 + $0x5d8] sm:$0xff]  ;;  %v5676_v44 = vpack.c.bf16 %v4379_v48, %v4378_v35  ;;  %v4449_v48 = vld [vmem:[%s12614_s25 + $0x6a8] sm:$0xff] }
 0x55b   :  { %v5698_v11 = vpack.c.bf16 %v4423_v15, %v4422_v40  ;;  %v4447_v35 = vld [vmem:[%s12614_s25 + $0x698] sm:$0xff] }
 0x55c   :  { %4736 = vmatmul.mubr.f32.vlgmr.msra.gmra.mrb[2].mxu1 %v4231_v47  ;;  %v4409_v47 = vld [vmem:[%s12614_s25 + $0x568] sm:$0xff]  ;;  %v4451_v40 = vld [vmem:[%s12614_s25 + $0x6b8] sm:$0xff] }
 0x55d   :  { %5661 = vmatpush3.bf16.msra.mxu0 %v5660_v8  ;;  %5681 = vmatpush3.bf16.msra.mxu1 %v5680_v16  ;;  %v4424_v8 = vld [vmem:[%s12614_s25 + $0x5e0] sm:$0xff]  ;;  %v4425_v16 = vld [vmem:[%s12614_s25 + $0x5e8] sm:$0xff]  ;;  %v5744_v15 = vpack.c.bf16 %v4451_v40, %v4450_v0 }
 0x55e   :  { %4875 = vmatprep.mubr.f32.mxu1 %v4234_v53  ;;  %5663 = vmatprep.subr.bf16.mxu0 %v5662_v21  ;;  %v4223_v21 = vpop.permute.xlu0 %4222  ;;  %v5702_v49 = vpack.c.bf16 %v4425_v16, %v4424_v8  ;;  %v4427_v53 = vld [vmem:[%s12614_s25 + $0x5f8] sm:$0xff]  ;;  %v5753_v8 = vpack.c.bf16 %v4957_v13, %v4956_v25  ;;  %v4958_v16 = vld [vmem:[%s12693_s14 + $0x30] sm:$0xff]  ;;  %v5053_v0 = vld [vmem:[%s12695_s4 + $0x28] sm:$0xff] }
 0x55f   :  { %5683 = vmatprep.subr.bf16.mxu1 %v5682_v62  ;;  %v4430_v62 = vld [vmem:[%s12614_s25 + $0x610] sm:$0xff]  ;;  %v5706_v3 = vpack.c.bf16 %v4427_v53, %v4426_v18  ;;  %v5965_v53 = vmov 0.0  }
 0x560   :  { %v5714_v17 = vpack.c.bf16 %v4431_v6, %v4430_v62  ;;  %v4964_v6 = vld [vmem:[%s12693_s14 + $0x60] sm:$0xff] }
 0x561   :  { %5665 = vmatpush3.bf16.msra.mxu0 %v5664_v2  ;;  %5685 = vmatpush3.bf16.msra.mxu1 %v5684_v51  ;;  %v4224_v2 = vsel %vm970_vm5, %v11279_v1, %v4223_v21  ;;  %v5704_v51 = vpack.c.bf16 %v4409_v47, %v4408_v30  ;;  %v4960_v30 = vld [vmem:[%s12693_s14 + $0x40] sm:$0xff]  ;;  %v4961_v21 = vld [vmem:[%s12693_s14 + $0x48] sm:$0xff]  ;;  %v4963_v47 = vld [vmem:[%s12693_s14 + $0x58] sm:$0xff] }
 0x562   :  { %5667 = vmatprep.subr.bf16.mxu0 %v5666_v54  ;;  %5687 = vmatprep.subr.bf16.mxu1 %v5686_v23  ;;  %v4432_v54 = vld [vmem:[%s12614_s25 + $0x620] sm:$0xff]  ;;  %v4433_v23 = vld [vmem:[%s12614_s25 + $0x628] sm:$0xff] }
 0x563   :  { %v5717_v58 = vpack.c.bf16 %v4433_v23, %v4432_v54 }
 0x565   :  { %5669 = vmatpush3.bf16.msra.mxu0 %v5668_v32  ;;  %5689 = vmatpush3.bf16.msra.mxu1 %v5688_v24  ;;  %v4436_v32 = vld [vmem:[%s12614_s25 + $0x640] sm:$0xff]  ;;  %v4437_v24 = vld [vmem:[%s12614_s25 + $0x648] sm:$0xff] }
 0x566   :  { %5671 = vmatprep.subr.bf16.mxu0 %v5670_v7  ;;  %5691 = vmatprep.subr.bf16.mxu1 %v5690_v52  ;;  %v5723_v5 = vpack.c.bf16 %v4437_v24, %v4436_v32  ;;  %v4439_v7 = vld [vmem:[%s12614_s25 + $0x658] sm:$0xff] }
 0x567   :  { %v5726_v52 = vpack.c.bf16 %v4439_v7, %v4438_v59 }
 0x569   :  { %5673 = vmatpush3.bf16.msra.mxu0 %v5672_v43  ;;  %5693 = vmatpush3.bf16.msra.mxu1 %v5692_v31  ;;  %v5735_v43 = vpack.c.bf16 %v4445_v42, %v4444_v60  ;;  %v4446_v31 = vld [vmem:[%s12614_s25 + $0x690] sm:$0xff] }
 0x56a   :  { %5675 = vmatprep.subr.bf16.mxu0 %v5674_v20  ;;  %5695 = vmatprep.subr.bf16.mxu1 %v5694_v46  ;;  %v5738_v20 = vpack.c.bf16 %v4447_v35, %v4446_v31  ;;  %v4448_v46 = vld [vmem:[%s12614_s25 + $0x6a0] sm:$0xff] }
 0x56b   :  { %v5741_v37 = vpack.c.bf16 %v4449_v48, %v4448_v46  ;;  %v5051_v46 = vld [vmem:[%s12695_s4 + $0x18] sm:$0xff] }
 0x56d   :  { %5677 = vmatpush3.bf16.msra.mxu0 %v5676_v44  ;;  %5697 = vmatpush3.bf16.msra.mxu1 %v5696_v38  ;;  %v4235_v44 = vsel %vm970_vm5, %v11023_v26, %v11279_v1  ;;  %v4952_v38 = vld [vmem:[%s12693_s14] sm:$0xff]  ;;  %v5759_v1 = vpack.c.bf16 %v4961_v21, %v4960_v30  ;;  %vm5143_vm5 = vcmask 74752  }
 0x56e   :  { %5699 = vmatprep.subr.bf16.mxu1 %v5698_v11  ;;  %5710 = vmatprep.subr.bf16.mxu0 %v5963_v39  ;;  %v4954_v11 = vld [vmem:[%s12693_s14 + $0x10] sm:$0xff]  ;;  %v5747_v10 = vpack.c.bf16 %v4953_v12, %v4952_v38  ;;  %v5056_v12 = vld [vmem:[%s12695_s4 + $0x40] sm:$0xff] }
 0x56f   :  { %v5750_v26 = vpack.c.bf16 %v4955_v45, %v4954_v11  ;;  %v5057_v11 = vld [vmem:[%s12695_s4 + $0x48] sm:$0xff]  ;;  %v5058_v45 = vld [vmem:[%s12695_s4 + $0x50] sm:$0xf] }
 0x570   :  { %4806 = vmatmul.mubr.f32.vlgmr.msra.gmra.mrb[4].mxu0 %v4101_v19  ;;  %v4965_v19 = vld [vmem:[%s12693_s14 + $0x68] sm:$0xff] }
 0x571   :  { %5701 = vmatpush3.bf16.msra.mxu1 %v5700_v56  ;;  %5712 = vmatpush1.bf16.msra.mxu0 %v5711_v22  ;;  %v4959_v56 = vld [vmem:[%s12693_s14 + $0x38] sm:$0xff]  ;;  %v5765_v18 = vpack.c.bf16 %v4965_v19, %v4964_v6 }
 0x572   :  { %5216 = vmatprep.mubr.msk.f32.mxu0 %vm4002_vm15, %v4224_v2  ;;  %5703 = vmatprep.subr.bf16.mxu1 %v5702_v49  ;;  %v5756_v22 = vpack.c.bf16 %v4959_v56, %v4958_v16  ;;  %v4962_v49 = vld [vmem:[%s12693_s14 + $0x50] sm:$0xff]  ;;  %v5219_v16 = vld [vmem:[%s12697_s0] ss:$0 sm:$0xff] }
 0x573   :  { %5713 = vmatprep.subr.bf16.mxu0 %v5963_v39  ;;  %v5762_v62 = vpack.c.bf16 %v4963_v47, %v4962_v49  ;;  %v4966_v2 = vld [vmem:[%s12693_s14 + $0x70] sm:$0xff] }
 0x575   :  { %5705 = vmatpush3.bf16.msra.mxu1 %v5704_v51  ;;  %5715 = vmatpush1.bf16.msra.mxu0 %v5714_v17 }
 0x576   :  { %5707 = vmatprep.subr.bf16.mxu1 %v5706_v3  ;;  %5716 = vmatprep.subr.bf16.mxu0 %v5963_v39  ;;  %v5215_v3 = vld [vmem:[%s12694_s18] ss:$0 sm:$0xff]  ;;  %s5151_s18 = sshll.u32 %s5966_s27, 4  ;;  %s5152_s18 = int_to_ptr.vmem [resolvable:$true] %s5151_s18 }
 0x577   :  { %s5892_s14 = scalar_lea.vmem %s5152_s18, 32  ;;  %p5897_p11 = scmp.lt.s32.totalorder %s5152_s18, %s5152_s18 }
 0x578   :  { %p5893_p10 = scmp.ne.s32.totalorder %s5152_s18, %s5892_s14  ;;  %p5898_p12 = scmp.lt.s32.totalorder %s5892_s14, %s5892_s14 }
 0x579   :  { %5709 = vmatpush3.bf16.msra.mxu1 %v5708_v4  ;;  %5718 = vmatpush1.bf16.msra.mxu0 %v5717_v58 }
 0x57a   :  { %5719 = vmatprep.subr.bf16.mxu0 %v5963_v39  ;;  %5746 = vmatprep.subr.bf16.mxu1 %v5963_v39  ;;  %p5899_p13 = por %p5898_p12, %p5897_p11 }
 0x57c   :  { %4876 = vmatmul.mubr.f32.vlgmr.msra.gmra.mrb[4].mxu1 %v4233_v9  ;;  %p5900_p0 = pnand %p5899_p13, %p5893_p10 }
 0x57d   :  { %5721 = vmatpush1.bf16.msra.mxu0 %v5720_v27  ;;  %5748 = vmatpush3.bf16.msra.mxu1 %v5747_v10  ;;  %v5780_v10 = vpack.c.bf16 %v5057_v11, %v5056_v12 }
 0x57e   :  { %5722 = vmatprep.subr.bf16.mxu0 %v5963_v39  ;;  %5749 = vmatprep.subr.bf16.mxu1 %v5963_v39 }
 0x57f   :  { %5490 = vmatprep.mubr.msk.f32.mxu1 %vm5964_vm3, %v5965_v53 }
 0x581   :  { %5724 = vmatpush1.bf16.msra.mxu0 %v5723_v5  ;;  %5751 = vmatpush3.bf16.msra.mxu1 %v5750_v26 }
 0x582   :  { %5725 = vmatprep.subr.bf16.mxu0 %v5963_v39  ;;  %5752 = vmatprep.subr.bf16.mxu1 %v5963_v39 }
 0x585   :  { %5727 = vmatpush1.bf16.msra.mxu0 %v5726_v52  ;;  %5754 = vmatpush3.bf16.msra.mxu1 %v5753_v8 }
 0x586   :  { %5728 = vmatprep.subr.bf16.mxu0 %v5963_v39  ;;  %5755 = vmatprep.subr.bf16.mxu1 %v5963_v39 }
 0x589   :  { %5730 = vmatpush1.bf16.msra.mxu0 %v5729_v34  ;;  %5757 = vmatpush3.bf16.msra.mxu1 %v5756_v22 }
 0x58a   :  { %5731 = vmatprep.subr.bf16.mxu0 %v5963_v39  ;;  %5758 = vmatprep.subr.bf16.mxu1 %v5963_v39 }
 0x58d   :  { %5733 = vmatpush1.bf16.msra.mxu0 %v5732_v57  ;;  %5760 = vmatpush3.bf16.msra.mxu1 %v5759_v1  ;;  %v5049_v57 = vld [vmem:[%s12695_s4 + $0x8] sm:$0xff] }
 0x58e   :  { %5734 = vmatprep.subr.bf16.mxu0 %v5963_v39  ;;  %5761 = vmatprep.subr.bf16.mxu1 %v5963_v39  ;;  %v5768_v31 = vpack.c.bf16 %v5049_v57, %v5048_v63 }
 0x591   :  { %5736 = vmatpush1.bf16.msra.mxu0 %v5735_v43  ;;  %5763 = vmatpush3.bf16.msra.mxu1 %v5762_v62 }
 0x592   :  { %5737 = vmatprep.subr.bf16.mxu0 %v5963_v39  ;;  %5764 = vmatprep.subr.bf16.mxu1 %v5963_v39 }
 0x595   :  { %5739 = vmatpush1.bf16.msra.mxu0 %v5738_v20  ;;  %5766 = vmatpush3.bf16.msra.mxu1 %v5765_v18  ;;  %v5050_v20 = vld [vmem:[%s12695_s4 + $0x10] sm:$0xff] }
 0x596   :  { %5740 = vmatprep.subr.bf16.mxu0 %v5963_v39  ;;  %5488 = vmatprep.subr.mxu1 %v5965_v53  ;;  %v5771_v48 = vpack.c.bf16 %v5051_v46, %v5050_v20 }
 0x599   :  { %5742 = vmatpush1.bf16.msra.mxu0 %v5741_v37  ;;  %5489 = vmatpush3.msra.mxu1 %v4966_v2  ;;  %v5052_v37 = vld [vmem:[%s12695_s4 + $0x20] sm:$0xff] }
 0x59a   :  { %5743 = vmatprep.subr.bf16.mxu0 %v5963_v39  ;;  %5767 = vmatprep.subr.bf16.mxu1 %v5963_v39  ;;  %v5774_v40 = vpack.c.bf16 %v5053_v0, %v5052_v37 }
 0x59d   :  { %5745 = vmatpush1.bf16.msra.mxu0 %v5744_v15  ;;  %v5054_v15 = vld [vmem:[%s12695_s4 + $0x30] sm:$0xff] }
 0x5a0   :  { %4946 = vmatmul.mubr.f32.vlgmr.msra.gmra.mrb[6].mxu0 %v4235_v44  ;;  %v5055_v44 = vld [vmem:[%s12695_s4 + $0x38] sm:$0xff] }
 0x5a1   :  { %v5777_v38 = vpack.c.bf16 %v5055_v44, %v5054_v15 }
 0x603   :  { %v5254_v51 = vpop.f32.mrb[0].mxu0 }
 0x604   :  { %v5255_v17 = vpop.f32.mrb[1].mxu0 }
 0x605   :  { %v5256_v28 = vadd.f32 %v5255_v17, %v5254_v51 }
 0x607   :  { %v4528_v23 = vadd.f32 %v5256_v28, %v5215_v3 }
 0x60f   :  { %v5289_v50 = vpop.f32.mrb[0].mxu1 }
 0x610   :  { %v5290_v54 = vpop.f32.mrb[1].mxu1 }
 0x611   :  { %v5291_v33 = vadd.f32 %v5290_v54, %v5289_v50 }
 0x613   :  { %v4598_v4 = vadd.f32 %v5291_v33, %v4528_v23 }
 0x623   :  { %v5324_v58 = vpop.f32.mrb[2].mxu0 }
 0x624   :  { %v5325_v55 = vpop.f32.mrb[3].mxu0 }
 0x625   :  { %v5326_v29 = vadd.f32 %v5325_v55, %v5324_v58 }
 0x627   :  { %v4668_v36 = vadd.f32 %v5326_v29, %v4598_v4 }
 0x62f   :  { %v5359_v27 = vpop.f32.mrb[2].mxu1 }
 0x630   :  { %v5360_v32 = vpop.f32.mrb[3].mxu1 }
 0x631   :  { %v5361_v24 = vadd.f32 %v5360_v32, %v5359_v27 }
 0x633   :  { %v4738_v9 = vadd.f32 %v5361_v24, %v4668_v36 }
 0x643   :  { %v5394_v5 = vpop.f32.mrb[4].mxu0 }
 0x644   :  { %v5395_v59 = vpop.f32.mrb[5].mxu0 }
 0x645   :  { %v5396_v7 = vadd.f32 %v5395_v59, %v5394_v5 }
 0x647   :  { %v4808_v52 = vadd.f32 %v5396_v7, %v4738_v9 }
 0x64f   :  { %v5429_v14 = vpop.f32.mrb[4].mxu1 }
 0x650   :  { %v5430_v61 = vpop.f32.mrb[5].mxu1 }
 0x651   :  { %v5431_v34 = vadd.f32 %v5430_v61, %v5429_v14 }
 0x653   :  { %v4878_v41 = vadd.f32 %v5431_v34, %v4808_v52 }
 0x673   :  { %v4947_v60 = vpop.f32.mrb[6].mxu0 }
 0x674   :  { %v4948_v42 = vadd.f32 %v4947_v60, %v4878_v41  ;;  %v4949_v43 = vpop.f32.mrb[7].mxu0 }
 0x676   :  { %v4951_v35 = vmax.f32 %v4948_v42, 0.0 }
 0x678   :  { %5491 = vmatmul.mubr.msk.f32.vlgmr.msra.gmra.mrb[6].mxu1 %vm1000_vm11, %v4951_v35 }
 0x679   :  { %5769 = vmatpush3.bf16.msra.mxu1 %v5768_v31  ;;  %5515 = vmatprep.mubr.msk.f32.mxu1 %vm5964_vm3, %v5965_v53 }
 0x67a   :  { %5770 = vmatprep.subr.bf16.mxu1 %v5963_v39 }
 0x67d   :  { %5772 = vmatpush3.bf16.msra.mxu1 %v5771_v48 }
 0x67e   :  { %5773 = vmatprep.subr.bf16.mxu1 %v5963_v39 }
 0x681   :  { %5775 = vmatpush3.bf16.msra.mxu1 %v5774_v40 }
 0x682   :  { %5776 = vmatprep.subr.bf16.mxu1 %v5963_v39 }
 0x685   :  { %5778 = vmatpush3.bf16.msra.mxu1 %v5777_v38 }
 0x686   :  { %5779 = vmatprep.subr.bf16.mxu1 %v5963_v39  ;;  %v5217_v39 = vld [vmem:[%s12696_s5] ss:$0 sm:$0xff] }
 0x689   :  { %5781 = vmatpush3.bf16.msra.mxu1 %v5780_v10 }
 0x68a   :  { %5513 = vmatprep.subr.mxu1 %v5965_v53 }
 0x68d   :  { %5514 = vmatpush3.msk.msra.mxu1 %vm5069_vm4, %v5058_v45 }
 0x74b   :  { %v5043_v26 = vpop.f32.mrb[6].mxu1 }
 0x74c   :  { %v5044_v25 = vadd.f32 %v5217_v39, %v5043_v26  ;;  %v5492_v13 = vpop.f32.mrb[7].mxu1 }
 0x74e   :  { %v5047_v8 = vmax.f32 %v5044_v25, 0.0 }
 0x750   :  { %5516 = vmatmul.mubr.msk.f32.vlgmr.msra.gmra.mrb[8].mxu1 %vm985_vm8, %v5047_v8 }
 0x823   :  { %v5139_v56 = vpop.f32.mrb[8].mxu1 }
 0x824   :  { %v5140_v22 = vadd.f32 %v5219_v16, %v5139_v56  ;;  %v5517_v30 = vpop.f32.mrb[9].mxu1 }
 0x826   :  { %5144 = vst.msk [vmem:[#allocation8] sm:$0x3] %vm5143_vm5, %v5140_v22 }
 0x827   :  { %5903 = shalt.err (!%p5900_p0)
}
 0x828   :  { %s12698_s25 = sld [smem:[#allocation285_spill]] }
 0x82e   :  { %s5904_s16 = scalar_lea.hbm %s12698_s25, 32 }
 0x82f   :  { %p5905_p1 = scmp.ne.s32.totalorder %s12698_s25, %s5904_s16  ;;  %p5908_p2 = scmp.lt.u32.totalorder %s5904_s16, %s12698_s25 }
 0x831   :  { %p5910_p3 = pnand %p5908_p2, %p5905_p1 }
 0x833   :  { %5913 = shalt.err (!%p5910_p3)
}
 0x834   :  { %5154 = dma.vmem_to_hbm [thread:$0]  %s5152_s18, 32, %s12698_s25, [#allocation4]  }
 0x835   :  { %5918 = dma.done.wait [#allocation4], 32  }
 0x836   :  { %5919 = vsyncadd [#allocation4], 4294967264 }
 0x837   :  { %5158 = vsyncpa [#allocation4], 1 }
 0x838   :  { %5159 = vsyncpa [#allocation5], 1 }
 0x839   :  { %5160 = vsyncpa [#allocation7], 1 }

</bundles_post_ra>
